<compile_context>
chip_gen: v7x
topology: tpu7x:2x2x1
jax: 0.10.0
libtpu: 0.0.40
codegen_flags: <defaults>
</compile_context>

<pallas_src>
import jax
import jax.numpy as jnp
from jax.experimental import pallas as pl
from jax.experimental.pallas import tpu as pltpu


def _round_up(x, m):
    return (x + m - 1) // m * m


# ------------------------------ Pallas kernel --------------------------------

def _up_conv_fused_kernel(xpad_ref, w1_ref, b1_ref, w2_ref, b2_ref,
                          o_ref, h_ref):
    """Fused (conv3x3 + BN + ReLU) x2 for one image.

    xpad_ref: (1, H+2, W+2, Cin)  bf16  spatially halo-padded NHWC input
    w1_ref  : (3, 3, Cin, Cout)   bf16  BN-folded conv1 weights (HWIO)
    b1_ref  : (1, Cout)           f32   BN-folded conv1 bias
    w2_ref  : (3, 3, Cout, Cout)  bf16  BN-folded conv2 weights
    b2_ref  : (1, Cout)           f32   BN-folded conv2 bias
    o_ref   : (1, H, W, Cout)     f32   output
    h_ref   : (H+2, W+2, Cout)    bf16  VMEM scratch (conv1 out + zero halo)
    """
    _, H, W, Cout = o_ref.shape
    Cin = xpad_ref.shape[-1]
    M = H * W

    # ---- conv1: 9 shifted-window matmuls, f32 accumulation on the MXU ----
    acc = jnp.zeros((M, Cout), jnp.float32)
    for dy in range(3):
        for dx in range(3):
            win = xpad_ref[:, dy:dy + H, dx:dx + W, :].reshape(M, Cin)
            acc += jax.lax.dot_general(
                win, w1_ref[dy, dx],
                dimension_numbers=(((1,), (0,)), ((), ())),
                preferred_element_type=jnp.float32)
    h1 = jnp.maximum(acc + b1_ref[...], 0.0)

    # Park conv1 output (with zero halo) in VMEM; conv2 never touches HBM.
    h_ref[...] = jnp.zeros_like(h_ref)
    h_ref[1:1 + H, 1:1 + W, :] = h1.reshape(H, W, Cout).astype(h_ref.dtype)

    # ---- conv2: 9 shifted-window matmuls over the VMEM-resident feature ----
    acc2 = jnp.zeros((M, Cout), jnp.float32)
    for dy in range(3):
        for dx in range(3):
            win = h_ref[dy:dy + H, dx:dx + W, :].reshape(M, Cout)
            acc2 += jax.lax.dot_general(
                win, w2_ref[dy, dx],
                dimension_numbers=(((1,), (0,)), ((), ())),
                preferred_element_type=jnp.float32)
    out = jnp.maximum(acc2 + b2_ref[...], 0.0)
    o_ref[...] = out.reshape(1, H, W, Cout).astype(o_ref.dtype)


# --------------------------------- glue ---------------------------------------

def _bilinear_matrix(n_in, n_out):
    """Interpolation matrix for bilinear upsampling with align_corners=True."""
    if n_in == 1:
        return jnp.ones((n_out, 1), jnp.float32)
    src = jnp.arange(n_out, dtype=jnp.float32) * (n_in - 1) / (n_out - 1)
    i0 = jnp.clip(jnp.floor(src).astype(jnp.int32), 0, n_in - 2)
    frac = src - i0.astype(jnp.float32)
    M = jnp.zeros((n_out, n_in), jnp.float32)
    M = M.at[jnp.arange(n_out), i0].add(1.0 - frac)
    M = M.at[jnp.arange(n_out), i0 + 1].add(frac)
    return M


def _upsample_concat(x1_nchw, x2_nchw, scale=2):
    """up(x1) bilinear/align_corners=True, then torch.cat([x2, x1], dim=1); NHWC out."""
    x1 = jnp.transpose(x1_nchw, (0, 2, 3, 1))
    x2 = jnp.transpose(x2_nchw, (0, 2, 3, 1))
    _, H, W, _ = x1.shape
    Uh = _bilinear_matrix(H, scale * H)
    Uw = _bilinear_matrix(W, scale * W)
    x1_up = jnp.einsum("oi,pj,bijc->bopc", Uh, Uw, x1)
    return jnp.concatenate([x2, x1_up], axis=-1)


def up_forward(x1_nchw, x2_nchw, params):
    """Up.forward(x1, x2) -> NCHW output; the two convs run in one fused Pallas call."""
    cat = _upsample_concat(x1_nchw, x2_nchw)           # (B, H, W, Cin) f32
    B, H, W, Cin = cat.shape
    w1, b1, w2, b2 = params["w1"], params["b1"], params["w2"], params["b2"]
    Cout = w1.shape[-1]

    # 128-lane alignment: pad K (input channels) and N (output channels).
    Cin_p = _round_up(Cin, 128)
    Cout_p = _round_up(Cout, 128)
    cat_p = jnp.pad(cat, ((0, 0), (1, 1), (1, 1), (0, Cin_p - Cin)))
    w1p = jnp.pad(w1, ((0, 0), (0, 0), (0, Cin_p - Cin), (0, Cout_p - Cout)))
    w2p = jnp.pad(w2, ((0, 0), (0, 0), (0, Cout_p - Cout), (0, Cout_p - Cout)))
    b1p = jnp.pad(b1, (0, Cout_p - Cout)).reshape(1, Cout_p)
    b2p = jnp.pad(b2, (0, Cout_p - Cout)).reshape(1, Cout_p)

    # bf16 operands (half the DMA bytes / 2x MXU rate), f32 accumulation in-kernel.
    xpad = cat_p.astype(jnp.bfloat16)
    w1p = w1p.astype(jnp.bfloat16)
    w2p = w2p.astype(jnp.bfloat16)

    out = pl.pallas_call(
        _up_conv_fused_kernel,
        out_shape=jax.ShapeDtypeStruct((B, H, W, Cout_p), jnp.float32),
        grid=(B,),
        in_specs=[
            pl.BlockSpec((1, H + 2, W + 2, Cin_p), lambda i: (i, 0, 0, 0)),
            pl.BlockSpec((3, 3, Cin_p, Cout_p), lambda i: (0, 0, 0, 0)),
            pl.BlockSpec((1, Cout_p), lambda i: (0, 0)),
            pl.BlockSpec((3, 3, Cout_p, Cout_p), lambda i: (0, 0, 0, 0)),
            pl.BlockSpec((1, Cout_p), lambda i: (0, 0)),
        ],
        out_specs=pl.BlockSpec((1, H, W, Cout_p), lambda i: (i, 0, 0, 0)),
        scratch_shapes=[pltpu.VMEM((H + 2, W + 2, Cout_p), jnp.bfloat16)],
        compiler_params=pltpu.CompilerParams(
            dimension_semantics=("parallel",)),
    )(xpad, w1p, b1p, w2p, b2p)

    out = out[..., :Cout]                              # drop lane padding
    return jnp.transpose(out, (0, 3, 1, 2))            # NHWC -> NCHW


# ---------------------------- pure-JAX reference ------------------------------
# Same precision policy as the kernel (bf16 operands, f32 accumulation) so the
# comparison isolates kernel correctness rather than bf16 vs f32 drift.

def _ref_conv3x3_bn_relu(x, w, b):
    B, H, W, Cin = x.shape
    Cout = w.shape[-1]
    xp = jnp.pad(x, ((0, 0), (1, 1), (1, 1), (0, 0)))
    cols = jnp.stack(
        [xp[:, dy:dy + H, dx:dx + W, :] for dy in range(3) for dx in range(3)],
        axis=3).reshape(B, H * W, 9 * Cin).astype(jnp.bfloat16)
    wf = w.reshape(9 * Cin, Cout).astype(jnp.bfloat16)
    y = jax.lax.dot_general(cols, wf, (((2,), (0,)), ((), ())),
                            preferred_element_type=jnp.float32)
    y = y + b[None, None, :]
    return jnp.maximum(y, 0.0).reshape(B, H, W, Cout)


def _ref_up_forward(x1_nchw, x2_nchw, params):
    cat = _upsample_concat(x1_nchw, x2_nchw)
    h = _ref_conv3x3_bn_relu(cat, params["w1"], params["b1"])
    h = _ref_conv3x3_bn_relu(h, params["w2"], params["b2"])
    return jnp.transpose(h, (0, 3, 1, 2))


# -------------------------------- parameters ----------------------------------

def init_params(key, cin, cout):
    """Conv weights (HWIO, no bias) with BatchNorm folded into weight + bias."""
    ks = jax.random.split(key, 10)
    eps = 1e-5  # BatchNorm2d default

    def bn_params(kg, kb, km, kv, n):
        gamma = 0.5 + jax.random.uniform(kg, (n,), jnp.float32)
        beta = 0.1 * jax.random.normal(kb, (n,), jnp.float32)
        mean = 0.1 * jax.random.normal(km, (n,), jnp.float32)
        var = 0.5 + jax.random.uniform(kv, (n,), jnp.float32)
        return gamma, beta, mean, var

    def fold_bn(w, gamma, beta, mean, var):
        scale = gamma / jnp.sqrt(var + eps)
        return w * scale[None, None, None, :], beta - mean * scale

    w1 = 0.05 * jax.random.normal(ks[0], (3, 3, cin, cout), jnp.float32)
    w2 = 0.05 * jax.random.normal(ks[1], (3, 3, cout, cout), jnp.float32)
    w1, b1 = fold_bn(w1, *bn_params(ks[2], ks[3], ks[4], ks[5], cout))
    w2, b2 = fold_bn(w2, *bn_params(ks[6], ks[7], ks[8], ks[9], cout))
    return dict(w1=w1, b1=b1, w2=w2, b2=b2)


# ----------------------------------- main --------------------------------------

if __name__ == "__main__":
    B = 2
    C1, C2, Cout = 96, 32, 128        # Up(in_channels=128, out_channels=128)
    H1, W1 = 8, 8                     # x1 spatial; x2 / output spatial = 16x16

    root = jax.random.PRNGKey(0)
    kx1, kx2, kp = jax.random.split(root, 3)
    x1 = jax.random.normal(kx1, (B, C1, H1, W1), jnp.float32)
    x2 = jax.random.normal(kx2, (B, C2, 2 * H1, 2 * W1), jnp.float32)
    params = init_params(kp, C1 + C2, Cout)

    out = jax.block_until_ready(up_forward(x1, x2, params))
    ref = jax.block_until_ready(_ref_up_forward(x1, x2, params))

    assert out.shape == (B, Cout, 2 * H1, 2 * W1), out.shape
    assert bool(jnp.all(jnp.isfinite(out)))
    max_err = float(jnp.max(jnp.abs(out - ref)))
    assert bool(jnp.allclose(out, ref, atol=1e-2, rtol=1e-2)), max_err
    print("KERNEL_OK")
</pallas_src>

<mosaic_0001>
module attributes {stable_mosaic.version = 11 : i64} {
  func.func @_up_conv_fused_kernel(%arg0: i32, %arg1: memref<1x18x18x128xbf16, #tpu.memory_space<vmem>>, %arg2: memref<3x3x128x128xbf16, #tpu.memory_space<vmem>>, %arg3: memref<1x128xf32, #tpu.memory_space<vmem>>, %arg4: memref<3x3x128x128xbf16, #tpu.memory_space<vmem>>, %arg5: memref<1x128xf32, #tpu.memory_space<vmem>>, %arg6: memref<1x16x16x128xf32, #tpu.memory_space<vmem>>, %arg7: memref<18x18x128xbf16, #tpu.memory_space<vmem>>) attributes {dimension_semantics = [#tpu.dimension_semantics<parallel>], iteration_bounds = array<i64: 2>, scalar_prefetch = 0 : i64, scratch_operands = 1 : i64, tpu.core_type = #tpu.core_type<tc>, window_params = [{transform_indices = @transform_0, window_bounds = array<i64: 1, 18, 18, 128>}, {pipeline_mode = #tpu.pipeline_mode<synchronous>, transform_indices = @transform_1, window_bounds = array<i64: 3, 3, 128, 128>}, {pipeline_mode = #tpu.pipeline_mode<synchronous>, transform_indices = @transform_2, window_bounds = array<i64: 1, 128>}, {pipeline_mode = #tpu.pipeline_mode<synchronous>, transform_indices = @transform_3, window_bounds = array<i64: 3, 3, 128, 128>}, {pipeline_mode = #tpu.pipeline_mode<synchronous>, transform_indices = @transform_4, window_bounds = array<i64: 1, 128>}, {transform_indices = @transform_5, window_bounds = array<i64: 1, 16, 16, 128>}]} {
    %cst = arith.constant 0.000000e+00 : f32
    %0 = vector.broadcast %cst : f32 to vector<256x128xf32>
    %c0 = arith.constant 0 : index
    %c0_0 = arith.constant 0 : index
    %c0_1 = arith.constant 0 : index
    %c0_2 = arith.constant 0 : index
    %1 = vector.load %arg1[%c0, %c0_0, %c0_1, %c0_2] : memref<1x18x18x128xbf16, #tpu.memory_space<vmem>>, vector<1x16x16x128xbf16>
    %2 = vector.shape_cast %1 : vector<1x16x16x128xbf16> to vector<256x128xbf16>
    %c0_3 = arith.constant 0 : index
    %c0_4 = arith.constant 0 : index
    %c0_5 = arith.constant 0 : index
    %c0_6 = arith.constant 0 : index
    %3 = vector.load %arg2[%c0_3, %c0_4, %c0_5, %c0_6] : memref<3x3x128x128xbf16, #tpu.memory_space<vmem>>, vector<1x1x128x128xbf16>
    %4 = vector.shape_cast %3 : vector<1x1x128x128xbf16> to vector<128x128xbf16>
    %cst_7 = arith.constant dense<0.000000e+00> : vector<256x128xf32>
    %5 = tpu.matmul %2, %4, %cst_7 {dimension_numbers = #tpu.dot_dimension_numbers<[1], [0], [0], [1], [0, 0, 1, 1], [], []>} : vector<256x128xbf16>, vector<128x128xbf16>, vector<256x128xf32> -> vector<256x128xf32>
    %6 = arith.addf %0, %5 : vector<256x128xf32>
    %c0_8 = arith.constant 0 : index
    %c0_9 = arith.constant 0 : index
    %c1 = arith.constant 1 : index
    %c0_10 = arith.constant 0 : index
    %7 = vector.load %arg1[%c0_8, %c0_9, %c1, %c0_10] : memref<1x18x18x128xbf16, #tpu.memory_space<vmem>>, vector<1x16x16x128xbf16>
    %8 = vector.shape_cast %7 : vector<1x16x16x128xbf16> to vector<256x128xbf16>
    %c0_11 = arith.constant 0 : index
    %c1_12 = arith.constant 1 : index
    %c0_13 = arith.constant 0 : index
    %c0_14 = arith.constant 0 : index
    %9 = vector.load %arg2[%c0_11, %c1_12, %c0_13, %c0_14] : memref<3x3x128x128xbf16, #tpu.memory_space<vmem>>, vector<1x1x128x128xbf16>
    %10 = vector.shape_cast %9 : vector<1x1x128x128xbf16> to vector<128x128xbf16>
    %cst_15 = arith.constant dense<0.000000e+00> : vector<256x128xf32>
    %11 = tpu.matmul %8, %10, %cst_15 {dimension_numbers = #tpu.dot_dimension_numbers<[1], [0], [0], [1], [0, 0, 1, 1], [], []>} : vector<256x128xbf16>, vector<128x128xbf16>, vector<256x128xf32> -> vector<256x128xf32>
    %12 = arith.addf %6, %11 : vector<256x128xf32>
    %c0_16 = arith.constant 0 : index
    %c0_17 = arith.constant 0 : index
    %c2 = arith.constant 2 : index
    %c0_18 = arith.constant 0 : index
    %13 = vector.load %arg1[%c0_16, %c0_17, %c2, %c0_18] : memref<1x18x18x128xbf16, #tpu.memory_space<vmem>>, vector<1x16x16x128xbf16>
    %14 = vector.shape_cast %13 : vector<1x16x16x128xbf16> to vector<256x128xbf16>
    %c0_19 = arith.constant 0 : index
    %c2_20 = arith.constant 2 : index
    %c0_21 = arith.constant 0 : index
    %c0_22 = arith.constant 0 : index
    %15 = vector.load %arg2[%c0_19, %c2_20, %c0_21, %c0_22] : memref<3x3x128x128xbf16, #tpu.memory_space<vmem>>, vector<1x1x128x128xbf16>
    %16 = vector.shape_cast %15 : vector<1x1x128x128xbf16> to vector<128x128xbf16>
    %cst_23 = arith.constant dense<0.000000e+00> : vector<256x128xf32>
    %17 = tpu.matmul %14, %16, %cst_23 {dimension_numbers = #tpu.dot_dimension_numbers<[1], [0], [0], [1], [0, 0, 1, 1], [], []>} : vector<256x128xbf16>, vector<128x128xbf16>, vector<256x128xf32> -> vector<256x128xf32>
    %18 = arith.addf %12, %17 : vector<256x128xf32>
    %c0_24 = arith.constant 0 : index
    %c1_25 = arith.constant 1 : index
    %c0_26 = arith.constant 0 : index
    %c0_27 = arith.constant 0 : index
    %19 = vector.load %arg1[%c0_24, %c1_25, %c0_26, %c0_27] : memref<1x18x18x128xbf16, #tpu.memory_space<vmem>>, vector<1x16x16x128xbf16>
    %20 = vector.shape_cast %19 : vector<1x16x16x128xbf16> to vector<256x128xbf16>
    %c1_28 = arith.constant 1 : index
    %c0_29 = arith.constant 0 : index
    %c0_30 = arith.constant 0 : index
    %c0_31 = arith.constant 0 : index
    %21 = vector.load %arg2[%c1_28, %c0_29, %c0_30, %c0_31] : memref<3x3x128x128xbf16, #tpu.memory_space<vmem>>, vector<1x1x128x128xbf16>
    %22 = vector.shape_cast %21 : vector<1x1x128x128xbf16> to vector<128x128xbf16>
    %cst_32 = arith.constant dense<0.000000e+00> : vector<256x128xf32>
    %23 = tpu.matmul %20, %22, %cst_32 {dimension_numbers = #tpu.dot_dimension_numbers<[1], [0], [0], [1], [0, 0, 1, 1], [], []>} : vector<256x128xbf16>, vector<128x128xbf16>, vector<256x128xf32> -> vector<256x128xf32>
    %24 = arith.addf %18, %23 : vector<256x128xf32>
    %c0_33 = arith.constant 0 : index
    %c1_34 = arith.constant 1 : index
    %c1_35 = arith.constant 1 : index
    %c0_36 = arith.constant 0 : index
    %25 = vector.load %arg1[%c0_33, %c1_34, %c1_35, %c0_36] : memref<1x18x18x128xbf16, #tpu.memory_space<vmem>>, vector<1x16x16x128xbf16>
    %26 = vector.shape_cast %25 : vector<1x16x16x128xbf16> to vector<256x128xbf16>
    %c1_37 = arith.constant 1 : index
    %c1_38 = arith.constant 1 : index
    %c0_39 = arith.constant 0 : index
    %c0_40 = arith.constant 0 : index
    %27 = vector.load %arg2[%c1_37, %c1_38, %c0_39, %c0_40] : memref<3x3x128x128xbf16, #tpu.memory_space<vmem>>, vector<1x1x128x128xbf16>
    %28 = vector.shape_cast %27 : vector<1x1x128x128xbf16> to vector<128x128xbf16>
    %cst_41 = arith.constant dense<0.000000e+00> : vector<256x128xf32>
    %29 = tpu.matmul %26, %28, %cst_41 {dimension_numbers = #tpu.dot_dimension_numbers<[1], [0], [0], [1], [0, 0, 1, 1], [], []>} : vector<256x128xbf16>, vector<128x128xbf16>, vector<256x128xf32> -> vector<256x128xf32>
    %30 = arith.addf %24, %29 : vector<256x128xf32>
    %c0_42 = arith.constant 0 : index
    %c1_43 = arith.constant 1 : index
    %c2_44 = arith.constant 2 : index
    %c0_45 = arith.constant 0 : index
    %31 = vector.load %arg1[%c0_42, %c1_43, %c2_44, %c0_45] : memref<1x18x18x128xbf16, #tpu.memory_space<vmem>>, vector<1x16x16x128xbf16>
    %32 = vector.shape_cast %31 : vector<1x16x16x128xbf16> to vector<256x128xbf16>
    %c1_46 = arith.constant 1 : index
    %c2_47 = arith.constant 2 : index
    %c0_48 = arith.constant 0 : index
    %c0_49 = arith.constant 0 : index
    %33 = vector.load %arg2[%c1_46, %c2_47, %c0_48, %c0_49] : memref<3x3x128x128xbf16, #tpu.memory_space<vmem>>, vector<1x1x128x128xbf16>
    %34 = vector.shape_cast %33 : vector<1x1x128x128xbf16> to vector<128x128xbf16>
    %cst_50 = arith.constant dense<0.000000e+00> : vector<256x128xf32>
    %35 = tpu.matmul %32, %34, %cst_50 {dimension_numbers = #tpu.dot_dimension_numbers<[1], [0], [0], [1], [0, 0, 1, 1], [], []>} : vector<256x128xbf16>, vector<128x128xbf16>, vector<256x128xf32> -> vector<256x128xf32>
    %36 = arith.addf %30, %35 : vector<256x128xf32>
    %c0_51 = arith.constant 0 : index
    %c2_52 = arith.constant 2 : index
    %c0_53 = arith.constant 0 : index
    %c0_54 = arith.constant 0 : index
    %37 = vector.load %arg1[%c0_51, %c2_52, %c0_53, %c0_54] : memref<1x18x18x128xbf16, #tpu.memory_space<vmem>>, vector<1x16x16x128xbf16>
    %38 = vector.shape_cast %37 : vector<1x16x16x128xbf16> to vector<256x128xbf16>
    %c2_55 = arith.constant 2 : index
    %c0_56 = arith.constant 0 : index
    %c0_57 = arith.constant 0 : index
    %c0_58 = arith.constant 0 : index
    %39 = vector.load %arg2[%c2_55, %c0_56, %c0_57, %c0_58] : memref<3x3x128x128xbf16, #tpu.memory_space<vmem>>, vector<1x1x128x128xbf16>
    %40 = vector.shape_cast %39 : vector<1x1x128x128xbf16> to vector<128x128xbf16>
    %cst_59 = arith.constant dense<0.000000e+00> : vector<256x128xf32>
    %41 = tpu.matmul %38, %40, %cst_59 {dimension_numbers = #tpu.dot_dimension_numbers<[1], [0], [0], [1], [0, 0, 1, 1], [], []>} : vector<256x128xbf16>, vector<128x128xbf16>, vector<256x128xf32> -> vector<256x128xf32>
    %42 = arith.addf %36, %41 : vector<256x128xf32>
    %c0_60 = arith.constant 0 : index
    %c2_61 = arith.constant 2 : index
    %c1_62 = arith.constant 1 : index
    %c0_63 = arith.constant 0 : index
    %43 = vector.load %arg1[%c0_60, %c2_61, %c1_62, %c0_63] : memref<1x18x18x128xbf16, #tpu.memory_space<vmem>>, vector<1x16x16x128xbf16>
    %44 = vector.shape_cast %43 : vector<1x16x16x128xbf16> to vector<256x128xbf16>
    %c2_64 = arith.constant 2 : index
    %c1_65 = arith.constant 1 : index
    %c0_66 = arith.constant 0 : index
    %c0_67 = arith.constant 0 : index
    %45 = vector.load %arg2[%c2_64, %c1_65, %c0_66, %c0_67] : memref<3x3x128x128xbf16, #tpu.memory_space<vmem>>, vector<1x1x128x128xbf16>
    %46 = vector.shape_cast %45 : vector<1x1x128x128xbf16> to vector<128x128xbf16>
    %cst_68 = arith.constant dense<0.000000e+00> : vector<256x128xf32>
    %47 = tpu.matmul %44, %46, %cst_68 {dimension_numbers = #tpu.dot_dimension_numbers<[1], [0], [0], [1], [0, 0, 1, 1], [], []>} : vector<256x128xbf16>, vector<128x128xbf16>, vector<256x128xf32> -> vector<256x128xf32>
    %48 = arith.addf %42, %47 : vector<256x128xf32>
    %c0_69 = arith.constant 0 : index
    %c2_70 = arith.constant 2 : index
    %c2_71 = arith.constant 2 : index
    %c0_72 = arith.constant 0 : index
    %49 = vector.load %arg1[%c0_69, %c2_70, %c2_71, %c0_72] : memref<1x18x18x128xbf16, #tpu.memory_space<vmem>>, vector<1x16x16x128xbf16>
    %50 = vector.shape_cast %49 : vector<1x16x16x128xbf16> to vector<256x128xbf16>
    %c2_73 = arith.constant 2 : index
    %c2_74 = arith.constant 2 : index
    %c0_75 = arith.constant 0 : index
    %c0_76 = arith.constant 0 : index
    %51 = vector.load %arg2[%c2_73, %c2_74, %c0_75, %c0_76] : memref<3x3x128x128xbf16, #tpu.memory_space<vmem>>, vector<1x1x128x128xbf16>
    %52 = vector.shape_cast %51 : vector<1x1x128x128xbf16> to vector<128x128xbf16>
    %cst_77 = arith.constant dense<0.000000e+00> : vector<256x128xf32>
    %53 = tpu.matmul %50, %52, %cst_77 {dimension_numbers = #tpu.dot_dimension_numbers<[1], [0], [0], [1], [0, 0, 1, 1], [], []>} : vector<256x128xbf16>, vector<128x128xbf16>, vector<256x128xf32> -> vector<256x128xf32>
    %54 = arith.addf %48, %53 : vector<256x128xf32>
    %c0_78 = arith.constant 0 : index
    %c0_79 = arith.constant 0 : index
    %55 = vector.load %arg3[%c0_78, %c0_79] : memref<1x128xf32, #tpu.memory_space<vmem>>, vector<1x128xf32>
    %56 = vector.broadcast %55 : vector<1x128xf32> to vector<256x128xf32>
    %57 = arith.addf %54, %56 : vector<256x128xf32>
    %cst_80 = arith.constant 0.000000e+00 : f32
    %58 = vector.broadcast %cst_80 : f32 to vector<256x128xf32>
    %59 = arith.maximumf %57, %58 : vector<256x128xf32>
    %cst_81 = arith.constant 0.000000e+00 : bf16
    %60 = vector.broadcast %cst_81 : bf16 to vector<18x18x128xbf16>
    %c0_82 = arith.constant 0 : index
    %c0_83 = arith.constant 0 : index
    %c0_84 = arith.constant 0 : index
    %61 = vector.load %arg7[%c0_82, %c0_83, %c0_84] : memref<18x18x128xbf16, #tpu.memory_space<vmem>>, vector<18x18x128xbf16>
    tpu.vector_store %arg7[%c0_82, %c0_83, %c0_84], %60 {strides = array<i32>} : memref<18x18x128xbf16, #tpu.memory_space<vmem>>, vector<18x18x128xbf16>,
    %62 = vector.shape_cast %59 : vector<256x128xf32> to vector<16x16x128xf32>
    %63 = arith.truncf %62 : vector<16x16x128xf32> to vector<16x16x128xbf16>
    %c1_85 = arith.constant 1 : index
    %c1_86 = arith.constant 1 : index
    %c0_87 = arith.constant 0 : index
    %64 = vector.load %arg7[%c1_85, %c1_86, %c0_87] : memref<18x18x128xbf16, #tpu.memory_space<vmem>>, vector<16x16x128xbf16>
    tpu.vector_store %arg7[%c1_85, %c1_86, %c0_87], %63 {strides = array<i32>} : memref<18x18x128xbf16, #tpu.memory_space<vmem>>, vector<16x16x128xbf16>,
    %cst_88 = arith.constant 0.000000e+00 : f32
    %65 = vector.broadcast %cst_88 : f32 to vector<256x128xf32>
    %c0_89 = arith.constant 0 : index
    %c0_90 = arith.constant 0 : index
    %c0_91 = arith.constant 0 : index
    %66 = vector.load %arg7[%c0_89, %c0_90, %c0_91] : memref<18x18x128xbf16, #tpu.memory_space<vmem>>, vector<16x16x128xbf16>
    %67 = vector.shape_cast %66 : vector<16x16x128xbf16> to vector<256x128xbf16>
    %c0_92 = arith.constant 0 : index
    %c0_93 = arith.constant 0 : index
    %c0_94 = arith.constant 0 : index
    %c0_95 = arith.constant 0 : index
    %68 = vector.load %arg4[%c0_92, %c0_93, %c0_94, %c0_95] : memref<3x3x128x128xbf16, #tpu.memory_space<vmem>>, vector<1x1x128x128xbf16>
    %69 = vector.shape_cast %68 : vector<1x1x128x128xbf16> to vector<128x128xbf16>
    %cst_96 = arith.constant dense<0.000000e+00> : vector<256x128xf32>
    %70 = tpu.matmul %67, %69, %cst_96 {dimension_numbers = #tpu.dot_dimension_numbers<[1], [0], [0], [1], [0, 0, 1, 1], [], []>} : vector<256x128xbf16>, vector<128x128xbf16>, vector<256x128xf32> -> vector<256x128xf32>
    %71 = arith.addf %65, %70 : vector<256x128xf32>
    %c0_97 = arith.constant 0 : index
    %c1_98 = arith.constant 1 : index
    %c0_99 = arith.constant 0 : index
    %72 = vector.load %arg7[%c0_97, %c1_98, %c0_99] : memref<18x18x128xbf16, #tpu.memory_space<vmem>>, vector<16x16x128xbf16>
    %73 = vector.shape_cast %72 : vector<16x16x128xbf16> to vector<256x128xbf16>
    %c0_100 = arith.constant 0 : index
    %c1_101 = arith.constant 1 : index
    %c0_102 = arith.constant 0 : index
    %c0_103 = arith.constant 0 : index
    %74 = vector.load %arg4[%c0_100, %c1_101, %c0_102, %c0_103] : memref<3x3x128x128xbf16, #tpu.memory_space<vmem>>, vector<1x1x128x128xbf16>
    %75 = vector.shape_cast %74 : vector<1x1x128x128xbf16> to vector<128x128xbf16>
    %cst_104 = arith.constant dense<0.000000e+00> : vector<256x128xf32>
    %76 = tpu.matmul %73, %75, %cst_104 {dimension_numbers = #tpu.dot_dimension_numbers<[1], [0], [0], [1], [0, 0, 1, 1], [], []>} : vector<256x128xbf16>, vector<128x128xbf16>, vector<256x128xf32> -> vector<256x128xf32>
    %77 = arith.addf %71, %76 : vector<256x128xf32>
    %c0_105 = arith.constant 0 : index
    %c2_106 = arith.constant 2 : index
    %c0_107 = arith.constant 0 : index
    %78 = vector.load %arg7[%c0_105, %c2_106, %c0_107] : memref<18x18x128xbf16, #tpu.memory_space<vmem>>, vector<16x16x128xbf16>
    %79 = vector.shape_cast %78 : vector<16x16x128xbf16> to vector<256x128xbf16>
    %c0_108 = arith.constant 0 : index
    %c2_109 = arith.constant 2 : index
    %c0_110 = arith.constant 0 : index
    %c0_111 = arith.constant 0 : index
    %80 = vector.load %arg4[%c0_108, %c2_109, %c0_110, %c0_111] : memref<3x3x128x128xbf16, #tpu.memory_space<vmem>>, vector<1x1x128x128xbf16>
    %81 = vector.shape_cast %80 : vector<1x1x128x128xbf16> to vector<128x128xbf16>
    %cst_112 = arith.constant dense<0.000000e+00> : vector<256x128xf32>
    %82 = tpu.matmul %79, %81, %cst_112 {dimension_numbers = #tpu.dot_dimension_numbers<[1], [0], [0], [1], [0, 0, 1, 1], [], []>} : vector<256x128xbf16>, vector<128x128xbf16>, vector<256x128xf32> -> vector<256x128xf32>
    %83 = arith.addf %77, %82 : vector<256x128xf32>
    %c1_113 = arith.constant 1 : index
    %c0_114 = arith.constant 0 : index
    %c0_115 = arith.constant 0 : index
    %84 = vector.load %arg7[%c1_113, %c0_114, %c0_115] : memref<18x18x128xbf16, #tpu.memory_space<vmem>>, vector<16x16x128xbf16>
    %85 = vector.shape_cast %84 : vector<16x16x128xbf16> to vector<256x128xbf16>
    %c1_116 = arith.constant 1 : index
    %c0_117 = arith.constant 0 : index
    %c0_118 = arith.constant 0 : index
    %c0_119 = arith.constant 0 : index
    %86 = vector.load %arg4[%c1_116, %c0_117, %c0_118, %c0_119] : memref<3x3x128x128xbf16, #tpu.memory_space<vmem>>, vector<1x1x128x128xbf16>
    %87 = vector.shape_cast %86 : vector<1x1x128x128xbf16> to vector<128x128xbf16>
    %cst_120 = arith.constant dense<0.000000e+00> : vector<256x128xf32>
    %88 = tpu.matmul %85, %87, %cst_120 {dimension_numbers = #tpu.dot_dimension_numbers<[1], [0], [0], [1], [0, 0, 1, 1], [], []>} : vector<256x128xbf16>, vector<128x128xbf16>, vector<256x128xf32> -> vector<256x128xf32>
    %89 = arith.addf %83, %88 : vector<256x128xf32>
    %c1_121 = arith.constant 1 : index
    %c1_122 = arith.constant 1 : index
    %c0_123 = arith.constant 0 : index
    %90 = vector.load %arg7[%c1_121, %c1_122, %c0_123] : memref<18x18x128xbf16, #tpu.memory_space<vmem>>, vector<16x16x128xbf16>
    %91 = vector.shape_cast %90 : vector<16x16x128xbf16> to vector<256x128xbf16>
    %c1_124 = arith.constant 1 : index
    %c1_125 = arith.constant 1 : index
    %c0_126 = arith.constant 0 : index
    %c0_127 = arith.constant 0 : index
    %92 = vector.load %arg4[%c1_124, %c1_125, %c0_126, %c0_127] : memref<3x3x128x128xbf16, #tpu.memory_space<vmem>>, vector<1x1x128x128xbf16>
    %93 = vector.shape_cast %92 : vector<1x1x128x128xbf16> to vector<128x128xbf16>
    %cst_128 = arith.constant dense<0.000000e+00> : vector<256x128xf32>
    %94 = tpu.matmul %91, %93, %cst_128 {dimension_numbers = #tpu.dot_dimension_numbers<[1], [0], [0], [1], [0, 0, 1, 1], [], []>} : vector<256x128xbf16>, vector<128x128xbf16>, vector<256x128xf32> -> vector<256x128xf32>
    %95 = arith.addf %89, %94 : vector<256x128xf32>
    %c1_129 = arith.constant 1 : index
    %c2_130 = arith.constant 2 : index
    %c0_131 = arith.constant 0 : index
    %96 = vector.load %arg7[%c1_129, %c2_130, %c0_131] : memref<18x18x128xbf16, #tpu.memory_space<vmem>>, vector<16x16x128xbf16>
    %97 = vector.shape_cast %96 : vector<16x16x128xbf16> to vector<256x128xbf16>
    %c1_132 = arith.constant 1 : index
    %c2_133 = arith.constant 2 : index
    %c0_134 = arith.constant 0 : index
    %c0_135 = arith.constant 0 : index
    %98 = vector.load %arg4[%c1_132, %c2_133, %c0_134, %c0_135] : memref<3x3x128x128xbf16, #tpu.memory_space<vmem>>, vector<1x1x128x128xbf16>
    %99 = vector.shape_cast %98 : vector<1x1x128x128xbf16> to vector<128x128xbf16>
    %cst_136 = arith.constant dense<0.000000e+00> : vector<256x128xf32>
    %100 = tpu.matmul %97, %99, %cst_136 {dimension_numbers = #tpu.dot_dimension_numbers<[1], [0], [0], [1], [0, 0, 1, 1], [], []>} : vector<256x128xbf16>, vector<128x128xbf16>, vector<256x128xf32> -> vector<256x128xf32>
    %101 = arith.addf %95, %100 : vector<256x128xf32>
    %c2_137 = arith.constant 2 : index
    %c0_138 = arith.constant 0 : index
    %c0_139 = arith.constant 0 : index
    %102 = vector.load %arg7[%c2_137, %c0_138, %c0_139] : memref<18x18x128xbf16, #tpu.memory_space<vmem>>, vector<16x16x128xbf16>
    %103 = vector.shape_cast %102 : vector<16x16x128xbf16> to vector<256x128xbf16>
    %c2_140 = arith.constant 2 : index
    %c0_141 = arith.constant 0 : index
    %c0_142 = arith.constant 0 : index
    %c0_143 = arith.constant 0 : index
    %104 = vector.load %arg4[%c2_140, %c0_141, %c0_142, %c0_143] : memref<3x3x128x128xbf16, #tpu.memory_space<vmem>>, vector<1x1x128x128xbf16>
    %105 = vector.shape_cast %104 : vector<1x1x128x128xbf16> to vector<128x128xbf16>
    %cst_144 = arith.constant dense<0.000000e+00> : vector<256x128xf32>
    %106 = tpu.matmul %103, %105, %cst_144 {dimension_numbers = #tpu.dot_dimension_numbers<[1], [0], [0], [1], [0, 0, 1, 1], [], []>} : vector<256x128xbf16>, vector<128x128xbf16>, vector<256x128xf32> -> vector<256x128xf32>
    %107 = arith.addf %101, %106 : vector<256x128xf32>
    %c2_145 = arith.constant 2 : index
    %c1_146 = arith.constant 1 : index
    %c0_147 = arith.constant 0 : index
    %108 = vector.load %arg7[%c2_145, %c1_146, %c0_147] : memref<18x18x128xbf16, #tpu.memory_space<vmem>>, vector<16x16x128xbf16>
    %109 = vector.shape_cast %108 : vector<16x16x128xbf16> to vector<256x128xbf16>
    %c2_148 = arith.constant 2 : index
    %c1_149 = arith.constant 1 : index
    %c0_150 = arith.constant 0 : index
    %c0_151 = arith.constant 0 : index
    %110 = vector.load %arg4[%c2_148, %c1_149, %c0_150, %c0_151] : memref<3x3x128x128xbf16, #tpu.memory_space<vmem>>, vector<1x1x128x128xbf16>
    %111 = vector.shape_cast %110 : vector<1x1x128x128xbf16> to vector<128x128xbf16>
    %cst_152 = arith.constant dense<0.000000e+00> : vector<256x128xf32>
    %112 = tpu.matmul %109, %111, %cst_152 {dimension_numbers = #tpu.dot_dimension_numbers<[1], [0], [0], [1], [0, 0, 1, 1], [], []>} : vector<256x128xbf16>, vector<128x128xbf16>, vector<256x128xf32> -> vector<256x128xf32>
    %113 = arith.addf %107, %112 : vector<256x128xf32>
    %c2_153 = arith.constant 2 : index
    %c2_154 = arith.constant 2 : index
    %c0_155 = arith.constant 0 : index
    %114 = vector.load %arg7[%c2_153, %c2_154, %c0_155] : memref<18x18x128xbf16, #tpu.memory_space<vmem>>, vector<16x16x128xbf16>
    %115 = vector.shape_cast %114 : vector<16x16x128xbf16> to vector<256x128xbf16>
    %c2_156 = arith.constant 2 : index
    %c2_157 = arith.constant 2 : index
    %c0_158 = arith.constant 0 : index
    %c0_159 = arith.constant 0 : index
    %116 = vector.load %arg4[%c2_156, %c2_157, %c0_158, %c0_159] : memref<3x3x128x128xbf16, #tpu.memory_space<vmem>>, vector<1x1x128x128xbf16>
    %117 = vector.shape_cast %116 : vector<1x1x128x128xbf16> to vector<128x128xbf16>
    %cst_160 = arith.constant dense<0.000000e+00> : vector<256x128xf32>
    %118 = tpu.matmul %115, %117, %cst_160 {dimension_numbers = #tpu.dot_dimension_numbers<[1], [0], [0], [1], [0, 0, 1, 1], [], []>} : vector<256x128xbf16>, vector<128x128xbf16>, vector<256x128xf32> -> vector<256x128xf32>
    %119 = arith.addf %113, %118 : vector<256x128xf32>
    %c0_161 = arith.constant 0 : index
    %c0_162 = arith.constant 0 : index
    %120 = vector.load %arg5[%c0_161, %c0_162] : memref<1x128xf32, #tpu.memory_space<vmem>>, vector<1x128xf32>
    %121 = vector.broadcast %120 : vector<1x128xf32> to vector<256x128xf32>
    %122 = arith.addf %119, %121 : vector<256x128xf32>
    %cst_163 = arith.constant 0.000000e+00 : f32
    %123 = vector.broadcast %cst_163 : f32 to vector<256x128xf32>
    %124 = arith.maximumf %122, %123 : vector<256x128xf32>
    %125 = vector.shape_cast %124 : vector<256x128xf32> to vector<1x16x16x128xf32>
    %c0_164 = arith.constant 0 : index
    %c0_165 = arith.constant 0 : index
    %c0_166 = arith.constant 0 : index
    %c0_167 = arith.constant 0 : index
    %126 = vector.load %arg6[%c0_164, %c0_165, %c0_166, %c0_167] : memref<1x16x16x128xf32, #tpu.memory_space<vmem>>, vector<1x16x16x128xf32>
    tpu.vector_store %arg6[%c0_164, %c0_165, %c0_166, %c0_167], %125 {strides = array<i32>} : memref<1x16x16x128xf32, #tpu.memory_space<vmem>>, vector<1x16x16x128xf32>,
    return
  }
  func.func @transform_0(%arg0: i32) -> (i32, i32, i32, i32) {
    %c0_i32 = arith.constant 0 : i32
    %c0_i32_0 = arith.constant 0 : i32
    %c0_i32_1 = arith.constant 0 : i32
    %c0_i32_2 = arith.constant 0 : i32
    return %arg0, %c0_i32, %c0_i32_0, %c0_i32_1 : i32, i32, i32, i32
  }
  func.func @transform_1(%arg0: i32) -> (i32, i32, i32, i32) {
    %c0_i32 = arith.constant 0 : i32
    %c0_i32_0 = arith.constant 0 : i32
    %c0_i32_1 = arith.constant 0 : i32
    %c0_i32_2 = arith.constant 0 : i32
    %c0_i32_3 = arith.constant 0 : i32
    return %c0_i32, %c0_i32_0, %c0_i32_1, %c0_i32_2 : i32, i32, i32, i32
  }
  func.func @transform_2(%arg0: i32) -> (i32, i32) {
    %c0_i32 = arith.constant 0 : i32
    %c0_i32_0 = arith.constant 0 : i32
    %c0_i32_1 = arith.constant 0 : i32
    return %c0_i32, %c0_i32_0 : i32, i32
  }
  func.func @transform_3(%arg0: i32) -> (i32, i32, i32, i32) {
    %c0_i32 = arith.constant 0 : i32
    %c0_i32_0 = arith.constant 0 : i32
    %c0_i32_1 = arith.constant 0 : i32
    %c0_i32_2 = arith.constant 0 : i32
    %c0_i32_3 = arith.constant 0 : i32
    return %c0_i32, %c0_i32_0, %c0_i32_1, %c0_i32_2 : i32, i32, i32, i32
  }
  func.func @transform_4(%arg0: i32) -> (i32, i32) {
    %c0_i32 = arith.constant 0 : i32
    %c0_i32_0 = arith.constant 0 : i32
    %c0_i32_1 = arith.constant 0 : i32
    return %c0_i32, %c0_i32_0 : i32, i32
  }
  func.func @transform_5(%arg0: i32) -> (i32, i32, i32, i32) {
    %c0_i32 = arith.constant 0 : i32
    %c0_i32_0 = arith.constant 0 : i32
    %c0_i32_1 = arith.constant 0 : i32
    %c0_i32_2 = arith.constant 0 : i32
    return %arg0, %c0_i32, %c0_i32_0, %c0_i32_1 : i32, i32, i32, i32
  }
}

</mosaic_0001>

<bundles_post_ra>
// kernel: tpu_custom_call.1
= control target key start
LH: loop header
LB: loop body
LE: loop exit
PB: predicated region body
PF: predicated region fallthrough
CT: control target
= control target key end

     0   :  { %10 = vsyncpa [#allocation4], 0  ;;  %s17549_s0 = inlined_call_operand.vmem [shape: bf16[2,18,18,128], index: 0, kind: input, shape index: {}]   ;;  %s17550_s1 = inlined_call_operand.vmem [shape: bf16[3,3,128,128], index: 1, kind: input, shape index: {}]   ;;  %s17551_s2 = inlined_call_operand.vmem [shape: f32[1,128], index: 2, kind: input, shape index: {}]   ;;  %s17552_s3 = inlined_call_operand.hbm [shape: bf16[3,3,128,128], index: 3, kind: input, shape index: {}]   ;;  %s17553_s4 = inlined_call_operand.vmem [shape: f32[1,128], index: 4, kind: input, shape index: {}]   ;;  %s17554_s5 = inlined_call_operand.hbm [shape: f32[2,16,16,128], index: 5, kind: output, shape index: {}]  }
   0x1   :  { %11 = vsyncpa [#allocation5], 0 }
   0x2   :  { %13 = vsyncpa [#allocation5 + $0x1], 0  ;;  %s13924_s18 = smov 0   ;;  %s13926_s19 = smov 0  }
   0x3   :  { %s13928_s20 = smov 0   ;;  %s13930_s21 = smov 0  }
   0x4 LB: > { %s13945_s22 = sadd.s32 4294967295, %s13885_s21   ;;  %s10703_s23 = sadd.s32 4294967294, %s13885_s21   ;;  %s13885_s21 = sphi %s13930_s21, %s17974_s21   ;;  %s13881_s20 = sphi %s13928_s20, %s17973_s20   ;;  %s13877_s19 = sphi %s13926_s19, %s17972_s19   ;;  %s13873_s18 = sphi %s13924_s18, %s17971_s18  }
   0x5   : > { %s13949_s24 = sadd.s32 1, %s13885_s21   ;;  %s136_s25 = sadd.s32 1, %s13881_s20 }
   0x6   : > { %s133_s26 = ssub.s32 %s13885_s21, %s13949_s24  ;;  %p146_p0 = scmp.ne.s32.totalorder %s13881_s20, %s13877_s19 }
   0x7   : > { %p134_p1 = scmp.eq.s32.totalorder %s133_s26, 0  ;;  %p147_p2 = scmp.eq.s32.totalorder %s13945_s22, 1 }
   0x8   : > { %p152_p3 = scmp.ne.s32.totalorder %s13877_s19, %s13873_s18  ;;  %p153_p4 = scmp.eq.s32.totalorder %s10703_s23, 1 }
   0x9   : > { %s13960_s27 = scalar_select %p134_p1, %s13881_s20, %s136_s25  }
   0xa   : > { %p13962_p5 = por %p147_p2, %p146_p0  ;;  %p13966_p6 = por %p153_p4, %p152_p3 }
   0xb   : > { %p10704_p7 = scmp.ge.s32.totalorder %s13885_s21, 1  ;;  %p160_p8 = scmp.lt.s32.totalorder %s13885_s21, 3 }
   0xc   : > { %s17666_s28 = scalar_select %p13962_p5, 1, 0 }
   0xd   : > { %s17667_s29 = scalar_select %p13966_p6, 1, 0 }
   0xe   : > { %p17555_p9 = scmp.eq.s32.totalorder %s13945_s22, 0  ;;  %p13973_p10 = pnand %p10704_p7, %p160_p8 }
   0xf   : > { %s13887_s6 = smov [#allocation3]   ;;  %s13791_s11 = scalar_lea.hbm %s17552_s3, 9216 }
  0x10   : > { %s17668_s30 = scalar_select %p13973_p10, 1, 0 }
  0x11   : > { %s178_s7 = sshll.u32 %s13887_s6, 4  ;;  %p13446_p11 = pneg %p13973_p10  ;;  %s179_s7 = int_to_ptr.vmem [resolvable:$true] %s178_s7 }
  0x12   : > { %p13792_p13 = scmp.ne.s32.totalorder %s17552_s3, %s13791_s11  ;;  %p13798_p3 = scmp.lt.u32.totalorder %s13791_s11, %s17552_s3 }
  0x13   : > { %p13981_p12 = pnand %p17555_p9, %p13446_p11 }
  0x15   : > { %p13793_p0 = pneg %p13981_p12 }
  0x17   : > { %p13794_p1 = pnand %p13793_p0, %p13792_p13 }
  0x19   : > { %p13795_p2 = pneg %p13794_p1 }
  0x1b   : > { %p13800_p4 = pnand %p13798_p3, %p13795_p2 }
  0x1d   : > { %13803 = shalt.err (!%p13800_p4)
}
  0x1e   : > { %s13804_s16 = scalar_lea.vmem %s179_s7, 9216  ;;  %p13812_p9 = scmp.lt.s32.totalorder %s179_s7, %s179_s7 }
  0x1f   : > { %p13805_p7 = scmp.ne.s32.totalorder %s179_s7, %s13804_s16  ;;  %p13813_p6 = scmp.lt.s32.totalorder %s13804_s16, %s13804_s16 }
  0x21   : > { %p13807_p8 = pnand %p13805_p7, %p13793_p0  ;;  %p13814_p5 = por %p13813_p6, %p13812_p9 }
  0x23   : > { %p13808_p11 = pneg %p13807_p8 }
  0x25   : > { %p13815_p10 = pnand %p13814_p5, %p13808_p11 }
  0x27   : > { %13818 = shalt.err (!%p13815_p10)
}
  0x28   : > { %s13888_s17 = smov 64   ;;  %s13889_s23 = smov 4  }
  0x29   : > { %13449 = dma.hbm_to_vmem [thread:$0]  (!%p13981_p12), %s17552_s3, 9216, %s179_s7, [#allocation4], %s13888_s17, %s13888_s17, %s13889_s23  }
  0x2a   : > { %p17670_p13 = scmp.ne.s32.totalorder %s17668_s30, 0 }
  0x2c   : > { %205 = sbr.rel (%p17670_p13) target bundleno = 1708 (0x6ac), region = 40 }
  0x33   : > { %p17671_p1 = scmp.eq.s32.totalorder %s13945_s22, 0 }
  0x35   : > { %13864 = dma.done.wait (%p17671_p1), [#allocation4], 9216   ;;  %p17672_p0 = pmov %p17671_p1 }
  0x36   : > { %p233_p5 = scmp.lt.s32.totalorder %s13945_s22, 1  ;;  %v13495_v0 = vld [vmem:[%s17550_s1 + $0x40] sm:$0xff]   ;;  %v13496_v1 = vld [vmem:[%s17550_s1 + $0x48] sm:$0xff]   ;;  %v13497_v2 = vld [vmem:[%s17550_s1 + $0x50] sm:$0xff]   ;;  %vm303_vm0 = vsmask.f32 3328 }
  0x37   : > { %13866 = vsyncadd (%p17672_p0), [#allocation4], 4294958080  ;;  %12063 = vmatprep.subr.bf16.mxu0 %v13495_v0  ;;  %vm304_vm1 = vsmask.f32 7440  ;;  %v13498_v3 = vld [vmem:[%s17550_s1 + $0x58] sm:$0xff]   ;;  %v13499_v12 = vld [vmem:[%s17550_s1 + $0x60] sm:$0xff]  }
  0x38   : > { %s234_s6 = scalar_select %p233_p5, %s13945_s22, 1  ;;  %12064 = vmatpush3.bf16.msra.mxu0 %v13495_v0  ;;  %vm14056_vm2 = vmor %vm303_vm0, %vm304_vm1  ;;  %v17673_v29 = vmov 0  ;;  %v13500_v38 = vld [vmem:[%s17550_s1 + $0x68] sm:$0xff]   ;;  %v13501_v58 = vld [vmem:[%s17550_s1 + $0x70] sm:$0xff]   ;;  %vm1333_vm3 = vcmask 1042432   ;;  %vm1334_vm4 = vcmask 1046532  }
  0x39   : > { %12065 = vmatprep.subr.bf16.mxu0 %v13496_v1  ;;  %v17674_v29 = vsel %vm14056_vm2, 4294967295, %v17673_v29  ;;  %vm14386_vm5 = vmor %vm1333_vm3, %vm1334_vm4  ;;  %vm5593_vm6 = vcmask 1043456   ;;  %vm5594_vm7 = vsmask.f32 7938  ;;  %vm5269_vm8 = vsmask.f32 256 }
  0x3a   : > { %s13439_s30 = smul.u32 216, %s234_s6  ;;  %17675 = vst [vmem:[#allocation9_spill] sm:$0xff] %v17674_v29  ;;  %vm5270_vm9 = vsmask.f32 4368  ;;  %vm5600_vm10 = vcmask 1040384   ;;  %vm15920_vm11 = vmand %vm5593_vm6, %vm5594_vm7  ;;  %s230_s9 = sand.u32 1, %s13877_s19  }
  0x3b   : > { %vm15927_vm12 = vmor %vm5269_vm8, %vm5270_vm9  ;;  %s10709_s11 = sshll.u32 %s230_s9, 8  ;;  %s11630_s7 = sshll.u32 %s13945_s22, 12 }
  0x3c   : > { %s14021_s15 = scalar_lea.vmem %s17549_s0, %s13439_s30  ;;  %12066 = vmatpush3.bf16.msra.mxu0 %v13496_v1  ;;  %vm15933_vm13 = vmand %vm5600_vm10, %vm5269_vm8  ;;  %s17435_s30 = scalar_lea.vmem [#allocation6], %s10709_s11 }
  0x3d   : > { %12067 = vmatprep.subr.bf16.mxu0 %v13497_v2  ;;  %v14027_v4 = vld [vmem:[%s14021_s15] sm:$0xf]  ;;  %v14030_v5 = vld [vmem:[%s14021_s15 + $0x4] sm:$0xf]  ;;  %v287_v6 = vld [vmem:[%s14021_s15 + $0x8] sm:$0x1]  ;;  %s17499_s16 = scalar_lea.hbm %s17554_s5, %s11630_s7 }
  0x3e   : > { %v307_v7 = vshrl.u32 %v14027_v4, 16  ;;  %v310_v8 = vshll.u32 %v14027_v4, 16  ;;  %v316_v9 = vshll.u32 %v14030_v5, 16  ;;  %v320_v10 = vshrl.u32 %v14030_v5, 16  ;;  %v14038_v11 = vld [vmem:[%s14021_s15 + $0xc] sm:$0xf] }
  0x3f   : > { %v326_v13 = vshll.u32 %v287_v6, 16  ;;  %v14044_v14 = vld [vmem:[%s14021_s15 + $0x10] sm:$0xf]  ;;  %v288_v15 = vld [vmem:[%s14021_s15 + $0x14] sm:$0x1]  ;;  %v331_v21 = vshrl.u32 %v14038_v11, 16 }
  0x40   : > { %12068 = vmatpush3.bf16.msra.mxu0 %v13497_v2  ;;  %v309_v16 = vrot.slane %v307_v7, 4  ;;  %v312_v17 = vrot.slane %v310_v8, 5  ;;  %v318_v18 = vrot.slane %v316_v9, 5  ;;  %v322_v19 = vrot.slane %v320_v10, 4  ;;  %v14052_v28 = vld [vmem:[%s14021_s15 + $0x18] sm:$0xf] }
  0x41   : > { %12069 = vmatprep.subr.bf16.mxu0 %v13498_v3  ;;  %v328_v20 = vrot.slane %v326_v13, 5  ;;  %v334_v22 = vshll.u32 %v14038_v11, 16  ;;  %v340_v23 = vshll.u32 %v14044_v14, 16  ;;  %v344_v26 = vshrl.u32 %v14044_v14, 16  ;;  %v14061_v33 = vld [vmem:[%s14021_s15 + $0x1c] sm:$0xf] }
  0x42   : > { %v313_v24 = vor.u32 %v312_v17, %v309_v16  ;;  %v323_v25 = vor.u32 %v322_v19, %v318_v18  ;;  %v350_v27 = vshll.u32 %v288_v15, 16  ;;  %v333_v30 = vrot.slane %v331_v21, 4  ;;  %v289_v40 = vld [vmem:[%s14021_s15 + $0x20] sm:$0x1]  ;;  %v14076_v48 = vld [vmem:[%s14021_s15 + $0x24] sm:$0xf] }
  0x43   : > { %v336_v31 = vrot.slane %v334_v22, 5  ;;  %v342_v32 = vrot.slane %v340_v23, 5  ;;  %v346_v36 = vrot.slane %v344_v26, 4  ;;  %v355_v41 = vshrl.u32 %v14052_v28, 16  ;;  %v14079_v49 = vld [vmem:[%s14021_s15 + $0x28] sm:$0xf] }
  0x44   : > { %12070 = vmatpush3.bf16.msra.mxu0 %v13498_v3  ;;  %v314_v34 = vrot.slane %v313_v24, 4  ;;  %v324_v35 = vrot.slane %v323_v25, 4  ;;  %v352_v37 = vrot.slane %v350_v27, 5  ;;  %v358_v42 = vshll.u32 %v14052_v28, 16  ;;  %v14087_v61 = vld [vmem:[%s14021_s15 + $0x2c] sm:$0x1] }
  0x45   : > { %12071 = vmatprep.subr.bf16.mxu0 %v13499_v12  ;;  %v337_v39 = vor.u32 %v336_v31, %v333_v30  ;;  %v364_v43 = vshll.u32 %v14061_v33, 16  ;;  %v347_v46 = vor.u32 %v346_v36, %v342_v32  ;;  %v368_v47 = vshrl.u32 %v14061_v33, 16  ;;  %v14095_v6 = vld [vmem:[%s14021_s15 + $0x30] sm:$0xf]  ;;  %v13502_v7 = vld [vmem:[%s17550_s1 + $0x78] sm:$0xff]   ;;  %s10629_s12 = sshll.u32 %s17435_s30, 4  ;;  %s17501_s12 = int_to_ptr.vmem [resolvable:$true] %s10629_s12 }
  0x46   : > { %v319_v44 = vsel %vm14056_vm2, %v314_v34, %v318_v18  ;;  %v329_v45 = vsel %vm14056_vm2, %v324_v35, %v328_v20  ;;  %v357_v52 = vrot.slane %v355_v41, 4  ;;  %v360_v53 = vrot.slane %v358_v42, 5  ;;  %v14103_v13 = vld [vmem:[%s14021_s15 + $0x34] sm:$0xf]  ;;  %v14108_v19 = vld [vmem:[%s14021_s15 + $0x38] sm:$0x1] }
  0x47   : > { %v10727_v50 = vcombine.low %v319_v44, %v329_v45  ;;  %v338_v51 = vrot.slane %v337_v39, 4  ;;  %v348_v54 = vrot.slane %v347_v46, 4  ;;  %v366_v55 = vrot.slane %v364_v43, 5  ;;  %v14118_v30 = vld [vmem:[%s14021_s15 + $0x3c] sm:$0xf]  ;;  %v13503_v41 = vld [vmem:[%s17550_s1] sm:$0xff]  }
  0x48   : > { %12072 = vmatpush3.bf16.msra.mxu0 %v13499_v12  ;;  %v370_v56 = vrot.slane %v368_v47, 4  ;;  %v374_v57 = vshll.u32 %v289_v40, 16  ;;  %v361_v60 = vor.u32 %v360_v53, %v357_v52  ;;  %v379_v62 = vshrl.u32 %v14076_v48, 16  ;;  %v14121_v36 = vld [vmem:[%s14021_s15 + $0x40] sm:$0xf]  ;;  %s17508_s22 = scalar_lea.sflag [#allocation5], %s230_s9 }
  0x49   : > { %12073 = vmatprep.subr.bf16.mxu0 %v13500_v38  ;;  %12079 = vmatprep.mubr.bf16.mxu0 %v10727_v50  ;;  %v343_v59 = vsel %vm14056_vm2, %v338_v51, %v342_v32  ;;  %v382_v63 = vshll.u32 %v14076_v48, 16  ;;  %v353_v0 = vsel %vm14056_vm2, %v348_v54, %v352_v37  ;;  %v388_v3 = vshll.u32 %v14079_v49, 16  ;;  %v14131_v44 = vld [vmem:[%s14021_s15 + $0x44] sm:$0x1]  ;;  %v14137_v53 = vld [vmem:[%s14021_s15 + $0x48] sm:$0xf] }
  0x4a   : > { %v371_v1 = vor.u32 %v370_v56, %v366_v55  ;;  %v376_v2 = vrot.slane %v374_v57, 5  ;;  %v14100_v8 = vcombine.low %v343_v59, %v353_v0  ;;  %v362_v9 = vrot.slane %v361_v60, 4  ;;  %s13819_s17 = scalar_lea.vmem %s17501_s12, 4096  ;;  %p17969_p9 = scmp.ne.s32.totalorder %s17666_s28, 0 }
  0x4b   : > { %v381_v10 = vrot.slane %v379_v62, 4  ;;  %v384_v12 = vrot.slane %v382_v63, 5  ;;  %v390_v16 = vrot.slane %v388_v3, 5  ;;  %v392_v17 = vshrl.u32 %v14079_v49, 16  ;;  %v14144_v63 = vld [vmem:[%s14021_s15 + $0x4c] sm:$0xf]  ;;  %p13820_p6 = scmp.ne.s32.totalorder %s17501_s12, %s13819_s17 }
  0x4c   : > { %12074 = vmatpush3.bf16.msra.mxu0 %v13500_v38  ;;  %v372_v15 = vrot.slane %v371_v1, 4  ;;  %v398_v18 = vshll.u32 %v14087_v61, 16  ;;  %v367_v20 = vsel %vm14056_vm2, %v362_v9, %v366_v55  ;;  %v403_v22 = vshrl.u32 %v14095_v6, 16  ;;  %v13504_v1 = vld [vmem:[%s17550_s1 + $0x8] sm:$0xff]   ;;  %v14152_v9 = vld [vmem:[%s14021_s15 + $0x50] sm:$0x1] }
  0x4d   : > { %12075 = vmatprep.subr.bf16.mxu0 %v13501_v58  ;;  %v385_v21 = vor.u32 %v384_v12, %v381_v10  ;;  %v406_v23 = vshll.u32 %v14095_v6, 16  ;;  %v394_v25 = vrot.slane %v392_v17, 4  ;;  %v412_v27 = vshll.u32 %v14103_v13, 16  ;;  %p13821_p10 = pnand %p13820_p6, %p17969_p9  ;;  %s13891_s23 = smov [#allocation6]  }
  0x4e   : > { %v377_v24 = vsel %vm14056_vm2, %v372_v15, %v376_v2  ;;  %v400_v26 = vrot.slane %v398_v18, 5  ;;  %v405_v34 = vrot.slane %v403_v22, 4  ;;  %v416_v39 = vshrl.u32 %v14103_v13, 16  ;;  %v14160_v22 = vld [vmem:[%s14021_s15 + $0x54] sm:$0xf] }
  0x4f   : > { %v10729_v31 = vcombine.low %v367_v20, %v377_v24  ;;  %v386_v32 = vrot.slane %v385_v21, 4  ;;  %v408_v35 = vrot.slane %v406_v23, 5  ;;  %v395_v37 = vor.u32 %v394_v25, %v390_v16  ;;  %v13505_v24 = vld [vmem:[%s17550_s1 + $0x10] sm:$0xff]   ;;  %p13822_p12 = pneg %p13821_p10 }
  0x50   : > { %12076 = vmatpush3.bf16.msra.mxu0 %v13501_v58  ;;  %v414_v38 = vrot.slane %v412_v27, 5  ;;  %v422_v40 = vshll.u32 %v14108_v19, 16  ;;  %v427_v45 = vshrl.u32 %v14118_v30, 16  ;;  %v430_v46 = vshll.u32 %v14118_v30, 16  ;;  %v14169_v27 = vld [vmem:[%s14021_s15 + $0x58] sm:$0xf] }
  0x51   : > { %12077 = vmatprep.subr.bf16.mxu0 %v13502_v7  ;;  %v391_v42 = vsel %vm14056_vm2, %v386_v32, %v390_v16  ;;  %v409_v43 = vor.u32 %v408_v35, %v405_v34  ;;  %v396_v47 = vrot.slane %v395_v37, 4  ;;  %v418_v50 = vrot.slane %v416_v39, 4 }
  0x52   : > { %v424_v51 = vrot.slane %v422_v40, 5  ;;  %v436_v52 = vshll.u32 %v14121_v36, 16  ;;  %v429_v55 = vrot.slane %v427_v45, 4  ;;  %v432_v56 = vrot.slane %v430_v46, 5  ;;  %v14174_v40 = vld [vmem:[%s14021_s15 + $0x5c] sm:$0x1] }
  0x53   : > { %v410_v54 = vrot.slane %v409_v43, 4  ;;  %v440_v57 = vshrl.u32 %v14121_v36, 16  ;;  %v401_v58 = vsel %vm14056_vm2, %v396_v47, %v400_v26  ;;  %v419_v59 = vor.u32 %v418_v50, %v414_v38  ;;  %v14183_v47 = vld [vmem:[%s14021_s15 + $0x60] sm:$0xf] }
  0x54   : > { %12078 = vmatpush3.bf16.msra.mxu0 %v13502_v7  ;;  %v438_v60 = vrot.slane %v436_v52, 5  ;;  %v446_v62 = vshll.u32 %v14131_v44, 16  ;;  %v10730_v0 = vcombine.low %v391_v42, %v401_v58  ;;  %v433_v3 = vor.u32 %v432_v56, %v429_v55  ;;  %v13506_v55 = vld [vmem:[%s17550_s1 + $0x18] sm:$0xff]   ;;  %v14189_v56 = vld [vmem:[%s14021_s15 + $0x64] sm:$0xf] }
  0x55   : > { %12111 = vmatprep.subr.bf16.mxu0 %v13503_v41  ;;  %v415_v2 = vsel %vm14056_vm2, %v410_v54, %v414_v38  ;;  %v442_v7 = vrot.slane %v440_v57, 4  ;;  %v420_v10 = vrot.slane %v419_v59, 4  ;;  %v451_v15 = vshrl.u32 %v14137_v53, 16 }
  0x56   : > { %v448_v12 = vrot.slane %v446_v62, 5  ;;  %v454_v16 = vshll.u32 %v14137_v53, 16  ;;  %v434_v17 = vrot.slane %v433_v3, 4  ;;  %v460_v20 = vshll.u32 %v14144_v63, 16  ;;  %v14193_v62 = vld [vmem:[%s14021_s15 + $0x68] sm:$0x1] }
  0x57   : > { %12080 = vmatmul.mubr.bf16.vlgmr.msra.gmra.mrb[0].mxu0 %v14100_v8  ;;  %v443_v18 = vor.u32 %v442_v7, %v438_v60  ;;  %v464_v21 = vshrl.u32 %v14144_v63, 16  ;;  %v425_v23 = vsel %vm14056_vm2, %v420_v10, %v424_v51  ;;  %v453_v25 = vrot.slane %v451_v15, 4  ;;  %17676 = vst [vmem:[#allocation10_spill] sm:$0xff] %v14193_v62  ;;  %v14200_v10 = vld [vmem:[%s14021_s15 + $0x6c] sm:$0xf] }
  0x58   : > { %12112 = vmatpush3.bf16.msra.mxu0 %v13503_v41  ;;  %12083 = vmatprep.mubr.bf16.mxu0 %v10729_v31  ;;  %v456_v8 = vrot.slane %v454_v16, 5  ;;  %v470_v26 = vshll.u32 %v14152_v9, 16  ;;  %v10731_v32 = vcombine.low %v415_v2, %v425_v23  ;;  %v439_v34 = vsel %vm14056_vm2, %v434_v17, %v438_v60 }
  0x59   : > { %12113 = vmatprep.subr.bf16.mxu0 %v13504_v1  ;;  %v444_v31 = vrot.slane %v443_v18, 4  ;;  %v462_v35 = vrot.slane %v460_v20, 5  ;;  %v466_v38 = vrot.slane %v464_v21, 4  ;;  %v475_v41 = vshrl.u32 %v14160_v22, 16 }
  0x5a   : > { %v457_v37 = vor.u32 %v456_v8, %v453_v25  ;;  %v472_v39 = vrot.slane %v470_v26, 5  ;;  %v478_v43 = vshll.u32 %v14160_v22, 16  ;;  %v484_v45 = vshll.u32 %v14169_v27, 16  ;;  %v14207_v25 = vld [vmem:[%s14021_s15 + $0x70] sm:$0xf] }
  0x5b   : > { %v449_v42 = vsel %vm14056_vm2, %v444_v31, %v448_v12  ;;  %v488_v46 = vshrl.u32 %v14169_v27, 16  ;;  %v467_v52 = vor.u32 %v466_v38, %v462_v35  ;;  %v477_v54 = vrot.slane %v475_v41, 4  ;;  %v14219_v41 = vld [vmem:[%s14021_s15 + $0x74] sm:$0x1] }
  0x5c   : > { %12114 = vmatpush3.bf16.msra.mxu0 %v13504_v1  ;;  %v10732_v50 = vcombine.low %v439_v34, %v449_v42  ;;  %v458_v51 = vrot.slane %v457_v37, 4  ;;  %v480_v57 = vrot.slane %v478_v43, 5  ;;  %v486_v58 = vrot.slane %v484_v45, 5  ;;  %17677 = vst [vmem:[#allocation11_spill] sm:$0xff] %v14219_v41  ;;  %v14224_v45 = vld [vmem:[%s14021_s15 + $0x78] sm:$0xf] }
  0x5d   : > { %12115 = vmatprep.subr.bf16.mxu0 %v13505_v24  ;;  %v490_v59 = vrot.slane %v488_v46, 4  ;;  %v494_v60 = vshll.u32 %v14174_v40, 16  ;;  %v468_v2 = vrot.slane %v467_v52, 4  ;;  %v499_v3 = vshrl.u32 %v14183_v47, 16  ;;  %v13508_v46 = vld [vmem:[%s17550_s1 + $0x28] sm:$0xff]  }
  0x5e   : > { %v463_v1 = vsel %vm14056_vm2, %v458_v51, %v462_v35  ;;  %v502_v7 = vshll.u32 %v14183_v47, 16  ;;  %v481_v12 = vor.u32 %v480_v57, %v477_v54  ;;  %v508_v17 = vshll.u32 %v14189_v56, 16 }
  0x5f   : > { %12084 = vmatmul.mubr.bf16.gmra.mrb[4].mxu0 %v10730_v0  ;;  %v491_v15 = vor.u32 %v490_v59, %v486_v58  ;;  %v496_v16 = vrot.slane %v494_v60, 5  ;;  %v473_v18 = vsel %vm14056_vm2, %v468_v2, %v472_v39  ;;  %v501_v20 = vrot.slane %v499_v3, 4 }
  0x60   : > { %12087 = vmatprep.mubr.bf16.mxu0 %v10731_v32  ;;  %12116 = vmatpush3.bf16.msra.mxu0 %v13505_v24  ;;  %v504_v21 = vrot.slane %v502_v7, 5  ;;  %v512_v23 = vshrl.u32 %v14189_v56, 16  ;;  %v10733_v8 = vcombine.low %v463_v1, %v473_v18  ;;  %v482_v0 = vrot.slane %v481_v12, 4  ;;  %v13507_v24 = vld [vmem:[%s17550_s1 + $0x20] sm:$0xff]  }
  0x61   : > { %v492_v26 = vrot.slane %v491_v15, 4  ;;  %12117 = vmatprep.subr.bf16.mxu0 %v13506_v55  ;;  %v510_v34 = vrot.slane %v508_v17, 5  ;;  %v518_v35 = vshll.u32 %v14193_v62, 16  ;;  %v523_v37 = vshrl.u32 %v14200_v10, 16  ;;  %v14237_v15 = vld [vmem:[%s14021_s15 + $0x80] sm:$0x1] }
  0x62   : > { %v505_v32 = vor.u32 %v504_v21, %v501_v20  ;;  %v514_v31 = vrot.slane %v512_v23, 4  ;;  %v487_v38 = vsel %vm14056_vm2, %v482_v0, %v486_v58  ;;  %v526_v42 = vshll.u32 %v14200_v10, 16  ;;  %v14230_v58 = vld [vmem:[%s14021_s15 + $0x7c] sm:$0xf]  ;;  %17678 = vst [vmem:[#allocation12_spill] sm:$0xff] %v14237_v15 }
  0x63   : > { %v497_v39 = vsel %vm14056_vm2, %v492_v26, %v496_v16  ;;  %v532_v43 = vshll.u32 %v14207_v25, 16  ;;  %v520_v57 = vrot.slane %v518_v35, 5  ;;  %v525_v59 = vrot.slane %v523_v37, 4  ;;  %v14243_v21 = vld [vmem:[%s14021_s15 + $0x84] sm:$0xf] }
  0x64   : > { %v10734_v51 = vcombine.low %v487_v38, %v497_v39  ;;  %12118 = vmatpush3.bf16.msra.mxu0 %v13506_v55  ;;  %v506_v52 = vrot.slane %v505_v32, 4  ;;  %v515_v54 = vor.u32 %v514_v31, %v510_v34  ;;  %v528_v60 = vrot.slane %v526_v42, 5  ;;  %v14252_v38 = vld [vmem:[%s14021_s15 + $0x88] sm:$0xf] }
  0x65   : > { %v534_v1 = vrot.slane %v532_v43, 5  ;;  %v536_v2 = vshrl.u32 %v14207_v25, 16  ;;  %12119 = vmatprep.subr.bf16.mxu0 %v13507_v24  ;;  %v542_v12 = vshll.u32 %v14219_v41, 16  ;;  %v547_v55 = vshrl.u32 %v14224_v45, 16 }
  0x66   : > { %v511_v3 = vsel %vm14056_vm2, %v506_v52, %v510_v34  ;;  %v516_v7 = vrot.slane %v515_v54, 4  ;;  %v529_v16 = vor.u32 %v528_v60, %v525_v59  ;;  %v550_v18 = vshll.u32 %v14224_v45, 16  ;;  %v13509_v34 = vld [vmem:[%s17550_s1 + $0x30] sm:$0xff]  }
  0x67   : > { %12088 = vmatmul.mubr.bf16.gmra.mrb[8].mxu0 %v10732_v50  ;;  %v538_v17 = vrot.slane %v536_v2, 4  ;;  %v556_v20 = vshll.u32 %v14230_v58, 16  ;;  %v544_v0 = vrot.slane %v542_v12, 5  ;;  %v549_v26 = vrot.slane %v547_v55, 4  ;;  %v14260_v52 = vld [vmem:[%s14021_s15 + $0x90] sm:$0xf] }
  0x68   : > { %12091 = vmatprep.mubr.bf16.mxu0 %v10733_v8  ;;  %v521_v23 = vsel %vm14056_vm2, %v516_v7, %v520_v57  ;;  %12120 = vmatpush3.bf16.msra.mxu0 %v13507_v24  ;;  %v560_v50 = vshrl.u32 %v14230_v58, 16  ;;  %v530_v31 = vrot.slane %v529_v16, 4  ;;  %v552_v37 = vrot.slane %v550_v18, 5  ;;  %v14255_v8 = vld [vmem:[%s14021_s15 + $0x8c] sm:$0x1] }
  0x69   : > { %v10735_v32 = vcombine.low %v511_v3, %v521_v23  ;;  %v539_v35 = vor.u32 %v538_v17, %v534_v1  ;;  %17679 = vst [vmem:[#allocation13_spill] sm:$0xff] %v14255_v8  ;;  %12121 = vmatprep.subr.bf16.mxu0 %v13508_v46  ;;  %v558_v39 = vrot.slane %v556_v20, 5  ;;  %v566_v24 = vshll.u32 %v14237_v15, 16  ;;  %v14266_v2 = vld [vmem:[%s14021_s15 + $0x94] sm:$0xf]  ;;  %v13510_v23 = vld [vmem:[%s17550_s1 + $0x38] sm:$0xff]  }
  0x6a   : > { %v562_v42 = vrot.slane %v560_v50, 4  ;;  %v571_v43 = vshrl.u32 %v14243_v21, 16  ;;  %v535_v54 = vsel %vm14056_vm2, %v530_v31, %v534_v1  ;;  %v553_v59 = vor.u32 %v552_v37, %v549_v26  ;;  %v14273_v20 = vld [vmem:[%s14021_s15 + $0x98] sm:$0x1] }
  0x6b   : > { %v540_v57 = vrot.slane %v539_v35, 4  ;;  %v574_v60 = vshll.u32 %v14243_v21, 16  ;;  %v568_v7 = vrot.slane %v566_v24, 5  ;;  %v580_v55 = vshll.u32 %v14252_v38, 16  ;;  %17680 = vst [vmem:[#allocation14_spill] sm:$0xff] %v14273_v20 }
  0x6c   : > { %v563_v3 = vor.u32 %v562_v42, %v558_v39  ;;  %v573_v12 = vrot.slane %v571_v43, 4  ;;  %12122 = vmatpush3.bf16.msra.mxu0 %v13508_v46  ;;  %v554_v17 = vrot.slane %v553_v59, 4  ;;  %v584_v1 = vshrl.u32 %v14252_v38, 16  ;;  %v14280_v35 = vld [vmem:[%s14021_s15 + $0x9c] sm:$0xf] }
  0x6d   : > { %v545_v16 = vsel %vm14056_vm2, %v540_v57, %v544_v0  ;;  %v576_v18 = vrot.slane %v574_v60, 5  ;;  %12123 = vmatprep.subr.bf16.mxu0 %v13509_v34  ;;  %v582_v31 = vrot.slane %v580_v55, 5  ;;  %v590_v46 = vshll.u32 %v14255_v8, 16  ;;  %v14286_v43 = vld [vmem:[%s14021_s15 + $0xa0] sm:$0xf] }
  0x6e   : > { %v10736_v26 = vcombine.low %v535_v54, %v545_v16  ;;  %v564_v50 = vrot.slane %v563_v3, 4  ;;  %v559_v0 = vsel %vm14056_vm2, %v554_v17, %v558_v39  ;;  %v586_v42 = vrot.slane %v584_v1, 4  ;;  %v14295_v39 = vld [vmem:[%s17550_s1 + $0x80] sm:$0xff]  }
  0x6f   : > { %12092 = vmatmul.mubr.bf16.gmra.mrb[12].mxu0 %v10734_v51  ;;  %v577_v37 = vor.u32 %v576_v18, %v573_v12  ;;  %v595_v24 = vshrl.u32 %v14260_v52, 16  ;;  %v592_v57 = vrot.slane %v590_v46, 5  ;;  %v598_v59 = vshll.u32 %v14260_v52, 16  ;;  %17681 = vst [vmem:[#allocation15_spill] sm:$0xff] %v14295_v39  ;;  %v14300_v18 = vld [vmem:[%s14021_s15 + $0xa4] sm:$0x1] }
  0x70   : > { %12095 = vmatprep.mubr.bf16.mxu0 %v10735_v32  ;;  %v569_v54 = vsel %vm14056_vm2, %v564_v50, %v568_v7  ;;  %v604_v51 = vshll.u32 %v14266_v2, 16  ;;  %12124 = vmatpush3.bf16.msra.mxu0 %v13509_v34  ;;  %v587_v32 = vor.u32 %v586_v42, %v582_v31  ;;  %v608_v16 = vshrl.u32 %v14266_v2, 16  ;;  %17682 = vst [vmem:[#allocation16_spill] sm:$0xff] %v14300_v18  ;;  %v14303_v34 = vld [vmem:[%s14021_s15 + $0xa8] sm:$0xf] }
  0x71   : > { %v10737_v60 = vcombine.low %v559_v0, %v569_v54  ;;  %v578_v3 = vrot.slane %v577_v37, 4  ;;  %v597_v12 = vrot.slane %v595_v24, 4  ;;  %12125 = vmatprep.subr.bf16.mxu0 %v13510_v23  ;;  %v600_v55 = vrot.slane %v598_v59, 5  ;;  %v14310_v37 = vld [vmem:[%s14021_s15 + $0xac] sm:$0xf] }
  0x72   : > { %v606_v7 = vrot.slane %v604_v51, 5  ;;  %v614_v17 = vshll.u32 %v14273_v20, 16  ;;  %v588_v50 = vrot.slane %v587_v32, 4  ;;  %v619_v46 = vshrl.u32 %v14280_v35, 16 }
  0x73   : > { %v583_v1 = vsel %vm14056_vm2, %v578_v3, %v582_v31  ;;  %v622_v0 = vshll.u32 %v14280_v35, 16  ;;  %v601_v42 = vor.u32 %v600_v55, %v597_v12  ;;  %v610_v24 = vrot.slane %v608_v16, 4  ;;  %v14318_v12 = vld [vmem:[%s14021_s15 + $0xb0] sm:$0x1] }
  0x74   : > { %v616_v54 = vrot.slane %v614_v17, 5  ;;  %v628_v59 = vshll.u32 %v14286_v43, 16  ;;  %12126 = vmatpush3.bf16.msra.mxu0 %v13510_v23  ;;  %v593_v51 = vsel %vm14056_vm2, %v588_v50, %v592_v57  ;;  %v621_v20 = vrot.slane %v619_v46, 4  ;;  %17683 = vst [vmem:[#allocation17_spill] sm:$0xff] %v14318_v12 }
  0x75   : > { %v624_v8 = vrot.slane %v622_v0, 5  ;;  %v632_v31 = vshrl.u32 %v14286_v43, 16  ;;  %12159 = vmatprep.subr.bf16.mxu0 %v14295_v39  ;;  %v10738_v3 = vcombine.low %v583_v1, %v593_v51  ;;  %v602_v32 = vrot.slane %v601_v42, 4 }
  0x76   : > { %v611_v15 = vor.u32 %v610_v24, %v606_v7  ;;  %v630_v41 = vrot.slane %v628_v59, 5  ;;  %v638_v23 = vshll.u32 %v14300_v18, 16  ;;  %v643_v57 = vshrl.u32 %v14303_v34, 16 }
  0x77   : > { %12096 = vmatmul.mubr.bf16.gmra.mrb[16].mxu0 %v10736_v26  ;;  %v625_v55 = vor.u32 %v624_v8, %v621_v20  ;;  %v634_v16 = vrot.slane %v632_v31, 4  ;;  %v607_v17 = vsel %vm14056_vm2, %v602_v32, %v606_v7  ;;  %v646_v1 = vshll.u32 %v14303_v34, 16  ;;  %v14327_v20 = vld [vmem:[%s14021_s15 + $0xb4] sm:$0xf]  ;;  %v14333_v7 = vld [vmem:[%s14021_s15 + $0xb8] sm:$0xf] }
  0x78   : > { %12099 = vmatprep.mubr.bf16.mxu0 %v10737_v60  ;;  %v612_v50 = vrot.slane %v611_v15, 4  ;;  %v652_v46 = vshll.u32 %v14310_v37, 16  ;;  %v640_v26 = vrot.slane %v638_v23, 5  ;;  %v645_v8 = vrot.slane %v643_v57, 4  ;;  %v14339_v57 = vld [vmem:[%s14021_s15 + $0xbc] sm:$0x1] }
  0x79   : > { %v626_v0 = vrot.slane %v625_v55, 4  ;;  %v635_v42 = vor.u32 %v634_v16, %v630_v41  ;;  %v648_v59 = vrot.slane %v646_v1, 5  ;;  %v656_v51 = vshrl.u32 %v14310_v37, 16  ;;  %v17694_v29 = vld [vmem:[#allocation16_spill] sm:$0xff] }
  0x7a   : > { %v617_v24 = vsel %vm14056_vm2, %v612_v50, %v616_v54  ;;  %v654_v60 = vrot.slane %v652_v46, 5  ;;  %v662_v55 = vshll.u32 %v14318_v12, 16  ;;  %v667_v18 = vshrl.u32 %v14327_v20, 16 }
  0x7b   : > { %v10739_v15 = vcombine.low %v607_v17, %v617_v24  ;;  %v631_v31 = vsel %vm14056_vm2, %v626_v0, %v630_v41  ;;  %v636_v32 = vrot.slane %v635_v42, 4  ;;  %v649_v16 = vor.u32 %v648_v59, %v645_v8 }
  0x7c   : > { %v658_v23 = vrot.slane %v656_v51, 4  ;;  %v670_v54 = vshll.u32 %v14327_v20, 16  ;;  %v664_v1 = vrot.slane %v662_v55, 5  ;;  %v676_v17 = vshll.u32 %v14333_v7, 16 }
  0x7d   : > { %v641_v50 = vsel %vm14056_vm2, %v636_v32, %v640_v26  ;;  %v680_v46 = vshrl.u32 %v14333_v7, 16  ;;  %v650_v41 = vrot.slane %v649_v16, 4  ;;  %v669_v42 = vrot.slane %v667_v18, 4  ;;  %v1300_v16 = vld [vmem:[%s14021_s15 + $0xb4] sm:$0xe] }
  0x7e   : > { %v659_v0 = vor.u32 %v658_v23, %v654_v60  ;;  %v672_v8 = vrot.slane %v670_v54, 5  ;;  %v678_v24 = vrot.slane %v676_v17, 5  ;;  %v686_v51 = vshll.u32 %v14339_v57, 16  ;;  %v1297_v17 = vld [vmem:[%s14021_s15 + $0x90] sm:$0xe] }
  0x7f   : > { %12100 = vmatmul.mubr.bf16.gmra.mrb[20].mxu0 %v10738_v3  ;;  %v682_v59 = vrot.slane %v680_v46, 4  ;;  %v10740_v12 = vcombine.low %v631_v31, %v641_v50  ;;  %v655_v39 = vsel %vm14056_vm2, %v650_v41, %v654_v60  ;;  %v10753_v41 = vcombine.low %v14052_v28, %v14061_v33  ;;  %v17687_v46 = vld [vmem:[#allocation11_spill] sm:$0xff]  ;;  %v17688_v50 = vld [vmem:[#allocation12_spill] sm:$0xff] }
  0x80   : > { %12103 = vmatprep.mubr.bf16.mxu0 %v10739_v15  ;;  %v660_v26 = vrot.slane %v659_v0, 4  ;;  %v673_v32 = vor.u32 %v672_v8, %v669_v42  ;;  %v688_v62 = vrot.slane %v686_v51, 5  ;;  %v1290_v42 = vld [vmem:[%s14021_s15 + $0x3c] sm:$0xe]  ;;  %v1376_v28 = vrot.slane %v14131_v44, 5  ;;  %v17689_v15 = vld [vmem:[#allocation15_spill] sm:$0xff] }
  0x81   : > { %v683_v55 = vor.u32 %v682_v59, %v678_v24  ;;  %v1288_v59 = vld [vmem:[%s14021_s15 + $0x24] sm:$0xe]  ;;  %v1387_v44 = vrot.slane %v14169_v27, 5  ;;  %v1411_v60 = vrot.slane %v17688_v50, 5  ;;  %v10787_v3 = vrot.slane %v1297_v17, 9 }
  0x82   : > { %v665_v18 = vsel %vm14056_vm2, %v660_v26, %v664_v1  ;;  %v674_v23 = vrot.slane %v673_v32, 4  ;;  %v10778_v32 = vrot.slane %v1288_v59, 9  ;;  %v1292_v59 = vld [vmem:[%s14021_s15 + $0x54] sm:$0xe]  ;;  %v1404_v1 = vrot.slane %v17687_v46, 5 }
  0x83   : > { %v10741_v31 = vcombine.low %v655_v39, %v665_v18  ;;  %v684_v54 = vrot.slane %v683_v55, 4  ;;  %v1359_v55 = vrot.slane %v14079_v49, 5  ;;  %v1289_v18 = vld [vmem:[%s14021_s15 + $0x30] sm:$0xe]  ;;  %v10752_v39 = vcombine.low %v14038_v11, %v14044_v14 }
  0x84   : > { %v679_v51 = vsel %vm14056_vm2, %v674_v23, %v678_v24  ;;  %v1362_v23 = vrot.slane %v14087_v61, 5  ;;  %v1408_v46 = vrot.slane %v14230_v58, 5 }
  0x85   : > { %v689_v26 = vsel %vm14056_vm2, %v684_v54, %v688_v62  ;;  %v1361_v24 = vrot.slane %v1359_v55, 4  ;;  %v10751_v62 = vcombine.low %v14027_v4, %v14030_v5  ;;  %v10779_v54 = vrot.slane %v1289_v18, 9  ;;  %v1294_v18 = vld [vmem:[%s14021_s15 + $0x6c] sm:$0xe] }
  0x86   : > { %v10742_v8 = vcombine.low %v679_v51, %v689_v26  ;;  %v1366_v26 = vrot.slane %v14103_v13, 5  ;;  %v1369_v4 = vrot.slane %v14108_v19, 5  ;;  %v10780_v5 = vrot.slane %v1290_v42, 9 }
  0x87   : > { %12104 = vmatmul.mubr.bf16.gmra.mrb[24].mxu0 %v10740_v12  ;;  %v1291_v12 = vld [vmem:[%s14021_s15 + $0x48] sm:$0xe]  ;;  %v14405_v51 = vsel %vm14386_vm5, %v1361_v24, %v1362_v23  ;;  %v1380_v42 = vrot.slane %v14144_v63, 5  ;;  %v10784_v61 = vrot.slane %v1294_v18, 9 }
  0x88   : > { %12107 = vmatprep.mubr.bf16.mxu0 %v10741_v31  ;;  %v14393_v31 = vsel %vm14386_vm5, %v10778_v32, %v1359_v55  ;;  %v1373_v32 = vrot.slane %v14121_v36, 5  ;;  %v1293_v55 = vld [vmem:[%s14021_s15 + $0x60] sm:$0xe]  ;;  %v14415_v11 = vsel %vm14386_vm5, %v10779_v54, %v1366_v26  ;;  %v1368_v14 = vrot.slane %v1366_v26, 4  ;;  %v1296_v26 = vld [vmem:[%s14021_s15 + $0x84] sm:$0xe] }
  0x89   : > { %v10781_v33 = vrot.slane %v1291_v12, 9  ;;  %v10782_v54 = vrot.slane %v1292_v59, 9  ;;  %v1390_v12 = vrot.slane %v14174_v40, 5 }
  0x8a   : > { %v14421_v24 = vsel %vm14386_vm5, %v10780_v5, %v1373_v32  ;;  %v1375_v19 = vrot.slane %v1373_v32, 4  ;;  %v14427_v23 = vsel %vm14386_vm5, %v1368_v14, %v1369_v4  ;;  %v1382_v4 = vrot.slane %v1380_v42, 4 }
  0x8b   : > { %v14446_v40 = vsel %vm14386_vm5, %v10782_v54, %v1387_v44  ;;  %v1389_v32 = vrot.slane %v1387_v44, 4  ;;  %v10783_v14 = vrot.slane %v1293_v55, 9  ;;  %v1401_v44 = vrot.slane %v14207_v25, 5  ;;  %v1298_v54 = vld [vmem:[%s14021_s15 + $0x9c] sm:$0xe] }
  0x8c   : > { %v14436_v5 = vsel %vm14386_vm5, %v1375_v19, %v1376_v28  ;;  %v13516_v28 = vld [vmem:[%s17550_s1 + $0x88] sm:$0xff]   ;;  %v1394_v19 = vrot.slane %v14189_v56, 5 }
  0x8d   : > { %v14462_v55 = vsel %vm14386_vm5, %v1389_v32, %v1390_v12  ;;  %v14476_v12 = vsel %vm14386_vm5, %v10784_v61, %v1401_v44  ;;  %v1403_v32 = vrot.slane %v1401_v44, 4  ;;  %v1299_v61 = vld [vmem:[%s14021_s15 + $0xa8] sm:$0xe]  ;;  %v13519_v44 = vld [vmem:[%s17550_s1 + $0x90] sm:$0xff]  }
  0x8e   : > { %v1396_v18 = vrot.slane %v1394_v19, 4 }
  0x8f   : > { %12108 = vmatmul.mubr.bf16.gmra.mrb[28].mxu0 %v10742_v8  ;;  %v1383_v8 = vrot.slane %v14152_v9, 5  ;;  %v14440_v9 = vsel %vm14386_vm5, %v10781_v33, %v1380_v42  ;;  %v17686_v42 = vld [vmem:[#allocation10_spill] sm:$0xff]  ;;  %v14495_v50 = vsel %vm14386_vm5, %v1403_v32, %v1404_v1  ;;  %v13522_v1 = vld [vmem:[%s17550_s1 + $0x98] sm:$0xff]  }
  0x90   : > { %12127 = vmatprep.mubr.bf16.mxu0 %v10751_v62  ;;  %v1295_v62 = vld [vmem:[%s14021_s15 + $0x78] sm:$0xe]  ;;  %v1397_v59 = vrot.slane %v17686_v42, 5  ;;  %17691 = vst [vmem:[#allocation10_spill] sm:$0xff] %v14495_v50  ;;  %v1432_v50 = vrot.slane %v17694_v29, 5  ;;  %v17696_v29 = vcombine.low %v14076_v48, %v14079_v49 }
  0x91   : > { %v14454_v33 = vsel %vm14386_vm5, %v1382_v4, %v1383_v8  ;;  %v14471_v4 = vsel %vm14386_vm5, %v10783_v14, %v1394_v19  ;;  %v10785_v42 = vrot.slane %v1295_v62, 9  ;;  %v10786_v62 = vrot.slane %v1296_v26, 9  ;;  %v17690_v19 = vld [vmem:[#allocation13_spill] sm:$0xff] }
  0x92   : > { %v14483_v14 = vsel %vm14386_vm5, %v1396_v18, %v1397_v59  ;;  %v1418_v8 = vrot.slane %v17690_v19, 5  ;;  %v1410_v26 = vrot.slane %v1408_v46, 4  ;;  %v10788_v59 = vrot.slane %v1298_v54, 9 }
  0x93   : > { %v10789_v54 = vrot.slane %v1299_v61, 9  ;;  %v1443_v61 = vrot.slane %v14333_v7, 5 }
  0x94   : > { %v14513_v32 = vsel %vm14386_vm5, %v1410_v26, %v1411_v60 }
  0x95   : > { %17692 = vst [vmem:[#allocation11_spill] sm:$0xff] %v14513_v32 }
  0x97   : > { %12128 = vmatmul.mubr.bf16.vlgmr.msra.gmra.mrb[0].mxu0 %v10752_v39  ;;  %v1415_v39 = vrot.slane %v14252_v38, 5 }
  0x98   : > { %12160 = vmatpush3.bf16.msra.mxu0 %v17689_v15  ;;  %12131 = vmatprep.mubr.bf16.mxu0 %v10753_v41  ;;  %v14499_v41 = vsel %vm14386_vm5, %v10785_v42, %v1408_v46  ;;  %v1422_v42 = vrot.slane %v14266_v2, 5  ;;  %v17693_v46 = vld [vmem:[#allocation14_spill] sm:$0xff] }
  0x99   : > { %12161 = vmatprep.subr.bf16.mxu0 %v13516_v28  ;;  %v14505_v18 = vsel %vm14386_vm5, %v10786_v62, %v1415_v39  ;;  %v1417_v19 = vrot.slane %v1415_v39, 4  ;;  %v1425_v15 = vrot.slane %v17693_v46, 5  ;;  %v1429_v39 = vrot.slane %v14286_v43, 5  ;;  %v17695_v62 = vld [vmem:[#allocation17_spill] sm:$0xff] }
  0x9a   : > { %v14529_v26 = vsel %vm14386_vm5, %v10787_v3, %v1422_v42  ;;  %v1439_v32 = vrot.slane %v17695_v62, 5  ;;  %v10790_v3 = vrot.slane %v1300_v16, 9 }
  0x9b   : > { %v14521_v17 = vsel %vm14386_vm5, %v1417_v19, %v1418_v8  ;;  %v14533_v46 = vsel %vm14386_vm5, %v10788_v59, %v1429_v39  ;;  %v1431_v8 = vrot.slane %v1429_v39, 4  ;;  %v1436_v19 = vrot.slane %v14310_v37, 5 }
  0x9c   : > { %12162 = vmatpush3.bf16.msra.mxu0 %v13516_v28  ;;  %v1424_v28 = vrot.slane %v1422_v42, 4  ;;  %v1446_v42 = vrot.slane %v14339_v57, 5  ;;  %v17697_v59 = vcombine.low %v14095_v6, %v14103_v13  ;;  %v13525_v57 = vld [vmem:[%s17550_s1 + $0xa0] sm:$0xff]   ;;  %v14566_v13 = vsel %vm14386_vm5, %v10790_v3, %v1443_v61 }
  0x9d   : > { %12163 = vmatprep.subr.bf16.mxu0 %v13519_v44  ;;  %v14553_v48 = vsel %vm14386_vm5, %v1431_v8, %v1432_v50  ;;  %v14557_v49 = vsel %vm14386_vm5, %v10789_v54, %v1436_v19  ;;  %v1438_v16 = vrot.slane %v1436_v19, 4  ;;  %v13528_v50 = vld [vmem:[%s17550_s1 + $0xa8] sm:$0xff]   ;;  %v17699_v8 = vcombine.low %v14137_v53, %v14144_v63  ;;  %v13531_v19 = vld [vmem:[%s17550_s1 + $0xb0] sm:$0xff]   ;;  %v13535_v53 = vld [vmem:[%s17550_s1 + $0xc0] sm:$0xff]  }
  0x9e   : > { %v14542_v60 = vsel %vm14386_vm5, %v1424_v28, %v1425_v15  ;;  %v10820_v6 = vcombine.low %v14533_v46, %v14553_v48  ;;  %v17702_v63 = vcombine.low %v14200_v10, %v14207_v25  ;;  %v17705_v10 = vcombine.low %v14260_v52, %v14266_v2 }
  0x9f   : > { %12132 = vmatmul.mubr.bf16.gmra.mrb[4].mxu0 %v17696_v29  ;;  %v10819_v62 = vcombine.low %v14529_v26, %v14542_v60  ;;  %v14570_v15 = vsel %vm14386_vm5, %v1438_v16, %v1439_v32  ;;  %v17698_v32 = vcombine.low %v14118_v30, %v14121_v36  ;;  %v17700_v30 = vcombine.low %v14160_v22, %v14169_v27  ;;  %v13735_v27 = vld [vmem:[%s14021_s15 + $0x4] sm:$0xf]  ;;  %v13736_v29 = vld [vmem:[%s14021_s15 + $0x8] sm:$0x1]  ;;  %v13737_v16 = vld [vmem:[%s14021_s15 + $0x10] sm:$0xf] }
  0xa0   : > { %12135 = vmatprep.mubr.bf16.mxu0 %v17697_v59  ;;  %12164 = vmatpush3.bf16.msra.mxu0 %v13519_v44  ;;  %v1445_v44 = vrot.slane %v1443_v61, 4  ;;  %v10821_v39 = vcombine.low %v14557_v49, %v14570_v15  ;;  %v17701_v36 = vcombine.low %v14183_v47, %v14189_v56  ;;  %v17703_v22 = vcombine.low %v14224_v45, %v14230_v58  ;;  %v1285_v56 = vld [vmem:[%s14021_s15] sm:$0xe]  ;;  %v1286_v58 = vld [vmem:[%s14021_s15 + $0xc] sm:$0xe] }
  0xa1   : > { %12165 = vmatprep.subr.bf16.mxu0 %v13522_v1  ;;  %v1338_v47 = vrot.slane %v13735_v27, 5  ;;  %v1341_v3 = vrot.slane %v13736_v29, 5  ;;  %v17704_v61 = vcombine.low %v14243_v21, %v14252_v38  ;;  %v10775_v25 = vrot.slane %v1285_v56, 9  ;;  %v13738_v21 = vld [vmem:[%s14021_s15 + $0x1c] sm:$0xf]  ;;  %v13543_v60 = vld [vmem:[%s14021_s15 + $0xc] sm:$0xff]  }
  0xa2   : > { %v14579_v28 = vsel %vm14386_vm5, %v1445_v44, %v1446_v42  ;;  %v17706_v45 = vcombine.low %v14280_v35, %v14286_v43  ;;  %v17707_v59 = vcombine.low %v14303_v34, %v14310_v37  ;;  %v1352_v38 = vrot.slane %v13738_v21, 5  ;;  %v1287_v44 = vld [vmem:[%s14021_s15 + $0x18] sm:$0xe]  ;;  %v13740_v37 = vld [vmem:[%s14021_s15 + $0x20] sm:$0x1] }
  0xa3   : > { %v10822_v54 = vcombine.low %v14566_v13, %v14579_v28  ;;  %v1340_v42 = vrot.slane %v1338_v47, 4  ;;  %v1339_v52 = vsel %vm14386_vm5, %v10775_v25, %v1338_v47  ;;  %v13538_v29 = vld [vmem:[%s17550_s1 + $0xd8] sm:$0xff]   ;;  %v10905_v49 = vld [vmem:[%s14021_s15 + $0x14] sm:$0x1]  ;;  %v13548_v13 = vld [vmem:[%s17550_s1 + $0x108] sm:$0xff]  }
  0xa4   : > { %12166 = vmatpush3.bf16.msra.mxu0 %v13522_v1  ;;  %v13534_v1 = vld [vmem:[%s17550_s1 + $0xb8] sm:$0xff]   ;;  %v1354_v34 = vrot.slane %v1352_v38, 4 }
  0xa5   : > { %12167 = vmatprep.subr.bf16.mxu0 %v13525_v57  ;;  %v1342_v2 = vsel %vm14386_vm5, %v1340_v42, %v1341_v3  ;;  %v17709_v3 = vcombine.low %v14393_v31, %v14405_v51  ;;  %v17711_v31 = vcombine.low %v14421_v24, %v14436_v5  ;;  %v17712_v51 = vcombine.low %v14440_v9, %v14454_v33  ;;  %v13545_v9 = vld [vmem:[%s17550_s1 + $0x100] sm:$0xff]  }
  0xa6   : > { %v10807_v43 = vcombine.low %v1339_v52, %v1342_v2  ;;  %v17713_v24 = vcombine.low %v14446_v40, %v14462_v55  ;;  %v17714_v5 = vcombine.low %v14471_v4, %v14483_v14  ;;  %v17715_v33 = vld [vmem:[#allocation10_spill] sm:$0xff]  ;;  %v17717_v40 = vld [vmem:[#allocation11_spill] sm:$0xff]  ;;  %v17719_v4 = vcombine.low %v14505_v18, %v14521_v17  ;;  %v10907_v18 = vld [vmem:[%s14021_s15 + $0x1c] sm:$0xf] }
  0xa7   : > { %12136 = vmatmul.mubr.bf16.gmra.mrb[8].mxu0 %v17698_v32  ;;  %v10776_v32 = vrot.slane %v1286_v58, 9  ;;  %v17716_v25 = vcombine.low %v14476_v12, %v17715_v33  ;;  %v17718_v55 = vcombine.low %v14499_v41, %v17717_v40  ;;  %v10903_v14 = vld [vmem:[%s14021_s15 + $0xc] sm:$0xf]  ;;  %v10904_v12 = vld [vmem:[%s14021_s15 + $0x10] sm:$0xf]  ;;  %v2239_v46 = vshll.u32 %v10907_v18, 16 }
  0xa8   : > { %12139 = vmatprep.mubr.bf16.mxu0 %v17699_v8  ;;  %12168 = vmatpush3.bf16.msra.mxu0 %v13525_v57  ;;  %v1345_v57 = vrot.slane %v13737_v16, 5  ;;  %v2206_v41 = vshrl.u32 %v10903_v14, 16  ;;  %v2209_v42 = vshll.u32 %v10903_v14, 16  ;;  %v2215_v17 = vshll.u32 %v10904_v12, 16  ;;  %v10908_v16 = vld [vmem:[%s14021_s15 + $0x20] sm:$0x1] }
  0xa9   : > { %12169 = vmatprep.subr.bf16.mxu0 %v13528_v50  ;;  %v2219_v58 = vshrl.u32 %v10904_v12, 16  ;;  %v2243_v48 = vshrl.u32 %v10907_v18, 16  ;;  %v13544_v52 = vld [vmem:[%s14021_s15 + $0x18] sm:$0xff]   ;;  %v14720_v2 = vrot.slane %v2239_v46, 5  ;;  %v2249_v28 = vshll.u32 %v10908_v16, 16  ;;  %v13560_v18 = vld [vmem:[%s17550_s1 + $0x128] sm:$0xff]  }
  0xaa   : > { %v1347_v8 = vrot.slane %v1345_v57, 4  ;;  %v2211_v15 = vrot.slane %v2209_v42, 5  ;;  %v10996_v33 = vld [vmem:[%s14021_s15 + $0x48] sm:$0xe]  ;;  %v13552_v12 = vld [vmem:[%s14021_s15 + $0x54] sm:$0xff]  }
  0xab   : > { %v11012_v14 = vrot.slane %v10996_v33, 9  ;;  %v10998_v16 = vld [vmem:[%s14021_s15 + $0x60] sm:$0xe]  ;;  %v14858_v33 = vld [vmem:[%s14021_s15 + $0x88] sm:$0xf] }
  0xac   : > { %12170 = vmatpush3.bf16.msra.mxu0 %v13528_v50  ;;  %v13739_v50 = vld [vmem:[%s14021_s15 + $0x14] sm:$0x1] }
  0xad   : > { %12171 = vmatprep.subr.bf16.mxu0 %v13531_v19  ;;  %v1348_v35 = vrot.slane %v13739_v50, 5  ;;  %v13546_v50 = vld [vmem:[%s14021_s15 + $0x24] sm:$0xff]  }
  0xaf   : > { %12140 = vmatmul.mubr.bf16.gmra.mrb[12].mxu0 %v17700_v30  ;;  %v17708_v30 = vcombine.low %v14327_v20, %v14333_v7  ;;  %v13536_v20 = vld [vmem:[%s17550_s1 + $0xc8] sm:$0xff]   ;;  %v13537_v7 = vld [vmem:[%s17550_s1 + $0xd0] sm:$0xff]  }
  0xb0   : > { %12143 = vmatprep.mubr.bf16.mxu0 %v17701_v36  ;;  %12172 = vmatpush3.bf16.msra.mxu0 %v13531_v19  ;;  %v10777_v19 = vrot.slane %v1287_v44, 9  ;;  %v1346_v36 = vsel %vm14386_vm5, %v10776_v32, %v1345_v57  ;;  %v2245_v44 = vrot.slane %v2243_v48, 4 }
  0xb1   : > { %12173 = vmatprep.subr.bf16.mxu0 %v13534_v1 }
  0xb4   : > { %12174 = vmatpush3.bf16.msra.mxu0 %v13534_v1  ;;  %v1355_v1 = vrot.slane %v13740_v37, 5  ;;  %v13551_v37 = vld [vmem:[%s17550_s1 + $0x110] sm:$0xff]  }
  0xb5   : > { %12207 = vmatprep.subr.bf16.mxu0 %v13535_v53 }
  0xb6   : > { %v1356_v27 = vsel %vm14386_vm5, %v1354_v34, %v1355_v1  ;;  %v2246_v34 = vor.u32 %v2245_v44, %v14720_v2  ;;  %v11014_v44 = vrot.slane %v10998_v16, 9  ;;  %v11002_v16 = vld [vmem:[%s14021_s15 + $0x90] sm:$0xe] }
  0xb7   : > { %12144 = vmatmul.mubr.bf16.gmra.mrb[16].mxu0 %v17702_v63  ;;  %v1349_v63 = vsel %vm14386_vm5, %v1347_v8, %v1348_v35  ;;  %v2225_v35 = vshll.u32 %v10905_v49, 16  ;;  %v14795_v49 = vld [vmem:[%s14021_s15 + $0x64] sm:$0xf] }
  0xb8   : > { %12147 = vmatprep.mubr.bf16.mxu0 %v17703_v22  ;;  %v1353_v22 = vsel %vm14386_vm5, %v10777_v19, %v1352_v38  ;;  %v10808_v47 = vcombine.low %v1346_v36, %v1349_v63  ;;  %v10909_v38 = vld [vmem:[%s14021_s15 + $0x24] sm:$0xf]  ;;  %v10910_v19 = vld [vmem:[%s14021_s15 + $0x28] sm:$0xf] }
  0xb9   : > { %v10809_v56 = vcombine.low %v1353_v22, %v1356_v27  ;;  %v14736_v36 = vrot.slane %v2225_v35, 5  ;;  %v13547_v22 = vld [vmem:[%s14021_s15 + $0x30] sm:$0xff]   ;;  %v14741_v27 = vrot.slane %v2246_v34, 4  ;;  %v14834_v34 = vld [vmem:[%s14021_s15 + $0x3c] sm:$0xf] }
  0xbf   : > { %12148 = vmatmul.mubr.bf16.gmra.mrb[20].mxu0 %v17704_v61  ;;  %v17710_v61 = vcombine.low %v14415_v11, %v14427_v23  ;;  %v13541_v11 = vld [vmem:[%s17550_s1 + $0xf0] sm:$0xff]   ;;  %v13542_v23 = vld [vmem:[%s17550_s1 + $0xf8] sm:$0xff]  }
  0xc0   : > { %12151 = vmatprep.mubr.bf16.mxu0 %v17705_v10  ;;  %v13540_v10 = vld [vmem:[%s17550_s1 + $0xe8] sm:$0xff]  }
  0xc7   : > { %12152 = vmatmul.mubr.bf16.gmra.mrb[24].mxu0 %v17706_v45  ;;  %v10906_v45 = vld [vmem:[%s14021_s15 + $0x18] sm:$0xf] }
  0xc8   : > { %12155 = vmatprep.mubr.bf16.mxu0 %v17707_v59  ;;  %v2230_v26 = vshrl.u32 %v10906_v45, 16  ;;  %v2221_v59 = vrot.slane %v2219_v58, 4 }
  0xca   : > { %v2232_v57 = vrot.slane %v2230_v26, 4 }
  0xcf   : > { %12156 = vmatmul.mubr.bf16.gmra.mrb[28].mxu0 %v17708_v30 }
  0xd0   : > { %12175 = vmatprep.mubr.bf16.mxu0 %v10807_v43 }
  0xd7   : > { %12176 = vmatmul.mubr.bf16.vlgmr.msra.gmra.mrb[0].mxu0 %v10808_v47  ;;  %v14743_v47 = vrot.slane %v2249_v28, 5  ;;  %v13566_v28 = vld [vmem:[%s17550_s1 + $0x138] sm:$0xff]  }
  0xd8   : > { %12208 = vmatpush3.bf16.msra.mxu0 %v13535_v53  ;;  %12179 = vmatprep.mubr.bf16.mxu0 %v10809_v56  ;;  %v13539_v53 = vld [vmem:[%s17550_s1 + $0xe0] sm:$0xff]   ;;  %v2257_v56 = vshll.u32 %v10909_v38, 16 }
  0xd9   : > { %12209 = vmatprep.subr.bf16.mxu0 %v13536_v20 }
  0xdc   : > { %12210 = vmatpush3.bf16.msra.mxu0 %v13536_v20  ;;  %v2263_v20 = vshll.u32 %v10910_v19, 16 }
  0xdd   : > { %12211 = vmatprep.subr.bf16.mxu0 %v13537_v7 }
  0xdf   : > { %12180 = vmatmul.mubr.bf16.gmra.mrb[4].mxu0 %v17709_v3  ;;  %v2267_v3 = vshrl.u32 %v10910_v19, 16  ;;  %v14831_v19 = vld [vmem:[%s17550_s1 + $0x140] sm:$0xff]  }
  0xe0   : > { %12183 = vmatprep.mubr.bf16.mxu0 %v17710_v61  ;;  %12212 = vmatpush3.bf16.msra.mxu0 %v13537_v7  ;;  %v13549_v7 = vld [vmem:[%s14021_s15 + $0x3c] sm:$0xff]   ;;  %v10912_v61 = vld [vmem:[%s14021_s15 + $0x30] sm:$0xf] }
  0xe1   : > { %12213 = vmatprep.subr.bf16.mxu0 %v13538_v29  ;;  %v14773_v42 = vrot.slane %v2267_v3, 4 }
  0xe4   : > { %12214 = vmatpush3.bf16.msra.mxu0 %v13538_v29 }
  0xe5   : > { %12215 = vmatprep.subr.bf16.mxu0 %v13539_v53 }
  0xe7   : > { %12184 = vmatmul.mubr.bf16.gmra.mrb[8].mxu0 %v17711_v31  ;;  %v13557_v31 = vld [vmem:[%s17550_s1 + $0x120] sm:$0xff]  }
  0xe8   : > { %12187 = vmatprep.mubr.bf16.mxu0 %v17712_v51  ;;  %12216 = vmatpush3.bf16.msra.mxu0 %v13539_v53  ;;  %v13554_v53 = vld [vmem:[%s17550_s1 + $0x118] sm:$0xff]   ;;  %v2259_v51 = vrot.slane %v2257_v56, 5 }
  0xe9   : > { %12217 = vmatprep.subr.bf16.mxu0 %v13540_v10 }
  0xec   : > { %12218 = vmatpush3.bf16.msra.mxu0 %v13540_v10  ;;  %v14751_v10 = vld [vmem:[%s14021_s15 + $0x34] sm:$0xf] }
  0xed   : > { %12219 = vmatprep.subr.bf16.mxu0 %v13541_v11 }
  0xef   : > { %12188 = vmatmul.mubr.bf16.gmra.mrb[12].mxu0 %v17713_v24  ;;  %v14760_v24 = vld [vmem:[%s14021_s15 + $0x50] sm:$0x1] }
  0xf0   : > { %12191 = vmatprep.mubr.bf16.mxu0 %v17714_v5  ;;  %12220 = vmatpush3.bf16.msra.mxu0 %v13541_v11  ;;  %v2278_v11 = vshrl.u32 %v10912_v61, 16  ;;  %v14762_v5 = vrot.slane %v2263_v20, 5  ;;  %v3015_v40 = vrot.slane %v14760_v24, 5 }
  0xf1   : > { %12221 = vmatprep.subr.bf16.mxu0 %v13542_v23 }
  0xf2   : > { %v14792_v48 = vrot.slane %v2278_v11, 4 }
  0xf4   : > { %12222 = vmatpush3.bf16.msra.mxu0 %v13542_v23  ;;  %v14757_v23 = vld [vmem:[%s14021_s15 + $0x4c] sm:$0xf] }
  0xf5   : > { %12255 = vmatprep.subr.bf16.mxu0 %v13545_v9 }
  0xf7   : > { %12192 = vmatmul.mubr.bf16.gmra.mrb[16].mxu0 %v17716_v25  ;;  %v3012_v25 = vrot.slane %v14757_v23, 5 }
  0xf8   : > { %12195 = vmatprep.mubr.bf16.mxu0 %v17718_v55  ;;  %v13550_v55 = vld [vmem:[%s14021_s15 + $0x48] sm:$0xff]  }
  0xff   : > { %12196 = vmatmul.mubr.bf16.gmra.mrb[20].mxu0 %v17719_v4  ;;  %v2287_v4 = vshll.u32 %v14751_v10, 16 }
 0x100   : > { %12199 = vmatprep.mubr.bf16.mxu0 %v10819_v62  ;;  %v2233_v62 = vshll.u32 %v10906_v45, 16  ;;  %v3014_v45 = vrot.slane %v3012_v25, 4 }
 0x102   : > { %v2235_v21 = vrot.slane %v2233_v62, 5  ;;  %v14784_v58 = vsel %vm14386_vm5, %v3014_v45, %v3015_v40  ;;  %v13563_v62 = vld [vmem:[%s17550_s1 + $0x130] sm:$0xff]   ;;  %v11001_v45 = vld [vmem:[%s14021_s15 + $0x84] sm:$0xe] }
 0x104   : > { %v2236_v8 = vor.u32 %v2235_v21, %v2232_v57  ;;  %v3026_v57 = vrot.slane %v14795_v49, 5 }
 0x106   : > { %v14738_v63 = vrot.slane %v2236_v8, 4 }
 0x107   : > { %12200 = vmatmul.mubr.bf16.gmra.mrb[24].mxu0 %v10820_v6  ;;  %v2208_v6 = vrot.slane %v2206_v41, 4  ;;  %v14771_v41 = vld [vmem:[%s14021_s15 + $0x2c] sm:$0x1] }
 0x108   : > { %12203 = vmatprep.mubr.bf16.mxu0 %v10821_v39  ;;  %v14715_v39 = vrot.slane %v2215_v17, 5  ;;  %v14780_v17 = vsel %vm14386_vm5, %v11012_v14, %v3012_v25  ;;  %v2273_v46 = vshll.u32 %v14771_v41, 16  ;;  %v14861_v25 = vld [vmem:[%s14021_s15 + $0x8c] sm:$0x1]  ;;  %v13564_v14 = vld [vmem:[%s14021_s15 + $0xb4] sm:$0xff]  }
 0x109   : > { %v2212_v43 = vor.u32 %v2211_v15, %v2208_v6  ;;  %v14798_v6 = vld [vmem:[%s14021_s15 + $0x68] sm:$0x1] }
 0x10a   : > { %v2222_v32 = vor.u32 %v2221_v59, %v14715_v39  ;;  %v14802_v59 = vrot.slane %v2287_v4, 5  ;;  %v3029_v21 = vrot.slane %v14798_v6, 5  ;;  %v14842_v56 = vrot.slane %v2273_v46, 5  ;;  %v14872_v4 = vld [vmem:[%s14021_s15 + $0x94] sm:$0xf] }
 0x10b   : > { %v14732_v1 = vrot.slane %v2212_v43, 4  ;;  %v14820_v43 = vsel %vm14386_vm5, %v11014_v44, %v3026_v57  ;;  %v11017_v46 = vrot.slane %v11001_v45, 9  ;;  %v11018_v44 = vrot.slane %v11002_v16, 9 }
 0x10c   : > { %v14734_v30 = vrot.slane %v2222_v32, 4 }
 0x10d   : > { %v2218_v20 = vsel %vm14056_vm2, %v14732_v1, %v14715_v39 }
 0x10f   : > { %12204 = vmatmul.mubr.bf16.gmra.mrb[28].mxu0 %v10822_v54  ;;  %v2254_v54 = vshrl.u32 %v10909_v38, 16  ;;  %v13553_v38 = vld [vmem:[%s14021_s15 + $0x60] sm:$0xff]  }
 0x110   : > { %12223 = vmatprep.mubr.bf16.mxu0 %v13543_v60 }
 0x111   : > { %v2256_v29 = vrot.slane %v2254_v54, 4  ;;  %v14816_v54 = vld [vmem:[%s14021_s15 + $0x38] sm:$0x1] }
 0x113   : > { %v2260_v26 = vor.u32 %v2259_v51, %v2256_v29  ;;  %v2302_v51 = vshrl.u32 %v14834_v34, 16 }
 0x115   : > { %v14810_v35 = vrot.slane %v2260_v26, 4  ;;  %v3050_v26 = vrot.slane %v14861_v25, 5  ;;  %v2304_v1 = vrot.slane %v2302_v51, 4  ;;  %v2242_v51 = vsel %vm14056_vm2, %v14738_v63, %v14720_v2 }
 0x117   : > { %12224 = vmatmul.mubr.bf16.vlgmr.msra.gmra.mrb[0].mxu0 %v13544_v52  ;;  %v2291_v52 = vshrl.u32 %v14751_v10, 16  ;;  %v2266_v2 = vsel %vm14056_vm2, %v14810_v35, %v14762_v5 }
 0x118   : > { %12256 = vmatpush3.bf16.msra.mxu0 %v13545_v9  ;;  %12227 = vmatprep.mubr.bf16.mxu0 %v13546_v50  ;;  %v2281_v9 = vshll.u32 %v10912_v61, 16  ;;  %v13555_v50 = vld [vmem:[%s14021_s15 + $0x6c] sm:$0xff]   ;;  %v13556_v61 = vld [vmem:[%s14021_s15 + $0x78] sm:$0xff]  }
 0x119   : > { %12257 = vmatprep.subr.bf16.mxu0 %v13548_v13 }
 0x11a   : > { %v14800_v15 = vrot.slane %v2281_v9, 5 }
 0x11c   : > { %12258 = vmatpush3.bf16.msra.mxu0 %v13548_v13  ;;  %v3028_v13 = vrot.slane %v3026_v57, 4  ;;  %v3054_v57 = vrot.slane %v14872_v4, 5 }
 0x11d   : > { %12259 = vmatprep.subr.bf16.mxu0 %v13551_v37 }
 0x11e   : > { %v14824_v32 = vsel %vm14386_vm5, %v3028_v13, %v3029_v21 }
 0x11f   : > { %12228 = vmatmul.mubr.bf16.gmra.mrb[4].mxu0 %v13547_v22  ;;  %17720 = vst [vmem:[#allocation12_spill] sm:$0xff] %v14824_v32  ;;  %v14840_v22 = vld [vmem:[%s14021_s15 + $0x80] sm:$0x1] }
 0x120   : > { %12231 = vmatprep.mubr.bf16.mxu0 %v13549_v7  ;;  %12260 = vmatpush3.bf16.msra.mxu0 %v13551_v37  ;;  %v14837_v37 = vld [vmem:[%s14021_s15 + $0x7c] sm:$0xf]  ;;  %v11000_v7 = vld [vmem:[%s14021_s15 + $0x78] sm:$0xe]  ;;  %v3043_v3 = vrot.slane %v14840_v22, 5 }
 0x121   : > { %12261 = vmatprep.subr.bf16.mxu0 %v13554_v53  ;;  %v3040_v29 = vrot.slane %v14837_v37, 5  ;;  %v11016_v10 = vrot.slane %v11000_v7, 9 }
 0x123   : > { %v3042_v11 = vrot.slane %v3040_v29, 4  ;;  %v14855_v9 = vsel %vm14386_vm5, %v11016_v10, %v3040_v29  ;;  %v14899_v29 = vsel %vm14386_vm5, %v11018_v44, %v3054_v57  ;;  %v11004_v44 = vld [vmem:[%s14021_s15 + $0xa8] sm:$0xe] }
 0x124   : > { %12262 = vmatpush3.bf16.msra.mxu0 %v13554_v53  ;;  %v14849_v53 = vrot.slane %v2291_v52, 4  ;;  %17721 = vst [vmem:[#allocation15_spill] sm:$0xff] %v14855_v9  ;;  %17725 = vst [vmem:[#allocation17_spill] sm:$0xff] %v14899_v29  ;;  %v13562_v10 = vld [vmem:[%s14021_s15 + $0xa8] sm:$0xff]  }
 0x125   : > { %12263 = vmatprep.subr.bf16.mxu0 %v13557_v31  ;;  %v14865_v40 = vsel %vm14386_vm5, %v3042_v11, %v3043_v3  ;;  %v14902_v3 = vld [vmem:[%s14021_s15 + $0xa0] sm:$0xf]  ;;  %v14914_v11 = vld [vmem:[%s14021_s15 + $0xac] sm:$0xf]  ;;  %v10918_v29 = vld [vmem:[%s14021_s15 + $0x48] sm:$0xf] }
 0x126   : > { %17722 = vst [vmem:[#allocation13_spill] sm:$0xff] %v14865_v40  ;;  %v3061_v16 = vrot.slane %v14902_v3, 5  ;;  %v2294_v63 = vor.u32 %v14849_v53, %v14802_v59  ;;  %v2335_v40 = vshll.u32 %v14757_v23, 16 }
 0x127   : > { %12232 = vmatmul.mubr.bf16.gmra.mrb[8].mxu0 %v13550_v55  ;;  %v14869_v55 = vld [vmem:[%s14021_s15 + $0x40] sm:$0xf] }
 0x128   : > { %12235 = vmatprep.mubr.bf16.mxu0 %v13552_v12  ;;  %12264 = vmatpush3.bf16.msra.mxu0 %v13557_v31  ;;  %v13558_v31 = vld [vmem:[%s14021_s15 + $0x84] sm:$0xff]   ;;  %v14877_v12 = vld [vmem:[%s14021_s15 + $0x98] sm:$0x1]  ;;  %v2311_v13 = vshll.u32 %v14869_v55, 16 }
 0x129   : > { %12265 = vmatprep.subr.bf16.mxu0 %v13560_v18  ;;  %v3057_v21 = vrot.slane %v14877_v12, 5 }
 0x12c   : > { %12266 = vmatpush3.bf16.msra.mxu0 %v13560_v18  ;;  %v3047_v18 = vrot.slane %v14858_v33, 5 }
 0x12d   : > { %12267 = vmatprep.subr.bf16.mxu0 %v13563_v62 }
 0x12e   : > { %v3049_v52 = vrot.slane %v3047_v18, 4 }
 0x12f   : > { %12236 = vmatmul.mubr.bf16.gmra.mrb[12].mxu0 %v13553_v38  ;;  %v13559_v38 = vld [vmem:[%s14021_s15 + $0x90] sm:$0xff]  }
 0x130   : > { %12239 = vmatprep.mubr.bf16.mxu0 %v13555_v50  ;;  %12268 = vmatpush3.bf16.msra.mxu0 %v13563_v62  ;;  %v2305_v62 = vshll.u32 %v14834_v34, 16  ;;  %v13561_v50 = vld [vmem:[%s14021_s15 + $0x9c] sm:$0xff]   ;;  %v3056_v34 = vrot.slane %v3054_v57, 4  ;;  %v14895_v7 = vsel %vm14386_vm5, %v3049_v52, %v3050_v26  ;;  %v14921_v26 = vld [vmem:[%s14021_s15 + $0xb0] sm:$0x1] }
 0x131   : > { %12269 = vmatprep.subr.bf16.mxu0 %v13566_v28  ;;  %17724 = vst [vmem:[#allocation16_spill] sm:$0xff] %v14895_v7  ;;  %v3071_v45 = vrot.slane %v14921_v26, 5  ;;  %v15010_v7 = vld [vmem:[%s14021_s15 + $0x58] sm:$0xf] }
 0x134   : > { %12270 = vmatpush3.bf16.msra.mxu0 %v13566_v28  ;;  %v14891_v28 = vsel %vm14386_vm5, %v11017_v46, %v3047_v18  ;;  %v2270_v18 = vor.u32 %v14773_v42, %v14762_v5  ;;  %v11003_v46 = vld [vmem:[%s14021_s15 + $0x9c] sm:$0xe]  ;;  %v3063_v42 = vrot.slane %v3061_v16, 4 }
 0x135   : > { %12303 = vmatprep.subr.bf16.mxu0 %v14831_v19  ;;  %17723 = vst [vmem:[#allocation14_spill] sm:$0xff] %v14891_v28  ;;  %v11019_v52 = vrot.slane %v11003_v46, 9  ;;  %v13565_v28 = vld [vmem:[%s14021_s15 + $0xc0] sm:$0xff]  }
 0x136   : > { %v14932_v8 = vrot.slane %v2270_v18, 4 }
 0x137   : > { %12240 = vmatmul.mubr.bf16.gmra.mrb[16].mxu0 %v13556_v61  ;;  %v14905_v61 = vld [vmem:[%s14021_s15 + $0xa4] sm:$0x1]  ;;  %v14936_v60 = vsel %vm14386_vm5, %v11019_v52, %v3061_v16  ;;  %v17731_v52 = vshll.u32 %v14816_v54, 16 }
 0x138   : > { %12243 = vmatprep.mubr.bf16.mxu0 %v13558_v31  ;;  %v14911_v31 = vsel %vm14386_vm5, %v3056_v34, %v3057_v21  ;;  %v3064_v57 = vrot.slane %v14905_v61, 5  ;;  %v2315_v21 = vshrl.u32 %v14869_v55, 16  ;;  %v3068_v34 = vrot.slane %v14914_v11, 5  ;;  %17727 = vst [vmem:[#allocation11_spill] sm:$0xff] %v14936_v60 }
 0x139   : > { %17726 = vst [vmem:[#allocation10_spill] sm:$0xff] %v14911_v31  ;;  %v2228_v31 = vsel %vm14056_vm2, %v14734_v30, %v14736_v36  ;;  %v14957_v39 = vrot.slane %v17731_v52, 5  ;;  %v10921_v30 = vld [vmem:[%s14021_s15 + $0x54] sm:$0xf]  ;;  %v2329_v60 = vshll.u32 %v10918_v29, 16 }
 0x13a   : > { %v14949_v18 = vsel %vm14386_vm5, %v3063_v42, %v3064_v57  ;;  %v14966_v57 = vld [vmem:[%s14021_s15 + $0x44] sm:$0x1]  ;;  %v2317_v42 = vrot.slane %v2315_v21, 4  ;;  %v10967_v52 = vcombine.low %v2218_v20, %v2228_v31  ;;  %v14986_v21 = vld [vmem:[%s14021_s15 + $0xbc] sm:$0x1]  ;;  %v2326_v20 = vshrl.u32 %v10918_v29, 16 }
 0x13b   : > { %17729 = vst [vmem:[#allocation9_spill] sm:$0xff] %v14949_v18  ;;  %v11006_v31 = vld [vmem:[%s14021_s15 + $0xc0] sm:$0xe]  ;;  %v2321_v53 = vshll.u32 %v14966_v57, 16 }
 0x13f   : > { %12244 = vmatmul.mubr.bf16.gmra.mrb[20].mxu0 %v13559_v38  ;;  %v11020_v38 = vrot.slane %v11004_v44, 9  ;;  %v2307_v44 = vrot.slane %v2305_v62, 5  ;;  %v2284_v62 = vor.u32 %v14800_v15, %v14792_v48  ;;  %v3078_v15 = vrot.slane %v14986_v21, 5 }
 0x140   : > { %12247 = vmatprep.mubr.bf16.mxu0 %v13561_v50  ;;  %v3070_v50 = vrot.slane %v3068_v34, 4 }
 0x141   : > { %v14953_v16 = vsel %vm14386_vm5, %v11020_v38, %v3068_v34  ;;  %v14968_v34 = vrot.slane %v2311_v13, 5  ;;  %v14983_v13 = vld [vmem:[%s14021_s15 + $0xb8] sm:$0xf]  ;;  %v2308_v35 = vor.u32 %v2307_v44, %v2304_v1  ;;  %v2339_v1 = vshrl.u32 %v14757_v23, 16 }
 0x142   : > { %17730 = vst [vmem:[#allocation18_spill] sm:$0xff] %v14953_v16  ;;  %v14963_v36 = vsel %vm14386_vm5, %v3070_v50, %v3071_v45  ;;  %v2252_v45 = vsel %vm14056_vm2, %v14741_v27, %v14743_v47  ;;  %v14989_v50 = vld [vmem:[%s14021_s15 + $0xc4] sm:$0xf]  ;;  %v14998_v27 = vld [vmem:[%s14021_s15 + $0xc8] sm:$0x1]  ;;  %v3075_v48 = vrot.slane %v14983_v13, 5  ;;  %v2276_v23 = vsel %vm14056_vm2, %v14932_v8, %v14842_v56 }
 0x143   : > { %17732 = vst [vmem:[#allocation19_spill] sm:$0xff] %v14963_v36  ;;  %v11005_v47 = vld [vmem:[%s14021_s15 + $0xb4] sm:$0xe]  ;;  %v3082_v38 = vrot.slane %v14989_v50, 5  ;;  %v3085_v5 = vrot.slane %v14998_v27, 5  ;;  %v11022_v16 = vrot.slane %v11006_v31, 9  ;;  %v2318_v18 = vor.u32 %v2317_v42, %v14968_v34 }
 0x144   : > { %v3077_v36 = vrot.slane %v3075_v48, 4  ;;  %v2350_v42 = vshrl.u32 %v10921_v30, 16  ;;  %v2353_v31 = vshll.u32 %v10921_v30, 16  ;;  %v15042_v30 = vrot.slane %v2294_v63, 4 }
 0x145   : > { %v15025_v29 = vsel %vm14386_vm5, %v11022_v16, %v3082_v38  ;;  %v2331_v8 = vrot.slane %v2329_v60, 5  ;;  %v15048_v56 = vrot.slane %v2335_v40, 5  ;;  %v2345_v16 = vshll.u32 %v14760_v24, 16 }
 0x146   : > { %v15021_v44 = vsel %vm14386_vm5, %v3077_v36, %v3078_v15  ;;  %17735 = vst [vmem:[#allocation22_spill] sm:$0xff] %v15025_v29  ;;  %v15037_v36 = vrot.slane %v2284_v62, 4  ;;  %v2359_v15 = vshll.u32 %v15010_v7, 16  ;;  %v2341_v62 = vrot.slane %v2339_v1, 4 }
 0x147   : > { %12248 = vmatmul.mubr.bf16.gmra.mrb[24].mxu0 %v13562_v10  ;;  %v11021_v10 = vrot.slane %v11005_v47, 9  ;;  %v3084_v47 = vrot.slane %v3082_v38, 4  ;;  %17734 = vst [vmem:[#allocation21_spill] sm:$0xff] %v15021_v44  ;;  %v15044_v38 = vrot.slane %v2321_v53, 5  ;;  %v2309_v44 = vrot.slane %v2308_v35, 4 }
 0x148   : > { %12251 = vmatprep.mubr.bf16.mxu0 %v13564_v14  ;;  %v2352_v63 = vrot.slane %v2350_v42, 4  ;;  %v10968_v53 = vcombine.low %v2242_v51, %v2252_v45  ;;  %v10969_v29 = vcombine.low %v2266_v2, %v2276_v23  ;;  %v15054_v9 = vrot.slane %v2359_v15, 5  ;;  %v15070_v42 = vld [vmem:[%s14021_s15 + $0x70] sm:$0xf] }
 0x149   : > { %v15014_v14 = vsel %vm14386_vm5, %v11021_v10, %v3075_v48  ;;  %v15031_v10 = vsel %vm14386_vm5, %v3084_v47, %v3085_v5  ;;  %v2328_v48 = vrot.slane %v2326_v20, 4  ;;  %v2363_v5 = vshrl.u32 %v15010_v7, 16  ;;  %v10924_v47 = vld [vmem:[%s14021_s15 + $0x60] sm:$0xf]  ;;  %v15052_v20 = vld [vmem:[%s14021_s15 + $0x5c] sm:$0x1] }
 0x14a   : > { %17733 = vst [vmem:[#allocation20_spill] sm:$0xff] %v15014_v14  ;;  %17736 = vst [vmem:[#allocation23_spill] sm:$0xff] %v15031_v10  ;;  %v2319_v14 = vrot.slane %v2318_v18, 4  ;;  %v2355_v10 = vrot.slane %v2353_v31, 5  ;;  %v2374_v32 = vshrl.u32 %v10924_v47, 16  ;;  %v2377_v60 = vshll.u32 %v10924_v47, 16 }
 0x14b   : > { %v2365_v35 = vrot.slane %v2363_v5, 4  ;;  %v2383_v40 = vshll.u32 %v14795_v49, 16  ;;  %v2290_v24 = vsel %vm14056_vm2, %v15037_v36, %v14802_v59  ;;  %v2300_v18 = vsel %vm14056_vm2, %v15042_v30, %v14957_v39  ;;  %v13568_v59 = vld [vmem:[%s17550_s1 + $0x148] sm:$0xff]   ;;  %v10930_v47 = vld [vmem:[%s14021_s15 + $0x78] sm:$0xf] }
 0x14c   : > { %v2332_v51 = vor.u32 %v2331_v8, %v2328_v48  ;;  %v2342_v45 = vor.u32 %v2341_v62, %v15048_v56  ;;  %v2356_v2 = vor.u32 %v2355_v10, %v2352_v63  ;;  %v2369_v1 = vshll.u32 %v15052_v20, 16 }
 0x14d   : > { %v2314_v23 = vsel %vm14056_vm2, %v2309_v44, %v14968_v34  ;;  %v2324_v39 = vsel %vm14056_vm2, %v2319_v14, %v15044_v38  ;;  %v15081_v48 = vrot.slane %v2345_v16, 5  ;;  %v2376_v10 = vrot.slane %v2374_v32, 4  ;;  %v13569_v38 = vld [vmem:[%s17550_s1 + $0x150] sm:$0xff]  }
 0x14e   : > { %v2366_v36 = vor.u32 %v2365_v35, %v15054_v9  ;;  %v2379_v15 = vrot.slane %v2377_v60, 5  ;;  %v15084_v30 = vrot.slane %v2383_v40, 5  ;;  %v2333_v8 = vrot.slane %v2332_v51, 4 }
 0x14f   : > { %12252 = vmatmul.mubr.bf16.gmra.mrb[28].mxu0 %v13565_v28  ;;  %v10927_v28 = vld [vmem:[%s14021_s15 + $0x6c] sm:$0xf]  ;;  %v2343_v62 = vrot.slane %v2342_v45, 4  ;;  %v2407_v63 = vshll.u32 %v15070_v42, 16  ;;  %v2411_v34 = vshrl.u32 %v15070_v42, 16  ;;  %v2357_v14 = vrot.slane %v2356_v2, 4 }
 0x150   : > { %12271 = vmatprep.mubr.bf16.mxu0 %v10967_v52  ;;  %v2387_v52 = vshrl.u32 %v14795_v49, 16  ;;  %v2398_v49 = vshrl.u32 %v10927_v28, 16  ;;  %v2401_v31 = vshll.u32 %v10927_v28, 16  ;;  %v2371_v44 = vrot.slane %v2369_v1, 5 }
 0x151   : > { %v2422_v28 = vshrl.u32 %v10930_v47, 16  ;;  %v2431_v35 = vshll.u32 %v14837_v37, 16  ;;  %v2435_v60 = vshrl.u32 %v14837_v37, 16  ;;  %v2367_v40 = vrot.slane %v2366_v36, 4 }
 0x152   : > { %v2389_v5 = vrot.slane %v2387_v52, 4  ;;  %v2400_v32 = vrot.slane %v2398_v49, 4  ;;  %v2403_v16 = vrot.slane %v2401_v31, 5  ;;  %v2393_v52 = vshll.u32 %v14798_v6, 16 }
 0x153   : > { %v10970_v51 = vcombine.low %v2290_v24, %v2300_v18  ;;  %v10971_v45 = vcombine.low %v2314_v23, %v2324_v39  ;;  %v15097_v2 = vrot.slane %v2407_v63, 5  ;;  %v2413_v1 = vrot.slane %v2411_v34, 4  ;;  %v10933_v24 = vld [vmem:[%s14021_s15 + $0x84] sm:$0xf]  ;;  %v13570_v18 = vld [vmem:[%s17550_s1 + $0x158] sm:$0xff]  }
 0x154   : > { %v2338_v49 = vsel %vm14056_vm2, %v2333_v8, %v15048_v56  ;;  %v2348_v37 = vsel %vm14056_vm2, %v2343_v62, %v15081_v48  ;;  %v2362_v31 = vsel %vm14056_vm2, %v2357_v14, %v15054_v9  ;;  %v2404_v6 = vor.u32 %v2403_v16, %v2400_v32 }
 0x155   : > { %v15115_v56 = vrot.slane %v2431_v35, 5  ;;  %v2437_v39 = vrot.slane %v2435_v60, 4  ;;  %v2372_v48 = vsel %vm14056_vm2, %v2367_v40, %v2371_v44  ;;  %v2395_v9 = vrot.slane %v2393_v52, 5 }
 0x156   : > { %v2446_v8 = vshrl.u32 %v10933_v24, 16  ;;  %v2449_v62 = vshll.u32 %v10933_v24, 16  ;;  %v2455_v63 = vshll.u32 %v14858_v33, 16  ;;  %v2459_v34 = vshrl.u32 %v14858_v33, 16  ;;  %v13572_v24 = vld [vmem:[%s17550_s1 + $0x168] sm:$0xff]  }
 0x157   : > { %12272 = vmatmul.mubr.bf16.vlgmr.msra.gmra.mrb[0].mxu0 %v10968_v53  ;;  %v2425_v53 = vshll.u32 %v10930_v47, 16  ;;  %v2405_v14 = vrot.slane %v2404_v6, 4  ;;  %v2438_v32 = vor.u32 %v2437_v39, %v15115_v56  ;;  %v2441_v16 = vshll.u32 %v14840_v22, 16 }
 0x158   : > { %12304 = vmatpush3.bf16.msra.mxu0 %v14831_v19  ;;  %12275 = vmatprep.mubr.bf16.mxu0 %v10969_v29  ;;  %v2380_v19 = vor.u32 %v2379_v15, %v2376_v10  ;;  %v2390_v29 = vor.u32 %v2389_v5, %v15084_v30  ;;  %v15109_v10 = vld [vmem:[%s14021_s15 + $0x74] sm:$0x1]  ;;  %v2414_v5 = vor.u32 %v2413_v1, %v15097_v2  ;;  %v2451_v52 = vrot.slane %v2449_v62, 5 }
 0x159   : > { %12305 = vmatprep.subr.bf16.mxu0 %v13568_v59  ;;  %v2427_v23 = vrot.slane %v2425_v53, 5  ;;  %v2417_v47 = vshll.u32 %v15109_v10, 16  ;;  %v10936_v53 = vld [vmem:[%s14021_s15 + $0x90] sm:$0xf]  ;;  %v10972_v35 = vcombine.low %v2338_v49, %v2348_v37  ;;  %v10973_v60 = vcombine.low %v2362_v31, %v2372_v48 }
 0x15a   : > { %v2381_v36 = vrot.slane %v2380_v19, 4  ;;  %v2391_v15 = vrot.slane %v2390_v29, 4  ;;  %v2415_v40 = vrot.slane %v2414_v5, 4  ;;  %v2448_v29 = vrot.slane %v2446_v8, 4 }
 0x15b   : > { %v2419_v19 = vrot.slane %v2417_v47, 5  ;;  %v15135_v22 = vrot.slane %v2455_v63, 5  ;;  %v2470_v1 = vshrl.u32 %v10936_v53, 16  ;;  %v2473_v6 = vshll.u32 %v10936_v53, 16 }
 0x15c   : > { %12306 = vmatpush3.bf16.msra.mxu0 %v13568_v59  ;;  %v2424_v59 = vrot.slane %v2422_v28, 4  ;;  %v13571_v28 = vld [vmem:[%s17550_s1 + $0x160] sm:$0xff]   ;;  %v2396_v33 = vsel %vm14056_vm2, %v2391_v15, %v2395_v9  ;;  %v2410_v49 = vsel %vm14056_vm2, %v2405_v14, %v15097_v2  ;;  %v2443_v31 = vrot.slane %v2441_v16, 5 }
 0x15d   : > { %12307 = vmatprep.subr.bf16.mxu0 %v13569_v38  ;;  %v2420_v48 = vsel %vm14056_vm2, %v2415_v40, %v2419_v19  ;;  %v2465_v2 = vshll.u32 %v14861_v25, 16  ;;  %v2507_v15 = vshrl.u32 %v14902_v3, 16  ;;  %v2452_v9 = vor.u32 %v2451_v52, %v2448_v29  ;;  %v13574_v19 = vld [vmem:[%s17550_s1 + $0x178] sm:$0xff]  }
 0x15e   : > { %v2428_v44 = vor.u32 %v2427_v23, %v2424_v59  ;;  %v2479_v59 = vshll.u32 %v14872_v4, 16  ;;  %v2472_v47 = vrot.slane %v2470_v1, 4  ;;  %v10945_v1 = vld [vmem:[%s14021_s15 + $0xb4] sm:$0xf] }
 0x15f   : > { %12276 = vmatmul.mubr.bf16.gmra.mrb[4].mxu0 %v10970_v51  ;;  %v10939_v51 = vld [vmem:[%s14021_s15 + $0x9c] sm:$0xf]  ;;  %v2467_v16 = vrot.slane %v2465_v2, 5  ;;  %v2509_v53 = vrot.slane %v2507_v15, 4 }
 0x160   : > { %12279 = vmatprep.mubr.bf16.mxu0 %v10971_v45  ;;  %12308 = vmatpush3.bf16.msra.mxu0 %v13569_v38  ;;  %v2386_v38 = vsel %vm14056_vm2, %v2381_v36, %v15084_v30  ;;  %v2461_v45 = vrot.slane %v2459_v34, 4  ;;  %v2429_v37 = vrot.slane %v2428_v44, 4  ;;  %v2439_v30 = vrot.slane %v2438_v32, 4 }
 0x161   : > { %12309 = vmatprep.subr.bf16.mxu0 %v13570_v18  ;;  %v2494_v23 = vshrl.u32 %v10939_v51, 16  ;;  %v2497_v39 = vshll.u32 %v10939_v51, 16  ;;  %v2503_v36 = vshll.u32 %v14902_v3, 16  ;;  %v10974_v8 = vcombine.low %v2386_v38, %v2396_v33  ;;  %v13573_v3 = vld [vmem:[%s17550_s1 + $0x170] sm:$0xff]  }
 0x162   : > { %v2462_v5 = vor.u32 %v2461_v45, %v15135_v22  ;;  %v2434_v62 = vsel %vm14056_vm2, %v2429_v37, %v15115_v56  ;;  %v2444_v25 = vsel %vm14056_vm2, %v2439_v30, %v2443_v31  ;;  %v15159_v63 = vrot.slane %v2479_v59, 5  ;;  %v10942_v56 = vld [vmem:[%s14021_s15 + $0xa8] sm:$0xf] }
 0x163   : > { %v2496_v14 = vrot.slane %v2494_v23, 4  ;;  %v2499_v44 = vrot.slane %v2497_v39, 5  ;;  %v10975_v32 = vcombine.low %v2410_v49, %v2420_v48  ;;  %v2489_v33 = vshll.u32 %v14877_v12, 16 }
 0x164   : > { %12310 = vmatpush3.bf16.msra.mxu0 %v13570_v18  ;;  %v2483_v18 = vshrl.u32 %v14872_v4, 16  ;;  %v2475_v4 = vrot.slane %v2473_v6, 5  ;;  %v10976_v40 = vcombine.low %v2434_v62, %v2444_v25  ;;  %v2513_v51 = vshll.u32 %v14905_v61, 16 }
 0x165   : > { %12311 = vmatprep.subr.bf16.mxu0 %v13571_v28  ;;  %v2500_v52 = vor.u32 %v2499_v44, %v2496_v14  ;;  %v2518_v45 = vshrl.u32 %v10942_v56, 16  ;;  %v2521_v49 = vshll.u32 %v10942_v56, 16  ;;  %v2527_v12 = vshll.u32 %v14914_v11, 16 }
 0x166   : > { %v2485_v34 = vrot.slane %v2483_v18, 4  ;;  %v2476_v38 = vor.u32 %v2475_v4, %v2472_v47  ;;  %v2531_v37 = vshrl.u32 %v14914_v11, 16  ;;  %v2491_v61 = vrot.slane %v2489_v33, 5  ;;  %v15184_v11 = vld [vmem:[%s17550_s1 + $0x180] sm:$0xff]  }
 0x167   : > { %12280 = vmatmul.mubr.bf16.gmra.mrb[8].mxu0 %v10972_v35  ;;  %v2453_v35 = vrot.slane %v2452_v9, 4  ;;  %v2542_v59 = vshrl.u32 %v10945_v1, 16  ;;  %v2545_v18 = vshll.u32 %v10945_v1, 16  ;;  %v2551_v23 = vshll.u32 %v14983_v13, 16 }
 0x168   : > { %12283 = vmatprep.mubr.bf16.mxu0 %v10973_v60  ;;  %12312 = vmatpush3.bf16.msra.mxu0 %v13571_v28  ;;  %v15161_v28 = vrot.slane %v2503_v36, 5  ;;  %v2463_v60 = vrot.slane %v2462_v5, 4  ;;  %v2486_v29 = vor.u32 %v2485_v34, %v15159_v63  ;;  %v2555_v39 = vshrl.u32 %v14983_v13, 16 }
 0x169   : > { %12313 = vmatprep.subr.bf16.mxu0 %v13572_v24  ;;  %v2458_v30 = vsel %vm14056_vm2, %v2453_v35, %v15135_v22  ;;  %v2501_v48 = vrot.slane %v2500_v52, 4  ;;  %v2515_v2 = vrot.slane %v2513_v51, 5  ;;  %v2520_v36 = vrot.slane %v2518_v45, 4 }
 0x16a   : > { %v2510_v6 = vor.u32 %v2509_v53, %v15161_v28  ;;  %v2468_v31 = vsel %vm14056_vm2, %v2463_v60, %v2467_v16  ;;  %v2487_v22 = vrot.slane %v2486_v29, 4  ;;  %v2523_v9 = vrot.slane %v2521_v49, 5 }
 0x16b   : > { %v2529_v5 = vrot.slane %v2527_v12, 5  ;;  %v2533_v47 = vrot.slane %v2531_v37, 4  ;;  %v10977_v4 = vcombine.low %v2458_v30, %v2468_v31  ;;  %v2547_v62 = vrot.slane %v2545_v18, 5 }
 0x16c   : > { %12314 = vmatpush3.bf16.msra.mxu0 %v13572_v24  ;;  %v2477_v24 = vrot.slane %v2476_v38, 4  ;;  %v2511_v15 = vrot.slane %v2510_v6, 4  ;;  %v2553_v13 = vrot.slane %v2551_v23, 5  ;;  %v2557_v25 = vrot.slane %v2555_v39, 4  ;;  %v13741_v23 = vld [vmem:[%s14021_s15 + $0x10] sm:$0xf] }
 0x16d   : > { %12315 = vmatprep.subr.bf16.mxu0 %v13573_v3  ;;  %v2492_v14 = vsel %vm14056_vm2, %v2487_v22, %v2491_v61  ;;  %v2537_v44 = vshll.u32 %v14921_v26, 16  ;;  %v2524_v53 = vor.u32 %v2523_v9, %v2520_v36  ;;  %v2534_v56 = vor.u32 %v2533_v47, %v2529_v5  ;;  %v10991_v22 = vld [vmem:[%s14021_s15 + $0xc] sm:$0xe]  ;;  %v13742_v47 = vld [vmem:[%s14021_s15 + $0x14] sm:$0x1] }
 0x16e   : > { %v2482_v34 = vsel %vm14056_vm2, %v2477_v24, %v15159_v63  ;;  %v2516_v16 = vsel %vm14056_vm2, %v2511_v15, %v2515_v2  ;;  %v2575_v63 = vshll.u32 %v14989_v50, 16  ;;  %v2579_v38 = vshrl.u32 %v14989_v50, 16 }
 0x16f   : > { %12284 = vmatmul.mubr.bf16.gmra.mrb[12].mxu0 %v10974_v8  ;;  %v2544_v8 = vrot.slane %v2542_v59, 4  ;;  %v2561_v26 = vshll.u32 %v14986_v21, 16  ;;  %v2525_v52 = vrot.slane %v2524_v53, 4  ;;  %v2539_v51 = vrot.slane %v2537_v44, 5  ;;  %v13744_v44 = vld [vmem:[%s14021_s15 + $0x28] sm:$0xf] }
 0x170   : > { %12287 = vmatprep.mubr.bf16.mxu0 %v10975_v32  ;;  %12316 = vmatpush3.bf16.msra.mxu0 %v13573_v3  ;;  %v10948_v3 = vld [vmem:[%s14021_s15 + $0xc0] sm:$0xf]  ;;  %v2506_v32 = vsel %vm14056_vm2, %v2501_v48, %v15161_v28  ;;  %v2535_v28 = vrot.slane %v2534_v56, 4  ;;  %v2577_v6 = vrot.slane %v2575_v63, 5  ;;  %v2581_v49 = vrot.slane %v2579_v38, 4 }
 0x171   : > { %12317 = vmatprep.subr.bf16.mxu0 %v13574_v19  ;;  %v2566_v35 = vshrl.u32 %v10948_v3, 16  ;;  %v2569_v60 = vshll.u32 %v10948_v3, 16  ;;  %v2548_v33 = vor.u32 %v2547_v62, %v2544_v8  ;;  %v10979_v29 = vcombine.low %v2506_v32, %v2516_v16  ;;  %v10993_v16 = vld [vmem:[%s14021_s15 + $0x24] sm:$0xe]  ;;  %v13745_v63 = vld [vmem:[%s14021_s15 + $0x20] sm:$0x1] }
 0x172   : > { %v2563_v30 = vrot.slane %v2561_v26, 5  ;;  %v2530_v50 = vsel %vm14056_vm2, %v2525_v52, %v2529_v5  ;;  %v2540_v21 = vsel %vm14056_vm2, %v2535_v28, %v2539_v51  ;;  %v2582_v24 = vor.u32 %v2581_v49, %v2577_v6  ;;  %v13746_v52 = vld [vmem:[%s14021_s15 + $0x34] sm:$0xf] }
 0x173   : > { %v2568_v45 = vrot.slane %v2566_v35, 4  ;;  %v2571_v1 = vrot.slane %v2569_v60, 5  ;;  %v2549_v12 = vrot.slane %v2548_v33, 4  ;;  %v2585_v61 = vshll.u32 %v14998_v27, 16 }
 0x174   : > { %12318 = vmatpush3.bf16.msra.mxu0 %v13574_v19  ;;  %v2558_v19 = vor.u32 %v2557_v25, %v2553_v13  ;;  %v2977_v39 = vrot.slane %v13741_v23, 5  ;;  %v10980_v48 = vcombine.low %v2530_v50, %v2540_v21  ;;  %v2583_v15 = vrot.slane %v2582_v24, 4  ;;  %v13576_v21 = vld [vmem:[%s17550_s1 + $0x188] sm:$0xff]   ;;  %v10997_v23 = vld [vmem:[%s14021_s15 + $0x54] sm:$0xe] }
 0x175   : > { %12351 = vmatprep.subr.bf16.mxu0 %v15184_v11  ;;  %v2572_v31 = vor.u32 %v2571_v1, %v2568_v45  ;;  %v2554_v59 = vsel %vm14056_vm2, %v2549_v12, %v2553_v13  ;;  %v2587_v9 = vrot.slane %v2585_v61, 5  ;;  %v11007_v5 = vrot.slane %v10991_v22, 9  ;;  %v13743_v13 = vld [vmem:[%s14021_s15 + $0x1c] sm:$0xf]  ;;  %v10994_v1 = vld [vmem:[%s14021_s15 + $0x30] sm:$0xe] }
 0x176   : > { %v2559_v37 = vrot.slane %v2558_v19, 4  ;;  %v2979_v27 = vrot.slane %v2977_v39, 4  ;;  %v2984_v25 = vrot.slane %v13743_v13, 5  ;;  %v2991_v32 = vrot.slane %v13744_v44, 5  ;;  %v13580_v13 = vld [vmem:[%s17550_s1 + $0x1a8] sm:$0xff]   ;;  %v13585_v44 = vld [vmem:[%s17550_s1 + $0x1c0] sm:$0xff]  }
 0x177   : > { %12288 = vmatmul.mubr.bf16.gmra.mrb[16].mxu0 %v10976_v40  ;;  %v10978_v40 = vcombine.low %v2482_v34, %v2492_v14  ;;  %v2573_v36 = vrot.slane %v2572_v31, 4  ;;  %v2588_v62 = vsel %vm14056_vm2, %v2583_v15, %v2587_v9  ;;  %v2978_v3 = vsel %vm14386_vm5, %v11007_v5, %v2977_v39  ;;  %v10992_v14 = vld [vmem:[%s14021_s15 + $0x18] sm:$0xe] }
 0x178   : > { %12291 = vmatprep.mubr.bf16.mxu0 %v10977_v4  ;;  %v2564_v18 = vsel %vm14056_vm2, %v2559_v37, %v2563_v30  ;;  %v2980_v4 = vrot.slane %v13742_v47, 5  ;;  %v11008_v35 = vrot.slane %v10992_v14, 9  ;;  %v2986_v60 = vrot.slane %v2984_v25, 4  ;;  %v13578_v15 = vld [vmem:[%s17550_s1 + $0x198] sm:$0xff]  }
 0x179   : > { %v10981_v2 = vcombine.low %v2554_v59, %v2564_v18  ;;  %v2578_v8 = vsel %vm14056_vm2, %v2573_v36, %v2577_v6  ;;  %v2987_v38 = vrot.slane %v13745_v63, 5  ;;  %v11009_v33 = vrot.slane %v10993_v16, 9  ;;  %v17741_v16 = vld [vmem:[#allocation13_spill] sm:$0xff]  ;;  %v17747_v63 = vld [vmem:[#allocation10_spill] sm:$0xff] }
 0x17a   : > { %v2981_v34 = vsel %vm14386_vm5, %v2979_v27, %v2980_v4  ;;  %v10982_v53 = vcombine.low %v2578_v8, %v2588_v62  ;;  %v2993_v19 = vrot.slane %v2991_v32, 4  ;;  %v2994_v26 = vrot.slane %v14771_v41, 5  ;;  %v10995_v41 = vld [vmem:[%s14021_s15 + $0x3c] sm:$0xe]  ;;  %v10999_v27 = vld [vmem:[%s14021_s15 + $0x6c] sm:$0xe] }
 0x17b   : > { %v11039_v56 = vcombine.low %v2978_v3, %v2981_v34  ;;  %v2998_v28 = vrot.slane %v13746_v52, 5  ;;  %v2992_v51 = vsel %vm14386_vm5, %v11009_v33, %v2991_v32  ;;  %v3005_v6 = vrot.slane %v14869_v55, 5  ;;  %v17740_v32 = vld [vmem:[#allocation15_spill] sm:$0xff] }
 0x17c   : > { %v2995_v45 = vsel %vm14386_vm5, %v2993_v19, %v2994_v26  ;;  %v11010_v37 = vrot.slane %v10994_v1, 9  ;;  %v3001_v50 = vrot.slane %v14816_v54, 5  ;;  %v11011_v31 = vrot.slane %v10995_v41, 9  ;;  %v17749_v33 = vld [vmem:[#allocation11_spill] sm:$0xff]  ;;  %v17750_v19 = vld [vmem:[#allocation9_spill] sm:$0xff] }
 0x17d   : > { %v11041_v12 = vcombine.low %v2992_v51, %v2995_v45  ;;  %v3000_v30 = vrot.slane %v2998_v28, 4  ;;  %v3007_v24 = vrot.slane %v3005_v6, 4  ;;  %v3008_v61 = vrot.slane %v14966_v57, 5  ;;  %v13577_v57 = vld [vmem:[%s17550_s1 + $0x190] sm:$0xff]   ;;  %v17756_v51 = vld [vmem:[#allocation21_spill] sm:$0xff]  ;;  %v17759_v41 = vld [vmem:[#allocation23_spill] sm:$0xff] }
 0x17e   : > { %v2999_v55 = vsel %vm14386_vm5, %v11010_v37, %v2998_v28  ;;  %v3006_v54 = vsel %vm14386_vm5, %v11011_v31, %v3005_v6  ;;  %v3022_v36 = vrot.slane %v15052_v20, 5  ;;  %v3033_v5 = vrot.slane %v15070_v42, 5  ;;  %v13579_v20 = vld [vmem:[%s17550_s1 + $0x1a0] sm:$0xff]   ;;  %v17755_v28 = vld [vmem:[#allocation20_spill] sm:$0xff]  ;;  %v13583_v1 = vld [vmem:[%s14021_s15 + $0x18] sm:$0xff]  }
 0x17f   : > { %12292 = vmatmul.mubr.bf16.gmra.mrb[20].mxu0 %v10978_v40  ;;  %v2985_v40 = vsel %vm14386_vm5, %v11008_v35, %v2984_v25  ;;  %v3002_v59 = vsel %vm14386_vm5, %v3000_v30, %v3001_v50  ;;  %v3009_v18 = vsel %vm14386_vm5, %v3007_v24, %v3008_v61  ;;  %v11015_v4 = vrot.slane %v10999_v27, 9  ;;  %v17744_v35 = vld [vmem:[#allocation16_spill] sm:$0xff]  ;;  %v17758_v6 = vld [vmem:[#allocation22_spill] sm:$0xff]  ;;  %v13588_v30 = vld [vmem:[%s17550_s1 + $0x1c8] sm:$0xff]  }
 0x180   : > { %12295 = vmatprep.mubr.bf16.mxu0 %v10979_v29  ;;  %v2988_v29 = vsel %vm14386_vm5, %v2986_v60, %v2987_v38  ;;  %v11042_v39 = vcombine.low %v2999_v55, %v3002_v59  ;;  %v11043_v22 = vcombine.low %v3006_v54, %v3009_v18  ;;  %v3035_v8 = vrot.slane %v3033_v5, 4  ;;  %v13586_v37 = vld [vmem:[%s14021_s15 + $0x30] sm:$0xff]   ;;  %v13589_v31 = vld [vmem:[%s14021_s15 + $0x48] sm:$0xff]   ;;  %v13594_v24 = vld [vmem:[%s17550_s1 + $0x1d8] sm:$0xff]  }
 0x181   : > { %v11040_v49 = vcombine.low %v2985_v40, %v2988_v29  ;;  %v3036_v62 = vrot.slane %v15109_v10, 5  ;;  %v17737_v25 = vcombine.low %v14780_v17, %v14784_v58  ;;  %v3034_v42 = vsel %vm14386_vm5, %v11015_v4, %v3033_v5  ;;  %v13581_v10 = vld [vmem:[%s17550_s1 + $0x1b0] sm:$0xff]   ;;  %v13582_v17 = vld [vmem:[%s17550_s1 + $0x1b8] sm:$0xff]   ;;  %v17752_v40 = vld [vmem:[#allocation18_spill] sm:$0xff] }
 0x182   : > { %v17738_v58 = vld [vmem:[#allocation12_spill] sm:$0xff]  ;;  %v17751_v26 = vcombine.low %v17749_v33, %v17750_v19  ;;  %v17753_v29 = vld [vmem:[#allocation19_spill] sm:$0xff]  ;;  %v17757_v45 = vcombine.low %v17755_v28, %v17756_v51  ;;  %v15331_v61 = vld [vmem:[%s14021_s15 + $0x58] sm:$0xf] }
 0x183   : > { %v3037_v3 = vsel %vm14386_vm5, %v3035_v8, %v3036_v62  ;;  %v17739_v14 = vcombine.low %v14820_v43, %v17738_v58  ;;  %v17746_v43 = vld [vmem:[#allocation17_spill] sm:$0xff]  ;;  %v17754_v52 = vcombine.low %v17752_v40, %v17753_v29  ;;  %v13591_v50 = vld [vmem:[%s17550_s1 + $0x1d0] sm:$0xff]   ;;  %v4651_v54 = vrot.slane %v15331_v61, 5 }
 0x184   : > { %v11047_v34 = vcombine.low %v3034_v42, %v3037_v3  ;;  %v17748_v38 = vcombine.low %v17746_v43, %v17747_v63  ;;  %v15334_v55 = vld [vmem:[%s14021_s15 + $0x5c] sm:$0x1]  ;;  %v11228_v59 = vld [vmem:[%s14021_s15 + $0x54] sm:$0xe]  ;;  %v15371_v42 = vld [vmem:[%s14021_s15 + $0x74] sm:$0x1] }
 0x185   : > { %v4654_v18 = vrot.slane %v15334_v55, 5  ;;  %v4668_v58 = vrot.slane %v15371_v42, 5  ;;  %v15385_v43 = vld [vmem:[%s14021_s15 + $0x20] sm:$0x1]  ;;  %v13595_v19 = vld [vmem:[%s14021_s15 + $0x78] sm:$0xff]  }
 0x186   : > { %v13606_v28 = vld [vmem:[%s17550_s1 + $0x1f8] sm:$0xff]   ;;  %v11141_v51 = vld [vmem:[%s14021_s15 + $0x30] sm:$0xf]  ;;  %v11236_v27 = vld [vmem:[%s14021_s15 + $0xb4] sm:$0xe] }
 0x187   : > { %12296 = vmatmul.mubr.bf16.gmra.mrb[24].mxu0 %v10980_v48  ;;  %v11013_v48 = vrot.slane %v10997_v23, 9  ;;  %v11135_v23 = vld [vmem:[%s14021_s15 + $0x18] sm:$0xf] }
 0x188   : > { %12299 = vmatprep.mubr.bf16.mxu0 %v10981_v2  ;;  %v3845_v5 = vshrl.u32 %v11135_v23, 16 }
 0x18f   : > { %12300 = vmatmul.mubr.bf16.gmra.mrb[28].mxu0 %v10982_v53  ;;  %v17742_v53 = vcombine.low %v17740_v32, %v17741_v16 }
 0x190   : > { %12319 = vmatprep.mubr.bf16.mxu0 %v11039_v56  ;;  %v17743_v56 = vld [vmem:[#allocation14_spill] sm:$0xff] }
 0x191   : > { %v17745_v60 = vcombine.low %v17743_v56, %v17744_v35 }
 0x197   : > { %12320 = vmatmul.mubr.bf16.vlgmr.msra.gmra.mrb[0].mxu0 %v11040_v49  ;;  %v17760_v49 = vcombine.low %v17758_v6, %v17759_v41  ;;  %v3864_v41 = vshll.u32 %v15385_v43, 16 }
 0x198   : > { %12352 = vmatpush3.bf16.msra.mxu0 %v15184_v11  ;;  %12323 = vmatprep.mubr.bf16.mxu0 %v11041_v12  ;;  %v3019_v11 = vrot.slane %v15010_v7, 5  ;;  %v13584_v12 = vld [vmem:[%s14021_s15 + $0x24] sm:$0xff]  }
 0x199   : > { %12353 = vmatprep.subr.bf16.mxu0 %v13576_v21 }
 0x19a   : > { %v3021_v2 = vrot.slane %v3019_v11, 4  ;;  %v3020_v7 = vsel %vm14386_vm5, %v11013_v48, %v3019_v11  ;;  %v11244_v11 = vrot.slane %v11228_v59, 9  ;;  %v15345_v48 = vld [vmem:[%s14021_s15 + $0x1c] sm:$0xf] }
 0x19b   : > { %v3854_v4 = vshll.u32 %v15345_v48, 16  ;;  %v3858_v8 = vshrl.u32 %v15345_v48, 16 }
 0x19c   : > { %12354 = vmatpush3.bf16.msra.mxu0 %v13576_v21  ;;  %v3023_v9 = vsel %vm14386_vm5, %v3021_v2, %v3022_v36  ;;  %v13587_v21 = vld [vmem:[%s14021_s15 + $0x3c] sm:$0xff]   ;;  %v15349_v2 = vsel %vm14386_vm5, %v11244_v11, %v4651_v54 }
 0x19d   : > { %12355 = vmatprep.subr.bf16.mxu0 %v13577_v57  ;;  %v11045_v47 = vcombine.low %v3020_v7, %v3023_v9  ;;  %17761 = vst [vmem:[#allocation12_spill] sm:$0xff] %v15349_v2  ;;  %v13592_v36 = vld [vmem:[%s14021_s15 + $0x60] sm:$0xff]   ;;  %v13600_v9 = vld [vmem:[%s17550_s1 + $0x1e8] sm:$0xff]   ;;  %v3860_v56 = vrot.slane %v3858_v8, 4  ;;  %v13598_v8 = vld [vmem:[%s14021_s15 + $0x90] sm:$0xff]  }
 0x19e   : > { %v13605_v2 = vld [vmem:[%s14021_s15 + $0xcc] sm:$0xff]  }
 0x19f   : > { %12324 = vmatmul.mubr.bf16.gmra.mrb[4].mxu0 %v11042_v39  ;;  %v4653_v39 = vrot.slane %v4651_v54, 4  ;;  %v15423_v54 = vld [vmem:[%s17550_s1 + $0x200] sm:$0xff]  }
 0x1a0   : > { %12327 = vmatprep.mubr.bf16.mxu0 %v11043_v22  ;;  %12356 = vmatpush3.bf16.msra.mxu0 %v13577_v57  ;;  %v13597_v57 = vld [vmem:[%s17550_s1 + $0x1e0] sm:$0xff]   ;;  %v13590_v22 = vld [vmem:[%s14021_s15 + $0x54] sm:$0xff]  }
 0x1a1   : > { %12357 = vmatprep.subr.bf16.mxu0 %v13578_v15  ;;  %v15355_v7 = vsel %vm14386_vm5, %v4653_v39, %v4654_v18  ;;  %v15426_v18 = vld [vmem:[%s14021_s15 + $0x34] sm:$0xf]  ;;  %v15432_v39 = vrot.slane %v3864_v41, 5 }
 0x1a2   : > { %17762 = vst [vmem:[#allocation15_spill] sm:$0xff] %v15355_v7  ;;  %v15626_v7 = vld [vmem:[%s14021_s15 + $0x64] sm:$0xf] }
 0x1a3   : > { %17777 = vst [vmem:[#allocation25_spill] sm:$0xff] %v15626_v7 }
 0x1a4   : > { %12358 = vmatpush3.bf16.msra.mxu0 %v13578_v15  ;;  %v11138_v15 = vld [vmem:[%s14021_s15 + $0x24] sm:$0xf] }
 0x1a5   : > { %12359 = vmatprep.subr.bf16.mxu0 %v13579_v20  ;;  %v3869_v62 = vshrl.u32 %v11138_v15, 16 }
 0x1a7   : > { %12328 = vmatmul.mubr.bf16.gmra.mrb[8].mxu0 %v17737_v25  ;;  %v15368_v25 = vld [vmem:[%s14021_s15 + $0x70] sm:$0xf]  ;;  %v3871_v63 = vrot.slane %v3869_v62, 4 }
 0x1a8   : > { %12331 = vmatprep.mubr.bf16.mxu0 %v11045_v47  ;;  %12360 = vmatpush3.bf16.msra.mxu0 %v13579_v20  ;;  %v15361_v20 = vld [vmem:[%s14021_s15 + $0x28] sm:$0xf]  ;;  %v3848_v47 = vshll.u32 %v11135_v23, 16 }
 0x1a9   : > { %12361 = vmatprep.subr.bf16.mxu0 %v13580_v13  ;;  %v3878_v3 = vshll.u32 %v15361_v20, 16 }
 0x1aa   : > { %v3850_v16 = vrot.slane %v3848_v47, 5  ;;  %v3896_v47 = vshll.u32 %v11141_v51, 16 }
 0x1ab   : > { %v15395_v40 = vrot.slane %v3878_v3, 5  ;;  %v3902_v3 = vshll.u32 %v15426_v18, 16 }
 0x1ac   : > { %12362 = vmatpush3.bf16.msra.mxu0 %v13580_v13  ;;  %v3872_v13 = vshll.u32 %v11138_v15, 16  ;;  %v13596_v15 = vld [vmem:[%s14021_s15 + $0x84] sm:$0xff]   ;;  %v3898_v41 = vrot.slane %v3896_v47, 5 }
 0x1ad   : > { %12363 = vmatprep.subr.bf16.mxu0 %v13581_v10 }
 0x1af   : > { %12332 = vmatmul.mubr.bf16.gmra.mrb[12].mxu0 %v17739_v14  ;;  %v13603_v14 = vld [vmem:[%s17550_s1 + $0x1f0] sm:$0xff]  }
 0x1b0   : > { %12335 = vmatprep.mubr.bf16.mxu0 %v11047_v34  ;;  %12364 = vmatpush3.bf16.msra.mxu0 %v13581_v10  ;;  %v3882_v10 = vshrl.u32 %v15361_v20, 16  ;;  %v11230_v34 = vld [vmem:[%s14021_s15 + $0x6c] sm:$0xe] }
 0x1b1   : > { %12365 = vmatprep.subr.bf16.mxu0 %v13582_v17  ;;  %v11246_v32 = vrot.slane %v11230_v34, 9  ;;  %v3906_v34 = vshrl.u32 %v15426_v18, 16 }
 0x1b2   : > { %v3884_v29 = vrot.slane %v3882_v10, 4 }
 0x1b4   : > { %12366 = vmatpush3.bf16.msra.mxu0 %v13582_v17  ;;  %v4665_v17 = vrot.slane %v15368_v25, 5 }
 0x1b5   : > { %12399 = vmatprep.subr.bf16.mxu0 %v13585_v44 }
 0x1b6   : > { %v4667_v35 = vrot.slane %v4665_v17, 4  ;;  %v15389_v33 = vsel %vm14386_vm5, %v11246_v32, %v4665_v17  ;;  %v15457_v17 = vld [vmem:[%s14021_s15 + $0x40] sm:$0xf]  ;;  %v15462_v32 = vld [vmem:[%s14021_s15 + $0x38] sm:$0x1] }
 0x1b7   : > { %12336 = vmatmul.mubr.bf16.gmra.mrb[16].mxu0 %v17742_v53  ;;  %v15381_v53 = vrot.slane %v3854_v4, 5  ;;  %17763 = vst [vmem:[#allocation13_spill] sm:$0xff] %v15389_v33 }
 0x1b8   : > { %12339 = vmatprep.mubr.bf16.mxu0 %v17745_v60  ;;  %v13593_v60 = vld [vmem:[%s14021_s15 + $0x6c] sm:$0xff]  }
 0x1b9   : > { %v3861_v6 = vor.u32 %v3860_v56, %v15381_v53  ;;  %v15468_v56 = vld [vmem:[%s14021_s15 + $0x98] sm:$0x1] }
 0x1bb   : > { %v15430_v23 = vrot.slane %v3861_v6, 4 }
 0x1bf   : > { %12340 = vmatmul.mubr.bf16.gmra.mrb[20].mxu0 %v17748_v38  ;;  %v3874_v38 = vrot.slane %v3872_v13, 5 }
 0x1c0   : > { %12343 = vmatprep.mubr.bf16.mxu0 %v17751_v26  ;;  %v15393_v26 = vld [vmem:[%s14021_s15 + $0x2c] sm:$0x1] }
 0x1c7   : > { %12344 = vmatmul.mubr.bf16.gmra.mrb[24].mxu0 %v17754_v52  ;;  %v15399_v52 = vsel %vm14386_vm5, %v4667_v35, %v4668_v58  ;;  %v15471_v35 = vld [vmem:[%s14021_s15 + $0xa0] sm:$0xf] }
 0x1c8   : > { %12347 = vmatprep.mubr.bf16.mxu0 %v17757_v45  ;;  %17764 = vst [vmem:[#allocation14_spill] sm:$0xff] %v15399_v52  ;;  %v11235_v45 = vld [vmem:[%s14021_s15 + $0xa8] sm:$0xe] }
 0x1cf   : > { %12348 = vmatmul.mubr.bf16.gmra.mrb[28].mxu0 %v17760_v49  ;;  %v3875_v49 = vor.u32 %v3874_v38, %v3871_v63  ;;  %v11233_v63 = vld [vmem:[%s14021_s15 + $0x90] sm:$0xe] }
 0x1d0   : > { %12367 = vmatprep.mubr.bf16.mxu0 %v13583_v1 }
 0x1d7   : > { %12368 = vmatmul.mubr.bf16.vlgmr.msra.gmra.mrb[0].mxu0 %v13584_v12  ;;  %v3888_v12 = vshll.u32 %v15393_v26, 16 }
 0x1d8   : > { %12400 = vmatpush3.bf16.msra.mxu0 %v13585_v44  ;;  %12371 = vmatprep.mubr.bf16.mxu0 %v13586_v37  ;;  %v3847_v44 = vrot.slane %v3845_v5, 4  ;;  %v15411_v37 = vld [vmem:[%s14021_s15 + $0x88] sm:$0xf] }
 0x1d9   : > { %12401 = vmatprep.subr.bf16.mxu0 %v13588_v30  ;;  %v15438_v5 = vrot.slane %v3888_v12, 5 }
 0x1da   : > { %v3851_v1 = vor.u32 %v3850_v16, %v3847_v44  ;;  %v15465_v16 = vld [vmem:[%s14021_s15 + $0x94] sm:$0xf]  ;;  %v15543_v44 = vld [vmem:[%s14021_s15 + $0xbc] sm:$0x1] }
 0x1db   : > { %v4686_v38 = vrot.slane %v15465_v16, 5 }
 0x1dc   : > { %12402 = vmatpush3.bf16.msra.mxu0 %v13588_v30  ;;  %v15414_v30 = vld [vmem:[%s14021_s15 + $0x8c] sm:$0x1]  ;;  %v15428_v11 = vrot.slane %v3851_v1, 4  ;;  %v4693_v1 = vrot.slane %v15471_v35, 5 }
 0x1dd   : > { %12403 = vmatprep.subr.bf16.mxu0 %v13591_v50  ;;  %v4682_v59 = vrot.slane %v15414_v30, 5  ;;  %v4688_v12 = vrot.slane %v4686_v38, 4 }
 0x1df   : > { %12372 = vmatmul.mubr.bf16.gmra.mrb[4].mxu0 %v13587_v21  ;;  %v3893_v21 = vshrl.u32 %v11141_v51, 16  ;;  %v11234_v51 = vld [vmem:[%s14021_s15 + $0x9c] sm:$0xe] }
 0x1e0   : > { %12375 = vmatprep.mubr.bf16.mxu0 %v13589_v31  ;;  %12404 = vmatpush3.bf16.msra.mxu0 %v13591_v50  ;;  %v3885_v50 = vor.u32 %v3884_v29, %v15395_v40  ;;  %v11232_v31 = vld [vmem:[%s14021_s15 + $0x84] sm:$0xe]  ;;  %v3926_v29 = vshll.u32 %v15457_v17, 16 }
 0x1e1   : > { %12405 = vmatprep.subr.bf16.mxu0 %v13594_v24  ;;  %v15447_v13 = vrot.slane %v3893_v21, 4  ;;  %v3908_v21 = vrot.slane %v3906_v34, 4 }
 0x1e2   : > { %v15445_v62 = vrot.slane %v3885_v50, 4  ;;  %v11250_v50 = vrot.slane %v11234_v51, 9  ;;  %v15519_v51 = vld [vmem:[%s14021_s15 + $0x4c] sm:$0xf] }
 0x1e4   : > { %12406 = vmatpush3.bf16.msra.mxu0 %v13594_v24  ;;  %v4679_v24 = vrot.slane %v15411_v37, 5 }
 0x1e5   : > { %12407 = vmatprep.subr.bf16.mxu0 %v13597_v57 }
 0x1e7   : > { %12376 = vmatmul.mubr.bf16.gmra.mrb[8].mxu0 %v13590_v22  ;;  %v11144_v22 = vld [vmem:[%s14021_s15 + $0x3c] sm:$0xf] }
 0x1e8   : > { %12379 = vmatprep.mubr.bf16.mxu0 %v13592_v36  ;;  %12408 = vmatpush3.bf16.msra.mxu0 %v13597_v57  ;;  %v11248_v57 = vrot.slane %v11232_v31, 9  ;;  %v4681_v36 = vrot.slane %v4679_v24, 4  ;;  %v3917_v58 = vshrl.u32 %v11144_v22, 16  ;;  %v15486_v31 = vld [vmem:[%s14021_s15 + $0x44] sm:$0x1] }
 0x1e9   : > { %12409 = vmatprep.subr.bf16.mxu0 %v13600_v9  ;;  %17767 = vst [vmem:[#allocation10_spill] sm:$0xff] %v15486_v31 }
 0x1ea   : > { %v15442_v4 = vsel %vm14386_vm5, %v11248_v57, %v4679_v24  ;;  %v15452_v10 = vsel %vm14386_vm5, %v4681_v36, %v4682_v59  ;;  %v11147_v24 = vld [vmem:[%s14021_s15 + $0x48] sm:$0xf]  ;;  %v4695_v57 = vrot.slane %v4693_v1, 4  ;;  %v3912_v36 = vshll.u32 %v15462_v32, 16 }
 0x1eb   : > { %17765 = vst [vmem:[#allocation16_spill] sm:$0xff] %v15442_v4  ;;  %17766 = vst [vmem:[#allocation17_spill] sm:$0xff] %v15452_v10 }
 0x1ec   : > { %12410 = vmatpush3.bf16.msra.mxu0 %v13600_v9  ;;  %v15436_v9 = vrot.slane %v3875_v49, 4  ;;  %v15483_v49 = vrot.slane %v3902_v3, 5  ;;  %v13601_v3 = vld [vmem:[%s14021_s15 + $0xa8] sm:$0xff]  }
 0x1ed   : > { %12411 = vmatprep.subr.bf16.mxu0 %v13603_v14 }
 0x1ef   : > { %12380 = vmatmul.mubr.bf16.gmra.mrb[12].mxu0 %v13593_v60  ;;  %v15474_v60 = vld [vmem:[%s14021_s15 + $0xa4] sm:$0x1] }
 0x1f0   : > { %12383 = vmatprep.mubr.bf16.mxu0 %v13595_v19  ;;  %12412 = vmatpush3.bf16.msra.mxu0 %v13603_v14  ;;  %v3920_v14 = vshll.u32 %v11144_v22, 16  ;;  %v4689_v19 = vrot.slane %v15468_v56, 5  ;;  %v4696_v6 = vrot.slane %v15474_v60, 5  ;;  %v13599_v22 = vld [vmem:[%s14021_s15 + $0x9c] sm:$0xff]  }
 0x1f1   : > { %12413 = vmatprep.subr.bf16.mxu0 %v13606_v28 }
 0x1f2   : > { %v15499_v47 = vsel %vm14386_vm5, %v4688_v12, %v4689_v19  ;;  %v15506_v34 = vrot.slane %v3920_v14, 5  ;;  %v3930_v19 = vshrl.u32 %v15457_v17, 16  ;;  %v3899_v12 = vor.u32 %v3898_v41, %v15447_v13 }
 0x1f3   : > { %17769 = vst [vmem:[#allocation9_spill] sm:$0xff] %v15499_v47  ;;  %v3867_v14 = vsel %vm14056_vm2, %v15430_v23, %v15432_v39  ;;  %v3944_v13 = vshll.u32 %v11147_v24, 16  ;;  %v11251_v41 = vrot.slane %v11235_v45, 9  ;;  %v3950_v23 = vshll.u32 %v15519_v51, 16 }
 0x1f4   : > { %12414 = vmatpush3.bf16.msra.mxu0 %v13606_v28  ;;  %v11249_v28 = vrot.slane %v11233_v63, 9  ;;  %v15508_v63 = vrot.slane %v3926_v29, 5  ;;  %v3857_v29 = vsel %vm14056_vm2, %v15428_v11, %v15381_v53  ;;  %v3954_v39 = vshrl.u32 %v15519_v51, 16 }
 0x1f5   : > { %12447 = vmatprep.subr.bf16.mxu0 %v15423_v54  ;;  %v15553_v47 = vrot.slane %v3899_v12, 4  ;;  %v3932_v4 = vrot.slane %v3930_v19, 4 }
 0x1f6   : > { %v15491_v59 = vsel %vm14386_vm5, %v11249_v28, %v4686_v38  ;;  %v15514_v38 = vsel %vm14386_vm5, %v4695_v57, %v4696_v6  ;;  %v3936_v28 = vshll.u32 %v15486_v31, 16  ;;  %v15529_v6 = vld [vmem:[%s14021_s15 + $0xac] sm:$0xf]  ;;  %v15535_v57 = vld [vmem:[%s14021_s15 + $0xb8] sm:$0xf]  ;;  %v3974_v31 = vshll.u32 %v15331_v61, 16 }
 0x1f7   : > { %12384 = vmatmul.mubr.bf16.gmra.mrb[16].mxu0 %v13596_v15  ;;  %17768 = vst [vmem:[#allocation11_spill] sm:$0xff] %v15491_v59  ;;  %v15495_v15 = vrot.slane %v3917_v58, 4  ;;  %17771 = vst [vmem:[#allocation19_spill] sm:$0xff] %v15514_v38  ;;  %v3909_v58 = vor.u32 %v3908_v21, %v15483_v49  ;;  %v4700_v53 = vrot.slane %v15529_v6, 5  ;;  %v4710_v38 = vrot.slane %v15543_v44, 5 }
 0x1f8   : > { %12387 = vmatprep.mubr.bf16.mxu0 %v13598_v8  ;;  %v15503_v8 = vsel %vm14386_vm5, %v11250_v50, %v4693_v1  ;;  %v3941_v1 = vshrl.u32 %v11147_v24, 16  ;;  %v15532_v50 = vld [vmem:[%s14021_s15 + $0xb0] sm:$0x1]  ;;  %v15555_v59 = vrot.slane %v3912_v36, 5  ;;  %v13604_v36 = vld [vmem:[%s14021_s15 + $0xc0] sm:$0xff]   ;;  %v15573_v12 = vrot.slane %v3936_v28, 5 }
 0x1f9   : > { %17770 = vst [vmem:[#allocation18_spill] sm:$0xff] %v15503_v8  ;;  %v4703_v11 = vrot.slane %v15532_v50, 5  ;;  %v4702_v21 = vrot.slane %v4700_v53, 4  ;;  %v11252_v8 = vrot.slane %v11236_v27, 9  ;;  %v15559_v45 = vsel %vm14386_vm5, %v11251_v41, %v4700_v53  ;;  %v11150_v41 = vld [vmem:[%s14021_s15 + $0x54] sm:$0xf] }
 0x1fa   : > { %17772 = vst [vmem:[#allocation20_spill] sm:$0xff] %v15559_v45  ;;  %v15562_v10 = vrot.slane %v3909_v58, 4  ;;  %v3943_v53 = vrot.slane %v3941_v1, 4  ;;  %v11199_v1 = vcombine.low %v3857_v29, %v3867_v14  ;;  %v3881_v58 = vsel %vm14056_vm2, %v15436_v9, %v15395_v40  ;;  %v15614_v14 = vld [vmem:[%s14021_s15 + $0xd4] sm:$0x1] }
 0x1fb   : > { %v15566_v52 = vsel %vm14386_vm5, %v4702_v21, %v4703_v11  ;;  %v15583_v11 = vld [vmem:[%s14021_s15 + $0x50] sm:$0x1]  ;;  %v3956_v21 = vrot.slane %v3954_v39, 4  ;;  %v15603_v39 = vld [vmem:[%s14021_s15 + $0xc8] sm:$0x1]  ;;  %v3905_v40 = vsel %vm14056_vm2, %v15553_v47, %v15483_v49  ;;  %v3933_v9 = vor.u32 %v3932_v4, %v15508_v63 }
 0x1fc   : > { %17773 = vst [vmem:[#allocation21_spill] sm:$0xff] %v15566_v52  ;;  %17776 = vst [vmem:[#allocation24_spill] sm:$0xff] %v15583_v11  ;;  %v3960_v4 = vshll.u32 %v15583_v11, 16  ;;  %v11153_v47 = vld [vmem:[%s14021_s15 + $0x60] sm:$0xf]  ;;  %v3968_v33 = vshll.u32 %v11150_v41, 16 }
 0x1ff   : > { %12388 = vmatmul.mubr.bf16.gmra.mrb[20].mxu0 %v13599_v22  ;;  %v4707_v22 = vrot.slane %v15535_v57, 5 }
 0x200   : > { %12391 = vmatprep.mubr.bf16.mxu0 %v13601_v3  ;;  %v13602_v3 = vld [vmem:[%s14021_s15 + $0xb4] sm:$0xff]  }
 0x201   : > { %v4709_v24 = vrot.slane %v4707_v22, 4  ;;  %v15570_v27 = vsel %vm14386_vm5, %v11252_v8, %v4707_v22  ;;  %v3946_v8 = vrot.slane %v3944_v13, 5  ;;  %v15585_v22 = vrot.slane %v3950_v23, 5  ;;  %v15600_v23 = vld [vmem:[%s14021_s15 + $0xc4] sm:$0xf] }
 0x202   : > { %17774 = vst [vmem:[#allocation22_spill] sm:$0xff] %v15570_v27  ;;  %v3923_v13 = vor.u32 %v15506_v34, %v15495_v15  ;;  %v4717_v15 = vrot.slane %v15603_v39, 5  ;;  %v3965_v34 = vshrl.u32 %v11150_v41, 16 }
 0x203   : > { %v15580_v19 = vsel %vm14386_vm5, %v4709_v24, %v4710_v38  ;;  %v3891_v38 = vsel %vm14056_vm2, %v15445_v62, %v15438_v5  ;;  %v15606_v24 = vld [vmem:[%s14021_s15 + $0xd0] sm:$0xf]  ;;  %v11237_v5 = vld [vmem:[%s14021_s15 + $0xc0] sm:$0xe]  ;;  %v4714_v62 = vrot.slane %v15600_v23, 5  ;;  %v3947_v49 = vor.u32 %v3946_v8, %v3943_v53 }
 0x204   : > { %17775 = vst [vmem:[#allocation23_spill] sm:$0xff] %v15580_v19  ;;  %v11253_v29 = vrot.slane %v11237_v5, 9  ;;  %v4721_v28 = vrot.slane %v15606_v24, 5  ;;  %v4724_v19 = vrot.slane %v15614_v14, 5  ;;  %v3957_v45 = vor.u32 %v3956_v21, %v15585_v22 }
 0x205   : > { %v4716_v27 = vrot.slane %v4714_v62, 4  ;;  %v3978_v53 = vshrl.u32 %v15331_v61, 16  ;;  %v3989_v21 = vshrl.u32 %v11153_v47, 16  ;;  %v3915_v61 = vsel %vm14056_vm2, %v15562_v10, %v15555_v59 }
 0x206   : > { %v4723_v5 = vrot.slane %v4721_v28, 4  ;;  %v3970_v10 = vrot.slane %v3968_v33, 5  ;;  %v15664_v59 = vrot.slane %v3974_v31, 5  ;;  %v4022_v31 = vshll.u32 %v15368_v25, 16 }
 0x207   : > { %12392 = vmatmul.mubr.bf16.gmra.mrb[24].mxu0 %v13602_v3  ;;  %v11238_v3 = vld [vmem:[%s14021_s15 + $0xcc] sm:$0xe]  ;;  %v15637_v8 = vsel %vm14386_vm5, %v4716_v27, %v4717_v15  ;;  %v15653_v27 = vrot.slane %v3923_v13, 4  ;;  %v3998_v15 = vshll.u32 %v15626_v7, 16  ;;  %v3980_v13 = vrot.slane %v3978_v53, 4 }
 0x208   : > { %12395 = vmatprep.mubr.bf16.mxu0 %v13604_v36  ;;  %v11254_v52 = vrot.slane %v11238_v3, 9  ;;  %v15630_v36 = vsel %vm14386_vm5, %v11253_v29, %v4714_v62  ;;  %17779 = vst [vmem:[#allocation27_spill] sm:$0xff] %v15637_v8  ;;  %v3992_v3 = vshll.u32 %v11153_v47, 16  ;;  %v15647_v29 = vsel %vm14386_vm5, %v4723_v5, %v4724_v19  ;;  %v11156_v5 = vld [vmem:[%s14021_s15 + $0x6c] sm:$0xf] }
 0x209   : > { %17778 = vst [vmem:[#allocation26_spill] sm:$0xff] %v15630_v36  ;;  %17781 = vst [vmem:[#allocation29_spill] sm:$0xff] %v15647_v29  ;;  %v15660_v47 = vrot.slane %v3960_v4, 5  ;;  %v3967_v62 = vrot.slane %v3965_v34, 4  ;;  %v4002_v19 = vshrl.u32 %v15626_v7, 16  ;;  %v3948_v8 = vrot.slane %v3947_v49, 4 }
 0x20a   : > { %v15641_v41 = vsel %vm14386_vm5, %v11254_v52, %v4721_v28  ;;  %v15658_v28 = vrot.slane %v3933_v9, 4  ;;  %v3958_v36 = vrot.slane %v3957_v45, 4  ;;  %v3984_v52 = vshll.u32 %v15334_v55, 16  ;;  %v15668_v34 = vld [vmem:[%s14021_s15 + $0x68] sm:$0x1] }
 0x20b   : > { %17780 = vst [vmem:[#allocation28_spill] sm:$0xff] %v15641_v41  ;;  %v3991_v9 = vrot.slane %v3989_v21, 4  ;;  %v3994_v29 = vrot.slane %v3992_v3, 5  ;;  %v11200_v4 = vcombine.low %v3881_v58, %v3891_v38  ;;  %v11201_v41 = vcombine.low %v3905_v40, %v3915_v61  ;;  %v15686_v21 = vld [vmem:[%s14021_s15 + $0x7c] sm:$0xf] }
 0x20c   : > { %v15670_v7 = vrot.slane %v3998_v15, 5  ;;  %v4013_v11 = vshrl.u32 %v11156_v5, 16  ;;  %v4004_v49 = vrot.slane %v4002_v19, 4  ;;  %v4016_v33 = vshll.u32 %v11156_v5, 16  ;;  %v11162_v5 = vld [vmem:[%s14021_s15 + $0x84] sm:$0xf] }
 0x20d   : > { %v3929_v55 = vsel %vm14056_vm2, %v15653_v27, %v15508_v63  ;;  %v3939_v45 = vsel %vm14056_vm2, %v15658_v28, %v15573_v12  ;;  %v3971_v58 = vor.u32 %v3970_v10, %v3967_v62  ;;  %v3981_v38 = vor.u32 %v3980_v13, %v15664_v59  ;;  %v13608_v63 = vld [vmem:[%s17550_s1 + $0x208] sm:$0xff]  }
 0x20e   : > { %v3995_v40 = vor.u32 %v3994_v29, %v3991_v9  ;;  %v4008_v53 = vshll.u32 %v15668_v34, 16  ;;  %v3953_v61 = vsel %vm14056_vm2, %v3948_v8, %v15585_v22  ;;  %v3963_v12 = vsel %vm14056_vm2, %v3958_v36, %v15660_v47  ;;  %v13609_v47 = vld [vmem:[%s17550_s1 + $0x210] sm:$0xff]  }
 0x20f   : > { %12396 = vmatmul.mubr.bf16.gmra.mrb[28].mxu0 %v13605_v2  ;;  %v11159_v2 = vld [vmem:[%s14021_s15 + $0x78] sm:$0xf]  ;;  %v15697_v62 = vrot.slane %v3984_v52, 5  ;;  %v4015_v29 = vrot.slane %v4013_v11, 4  ;;  %v4005_v27 = vor.u32 %v4004_v49, %v15670_v7  ;;  %v4018_v15 = vrot.slane %v4016_v33, 5 }
 0x210   : > { %12415 = vmatprep.mubr.bf16.mxu0 %v11199_v1  ;;  %v4026_v1 = vshrl.u32 %v15368_v25, 16  ;;  %v4037_v25 = vshrl.u32 %v11159_v2, 16  ;;  %v4040_v3 = vshll.u32 %v11159_v2, 16  ;;  %v15700_v28 = vrot.slane %v4022_v31, 5 }
 0x211   : > { %v3972_v10 = vrot.slane %v3971_v58, 4  ;;  %v3982_v13 = vrot.slane %v3981_v38, 4  ;;  %v4046_v9 = vshll.u32 %v15686_v21, 16  ;;  %v4050_v22 = vshrl.u32 %v15686_v21, 16 }
 0x212   : > { %v4028_v19 = vrot.slane %v4026_v1, 4  ;;  %v3996_v36 = vrot.slane %v3995_v40, 4  ;;  %v4010_v8 = vrot.slane %v4008_v53, 5  ;;  %v4039_v11 = vrot.slane %v4037_v25, 4 }
 0x213   : > { %v4042_v52 = vrot.slane %v4040_v3, 5  ;;  %v4061_v2 = vshrl.u32 %v11162_v5, 16  ;;  %v4070_v49 = vshll.u32 %v15411_v37, 16  ;;  %v4074_v33 = vshrl.u32 %v15411_v37, 16 }
 0x214   : > { %v4006_v31 = vrot.slane %v4005_v27, 4  ;;  %v4032_v1 = vshll.u32 %v15371_v42, 16  ;;  %v11202_v58 = vcombine.low %v3929_v55, %v3939_v45  ;;  %v11203_v38 = vcombine.low %v3953_v61, %v3963_v12  ;;  %v11165_v55 = vld [vmem:[%s14021_s15 + $0x90] sm:$0xf]  ;;  %v13610_v45 = vld [vmem:[%s17550_s1 + $0x218] sm:$0xff]  }
 0x215   : > { %v15713_v40 = vrot.slane %v4046_v9, 5  ;;  %v4052_v53 = vrot.slane %v4050_v22, 4  ;;  %v3977_v25 = vsel %vm14056_vm2, %v3972_v10, %v15664_v59  ;;  %v3987_v37 = vsel %vm14056_vm2, %v3982_v13, %v15697_v62 }
 0x216   : > { %v4001_v3 = vsel %vm14056_vm2, %v3996_v36, %v15670_v7  ;;  %v4043_v42 = vor.u32 %v4042_v52, %v4039_v11  ;;  %v15731_v59 = vrot.slane %v4070_v49, 5  ;;  %v4076_v12 = vrot.slane %v4074_v33, 4 }
 0x217   : > { %12416 = vmatmul.mubr.bf16.vlgmr.msra.gmra.mrb[0].mxu0 %v11200_v4  ;;  %v4064_v4 = vshll.u32 %v11162_v5, 16  ;;  %v4011_v62 = vsel %vm14056_vm2, %v4006_v31, %v4010_v8  ;;  %v4034_v7 = vrot.slane %v4032_v1, 5  ;;  %v4085_v10 = vshrl.u32 %v11165_v55, 16 }
 0x218   : > { %12448 = vmatpush3.bf16.msra.mxu0 %v15423_v54  ;;  %12419 = vmatprep.mubr.bf16.mxu0 %v11201_v41  ;;  %v4019_v54 = vor.u32 %v4018_v15, %v4015_v29  ;;  %v4029_v41 = vor.u32 %v4028_v19, %v15700_v28  ;;  %v15725_v29 = vld [vmem:[%s14021_s15 + $0x80] sm:$0x1]  ;;  %v4053_v19 = vor.u32 %v4052_v53, %v15713_v40  ;;  %v4088_v13 = vshll.u32 %v11165_v55, 16  ;;  %v13612_v55 = vld [vmem:[%s17550_s1 + $0x228] sm:$0xff]  }
 0x219   : > { %12449 = vmatprep.subr.bf16.mxu0 %v13608_v63  ;;  %v4066_v61 = vrot.slane %v4064_v4, 5  ;;  %v4056_v5 = vshll.u32 %v15725_v29, 16  ;;  %v4094_v9 = vshll.u32 %v15465_v16, 16  ;;  %v4098_v22 = vshrl.u32 %v15465_v16, 16  ;;  %v11168_v4 = vld [vmem:[%s14021_s15 + $0x9c] sm:$0xf] }
 0x21a   : > { %v4020_v27 = vrot.slane %v4019_v54, 4  ;;  %v4030_v15 = vrot.slane %v4029_v41, 4  ;;  %v4044_v36 = vrot.slane %v4043_v42, 4  ;;  %v4077_v11 = vor.u32 %v4076_v12, %v15731_v59 }
 0x21b   : > { %v4080_v52 = vshll.u32 %v15414_v30, 16  ;;  %v11204_v49 = vcombine.low %v3977_v25, %v3987_v37  ;;  %v11205_v33 = vcombine.low %v4001_v3, %v4011_v62  ;;  %v4054_v31 = vrot.slane %v4053_v19, 4 }
 0x21c   : > { %12450 = vmatpush3.bf16.msra.mxu0 %v13608_v63  ;;  %v4063_v63 = vrot.slane %v4061_v2, 4  ;;  %v13611_v2 = vld [vmem:[%s17550_s1 + $0x220] sm:$0xff]   ;;  %v4035_v16 = vsel %vm14056_vm2, %v4030_v15, %v4034_v7  ;;  %v4058_v54 = vrot.slane %v4056_v5, 5  ;;  %v4087_v41 = vrot.slane %v4085_v10, 4 }
 0x21d   : > { %12451 = vmatprep.subr.bf16.mxu0 %v13609_v47  ;;  %v4090_v1 = vrot.slane %v4088_v13, 5  ;;  %v15751_v30 = vrot.slane %v4094_v9, 5  ;;  %v4109_v53 = vshrl.u32 %v11168_v4, 16  ;;  %v4112_v42 = vshll.u32 %v11168_v4, 16 }
 0x21e   : > { %v4067_v8 = vor.u32 %v4066_v61, %v4063_v63  ;;  %v4049_v25 = vsel %vm14056_vm2, %v4044_v36, %v15713_v40  ;;  %v4082_v3 = vrot.slane %v4080_v52, 5  ;;  %v4118_v63 = vshll.u32 %v15471_v35, 16 }
 0x21f   : > { %12420 = vmatmul.mubr.bf16.gmra.mrb[4].mxu0 %v11202_v58  ;;  %v11171_v58 = vld [vmem:[%s14021_s15 + $0xa8] sm:$0xf]  ;;  %v4059_v62 = vsel %vm14056_vm2, %v4054_v31, %v4058_v54  ;;  %v4104_v40 = vshll.u32 %v15468_v56, 16  ;;  %v4146_v15 = vshrl.u32 %v15529_v6, 16  ;;  %v4091_v7 = vor.u32 %v4090_v1, %v4087_v41  ;;  %v13614_v54 = vld [vmem:[%s17550_s1 + $0x238] sm:$0xff]  }
 0x220   : > { %12423 = vmatprep.mubr.bf16.mxu0 %v11203_v38  ;;  %12452 = vmatpush3.bf16.msra.mxu0 %v13609_v47  ;;  %v4025_v47 = vsel %vm14056_vm2, %v4020_v27, %v15700_v28  ;;  %v4100_v38 = vrot.slane %v4098_v22, 4  ;;  %v4068_v37 = vrot.slane %v4067_v8, 4  ;;  %v4078_v28 = vrot.slane %v4077_v11, 4 }
 0x221   : > { %12453 = vmatprep.subr.bf16.mxu0 %v13610_v45  ;;  %v4133_v61 = vshrl.u32 %v11171_v58, 16  ;;  %v4136_v12 = vshll.u32 %v11171_v58, 16  ;;  %v4142_v27 = vshll.u32 %v15529_v6, 16  ;;  %v4111_v5 = vrot.slane %v4109_v53, 4  ;;  %v13613_v6 = vld [vmem:[%s17550_s1 + $0x230] sm:$0xff]  }
 0x222   : > { %v4101_v19 = vor.u32 %v4100_v38, %v15751_v30  ;;  %v11206_v10 = vcombine.low %v4025_v47, %v4035_v16  ;;  %v4073_v13 = vsel %vm14056_vm2, %v4068_v37, %v15731_v59  ;;  %v4083_v56 = vsel %vm14056_vm2, %v4078_v28, %v4082_v3  ;;  %v11174_v59 = vld [vmem:[%s14021_s15 + $0xb4] sm:$0xf]  ;;  %v11177_v53 = vld [vmem:[%s14021_s15 + $0xc0] sm:$0xf] }
 0x223   : > { %v15775_v9 = vrot.slane %v4118_v63, 5  ;;  %v4135_v36 = vrot.slane %v4133_v61, 4  ;;  %v4138_v8 = vrot.slane %v4136_v12, 5  ;;  %v11207_v11 = vcombine.low %v4049_v25, %v4059_v62 }
 0x224   : > { %12454 = vmatpush3.bf16.msra.mxu0 %v13610_v45  ;;  %v4122_v45 = vshrl.u32 %v15471_v35, 16  ;;  %v4114_v35 = vrot.slane %v4112_v42, 5  ;;  %v4106_v52 = vrot.slane %v4104_v40, 5  ;;  %v4148_v4 = vrot.slane %v4146_v15, 4 }
 0x225   : > { %12455 = vmatprep.subr.bf16.mxu0 %v13611_v2  ;;  %v4128_v16 = vshll.u32 %v15474_v60, 16  ;;  %v11208_v31 = vcombine.low %v4073_v13, %v4083_v56  ;;  %v4139_v1 = vor.u32 %v4138_v8, %v4135_v36  ;;  %v4152_v58 = vshll.u32 %v15532_v50, 16 }
 0x226   : > { %v4124_v22 = vrot.slane %v4122_v45, 4  ;;  %v4115_v47 = vor.u32 %v4114_v35, %v4111_v5  ;;  %v4157_v38 = vshrl.u32 %v11174_v59, 16  ;;  %v4160_v25 = vshll.u32 %v11174_v59, 16 }
 0x227   : > { %12424 = vmatmul.mubr.bf16.gmra.mrb[8].mxu0 %v11204_v49  ;;  %v4092_v49 = vrot.slane %v4091_v7, 4  ;;  %v4166_v60 = vshll.u32 %v15535_v57, 16  ;;  %v4170_v37 = vshrl.u32 %v15535_v57, 16  ;;  %v4130_v50 = vrot.slane %v4128_v16, 5 }
 0x228   : > { %12427 = vmatprep.mubr.bf16.mxu0 %v11205_v33  ;;  %12456 = vmatpush3.bf16.msra.mxu0 %v13611_v2  ;;  %v15777_v2 = vrot.slane %v4142_v27, 5  ;;  %v4102_v33 = vrot.slane %v4101_v19, 4  ;;  %v4125_v41 = vor.u32 %v4124_v22, %v15775_v9  ;;  %v4181_v63 = vshrl.u32 %v11177_v53, 16 }
 0x229   : > { %12457 = vmatprep.subr.bf16.mxu0 %v13612_v55  ;;  %v4097_v28 = vsel %vm14056_vm2, %v4092_v49, %v15751_v30  ;;  %v4184_v45 = vshll.u32 %v11177_v53, 16  ;;  %v4190_v61 = vshll.u32 %v15600_v23, 16  ;;  %v4194_v12 = vshrl.u32 %v15600_v23, 16 }
 0x22a   : > { %v4149_v42 = vor.u32 %v4148_v4, %v15777_v2  ;;  %v4107_v3 = vsel %vm14056_vm2, %v4102_v33, %v4106_v52  ;;  %v4126_v57 = vrot.slane %v4125_v41, 4  ;;  %v4140_v62 = vrot.slane %v4139_v1, 4 }
 0x22b   : > { %v4154_v40 = vrot.slane %v4152_v58, 5  ;;  %v4159_v27 = vrot.slane %v4157_v38, 4  ;;  %v4162_v30 = vrot.slane %v4160_v25, 5  ;;  %v4168_v7 = vrot.slane %v4166_v60, 5 }
 0x22c   : > { %12458 = vmatpush3.bf16.msra.mxu0 %v13612_v55  ;;  %v4116_v55 = vrot.slane %v4115_v47, 4  ;;  %v4150_v15 = vrot.slane %v4149_v42, 4  ;;  %v4172_v19 = vrot.slane %v4170_v37, 4  ;;  %v11209_v5 = vcombine.low %v4097_v28, %v4107_v3 }
 0x22d   : > { %12459 = vmatprep.subr.bf16.mxu0 %v13613_v6  ;;  %v4183_v35 = vrot.slane %v4181_v63, 4  ;;  %v4192_v13 = vrot.slane %v4190_v61, 5  ;;  %v4196_v56 = vrot.slane %v4194_v12, 4  ;;  %v4131_v22 = vsel %vm14056_vm2, %v4126_v57, %v4130_v50  ;;  %v11223_v61 = vld [vmem:[%s14021_s15 + $0x18] sm:$0xe] }
 0x22e   : > { %v4121_v23 = vsel %vm14056_vm2, %v4116_v55, %v15775_v9  ;;  %v4176_v36 = vshll.u32 %v15543_v44, 16  ;;  %v4145_v8 = vsel %vm14056_vm2, %v4140_v62, %v15777_v2  ;;  %v4163_v52 = vor.u32 %v4162_v30, %v4159_v27 }
 0x22f   : > { %12428 = vmatmul.mubr.bf16.gmra.mrb[12].mxu0 %v11206_v10  ;;  %v4186_v10 = vrot.slane %v4184_v45, 5  ;;  %v4173_v4 = vor.u32 %v4172_v19, %v4168_v7  ;;  %v4214_v9 = vshll.u32 %v15606_v24, 16  ;;  %v4218_v33 = vshrl.u32 %v15606_v24, 16 }
 0x230   : > { %12431 = vmatprep.mubr.bf16.mxu0 %v11207_v11  ;;  %12460 = vmatpush3.bf16.msra.mxu0 %v13613_v6  ;;  %v11180_v6 = vld [vmem:[%s14021_s15 + $0xcc] sm:$0xf]  ;;  %v4155_v11 = vsel %vm14056_vm2, %v4150_v15, %v4154_v40  ;;  %v4197_v16 = vor.u32 %v4196_v56, %v4192_v13  ;;  %v4200_v44 = vshll.u32 %v15603_v39, 16  ;;  %v4164_v41 = vrot.slane %v4163_v52, 4 }
 0x231   : > { %12461 = vmatprep.subr.bf16.mxu0 %v13614_v54  ;;  %v4205_v59 = vshrl.u32 %v11180_v6, 16  ;;  %v4208_v49 = vshll.u32 %v11180_v6, 16  ;;  %v4187_v47 = vor.u32 %v4186_v10, %v4183_v35  ;;  %v4174_v2 = vrot.slane %v4173_v4, 4  ;;  %v11224_v10 = vld [vmem:[%s14021_s15 + $0x24] sm:$0xe] }
 0x232   : > { %v4178_v1 = vrot.slane %v4176_v36, 5  ;;  %v4216_v53 = vrot.slane %v4214_v9, 5  ;;  %v4220_v42 = vrot.slane %v4218_v33, 4  ;;  %v4198_v60 = vrot.slane %v4197_v16, 4 }
 0x233   : > { %v4207_v58 = vrot.slane %v4205_v59, 4  ;;  %v4210_v38 = vrot.slane %v4208_v49, 5  ;;  %v4188_v25 = vrot.slane %v4187_v47, 4  ;;  %v4202_v37 = vrot.slane %v4200_v44, 5  ;;  %v11226_v49 = vld [vmem:[%s14021_s15 + $0x3c] sm:$0xe] }
 0x234   : > { %12462 = vmatpush3.bf16.msra.mxu0 %v13614_v54  ;;  %v11211_v54 = vcombine.low %v4145_v8, %v4155_v11  ;;  %v4169_v24 = vsel %vm14056_vm2, %v4164_v41, %v4168_v7  ;;  %v4179_v39 = vsel %vm14056_vm2, %v4174_v2, %v4178_v1  ;;  %v4221_v3 = vor.u32 %v4220_v42, %v4216_v53  ;;  %v17784_v42 = vld [vmem:[#allocation25_spill] sm:$0xff] }
 0x235   : > { %v4211_v28 = vor.u32 %v4210_v38, %v4207_v58  ;;  %v4224_v55 = vshll.u32 %v15614_v14, 16  ;;  %v4193_v50 = vsel %vm14056_vm2, %v4188_v25, %v4192_v13  ;;  %v4203_v63 = vsel %vm14056_vm2, %v4198_v60, %v4202_v37  ;;  %v11229_v60 = vld [vmem:[%s14021_s15 + $0x60] sm:$0xe] }
 0x236   : > { %v4616_v45 = vrot.slane %v15345_v48, 5  ;;  %v11212_v12 = vcombine.low %v4169_v24, %v4179_v39  ;;  %v11213_v57 = vcombine.low %v4193_v50, %v4203_v63  ;;  %v4222_v40 = vrot.slane %v4221_v3, 4 }
 0x237   : > { %12432 = vmatmul.mubr.bf16.gmra.mrb[16].mxu0 %v11208_v31  ;;  %v11210_v31 = vcombine.low %v4121_v23, %v4131_v22  ;;  %v4212_v62 = vrot.slane %v4211_v28, 4  ;;  %v4226_v27 = vrot.slane %v4224_v55, 5  ;;  %v11239_v15 = vrot.slane %v11223_v61, 9 }
 0x238   : > { %12435 = vmatprep.mubr.bf16.mxu0 %v11209_v5  ;;  %v4618_v30 = vrot.slane %v4616_v45, 4  ;;  %v4619_v14 = vrot.slane %v15385_v43, 5  ;;  %v4623_v19 = vrot.slane %v15361_v20, 5  ;;  %v4630_v13 = vrot.slane %v15426_v18, 5  ;;  %v11225_v43 = vld [vmem:[%s14021_s15 + $0x30] sm:$0xe] }
 0x239   : > { %v4217_v7 = vsel %vm14056_vm2, %v4212_v62, %v4216_v53  ;;  %v4227_v48 = vsel %vm14056_vm2, %v4222_v40, %v4226_v27  ;;  %v4617_v5 = vsel %vm14386_vm5, %v11239_v15, %v4616_v45  ;;  %v11240_v23 = vrot.slane %v11224_v10, 9  ;;  %v11231_v45 = vld [vmem:[%s14021_s15 + $0x78] sm:$0xe]  ;;  %v17785_v40 = vld [vmem:[#allocation12_spill] sm:$0xff]  ;;  %v17786_v27 = vld [vmem:[#allocation15_spill] sm:$0xff] }
 0x23a   : > { %v4620_v35 = vsel %vm14386_vm5, %v4618_v30, %v4619_v14  ;;  %v11214_v56 = vcombine.low %v4217_v7, %v4227_v48  ;;  %v4625_v22 = vrot.slane %v4623_v19, 4  ;;  %v4626_v36 = vrot.slane %v15393_v26, 5  ;;  %v17788_v7 = vld [vmem:[#allocation13_spill] sm:$0xff] }
 0x23b   : > { %v11271_v6 = vcombine.low %v4617_v5, %v4620_v35  ;;  %v11241_v8 = vrot.slane %v11225_v43, 9  ;;  %v4632_v20 = vrot.slane %v4630_v13, 4  ;;  %v4633_v11 = vrot.slane %v15462_v32, 5  ;;  %v11227_v32 = vld [vmem:[%s14021_s15 + $0x48] sm:$0xe]  ;;  %v17792_v5 = vld [vmem:[#allocation17_spill] sm:$0xff] }
 0x23c   : > { %v4624_v52 = vsel %vm14386_vm5, %v11240_v23, %v4623_v19  ;;  %v4627_v18 = vsel %vm14386_vm5, %v4625_v22, %v4626_v36  ;;  %v4637_v4 = vrot.slane %v15457_v17, 5  ;;  %v4644_v9 = vrot.slane %v15519_v51, 5  ;;  %v17783_v17 = vld [vmem:[#allocation24_spill] sm:$0xff]  ;;  %v17794_v35 = vld [vmem:[#allocation11_spill] sm:$0xff]  ;;  %v17795_v10 = vld [vmem:[#allocation9_spill] sm:$0xff]  ;;  %s13823_s15 = sshll.u32 %s13891_s23, 4  ;;  %s13824_s15 = int_to_ptr.vmem [resolvable:$false] %s13823_s15 }
 0x23d   : > { %v4631_v59 = vsel %vm14386_vm5, %v11241_v8, %v4630_v13  ;;  %v4634_v26 = vsel %vm14386_vm5, %v4632_v20, %v4633_v11  ;;  %v11272_v33 = vcombine.low %v4624_v52, %v4627_v18  ;;  %v11242_v16 = vrot.slane %v11226_v49, 9  ;;  %v17791_v19 = vld [vmem:[#allocation16_spill] sm:$0xff]  ;;  %v17797_v43 = vld [vmem:[#allocation18_spill] sm:$0xff]  ;;  %v17801_v22 = vld [vmem:[#allocation21_spill] sm:$0xff]  ;;  %s13825_s25 = scalar_lea.vmem %s13824_s15, 8192  ;;  %p13826_p2 = scmp.lt.s32.totalorder %s17501_s12, %s13824_s15 }
 0x23e   : > { %v11273_v47 = vcombine.low %v4631_v59, %v4634_v26  ;;  %v4639_v44 = vrot.slane %v4637_v4, 4  ;;  %v11243_v41 = vrot.slane %v11227_v32, 9  ;;  %v4646_v2 = vrot.slane %v4644_v9, 4  ;;  %v17800_v23 = vld [vmem:[#allocation20_spill] sm:$0xff]  ;;  %v17803_v8 = vld [vmem:[#allocation22_spill] sm:$0xff]  ;;  %v17804_v20 = vld [vmem:[#allocation23_spill] sm:$0xff]  ;;  %p13827_p3 = scmp.lt.s32.totalorder %s13825_s25, %s13819_s17 }
 0x23f   : > { %12436 = vmatmul.mubr.bf16.gmra.mrb[20].mxu0 %v11210_v31  ;;  %v17782_v31 = vld [vmem:[#allocation10_spill] sm:$0xff]  ;;  %v4647_v1 = vrot.slane %v17783_v17, 5  ;;  %v4638_v58 = vsel %vm14386_vm5, %v11242_v16, %v4637_v4  ;;  %v4658_v25 = vrot.slane %v17784_v42, 5  ;;  %v11245_v39 = vrot.slane %v11229_v60, 9  ;;  %v17807_v18 = vld [vmem:[#allocation27_spill] sm:$0xff]  ;;  %v17809_v59 = vld [vmem:[#allocation28_spill] sm:$0xff] }
 0x240   : > { %12439 = vmatprep.mubr.bf16.mxu0 %v11211_v54  ;;  %v4640_v54 = vrot.slane %v17782_v31, 5  ;;  %v4645_v38 = vsel %vm14386_vm5, %v11243_v41, %v4644_v9  ;;  %v4661_v3 = vrot.slane %v15668_v34, 5  ;;  %v4672_v63 = vrot.slane %v15686_v21, 5  ;;  %v17789_v21 = vld [vmem:[#allocation14_spill] sm:$0xff]  ;;  %v17810_v26 = vld [vmem:[#allocation29_spill] sm:$0xff]  ;;  %v13618_v16 = vld [vmem:[#allocation3 + $0x58] sm:$0xff]   ;;  %p13828_p4 = por %p13827_p3, %p13826_p2 }
 0x241   : > { %v4648_v53 = vsel %vm14386_vm5, %v4646_v2, %v4647_v1  ;;  %v4660_v28 = vrot.slane %v4658_v25, 4  ;;  %v4659_v55 = vsel %vm14386_vm5, %v11245_v39, %v4658_v25  ;;  %v4675_v62 = vrot.slane %v15725_v29, 5  ;;  %v17806_v52 = vld [vmem:[#allocation26_spill] sm:$0xff]  ;;  %v13615_v9 = vld [vmem:[#allocation3 + $0x40] sm:$0xff]  }
 0x242   : > { %v4641_v51 = vsel %vm14386_vm5, %v4639_v44, %v4640_v54  ;;  %v11275_v24 = vcombine.low %v4645_v38, %v4648_v53  ;;  %v17787_v15 = vcombine.low %v17785_v40, %v17786_v27  ;;  %v17790_v48 = vcombine.low %v17788_v7, %v17789_v21  ;;  %12495 = vmatprep.subr.bf16.mxu1 %v13615_v9  ;;  %v13619_v44 = vld [vmem:[#allocation3 + $0x60] sm:$0xff]   ;;  %v13620_v31 = vld [vmem:[#allocation3 + $0x68] sm:$0xff]   ;;  %v13621_v54 = vld [vmem:[#allocation3 + $0x70] sm:$0xff]   ;;  %p13829_p7 = pnand %p13828_p4, %p13822_p12 }
 0x243   : > { %v11274_v37 = vcombine.low %v4638_v58, %v4641_v51  ;;  %v4662_v50 = vsel %vm14386_vm5, %v4660_v28, %v4661_v3  ;;  %v17793_v29 = vcombine.low %v17791_v19, %v17792_v5  ;;  %v17796_v13 = vcombine.low %v17794_v35, %v17795_v10  ;;  %12496 = vmatpush3.bf16.msra.mxu1 %v13615_v9  ;;  %v13622_v38 = vld [vmem:[#allocation3 + $0x78] sm:$0xff]  }
 0x244   : > { %v11277_v61 = vcombine.low %v4659_v55, %v4662_v50  ;;  %v17802_v36 = vcombine.low %v17800_v23, %v17801_v22  ;;  %v17805_v11 = vcombine.low %v17803_v8, %v17804_v20  ;;  %v17808_v4 = vcombine.low %v17806_v52, %v17807_v18 }
 0x245   : > { %v17811_v49 = vcombine.low %v17809_v59, %v17810_v26  ;;  %v13890_v32 = vmov 0  }
 0x246   : > { %5125 = vst [vmem:[#allocation2 + $0x18] sm:$0xf] %v13890_v32  ;;  %5119 = vst [vmem:[#allocation2] sm:$0xf] %v13890_v32 }
 0x247   : > { %12440 = vmatmul.mubr.bf16.gmra.mrb[24].mxu0 %v11212_v12  ;;  %v11247_v12 = vrot.slane %v11231_v45, 9  ;;  %5120 = vst [vmem:[#allocation2 + $0x4] sm:$0xf] %v13890_v32  ;;  %5121 = vst [vmem:[#allocation2 + $0x8] sm:$0x1] %v13890_v32 }
 0x248   : > { %12443 = vmatprep.mubr.bf16.mxu0 %v11213_v57  ;;  %v4674_v57 = vrot.slane %v4672_v63, 4  ;;  %5122 = vst [vmem:[#allocation2 + $0xc] sm:$0xf] %v13890_v32  ;;  %5123 = vst [vmem:[#allocation2 + $0x10] sm:$0xf] %v13890_v32 }
 0x249   : > { %v4673_v34 = vsel %vm14386_vm5, %v11247_v12, %v4672_v63  ;;  %5124 = vst [vmem:[#allocation2 + $0x14] sm:$0x1] %v13890_v32  ;;  %5126 = vst [vmem:[#allocation2 + $0x1c] sm:$0xf] %v13890_v32  ;;  %v15905_v12 = vld [vmem:[#allocation3] sm:$0xff]  }
 0x24a   : > { %v4676_v30 = vsel %vm14386_vm5, %v4674_v57, %v4675_v62  ;;  %5127 = vst [vmem:[#allocation2 + $0x20] sm:$0x1] %v13890_v32  ;;  %5128 = vst [vmem:[#allocation2 + $0x24] sm:$0xf] %v13890_v32  ;;  %v15911_v57 = vld [vmem:[%s17551_s2] ss:$0 sm:$0xff] }
 0x24b   : > { %v11279_v14 = vcombine.low %v4673_v34, %v4676_v30  ;;  %5129 = vst [vmem:[#allocation2 + $0x28] sm:$0xf] %v13890_v32  ;;  %5130 = vst [vmem:[#allocation2 + $0x2c] sm:$0x1] %v13890_v32 }
 0x24c   : > { %5131 = vst [vmem:[#allocation2 + $0x30] sm:$0xf] %v13890_v32  ;;  %5132 = vst [vmem:[#allocation2 + $0x34] sm:$0xf] %v13890_v32 }
 0x24d   : > { %5133 = vst [vmem:[#allocation2 + $0x38] sm:$0x1] %v13890_v32  ;;  %5134 = vst [vmem:[#allocation2 + $0x3c] sm:$0xf] %v13890_v32  ;;  %v5710_v41 = vld [vmem:[#allocation2] sm:$0xf] }
 0x24e   : > { %5135 = vst [vmem:[#allocation2 + $0x40] sm:$0xf] %v13890_v32  ;;  %5136 = vst [vmem:[#allocation2 + $0x44] sm:$0x1] %v13890_v32  ;;  %v5711_v2 = vld [vmem:[#allocation2 + $0x4] sm:$0xf] }
 0x24f   : > { %12444 = vmatmul.mubr.bf16.gmra.mrb[28].mxu0 %v11214_v56  ;;  %v17798_v56 = vld [vmem:[#allocation19_spill] sm:$0xff]  ;;  %5137 = vst [vmem:[#allocation2 + $0x48] sm:$0xf] %v13890_v32  ;;  %5138 = vst [vmem:[#allocation2 + $0x4c] sm:$0xf] %v13890_v32  ;;  %v5775_v17 = vshrl.u32 %v5710_v41, 16 }
 0x250   : > { %12463 = vmatprep.mubr.bf16.mxu0 %v11271_v6  ;;  %v17799_v6 = vcombine.low %v17797_v43, %v17798_v56  ;;  %5139 = vst [vmem:[#allocation2 + $0x50] sm:$0x1] %v13890_v32  ;;  %5140 = vst [vmem:[#allocation2 + $0x54] sm:$0xf] %v13890_v32  ;;  %v5778_v1 = vshll.u32 %v5710_v41, 16  ;;  %v5784_v58 = vshll.u32 %v5711_v2, 16 }
 0x251   : > { %5141 = vst [vmem:[#allocation2 + $0x58] sm:$0xf] %v13890_v32  ;;  %5142 = vst [vmem:[#allocation2 + $0x5c] sm:$0x1] %v13890_v32  ;;  %v5788_v51 = vshrl.u32 %v5711_v2, 16  ;;  %v5777_v53 = vrot.slane %v5775_v17, 4 }
 0x252   : > { %5143 = vst [vmem:[#allocation2 + $0x60] sm:$0xf] %v13890_v32  ;;  %5144 = vst [vmem:[#allocation2 + $0x64] sm:$0xf] %v13890_v32  ;;  %v5780_v42 = vrot.slane %v5778_v1, 5  ;;  %v5786_v25 = vrot.slane %v5784_v58, 5 }
 0x253   : > { %5145 = vst [vmem:[#allocation2 + $0x68] sm:$0x1] %v13890_v32  ;;  %5146 = vst [vmem:[#allocation2 + $0x6c] sm:$0xf] %v13890_v32  ;;  %v5758_v60 = vld [vmem:[#allocation2 + $0x8] sm:$0x1] }
 0x254   : > { %5147 = vst [vmem:[#allocation2 + $0x70] sm:$0xf] %v13890_v32  ;;  %5148 = vst [vmem:[#allocation2 + $0x74] sm:$0x1] %v13890_v32  ;;  %v5794_v39 = vshll.u32 %v5758_v60, 16 }
 0x255   : > { %5149 = vst [vmem:[#allocation2 + $0x78] sm:$0xf] %v13890_v32  ;;  %5150 = vst [vmem:[#allocation2 + $0x7c] sm:$0xf] %v13890_v32  ;;  %v5609_v58 = vld [vmem:[#allocation2 + $0x20] sm:$0x1] }
 0x256   : > { %5151 = vst [vmem:[#allocation2 + $0x80] sm:$0x1] %v13890_v32  ;;  %5152 = vst [vmem:[#allocation2 + $0x84] sm:$0xf] %v13890_v32  ;;  %v5796_v55 = vrot.slane %v5794_v39, 5 }
 0x257   : > { %12464 = vmatmul.mubr.bf16.vlgmr.msra.gmra.mrb[0].mxu0 %v11272_v33  ;;  %5153 = vst [vmem:[#allocation2 + $0x88] sm:$0xf] %v13890_v32  ;;  %5154 = vst [vmem:[#allocation2 + $0x8c] sm:$0x1] %v13890_v32  ;;  %v13616_v33 = vld [vmem:[#allocation3 + $0x48] sm:$0xff]  }
 0x258   : > { %12467 = vmatprep.mubr.bf16.mxu0 %v11273_v47  ;;  %5155 = vst [vmem:[#allocation2 + $0x90] sm:$0xf] %v13890_v32  ;;  %5156 = vst [vmem:[#allocation2 + $0x94] sm:$0xf] %v13890_v32  ;;  %12497 = vmatprep.subr.bf16.mxu1 %v13616_v33  ;;  %v13617_v47 = vld [vmem:[#allocation3 + $0x50] sm:$0xff]  }
 0x259   : > { %5157 = vst [vmem:[#allocation2 + $0x98] sm:$0x1] %v13890_v32  ;;  %5158 = vst [vmem:[#allocation2 + $0x9c] sm:$0xf] %v13890_v32  ;;  %12498 = vmatpush3.bf16.msra.mxu1 %v13616_v33  ;;  %v5602_v60 = vld [vmem:[#allocation2 + $0x14] sm:$0x1] }
 0x25a   : > { %5159 = vst [vmem:[#allocation2 + $0xa0] sm:$0xf] %v13890_v32  ;;  %5160 = vst [vmem:[#allocation2 + $0xa4] sm:$0x1] %v13890_v32  ;;  %12499 = vmatprep.subr.bf16.mxu1 %v13617_v47 }
 0x25b   : > { %5161 = vst [vmem:[#allocation2 + $0xa8] sm:$0xf] %v13890_v32  ;;  %5162 = vst [vmem:[#allocation2 + $0xac] sm:$0xf] %v13890_v32 }
 0x25c   : > { %5163 = vst [vmem:[#allocation2 + $0xb0] sm:$0x1] %v13890_v32  ;;  %5164 = vst [vmem:[#allocation2 + $0xb4] sm:$0xf] %v13890_v32 }
 0x25d   : > { %5165 = vst [vmem:[#allocation2 + $0xb8] sm:$0xf] %v13890_v32  ;;  %5166 = vst [vmem:[#allocation2 + $0xbc] sm:$0x1] %v13890_v32  ;;  %12500 = vmatpush3.bf16.msra.mxu1 %v13617_v47 }
 0x25e   : > { %5167 = vst [vmem:[#allocation2 + $0xc0] sm:$0xf] %v13890_v32  ;;  %5168 = vst [vmem:[#allocation2 + $0xc4] sm:$0xf] %v13890_v32  ;;  %12501 = vmatprep.subr.bf16.mxu1 %v13618_v16 }
 0x25f   : > { %12468 = vmatmul.mubr.bf16.gmra.mrb[4].mxu0 %v11274_v37  ;;  %5169 = vst [vmem:[#allocation2 + $0xc8] sm:$0x1] %v13890_v32  ;;  %5170 = vst [vmem:[#allocation2 + $0xcc] sm:$0xf] %v13890_v32  ;;  %v5790_v37 = vrot.slane %v5788_v51, 4 }
 0x260   : > { %12471 = vmatprep.mubr.bf16.mxu0 %v11275_v24  ;;  %5171 = vst [vmem:[#allocation2 + $0xd0] sm:$0xf] %v13890_v32  ;;  %5172 = vst [vmem:[#allocation2 + $0xd4] sm:$0x1] %v13890_v32  ;;  %v5781_v24 = vor.u32 %v5780_v42, %v5777_v53 }
 0x261   : > { %12502 = vmatpush3.bf16.msra.mxu1 %v13618_v16  ;;  %v5791_v28 = vor.u32 %v5790_v37, %v5786_v25  ;;  %v5596_v16 = vld [vmem:[#allocation2 + $0xc] sm:$0xf] }
 0x262   : > { %12503 = vmatprep.subr.bf16.mxu1 %v13619_v44  ;;  %v5782_v3 = vrot.slane %v5781_v24, 4 }
 0x263   : > { %v5792_v50 = vrot.slane %v5791_v28, 4 }
 0x264   : > { %v5787_v63 = vsel %vm14056_vm2, %v5782_v3, %v5786_v25 }
 0x265   : > { %12504 = vmatpush3.bf16.msra.mxu1 %v13619_v44  ;;  %v5797_v45 = vsel %vm14056_vm2, %v5792_v50, %v5796_v55 }
 0x266   : > { %12505 = vmatprep.subr.bf16.mxu1 %v13620_v31 }
 0x267   : > { %12472 = vmatmul.mubr.bf16.gmra.mrb[8].mxu0 %v17787_v15 }
 0x268   : > { %12475 = vmatprep.mubr.bf16.mxu0 %v11277_v61  ;;  %v11328_v61 = vcombine.low %v5787_v63, %v5797_v45 }
 0x269   : > { %12506 = vmatpush3.bf16.msra.mxu1 %v13620_v31 }
 0x26a   : > { %12507 = vmatprep.subr.bf16.mxu1 %v13621_v54  ;;  %12511 = vmatprep.mubr.bf16.mxu1 %v11328_v61 }
 0x26d   : > { %12508 = vmatpush3.bf16.msra.mxu1 %v13621_v54 }
 0x26e   : > { %12509 = vmatprep.subr.bf16.mxu1 %v13622_v38 }
 0x26f   : > { %12476 = vmatmul.mubr.bf16.gmra.mrb[12].mxu0 %v17790_v48 }
 0x270   : > { %12479 = vmatprep.mubr.bf16.mxu0 %v11279_v14 }
 0x271   : > { %12510 = vmatpush3.bf16.msra.mxu1 %v13622_v38 }
 0x272   : > { %12543 = vmatprep.subr.bf16.mxu1 %v15905_v12 }
 0x277   : > { %12480 = vmatmul.mubr.bf16.gmra.mrb[16].mxu0 %v17793_v29 }
 0x278   : > { %12483 = vmatprep.mubr.bf16.mxu0 %v17796_v13 }
 0x27f   : > { %12484 = vmatmul.mubr.bf16.gmra.mrb[20].mxu0 %v17799_v6 }
 0x280   : > { %12487 = vmatprep.mubr.bf16.mxu0 %v17802_v36 }
 0x287   : > { %12488 = vmatmul.mubr.bf16.gmra.mrb[24].mxu0 %v17805_v11 }
 0x288   : > { %12491 = vmatprep.mubr.bf16.mxu0 %v17808_v4  ;;  %v5605_v4 = vld [vmem:[#allocation2 + $0x18] sm:$0xf] }
 0x28f   : > { %12492 = vmatmul.mubr.bf16.gmra.mrb[28].mxu0 %v17811_v49 }
 0x32a   : > { %v12465_v62 = vpop.f32.mrb[0].mxu0 }
 0x32b   : > { %v5057_v40 = vadd.f32 %v12465_v62, %v15911_v57  ;;  %v4889_v27 = vpop.f32.mrb[1].mxu0 }
 0x32c   : > { %v5055_v15 = vadd.f32 %v15911_v57, %v4889_v27  ;;  %v12466_v34 = vpop.f32.mrb[2].mxu0 }
 0x32d   : > { %v5089_v30 = vmax.f32 %v5057_v40, 0.0  ;;  %v5058_v14 = vadd.f32 %v12466_v34, %v15911_v57  ;;  %v4892_v7 = vpop.f32.mrb[3].mxu0 }
 0x32e   : > { %v5087_v21 = vmax.f32 %v5055_v15, 0.0  ;;  %v5056_v48 = vadd.f32 %v15911_v57, %v4892_v7 }
 0x32f   : > { %v11600_v19 = vpack.c.bf16 %v5089_v30, %v5089_v30  ;;  %v5090_v5 = vmax.f32 %v5058_v14, 0.0 }
 0x330   : > { %v11598_v29 = vpack.c.bf16 %v5087_v21, %v5087_v21  ;;  %v5088_v35 = vmax.f32 %v5056_v48, 0.0  ;;  %v5619_v21 = vld [vmem:[#allocation2 + $0x30] sm:$0xf] }
 0x331   : > { %v5290_v10 = vshrl.u32 %v11600_v19, 16  ;;  %v11601_v13 = vpack.c.bf16 %v5090_v5, %v5090_v5  ;;  %v5293_v43 = vshll.u32 %v11600_v19, 16 }
 0x332   : > { %v5273_v56 = vshrl.u32 %v11598_v29, 16  ;;  %v5276_v6 = vshll.u32 %v11598_v29, 16  ;;  %v11599_v23 = vpack.c.bf16 %v5088_v35, %v5088_v35  ;;  %v12469_v22 = vpop.f32.mrb[4].mxu0 }
 0x333   : > { %v5292_v36 = vrot.slane %v5290_v10, 7  ;;  %v5298_v8 = vshrl.u32 %v11601_v13, 16  ;;  %v5301_v20 = vshll.u32 %v11601_v13, 16  ;;  %v5061_v11 = vadd.f32 %v12469_v22, %v15911_v57  ;;  %v4905_v52 = vpop.f32.mrb[5].mxu0  ;;  %v5612_v13 = vld [vmem:[#allocation2 + $0x24] sm:$0xf] }
 0x334   : > { %v5275_v59 = vrot.slane %v5273_v56, 7  ;;  %v5281_v26 = vshrl.u32 %v11599_v23, 16  ;;  %v5284_v49 = vshll.u32 %v11599_v23, 16  ;;  %v5059_v9 = vadd.f32 %v15911_v57, %v4905_v52  ;;  %v12470_v32 = vpop.f32.mrb[6].mxu0 }
 0x335   : > { %v5295_v33 = vor.u32 %v5293_v43, %v5292_v36  ;;  %v5296_v47 = vrot.slane %v5292_v36, 4  ;;  %v5300_v31 = vrot.slane %v5298_v8, 7  ;;  %v5093_v54 = vmax.f32 %v5061_v11, 0.0  ;;  %v4908_v41 = vpop.f32.mrb[7].mxu0 }
 0x336   : > { %v5278_v2 = vor.u32 %v5276_v6, %v5275_v59  ;;  %v5279_v17 = vrot.slane %v5275_v59, 4  ;;  %v5283_v51 = vrot.slane %v5281_v26, 7  ;;  %v5091_v38 = vmax.f32 %v5059_v9, 0.0 }
 0x337   : > { %v5606_v53 = vsel %vm15920_vm11, %v5295_v33, %v5605_v4  ;;  %v5303_v42 = vor.u32 %v5301_v20, %v5300_v31  ;;  %v5305_v25 = vrot.slane %v5300_v31, 4  ;;  %v11604_v37 = vpack.c.bf16 %v5093_v54, %v5093_v54  ;;  %v5623_v31 = vld [vmem:[#allocation2 + $0x38] sm:$0x1]  ;;  %v5616_v54 = vld [vmem:[#allocation2 + $0x2c] sm:$0x1] }
 0x338   : > { %5607 = vst [vmem:[#allocation2 + $0x18] sm:$0xf] %v5606_v53  ;;  %v5597_v24 = vsel %vm15920_vm11, %v5278_v2, %v5596_v16  ;;  %v5286_v39 = vor.u32 %v5284_v49, %v5283_v51  ;;  %v5288_v28 = vrot.slane %v5283_v51, 4  ;;  %v11602_v3 = vpack.c.bf16 %v5091_v38, %v5091_v38 }
 0x339   : > { %5598 = vst [vmem:[#allocation2 + $0xc] sm:$0xf] %v5597_v24  ;;  %v5304_v55 = vsel %vm15927_vm12, %v5296_v47, %v5303_v42  ;;  %v5610_v50 = vsel %vm15933_vm13, %v5305_v25, %v5609_v58  ;;  %v5324_v63 = vshrl.u32 %v11604_v37, 16  ;;  %v5327_v62 = vshll.u32 %v11604_v37, 16  ;;  %v5633_v24 = vld [vmem:[#allocation2 + $0x48] sm:$0xf] }
 0x33a   : > { %5608 = vst [vmem:[#allocation2 + $0x1c] sm:$0xf] %v5304_v55  ;;  %5611 = vst [vmem:[#allocation2 + $0x20] sm:$0x1] %v5610_v50  ;;  %v5287_v45 = vsel %vm15927_vm12, %v5279_v17, %v5286_v39  ;;  %v5603_v61 = vsel %vm15933_vm13, %v5288_v28, %v5602_v60  ;;  %v5307_v40 = vshrl.u32 %v11602_v3, 16  ;;  %v12473_v27 = vpop.f32.mrb[8].mxu0  ;;  %v5062_v34 = vadd.f32 %v12470_v32, %v15911_v57 }
 0x33b   : > { %5599 = vst [vmem:[#allocation2 + $0x10] sm:$0xf] %v5287_v45  ;;  %5604 = vst [vmem:[#allocation2 + $0x14] sm:$0x1] %v5603_v61  ;;  %v15949_v15 = vrot.slane %v5324_v63, 7  ;;  %v5060_v30 = vadd.f32 %v15911_v57, %v4908_v41  ;;  %v5065_v14 = vadd.f32 %v12473_v27, %v15911_v57  ;;  %v4921_v7 = vpop.f32.mrb[9].mxu0 }
 0x33c   : > { %v5309_v48 = vrot.slane %v5307_v40, 7  ;;  %v5310_v19 = vshll.u32 %v11602_v3, 16  ;;  %v5063_v5 = vadd.f32 %v15911_v57, %v4921_v7  ;;  %v12474_v29 = vpop.f32.mrb[10].mxu0  ;;  %v5094_v43 = vmax.f32 %v5062_v34, 0.0 }
 0x33d   : > { %v5329_v35 = vor.u32 %v5327_v62, %v15949_v15  ;;  %v5330_v10 = vrot.slane %v15949_v15, 4  ;;  %v5092_v56 = vmax.f32 %v5060_v30, 0.0  ;;  %v4924_v6 = vpop.f32.mrb[11].mxu0  ;;  %v5097_v36 = vmax.f32 %v5065_v14, 0.0  ;;  %v5626_v62 = vld [vmem:[#allocation2 + $0x3c] sm:$0xf] }
 0x33e   : > { %v5312_v23 = vor.u32 %v5310_v19, %v5309_v48  ;;  %v5313_v22 = vrot.slane %v5309_v48, 4  ;;  %v5095_v8 = vmax.f32 %v5063_v5, 0.0  ;;  %v11605_v11 = vpack.c.bf16 %v5094_v43, %v5094_v43 }
 0x33f   : > { %v5620_v20 = vsel %vm15920_vm11, %v5329_v35, %v5619_v21  ;;  %v11603_v52 = vpack.c.bf16 %v5092_v56, %v5092_v56  ;;  %v5066_v4 = vadd.f32 %v12474_v29, %v15911_v57  ;;  %v11608_v26 = vpack.c.bf16 %v5097_v36, %v5097_v36 }
 0x340   : > { %5621 = vst [vmem:[#allocation2 + $0x30] sm:$0xf] %v5620_v20  ;;  %v5613_v59 = vsel %vm15920_vm11, %v5312_v23, %v5612_v13  ;;  %v11606_v49 = vpack.c.bf16 %v5095_v8, %v5095_v8  ;;  %v5064_v9 = vadd.f32 %v15911_v57, %v4924_v6  ;;  %v5332_v32 = vshrl.u32 %v11605_v11, 16  ;;  %v5637_v20 = vld [vmem:[#allocation2 + $0x50] sm:$0x1] }
 0x341   : > { %5614 = vst [vmem:[#allocation2 + $0x24] sm:$0xf] %v5613_v59  ;;  %v5335_v33 = vshll.u32 %v11605_v11, 16  ;;  %v5315_v47 = vshrl.u32 %v11603_v52, 16  ;;  %v5318_v16 = vshll.u32 %v11603_v52, 16  ;;  %v5358_v41 = vshrl.u32 %v11608_v26, 16 }
 0x342   : > { %v5361_v2 = vshll.u32 %v11608_v26, 16  ;;  %v5341_v17 = vshrl.u32 %v11606_v49, 16  ;;  %v5344_v58 = vshll.u32 %v11606_v49, 16  ;;  %v12477_v51 = vpop.f32.mrb[12].mxu0  ;;  %v5334_v38 = vrot.slane %v5332_v32, 7 }
 0x343   : > { %v5317_v53 = vrot.slane %v5315_v47, 7  ;;  %v5098_v42 = vmax.f32 %v5066_v4, 0.0  ;;  %v5096_v25 = vmax.f32 %v5064_v9, 0.0  ;;  %v4937_v60 = vpop.f32.mrb[13].mxu0  ;;  %v15963_v37 = vrot.slane %v5358_v41, 7 }
 0x344   : > { %v15965_v39 = vrot.slane %v5341_v17, 7  ;;  %v5069_v28 = vadd.f32 %v12477_v51, %v15911_v57  ;;  %v5067_v3 = vadd.f32 %v15911_v57, %v4937_v60  ;;  %v12478_v55 = vpop.f32.mrb[14].mxu0  ;;  %v5337_v50 = vor.u32 %v5335_v33, %v5334_v38  ;;  %v5630_v32 = vld [vmem:[#allocation2 + $0x44] sm:$0x1] }
 0x345   : > { %v5339_v63 = vrot.slane %v5334_v38, 4  ;;  %v5320_v45 = vor.u32 %v5318_v16, %v5317_v53  ;;  %v5322_v61 = vrot.slane %v5317_v53, 4  ;;  %v4940_v40 = vpop.f32.mrb[15].mxu0  ;;  %v5363_v27 = vor.u32 %v5361_v2, %v15963_v37 }
 0x346   : > { %v5364_v15 = vrot.slane %v15963_v37, 4  ;;  %v5346_v34 = vor.u32 %v5344_v58, %v15965_v39  ;;  %v5347_v30 = vrot.slane %v15965_v39, 4  ;;  %v5338_v14 = vsel %vm15927_vm12, %v5330_v10, %v5337_v50  ;;  %v5640_v50 = vld [vmem:[#allocation2 + $0x54] sm:$0xf] }
 0x347   : > { %v5624_v7 = vsel %vm15933_vm13, %v5339_v63, %v5623_v31  ;;  %v5321_v21 = vsel %vm15927_vm12, %v5313_v22, %v5320_v45  ;;  %v5617_v48 = vsel %vm15933_vm13, %v5322_v61, %v5616_v54  ;;  %5622 = vst [vmem:[#allocation2 + $0x34] sm:$0xf] %v5338_v14  ;;  %v5634_v19 = vsel %vm15920_vm11, %v5363_v27, %v5633_v24 }
 0x348   : > { %5625 = vst [vmem:[#allocation2 + $0x38] sm:$0x1] %v5624_v7  ;;  %5615 = vst [vmem:[#allocation2 + $0x28] sm:$0xf] %v5321_v21  ;;  %v5627_v5 = vsel %vm15920_vm11, %v5346_v34, %v5626_v62  ;;  %v11609_v29 = vpack.c.bf16 %v5098_v42, %v5098_v42  ;;  %v11607_v35 = vpack.c.bf16 %v5096_v25, %v5096_v25  ;;  %v5101_v10 = vmax.f32 %v5069_v28, 0.0 }
 0x349   : > { %5618 = vst [vmem:[#allocation2 + $0x2c] sm:$0x1] %v5617_v48  ;;  %5635 = vst [vmem:[#allocation2 + $0x48] sm:$0xf] %v5634_v19  ;;  %v5099_v13 = vmax.f32 %v5067_v3, 0.0  ;;  %v5070_v43 = vadd.f32 %v12478_v55, %v15911_v57  ;;  %v5068_v56 = vadd.f32 %v15911_v57, %v4940_v40 }
 0x34a   : > { %5628 = vst [vmem:[#allocation2 + $0x3c] sm:$0xf] %v5627_v5  ;;  %v5366_v6 = vshrl.u32 %v11609_v29, 16  ;;  %v5369_v23 = vshll.u32 %v11609_v29, 16  ;;  %v5349_v22 = vshrl.u32 %v11607_v35, 16  ;;  %v5352_v36 = vshll.u32 %v11607_v35, 16 }
 0x34b   : > { %v12481_v8 = vpop.f32.mrb[16].mxu0  ;;  %v11612_v11 = vpack.c.bf16 %v5101_v10, %v5101_v10  ;;  %v11610_v52 = vpack.c.bf16 %v5099_v13, %v5099_v13  ;;  %v5102_v4 = vmax.f32 %v5070_v43, 0.0  ;;  %v5100_v59 = vmax.f32 %v5068_v56, 0.0  ;;  %v5647_v55 = vld [vmem:[#allocation2 + $0x60] sm:$0xf] }
 0x34c   : > { %v4953_v26 = vpop.f32.mrb[17].mxu0  ;;  %v5368_v49 = vrot.slane %v5366_v6, 7  ;;  %v5351_v9 = vrot.slane %v5349_v22, 7  ;;  %v5073_v33 = vadd.f32 %v12481_v8, %v15911_v57  ;;  %v5712_v40 = vld [vmem:[#allocation2 + $0xc] sm:$0xf] }
 0x34d   : > { %v5071_v47 = vadd.f32 %v15911_v57, %v4953_v26  ;;  %v12482_v16 = vpop.f32.mrb[18].mxu0  ;;  %v5392_v31 = vshrl.u32 %v11612_v11, 16  ;;  %v5395_v54 = vshll.u32 %v11612_v11, 16  ;;  %v5375_v41 = vshrl.u32 %v11610_v52, 16  ;;  %v5651_v48 = vld [vmem:[#allocation2 + $0x68] sm:$0x1] }
 0x34e   : > { %v5378_v2 = vshll.u32 %v11610_v52, 16  ;;  %v4956_v17 = vpop.f32.mrb[19].mxu0  ;;  %v5371_v58 = vor.u32 %v5369_v23, %v5368_v49  ;;  %v5373_v51 = vrot.slane %v5368_v49, 4  ;;  %v5354_v38 = vor.u32 %v5352_v36, %v5351_v9  ;;  %v5644_v13 = vld [vmem:[#allocation2 + $0x5c] sm:$0x1] }
 0x34f   : > { %v5356_v53 = vrot.slane %v5351_v9, 4  ;;  %v5394_v42 = vrot.slane %v5392_v31, 7  ;;  %v5377_v25 = vrot.slane %v5375_v41, 7  ;;  %v11613_v60 = vpack.c.bf16 %v5102_v4, %v5102_v4  ;;  %v5713_v36 = vld [vmem:[#allocation2 + $0x10] sm:$0xf] }
 0x350   : > { %v11611_v37 = vpack.c.bf16 %v5100_v59, %v5100_v59  ;;  %v5372_v24 = vsel %vm15927_vm12, %v5364_v15, %v5371_v58  ;;  %v5638_v39 = vsel %vm15933_vm13, %v5373_v51, %v5637_v20  ;;  %v5355_v28 = vsel %vm15927_vm12, %v5347_v30, %v5354_v38  ;;  %v5661_v41 = vld [vmem:[#allocation2 + $0x78] sm:$0xf] }
 0x351   : > { %v5631_v3 = vsel %vm15933_vm13, %v5356_v53, %v5630_v32  ;;  %5636 = vst [vmem:[#allocation2 + $0x4c] sm:$0xf] %v5372_v24  ;;  %5639 = vst [vmem:[#allocation2 + $0x50] sm:$0x1] %v5638_v39  ;;  %v5397_v63 = vor.u32 %v5395_v54, %v5394_v42  ;;  %v5398_v45 = vrot.slane %v5394_v42, 4  ;;  %v5380_v61 = vor.u32 %v5378_v2, %v5377_v25 }
 0x352   : > { %5629 = vst [vmem:[#allocation2 + $0x40] sm:$0xf] %v5355_v28  ;;  %5632 = vst [vmem:[#allocation2 + $0x44] sm:$0x1] %v5631_v3  ;;  %v5381_v62 = vrot.slane %v5377_v25, 4  ;;  %v5400_v27 = vshrl.u32 %v11613_v60, 16  ;;  %v5074_v43 = vadd.f32 %v12482_v16, %v15911_v57  ;;  %v5072_v56 = vadd.f32 %v15911_v57, %v4956_v17 }
 0x353   : > { %v5403_v15 = vshll.u32 %v11613_v60, 16  ;;  %v5383_v34 = vshrl.u32 %v11611_v37, 16  ;;  %v5386_v14 = vshll.u32 %v11611_v37, 16  ;;  %v15997_v7 = vpop.f32.mrb[20].mxu0  ;;  %v5648_v30 = vsel %vm15920_vm11, %v5397_v63, %v5647_v55  ;;  %v5654_v2 = vld [vmem:[#allocation2 + $0x6c] sm:$0xf] }
 0x354   : > { %v5641_v21 = vsel %vm15920_vm11, %v5380_v61, %v5640_v50  ;;  %v5105_v19 = vmax.f32 %v5073_v33, 0.0  ;;  %v5103_v5 = vmax.f32 %v5071_v47, 0.0  ;;  %v16003_v29 = vpop.f32.mrb[21].mxu0  ;;  %5649 = vst [vmem:[#allocation2 + $0x60] sm:$0xf] %v5648_v30  ;;  %v5402_v35 = vrot.slane %v5400_v27, 7 }
 0x355   : > { %5642 = vst [vmem:[#allocation2 + $0x54] sm:$0xf] %v5641_v21  ;;  %v5385_v10 = vrot.slane %v5383_v34, 7  ;;  %v16007_v6 = vpop.f32.mrb[22].mxu0  ;;  %v5799_v8 = vshrl.u32 %v5712_v40, 16  ;;  %v5802_v20 = vshll.u32 %v5712_v40, 16 }
 0x356   : > { %v11616_v23 = vpack.c.bf16 %v5105_v19, %v5105_v19  ;;  %v11614_v22 = vpack.c.bf16 %v5103_v5, %v5103_v5  ;;  %v16009_v11 = vpop.f32.mrb[23].mxu0  ;;  %v5405_v52 = vor.u32 %v5403_v15, %v5402_v35  ;;  %v5407_v4 = vrot.slane %v5402_v35, 4  ;;  %v5759_v53 = vld [vmem:[#allocation2 + $0x14] sm:$0x1]  ;;  %v5715_v30 = vld [vmem:[#allocation2 + $0x1c] sm:$0xf] }
 0x357   : > { %v5388_v59 = vor.u32 %v5386_v14, %v5385_v10  ;;  %v5390_v26 = vrot.slane %v5385_v10, 4  ;;  %v5106_v51 = vmax.f32 %v5074_v43, 0.0  ;;  %v5104_v38 = vmax.f32 %v5072_v56, 0.0 }
 0x358   : > { %v5426_v49 = vshrl.u32 %v11616_v23, 16  ;;  %v5429_v9 = vshll.u32 %v11616_v23, 16  ;;  %v5409_v32 = vshrl.u32 %v11614_v22, 16  ;;  %v5412_v33 = vshll.u32 %v11614_v22, 16  ;;  %v5665_v22 = vld [vmem:[#allocation2 + $0x80] sm:$0x1] }
 0x359   : > { %v5406_v47 = vsel %vm15927_vm12, %v5398_v45, %v5405_v52  ;;  %v5652_v16 = vsel %vm15933_vm13, %v5407_v4, %v5651_v48  ;;  %v5389_v31 = vsel %vm15927_vm12, %v5381_v62, %v5388_v59  ;;  %v5645_v54 = vsel %vm15933_vm13, %v5390_v26, %v5644_v13  ;;  %v5714_v62 = vld [vmem:[#allocation2 + $0x18] sm:$0xf]  ;;  %v5658_v52 = vld [vmem:[#allocation2 + $0x74] sm:$0x1] }
 0x35a   : > { %5650 = vst [vmem:[#allocation2 + $0x64] sm:$0xf] %v5406_v47  ;;  %5653 = vst [vmem:[#allocation2 + $0x68] sm:$0x1] %v5652_v16  ;;  %v5428_v17 = vrot.slane %v5426_v49, 7  ;;  %v5411_v58 = vrot.slane %v5409_v32, 7  ;;  %v11617_v50 = vpack.c.bf16 %v5106_v51, %v5106_v51  ;;  %v11615_v63 = vpack.c.bf16 %v5104_v38, %v5104_v38 }
 0x35b   : > { %5643 = vst [vmem:[#allocation2 + $0x58] sm:$0xf] %v5389_v31  ;;  %5646 = vst [vmem:[#allocation2 + $0x5c] sm:$0x1] %v5645_v54  ;;  %v5801_v42 = vrot.slane %v5799_v8, 4  ;;  %v5804_v25 = vrot.slane %v5802_v20, 5 }
 0x35c   : > { %v5808_v60 = vshll.u32 %v5713_v36, 16  ;;  %v5812_v37 = vshrl.u32 %v5713_v36, 16  ;;  %v16019_v24 = vpop.f32.mrb[24].mxu0  ;;  %v5431_v39 = vor.u32 %v5429_v9, %v5428_v17  ;;  %v5432_v28 = vrot.slane %v5428_v17, 4  ;;  %v5760_v16 = vld [vmem:[#allocation2 + $0x20] sm:$0x1] }
 0x35d   : > { %v5414_v3 = vor.u32 %v5412_v33, %v5411_v58  ;;  %v16021_v55 = vpop.f32.mrb[25].mxu0  ;;  %v5805_v45 = vor.u32 %v5804_v25, %v5801_v42  ;;  %v5818_v14 = vshll.u32 %v5759_v53, 16  ;;  %v5415_v48 = vrot.slane %v5411_v58, 4  ;;  %v5716_v58 = vld [vmem:[#allocation2 + $0x24] sm:$0xf] }
 0x35e   : > { %v5810_v61 = vrot.slane %v5808_v60, 5  ;;  %v16023_v40 = vpop.f32.mrb[26].mxu0  ;;  %v5662_v27 = vsel %vm15920_vm11, %v5431_v39, %v5661_v41  ;;  %v5814_v34 = vrot.slane %v5812_v37, 4  ;;  %v5434_v19 = vshrl.u32 %v11617_v50, 16 }
 0x35f   : > { %v5655_v15 = vsel %vm15920_vm11, %v5414_v3, %v5654_v2  ;;  %v16029_v21 = vpop.f32.mrb[27].mxu0  ;;  %5663 = vst [vmem:[#allocation2 + $0x78] sm:$0xf] %v5662_v27  ;;  %v5437_v5 = vshll.u32 %v11617_v50, 16  ;;  %v5417_v35 = vshrl.u32 %v11615_v63, 16  ;;  %v5420_v10 = vshll.u32 %v11615_v63, 16 }
 0x360   : > { %5656 = vst [vmem:[#allocation2 + $0x6c] sm:$0xf] %v5655_v15  ;;  %v5806_v13 = vrot.slane %v5805_v45, 4  ;;  %v5815_v43 = vor.u32 %v5814_v34, %v5810_v61  ;;  %v5820_v56 = vrot.slane %v5818_v14, 5  ;;  %v5436_v23 = vrot.slane %v5434_v19, 7 }
 0x361   : > { %v5419_v36 = vrot.slane %v5417_v35, 7  ;;  %v5823_v8 = vshrl.u32 %v5714_v62, 16  ;;  %v5826_v20 = vshll.u32 %v5714_v62, 16  ;;  %v5832_v26 = vshll.u32 %v5715_v30, 16  ;;  %v5717_v15 = vld [vmem:[#allocation2 + $0x28] sm:$0xf] }
 0x362   : > { %v5811_v4 = vsel %vm14056_vm2, %v5806_v13, %v5810_v61  ;;  %v5816_v59 = vrot.slane %v5815_v43, 4  ;;  %v5836_v49 = vshrl.u32 %v5715_v30, 16  ;;  %v5439_v9 = vor.u32 %v5437_v5, %v5436_v23  ;;  %v16033_v31 = vpop.f32.mrb[28].mxu0 }
 0x363   : > { %v5441_v32 = vrot.slane %v5436_v23, 4  ;;  %v5422_v33 = vor.u32 %v5420_v10, %v5419_v36  ;;  %v5424_v47 = vrot.slane %v5419_v36, 4  ;;  %v5825_v41 = vrot.slane %v5823_v8, 4  ;;  %v16037_v51 = vpop.f32.mrb[29].mxu0 }
 0x364   : > { %v5821_v54 = vsel %vm14056_vm2, %v5816_v59, %v5820_v56  ;;  %v5828_v2 = vrot.slane %v5826_v20, 5  ;;  %v5834_v17 = vrot.slane %v5832_v26, 5  ;;  %v5440_v38 = vsel %vm15927_vm12, %v5432_v28, %v5439_v9  ;;  %v16047_v60 = vpop.f32.mrb[30].mxu0  ;;  %v13624_v28 = vld [vmem:[#allocation3 + $0x8] sm:$0xff]  }
 0x365   : > { %v5666_v53 = vsel %vm15933_vm13, %v5441_v32, %v5665_v22  ;;  %v5423_v42 = vsel %vm15927_vm12, %v5415_v48, %v5422_v33  ;;  %v5659_v25 = vsel %vm15933_vm13, %v5424_v47, %v5658_v52  ;;  %5664 = vst [vmem:[#allocation2 + $0x7c] sm:$0xf] %v5440_v38  ;;  %v11329_v37 = vcombine.low %v5811_v4, %v5821_v54  ;;  %v16049_v63 = vpop.f32.mrb[31].mxu0  ;;  %v5668_v32 = vld [vmem:[#allocation2 + $0x84] sm:$0xf]  ;;  %v13626_v54 = vld [vmem:[#allocation3 + $0x18] sm:$0xff]  }
 0x366   : > { %5667 = vst [vmem:[#allocation2 + $0x80] sm:$0x1] %v5666_v53  ;;  %5657 = vst [vmem:[#allocation2 + $0x70] sm:$0xf] %v5423_v42  ;;  %v5829_v39 = vor.u32 %v5828_v2, %v5825_v41  ;;  %v5838_v3 = vrot.slane %v5836_v49, 4  ;;  %v5842_v50 = vshll.u32 %v5760_v16, 16  ;;  %v5077_v45 = vadd.f32 %v15997_v7, %v15911_v57 }
 0x367   : > { %5660 = vst [vmem:[#allocation2 + $0x74] sm:$0x1] %v5659_v25  ;;  %v5075_v61 = vadd.f32 %v15911_v57, %v16003_v29  ;;  %v5078_v62 = vadd.f32 %v16007_v6, %v15911_v57  ;;  %v5076_v27 = vadd.f32 %v15911_v57, %v16009_v11  ;;  %12512 = vmatmul.mubr.bf16.vlgmr.msra.gmra.mrb[0].mxu1 %v11329_v37  ;;  %v5847_v48 = vshrl.u32 %v5716_v58, 16  ;;  %v13625_v11 = vld [vmem:[#allocation3 + $0x10] sm:$0xff]   ;;  %v5675_v49 = vld [vmem:[#allocation2 + $0x90] sm:$0xf] }
 0x368   : > { %v5830_v34 = vrot.slane %v5829_v39, 4  ;;  %v5839_v14 = vor.u32 %v5838_v3, %v5834_v17  ;;  %v5844_v30 = vrot.slane %v5842_v50, 5  ;;  %12544 = vmatpush3.bf16.msra.mxu1 %v15905_v12  ;;  %v5109_v19 = vmax.f32 %v5077_v45, 0.0  ;;  %v5672_v38 = vld [vmem:[#allocation2 + $0x8c] sm:$0x1]  ;;  %v13627_v3 = vld [vmem:[#allocation3 + $0x20] sm:$0xff]  }
 0x369   : > { %v5107_v5 = vmax.f32 %v5075_v61, 0.0  ;;  %v5110_v7 = vmax.f32 %v5078_v62, 0.0  ;;  %v5108_v35 = vmax.f32 %v5076_v27, 0.0  ;;  %v5849_v6 = vrot.slane %v5847_v48, 4  ;;  %12545 = vmatprep.subr.bf16.mxu1 %v13624_v28 }
 0x36a   : > { %v5835_v29 = vsel %vm14056_vm2, %v5830_v34, %v5834_v17  ;;  %v5840_v10 = vrot.slane %v5839_v14, 4  ;;  %v5850_v13 = vshll.u32 %v5716_v58, 16  ;;  %v11620_v43 = vpack.c.bf16 %v5109_v19, %v5109_v19  ;;  %v5679_v17 = vld [vmem:[#allocation2 + $0x98] sm:$0x1]  ;;  %v5761_v14 = vld [vmem:[#allocation2 + $0x2c] sm:$0x1] }
 0x36b   : > { %v11618_v56 = vpack.c.bf16 %v5107_v5, %v5107_v5  ;;  %v11621_v23 = vpack.c.bf16 %v5110_v7, %v5110_v7  ;;  %v11619_v22 = vpack.c.bf16 %v5108_v35, %v5108_v35  ;;  %v5856_v8 = vshll.u32 %v5717_v15, 16  ;;  %v16070_v35 = vld [vmem:[#allocation2 + $0x34] sm:$0xf] }
 0x36c   : > { %v5845_v36 = vsel %vm14056_vm2, %v5840_v10, %v5844_v30  ;;  %v5852_v12 = vrot.slane %v5850_v13, 5  ;;  %v5860_v20 = vshrl.u32 %v5717_v15, 16  ;;  %v5460_v4 = vshrl.u32 %v11620_v43, 16  ;;  %12546 = vmatpush3.bf16.msra.mxu1 %v13624_v28  ;;  %v16064_v30 = vld [vmem:[#allocation2 + $0x30] sm:$0xf] }
 0x36d   : > { %v11330_v52 = vcombine.low %v5835_v29, %v5845_v36  ;;  %v5463_v59 = vshll.u32 %v11620_v43, 16  ;;  %v5443_v26 = vshrl.u32 %v11618_v56, 16  ;;  %v5446_v9 = vshll.u32 %v11618_v56, 16  ;;  %12547 = vmatprep.subr.bf16.mxu1 %v13625_v11  ;;  %v5762_v29 = vld [vmem:[#allocation2 + $0x38] sm:$0x1] }
 0x36e   : > { %v5468_v33 = vshrl.u32 %v11621_v23, 16  ;;  %v5471_v47 = vshll.u32 %v11621_v23, 16  ;;  %v5451_v16 = vshrl.u32 %v11619_v22, 16  ;;  %v5462_v41 = vrot.slane %v5460_v4, 7 }
 0x36f   : > { %12515 = vmatprep.mubr.bf16.mxu1 %v11330_v52  ;;  %v5445_v2 = vrot.slane %v5443_v26, 7  ;;  %v5454_v58 = vshll.u32 %v11619_v22, 16  ;;  %v5853_v53 = vor.u32 %v5852_v12, %v5849_v6  ;;  %v5858_v37 = vrot.slane %v5856_v8, 5  ;;  %v13628_v52 = vld [vmem:[#allocation3 + $0x28] sm:$0xff]  }
 0x370   : > { %v5470_v42 = vrot.slane %v5468_v33, 7  ;;  %v5453_v25 = vrot.slane %v5451_v16, 7  ;;  %v5862_v39 = vrot.slane %v5860_v20, 4  ;;  %v5465_v50 = vor.u32 %v5463_v59, %v5462_v41  ;;  %12548 = vmatpush3.bf16.msra.mxu1 %v13625_v11  ;;  %v16090_v16 = vld [vmem:[#allocation2 + $0x3c] sm:$0xf] }
 0x371   : > { %v5466_v28 = vrot.slane %v5462_v41, 4  ;;  %v5448_v45 = vor.u32 %v5446_v9, %v5445_v2  ;;  %v5449_v61 = vrot.slane %v5445_v2, 4  ;;  %12549 = vmatprep.subr.bf16.mxu1 %v13626_v54  ;;  %v5854_v5 = vrot.slane %v5853_v53, 4  ;;  %v13629_v53 = vld [vmem:[#allocation3 + $0x30] sm:$0xff]  }
 0x372   : > { %v5473_v62 = vor.u32 %v5471_v47, %v5470_v42  ;;  %v5475_v27 = vrot.slane %v5470_v42, 4  ;;  %v5456_v15 = vor.u32 %v5454_v58, %v5453_v25  ;;  %v5458_v34 = vrot.slane %v5453_v25, 4 }
 0x373   : > { %v5676_v48 = vsel %vm15920_vm11, %v5465_v50, %v5675_v49  ;;  %v5669_v19 = vsel %vm15920_vm11, %v5448_v45, %v5668_v32  ;;  %v5863_v7 = vor.u32 %v5862_v39, %v5858_v37  ;;  %v5859_v43 = vsel %vm14056_vm2, %v5854_v5, %v5858_v37  ;;  %v13630_v5 = vld [vmem:[#allocation3 + $0x38] sm:$0xff]  }
 0x374   : > { %5677 = vst [vmem:[#allocation2 + $0x90] sm:$0xf] %v5676_v48  ;;  %5670 = vst [vmem:[#allocation2 + $0x84] sm:$0xf] %v5669_v19  ;;  %v5474_v10 = vsel %vm15927_vm12, %v5466_v28, %v5473_v62  ;;  %v5680_v6 = vsel %vm15933_vm13, %v5475_v27, %v5679_v17  ;;  %v5457_v13 = vsel %vm15927_vm12, %v5449_v61, %v5456_v15  ;;  %v5866_v23 = vshll.u32 %v5761_v14, 16 }
 0x375   : > { %v5673_v11 = vsel %vm15933_vm13, %v5458_v34, %v5672_v38  ;;  %5678 = vst [vmem:[#allocation2 + $0x94] sm:$0xf] %v5474_v10  ;;  %5681 = vst [vmem:[#allocation2 + $0x98] sm:$0x1] %v5680_v6  ;;  %v5864_v56 = vrot.slane %v5863_v7, 4  ;;  %v5871_v22 = vshrl.u32 %v16064_v30, 16  ;;  %12550 = vmatpush3.bf16.msra.mxu1 %v13626_v54  ;;  %v5081_v26 = vadd.f32 %v16019_v24, %v15911_v57 }
 0x376   : > { %5671 = vst [vmem:[#allocation2 + $0x88] sm:$0xf] %v5457_v13  ;;  %5674 = vst [vmem:[#allocation2 + $0x8c] sm:$0x1] %v5673_v11  ;;  %v5874_v36 = vshll.u32 %v16064_v30, 16  ;;  %v5880_v12 = vshll.u32 %v16070_v35, 16  ;;  %12551 = vmatprep.subr.bf16.mxu1 %v13627_v3  ;;  %v5079_v49 = vadd.f32 %v15911_v57, %v16021_v55  ;;  %v5082_v17 = vadd.f32 %v16023_v40, %v15911_v57 }
 0x377   : > { %v5884_v8 = vshrl.u32 %v16070_v35, 16  ;;  %v5890_v20 = vshll.u32 %v5762_v29, 16  ;;  %v5868_v4 = vrot.slane %v5866_v23, 5  ;;  %v5873_v59 = vrot.slane %v5871_v22, 4  ;;  %v5689_v15 = vld [vmem:[#allocation2 + $0xa8] sm:$0xf] }
 0x378   : > { %v5876_v9 = vrot.slane %v5874_v36, 5  ;;  %v5882_v32 = vrot.slane %v5880_v12, 5  ;;  %v5113_v41 = vmax.f32 %v5081_v26, 0.0  ;;  %v5111_v2 = vmax.f32 %v5079_v49, 0.0  ;;  %v5682_v34 = vld [vmem:[#allocation2 + $0x9c] sm:$0xf] }
 0x379   : > { %v5886_v33 = vrot.slane %v5884_v8, 4  ;;  %v5892_v47 = vrot.slane %v5890_v20, 5  ;;  %v5869_v54 = vsel %vm14056_vm2, %v5864_v56, %v5868_v4  ;;  %12552 = vmatpush3.bf16.msra.mxu1 %v13627_v3  ;;  %v5080_v55 = vadd.f32 %v15911_v57, %v16029_v21  ;;  %v16104_v19 = vld [vmem:[#allocation2 + $0x40] sm:$0xf]  ;;  %v5763_v6 = vld [vmem:[#allocation2 + $0x44] sm:$0x1] }
 0x37a   : > { %v11331_v58 = vcombine.low %v5859_v43, %v5869_v54  ;;  %v5877_v24 = vor.u32 %v5876_v9, %v5873_v59  ;;  %12553 = vmatprep.subr.bf16.mxu1 %v13628_v52  ;;  %v11624_v42 = vpack.c.bf16 %v5113_v41, %v5113_v41  ;;  %v11622_v25 = vpack.c.bf16 %v5111_v2, %v5111_v2  ;;  %v5693_v20 = vld [vmem:[#allocation2 + $0xb0] sm:$0x1]  ;;  %v16107_v49 = vld [vmem:[#allocation3 + $0x80] sm:$0xff]  }
 0x37b   : > { %v5887_v38 = vor.u32 %v5886_v33, %v5882_v32  ;;  %v5114_v37 = vmax.f32 %v5082_v17, 0.0  ;;  %v5895_v39 = vshrl.u32 %v16090_v16, 16  ;;  %v5112_v45 = vmax.f32 %v5080_v55, 0.0  ;;  %v5686_v33 = vld [vmem:[#allocation2 + $0xa4] sm:$0x1] }
 0x37c   : > { %12516 = vmatmul.mubr.bf16.gmra.mrb[4].mxu1 %v11331_v58  ;;  %v5878_v50 = vrot.slane %v5877_v24, 4  ;;  %v5898_v40 = vshll.u32 %v16090_v16, 16  ;;  %v5494_v3 = vshrl.u32 %v11624_v42, 16  ;;  %v5497_v61 = vshll.u32 %v11624_v42, 16  ;;  %v16114_v24 = vld [vmem:[#allocation2 + $0x48] sm:$0xf] }
 0x37d   : > { %v5888_v28 = vrot.slane %v5887_v38, 4  ;;  %v5477_v62 = vshrl.u32 %v11622_v25, 16  ;;  %v5480_v27 = vshll.u32 %v11622_v25, 16  ;;  %12554 = vmatpush3.bf16.msra.mxu1 %v13628_v52  ;;  %v11625_v14 = vpack.c.bf16 %v5114_v37, %v5114_v37  ;;  %v16116_v38 = vld [vmem:[#allocation2 + $0x4c] sm:$0xf] }
 0x37e   : > { %v5883_v57 = vsel %vm14056_vm2, %v5878_v50, %v5882_v32  ;;  %v11623_v48 = vpack.c.bf16 %v5112_v45, %v5112_v45  ;;  %12555 = vmatprep.subr.bf16.mxu1 %v13629_v53  ;;  %v5496_v29 = vrot.slane %v5494_v3, 7  ;;  %v5897_v13 = vrot.slane %v5895_v39, 4  ;;  %v16118_v37 = vld [vmem:[#allocation2 + $0x50] sm:$0x1] }
 0x37f   : > { %v5893_v21 = vsel %vm14056_vm2, %v5888_v28, %v5892_v47  ;;  %v5479_v10 = vrot.slane %v5477_v62, 7  ;;  %v5502_v11 = vshrl.u32 %v11625_v14, 16  ;;  %v5505_v43 = vshll.u32 %v11625_v14, 16 }
 0x380   : > { %v11332_v7 = vcombine.low %v5883_v57, %v5893_v21  ;;  %v5485_v56 = vshrl.u32 %v11623_v48, 16  ;;  %v5488_v23 = vshll.u32 %v11623_v48, 16  ;;  %v5499_v22 = vor.u32 %v5497_v61, %v5496_v29 }
 0x381   : > { %v5500_v36 = vrot.slane %v5496_v29, 4  ;;  %v5482_v12 = vor.u32 %v5480_v27, %v5479_v10  ;;  %v5483_v8 = vrot.slane %v5479_v10, 4  ;;  %12556 = vmatpush3.bf16.msra.mxu1 %v13629_v53  ;;  %v5504_v52 = vrot.slane %v5502_v11, 7  ;;  %v16140_v11 = vld [vmem:[#allocation2 + $0x54] sm:$0xf] }
 0x382   : > { %12519 = vmatprep.mubr.bf16.mxu1 %v11332_v7  ;;  %v5487_v4 = vrot.slane %v5485_v56, 7  ;;  %v5900_v59 = vrot.slane %v5898_v40, 5  ;;  %v5904_v26 = vshll.u32 %v16104_v19, 16  ;;  %12557 = vmatprep.subr.bf16.mxu1 %v13630_v5  ;;  %v5690_v9 = vsel %vm15920_vm11, %v5499_v22, %v5689_v15  ;;  %v13747_v15 = vld [vmem:[%s17551_s2] ss:$0 sm:$0xff] }
 0x383   : > { %v5683_v32 = vsel %vm15920_vm11, %v5482_v12, %v5682_v34  ;;  %v5908_v47 = vshrl.u32 %v16104_v19, 16  ;;  %v5914_v54 = vshll.u32 %v5763_v6, 16  ;;  %5691 = vst [vmem:[#allocation2 + $0xa8] sm:$0xf] %v5690_v9  ;;  %v5507_v41 = vor.u32 %v5505_v43, %v5504_v52 }
 0x384   : > { %5684 = vst [vmem:[#allocation2 + $0x9c] sm:$0xf] %v5683_v32  ;;  %v5509_v2 = vrot.slane %v5504_v52, 4  ;;  %v5490_v17 = vor.u32 %v5488_v23, %v5487_v4  ;;  %v5492_v58 = vrot.slane %v5487_v4, 4  ;;  %v5901_v55 = vor.u32 %v5900_v59, %v5897_v13 }
 0x385   : > { %v5906_v53 = vrot.slane %v5904_v26, 5  ;;  %v5910_v42 = vrot.slane %v5908_v47, 4  ;;  %v5916_v25 = vrot.slane %v5914_v54, 5  ;;  %12558 = vmatpush3.bf16.msra.mxu1 %v13630_v5  ;;  %v5508_v39 = vsel %vm15927_vm12, %v5500_v36, %v5507_v41  ;;  %v5703_v47 = vld [vmem:[#allocation2 + $0xc0] sm:$0xf] }
 0x386   : > { %v5694_v50 = vsel %vm15933_vm13, %v5509_v2, %v5693_v20  ;;  %v5491_v28 = vsel %vm15927_vm12, %v5483_v8, %v5490_v17  ;;  %v5687_v45 = vsel %vm15933_vm13, %v5492_v58, %v5686_v33  ;;  %12591 = vmatprep.subr.bf16.mxu1 %v16107_v49  ;;  %5692 = vst [vmem:[#allocation2 + $0xac] sm:$0xf] %v5508_v39  ;;  %v5902_v40 = vrot.slane %v5901_v55, 4  ;;  %v16152_v58 = vld [vmem:[#allocation2 + $0x58] sm:$0xf] }
 0x387   : > { %5695 = vst [vmem:[#allocation2 + $0xb0] sm:$0x1] %v5694_v50  ;;  %5685 = vst [vmem:[#allocation2 + $0xa0] sm:$0xf] %v5491_v28  ;;  %v5911_v3 = vor.u32 %v5910_v42, %v5906_v53  ;;  %v5919_v61 = vshrl.u32 %v16114_v24, 16  ;;  %v5922_v62 = vshll.u32 %v16114_v24, 16  ;;  %v5085_v34 = vadd.f32 %v13747_v15, %v16033_v31 }
 0x388   : > { %5688 = vst [vmem:[#allocation2 + $0xa4] sm:$0x1] %v5687_v45  ;;  %v5928_v27 = vshll.u32 %v16116_v38, 16  ;;  %v5932_v57 = vshrl.u32 %v16116_v38, 16  ;;  %v5938_v21 = vshll.u32 %v16118_v37, 16  ;;  %v5907_v14 = vsel %vm14056_vm2, %v5902_v40, %v5906_v53 }
 0x389   : > { %v5912_v48 = vrot.slane %v5911_v3, 4  ;;  %v5921_v5 = vrot.slane %v5919_v61, 4  ;;  %v5924_v7 = vrot.slane %v5922_v62, 5  ;;  %v5117_v13 = vmax.f32 %v5085_v34, 0.0  ;;  %v5696_v61 = vld [vmem:[#allocation2 + $0xb4] sm:$0xf] }
 0x38a   : > { %v5930_v29 = vrot.slane %v5928_v27, 5  ;;  %v5934_v10 = vrot.slane %v5932_v57, 4  ;;  %v5940_v6 = vrot.slane %v5938_v21, 5  ;;  %v5083_v23 = vadd.f32 %v13747_v15, %v16037_v51 }
 0x38b   : > { %v5917_v43 = vsel %vm14056_vm2, %v5912_v48, %v5916_v25  ;;  %v5925_v56 = vor.u32 %v5924_v7, %v5921_v5  ;;  %v5086_v31 = vadd.f32 %v13747_v15, %v16047_v60  ;;  %v11628_v12 = vpack.c.bf16 %v5117_v13, %v5117_v13  ;;  %v16159_v13 = vld [vmem:[#allocation2 + $0x5c] sm:$0x1] }
 0x38c   : > { %v11333_v22 = vcombine.low %v5907_v14, %v5917_v43  ;;  %v5935_v36 = vor.u32 %v5934_v10, %v5930_v29  ;;  %v5084_v8 = vadd.f32 %v13747_v15, %v16049_v63  ;;  %v5115_v52 = vmax.f32 %v5083_v23, 0.0  ;;  %v5707_v15 = vld [vmem:[#allocation2 + $0xc8] sm:$0x1] }
 0x38d   : > { %v5926_v20 = vrot.slane %v5925_v56, 4  ;;  %v5118_v4 = vmax.f32 %v5086_v31, 0.0  ;;  %v5943_v59 = vshrl.u32 %v16140_v11, 16  ;;  %v5528_v9 = vshrl.u32 %v11628_v12, 16 }
 0x38e   : > { %12520 = vmatmul.mubr.bf16.gmra.mrb[8].mxu1 %v11333_v22  ;;  %v5936_v26 = vrot.slane %v5935_v36, 4  ;;  %v5531_v32 = vshll.u32 %v11628_v12, 16  ;;  %v5116_v33 = vmax.f32 %v5084_v8, 0.0  ;;  %v11626_v60 = vpack.c.bf16 %v5115_v52, %v5115_v52  ;;  %v16161_v22 = vld [vmem:[#allocation2 + $0x60] sm:$0xf] }
 0x38f   : > { %v5931_v51 = vsel %vm14056_vm2, %v5926_v20, %v5930_v29  ;;  %v11629_v54 = vpack.c.bf16 %v5118_v4, %v5118_v4  ;;  %v5945_v41 = vrot.slane %v5943_v59, 4  ;;  %v5530_v2 = vrot.slane %v5528_v9, 7  ;;  %v16163_v36 = vld [vmem:[#allocation2 + $0x64] sm:$0xf]  ;;  %v16171_v4 = vld [vmem:[#allocation2 + $0x68] sm:$0x1] }
 0x390   : > { %v5941_v63 = vsel %vm14056_vm2, %v5936_v26, %v5940_v6  ;;  %v11627_v17 = vpack.c.bf16 %v5116_v33, %v5116_v33  ;;  %v5946_v55 = vshll.u32 %v16140_v11, 16  ;;  %v5511_v42 = vshrl.u32 %v11626_v60, 16  ;;  %v5700_v6 = vld [vmem:[#allocation2 + $0xbc] sm:$0x1] }
 0x391   : > { %v11334_v53 = vcombine.low %v5931_v51, %v5941_v63  ;;  %v5514_v25 = vshll.u32 %v11626_v60, 16  ;;  %v5536_v39 = vshrl.u32 %v11629_v54, 16  ;;  %v5533_v50 = vor.u32 %v5531_v32, %v5530_v2  ;;  %v16178_v32 = vld [vmem:[#allocation2 + $0x6c] sm:$0xf] }
 0x392   : > { %v5534_v28 = vrot.slane %v5530_v2, 4  ;;  %v5539_v45 = vshll.u32 %v11629_v54, 16  ;;  %v5519_v40 = vshrl.u32 %v11627_v17, 16  ;;  %v5513_v3 = vrot.slane %v5511_v42, 7  ;;  %v16183_v54 = vld [vmem:[#allocation2 + $0x70] sm:$0xf] }
 0x393   : > { %12523 = vmatprep.mubr.bf16.mxu1 %v11334_v53  ;;  %v5538_v62 = vrot.slane %v5536_v39, 7  ;;  %v5522_v27 = vshll.u32 %v11627_v17, 16  ;;  %v5948_v57 = vrot.slane %v5946_v55, 5  ;;  %v5704_v21 = vsel %vm15920_vm11, %v5533_v50, %v5703_v47  ;;  %v16189_v42 = vld [vmem:[#allocation2 + $0x74] sm:$0x1] }
 0x394   : > { %v5521_v34 = vrot.slane %v5519_v40, 7  ;;  %v5952_v14 = vshll.u32 %v16152_v58, 16  ;;  %v5956_v48 = vshrl.u32 %v16152_v58, 16  ;;  %5705 = vst [vmem:[#allocation2 + $0xc0] sm:$0xf] %v5704_v21  ;;  %v5516_v5 = vor.u32 %v5514_v25, %v5513_v3 }
 0x395   : > { %v5517_v7 = vrot.slane %v5513_v3, 4  ;;  %v5541_v29 = vor.u32 %v5539_v45, %v5538_v62  ;;  %v5543_v10 = vrot.slane %v5538_v62, 4  ;;  %v5949_v23 = vor.u32 %v5948_v57, %v5945_v41  ;;  %v16191_v25 = vld [vmem:[#allocation2 + $0x78] sm:$0xf] }
 0x396   : > { %v5524_v43 = vor.u32 %v5522_v27, %v5521_v34  ;;  %v5526_v56 = vrot.slane %v5521_v34, 4  ;;  %v5954_v31 = vrot.slane %v5952_v14, 5  ;;  %v5697_v12 = vsel %vm15920_vm11, %v5516_v5, %v5696_v61  ;;  %v16199_v27 = vld [vmem:[#allocation2 + $0x7c] sm:$0xf] }
 0x397   : > { %v5542_v8 = vsel %vm15927_vm12, %v5534_v28, %v5541_v29  ;;  %v5708_v20 = vsel %vm15933_vm13, %v5543_v10, %v5707_v15  ;;  %v5958_v52 = vrot.slane %v5956_v48, 4  ;;  %5698 = vst [vmem:[#allocation2 + $0xb4] sm:$0xf] %v5697_v12  ;;  %v5950_v18 = vrot.slane %v5949_v23, 4 }
 0x398   : > { %5706 = vst [vmem:[#allocation2 + $0xc4] sm:$0xf] %v5542_v8  ;;  %5709 = vst [vmem:[#allocation2 + $0xc8] sm:$0x1] %v5708_v20  ;;  %v5525_v59 = vsel %vm15927_vm12, %v5517_v7, %v5524_v43  ;;  %v5701_v26 = vsel %vm15933_vm13, %v5526_v56, %v5700_v6  ;;  %v5962_v9 = vshll.u32 %v16159_v13, 16  ;;  %v5967_v51 = vshrl.u32 %v16161_v22, 16 }
 0x399   : > { %5699 = vst [vmem:[#allocation2 + $0xb8] sm:$0xf] %v5525_v59  ;;  %5702 = vst [vmem:[#allocation2 + $0xbc] sm:$0x1] %v5701_v26  ;;  %v5959_v33 = vor.u32 %v5958_v52, %v5954_v31  ;;  %v5970_v47 = vshll.u32 %v16161_v22, 16  ;;  %v5976_v60 = vshll.u32 %v16163_v36, 16  ;;  %v5955_v44 = vsel %vm14056_vm2, %v5950_v18, %v5954_v31 }
 0x39a   : > { %v5964_v1 = vrot.slane %v5962_v9, 5  ;;  %v5980_v41 = vshrl.u32 %v16163_v36, 16  ;;  %v5986_v63 = vshll.u32 %v16171_v4, 16  ;;  %v5969_v17 = vrot.slane %v5967_v51, 4  ;;  %v16202_v6 = vld [vmem:[#allocation2 + $0x80] sm:$0x1] }
 0x39b   : > { %v5960_v2 = vrot.slane %v5959_v33, 4  ;;  %v5972_v55 = vrot.slane %v5970_v47, 5  ;;  %v5978_v53 = vrot.slane %v5976_v60, 5  ;;  %v5991_v28 = vshrl.u32 %v16178_v32, 16  ;;  %v16209_v20 = vld [vmem:[#allocation2 + $0x84] sm:$0xf] }
 0x39c   : > { %v5982_v39 = vrot.slane %v5980_v41, 4  ;;  %v5988_v50 = vrot.slane %v5986_v63, 5  ;;  %v5994_v45 = vshll.u32 %v16178_v32, 16  ;;  %v6000_v61 = vshll.u32 %v16183_v54, 16  ;;  %v16211_v52 = vld [vmem:[#allocation2 + $0x88] sm:$0xf] }
 0x39d   : > { %v5965_v40 = vsel %vm14056_vm2, %v5960_v2, %v5964_v1  ;;  %v5973_v3 = vor.u32 %v5972_v55, %v5969_v17  ;;  %v6004_v62 = vshrl.u32 %v16183_v54, 16  ;;  %v5993_v15 = vrot.slane %v5991_v28, 4  ;;  %v16220_v2 = vld [vmem:[#allocation2 + $0x90] sm:$0xf] }
 0x39e   : > { %v11335_v57 = vcombine.low %v5955_v44, %v5965_v40  ;;  %v5983_v21 = vor.u32 %v5982_v39, %v5978_v53  ;;  %v5996_v34 = vrot.slane %v5994_v45, 5  ;;  %v6002_v48 = vrot.slane %v6000_v61, 5  ;;  %v16228_v61 = vld [vmem:[#allocation2 + $0x94] sm:$0xf] }
 0x39f   : > { %v5974_v14 = vrot.slane %v5973_v3, 4  ;;  %v6006_v5 = vrot.slane %v6004_v62, 4  ;;  %v6010_v7 = vshll.u32 %v16189_v42, 16  ;;  %v6015_v43 = vshrl.u32 %v16191_v25, 16 }
 0x3a0   : > { %12524 = vmatmul.mubr.bf16.gmra.mrb[12].mxu1 %v11335_v57  ;;  %v5984_v29 = vrot.slane %v5983_v21, 4  ;;  %v5997_v10 = vor.u32 %v5996_v34, %v5993_v15  ;;  %v6018_v56 = vshll.u32 %v16191_v25, 16  ;;  %v6024_v8 = vshll.u32 %v16199_v27, 16 }
 0x3a1   : > { %v5979_v23 = vsel %vm14056_vm2, %v5974_v14, %v5978_v53  ;;  %v6007_v31 = vor.u32 %v6006_v5, %v6002_v48  ;;  %v6012_v12 = vrot.slane %v6010_v7, 5  ;;  %v6017_v18 = vrot.slane %v6015_v43, 4  ;;  %v16224_v53 = vld [vmem:[#allocation2 + $0x8c] sm:$0x1]  ;;  %v16236_v43 = vld [vmem:[#allocation2 + $0x98] sm:$0x1] }
 0x3a2   : > { %v5989_v59 = vsel %vm14056_vm2, %v5984_v29, %v5988_v50  ;;  %v5998_v26 = vrot.slane %v5997_v10, 4  ;;  %v6020_v9 = vrot.slane %v6018_v56, 5  ;;  %v6026_v47 = vrot.slane %v6024_v8, 5 }
 0x3a3   : > { %v11336_v33 = vcombine.low %v5979_v23, %v5989_v59  ;;  %v6008_v51 = vrot.slane %v6007_v31, 4  ;;  %v6028_v60 = vshrl.u32 %v16199_v27, 16  ;;  %v6034_v41 = vshll.u32 %v16202_v6, 16  ;;  %v16240_v59 = vld [vmem:[#allocation2 + $0x9c] sm:$0xf] }
 0x3a4   : > { %v6003_v44 = vsel %vm14056_vm2, %v5998_v26, %v6002_v48  ;;  %v6021_v1 = vor.u32 %v6020_v9, %v6017_v18  ;;  %v6039_v63 = vshrl.u32 %v16209_v20, 16  ;;  %v6042_v39 = vshll.u32 %v16209_v20, 16 }
 0x3a5   : > { %12527 = vmatprep.mubr.bf16.mxu1 %v11336_v33  ;;  %v6013_v17 = vsel %vm14056_vm2, %v6008_v51, %v6012_v12  ;;  %v6030_v55 = vrot.slane %v6028_v60, 4  ;;  %v6048_v50 = vshll.u32 %v16211_v52, 16  ;;  %v6036_v40 = vrot.slane %v6034_v41, 5  ;;  %v16244_v51 = vld [vmem:[#allocation2 + $0xa0] sm:$0xf] }
 0x3a6   : > { %v11337_v28 = vcombine.low %v6003_v44, %v6013_v17  ;;  %v6022_v45 = vrot.slane %v6021_v1, 4  ;;  %v6041_v3 = vrot.slane %v6039_v63, 4  ;;  %v6044_v57 = vrot.slane %v6042_v39, 5  ;;  %v16247_v41 = vld [vmem:[#allocation2 + $0xa8] sm:$0xf] }
 0x3a7   : > { %v6031_v62 = vor.u32 %v6030_v55, %v6026_v47  ;;  %v6050_v21 = vrot.slane %v6048_v50, 5  ;;  %v6052_v15 = vshrl.u32 %v16211_v52, 16  ;;  %v6058_v14 = vshll.u32 %v16224_v53, 16 }
 0x3a8   : > { %12528 = vmatmul.mubr.bf16.gmra.mrb[16].mxu1 %v11337_v28  ;;  %v6027_v34 = vsel %vm14056_vm2, %v6022_v45, %v6026_v47  ;;  %v6063_v48 = vshrl.u32 %v16220_v2, 16  ;;  %v6066_v5 = vshll.u32 %v16220_v2, 16  ;;  %v6045_v29 = vor.u32 %v6044_v57, %v6041_v3 }
 0x3a9   : > { %v6032_v7 = vrot.slane %v6031_v62, 4  ;;  %v6054_v10 = vrot.slane %v6052_v15, 4  ;;  %v6072_v56 = vshll.u32 %v16228_v61, 16  ;;  %v6060_v23 = vrot.slane %v6058_v14, 5 }
 0x3aa   : > { %v6065_v31 = vrot.slane %v6063_v48, 4  ;;  %v6068_v12 = vrot.slane %v6066_v5, 5  ;;  %v6076_v8 = vshrl.u32 %v16228_v61, 16  ;;  %v6046_v18 = vrot.slane %v6045_v29, 4  ;;  %v16263_v29 = vld [vmem:[#allocation2 + $0xb0] sm:$0x1] }
 0x3ab   : > { %v6037_v26 = vsel %vm14056_vm2, %v6032_v7, %v6036_v40  ;;  %v6055_v9 = vor.u32 %v6054_v10, %v6050_v21  ;;  %v6074_v33 = vrot.slane %v6072_v56, 5  ;;  %v6082_v1 = vshll.u32 %v16236_v43, 16  ;;  %v16253_v40 = vld [vmem:[#allocation2 + $0xa4] sm:$0x1]  ;;  %v16265_v10 = vld [vmem:[#allocation2 + $0xb4] sm:$0xf] }
 0x3ac   : > { %v11338_v47 = vcombine.low %v6027_v34, %v6037_v26  ;;  %v6069_v60 = vor.u32 %v6068_v12, %v6065_v31  ;;  %v6078_v44 = vrot.slane %v6076_v8, 4  ;;  %v6051_v63 = vsel %vm14056_vm2, %v6046_v18, %v6050_v21  ;;  %v16259_v34 = vld [vmem:[#allocation2 + $0xac] sm:$0xf]  ;;  %v16269_v8 = vld [vmem:[#allocation2 + $0xb8] sm:$0xf] }
 0x3ad   : > { %v6056_v17 = vrot.slane %v6055_v9, 4  ;;  %v6087_v55 = vshrl.u32 %v16240_v59, 16  ;;  %v6090_v39 = vshll.u32 %v16240_v59, 16  ;;  %v6084_v45 = vrot.slane %v6082_v1, 5 }
 0x3ae   : > { %12531 = vmatprep.mubr.bf16.mxu1 %v11338_v47  ;;  %v6070_v50 = vrot.slane %v6069_v60, 4  ;;  %v6079_v28 = vor.u32 %v6078_v44, %v6074_v33  ;;  %v6096_v3 = vshll.u32 %v16244_v51, 16  ;;  %v6100_v21 = vshrl.u32 %v16244_v51, 16 }
 0x3af   : > { %v6061_v62 = vsel %vm14056_vm2, %v6056_v17, %v6060_v23  ;;  %v6089_v57 = vrot.slane %v6087_v55, 4  ;;  %v6092_v15 = vrot.slane %v6090_v39, 5  ;;  %v6106_v23 = vshll.u32 %v16253_v40, 16 }
 0x3b0   : > { %v11339_v14 = vcombine.low %v6051_v63, %v6061_v62  ;;  %v6075_v48 = vsel %vm14056_vm2, %v6070_v50, %v6074_v33  ;;  %v6080_v5 = vrot.slane %v6079_v28, 4  ;;  %v6098_v7 = vrot.slane %v6096_v3, 5 }
 0x3b1   : > { %v6093_v56 = vor.u32 %v6092_v15, %v6089_v57  ;;  %v6102_v31 = vrot.slane %v6100_v21, 4  ;;  %v6111_v12 = vshrl.u32 %v16247_v41, 16  ;;  %v6114_v18 = vshll.u32 %v16247_v41, 16  ;;  %v16280_v15 = vld [vmem:[#allocation2 + $0xbc] sm:$0x1] }
 0x3b2   : > { %12532 = vmatmul.mubr.bf16.gmra.mrb[20].mxu1 %v11339_v14  ;;  %v6085_v26 = vsel %vm14056_vm2, %v6080_v5, %v6084_v45  ;;  %v6120_v9 = vshll.u32 %v16259_v34, 16  ;;  %v6124_v33 = vshrl.u32 %v16259_v34, 16  ;;  %v6108_v1 = vrot.slane %v6106_v23, 5 }
 0x3b3   : > { %v11340_v47 = vcombine.low %v6075_v48, %v6085_v26  ;;  %v6094_v60 = vrot.slane %v6093_v56, 4  ;;  %v6103_v44 = vor.u32 %v6102_v31, %v6098_v7  ;;  %v6113_v63 = vrot.slane %v6111_v12, 4 }
 0x3b4   : > { %v6116_v17 = vrot.slane %v6114_v18, 5  ;;  %v6122_v55 = vrot.slane %v6120_v9, 5  ;;  %v6126_v39 = vrot.slane %v6124_v33, 4  ;;  %v6130_v45 = vshll.u32 %v16263_v29, 16 }
 0x3b5   : > { %12535 = vmatprep.mubr.bf16.mxu1 %v11340_v47  ;;  %v6099_v50 = vsel %vm14056_vm2, %v6094_v60, %v6098_v7  ;;  %v6104_v28 = vrot.slane %v6103_v44, 4  ;;  %v6135_v3 = vshrl.u32 %v16265_v10, 16  ;;  %v6138_v21 = vshll.u32 %v16265_v10, 16 }
 0x3b6   : > { %v6117_v62 = vor.u32 %v6116_v17, %v6113_v63  ;;  %v6127_v57 = vor.u32 %v6126_v39, %v6122_v55  ;;  %v6144_v14 = vshll.u32 %v16269_v8, 16  ;;  %v6132_v5 = vrot.slane %v6130_v45, 5  ;;  %v13748_v39 = vld [vmem:[#allocation2] sm:$0xf] }
 0x3b7   : > { %v6109_v48 = vsel %vm14056_vm2, %v6104_v28, %v6108_v1  ;;  %v6137_v56 = vrot.slane %v6135_v3, 4  ;;  %v6148_v7 = vshrl.u32 %v16269_v8, 16  ;;  %v6140_v26 = vrot.slane %v6138_v21, 5 }
 0x3b8   : > { %v11341_v31 = vcombine.low %v6099_v50, %v6109_v48  ;;  %v6118_v23 = vrot.slane %v6117_v62, 4  ;;  %v6128_v12 = vrot.slane %v6127_v57, 4  ;;  %v6146_v18 = vrot.slane %v6144_v14, 5  ;;  %v16292_v50 = vld [vmem:[#allocation2 + $0x4] sm:$0xf] }
 0x3b9   : > { %v6150_v9 = vrot.slane %v6148_v7, 4  ;;  %v6154_v33 = vshll.u32 %v16280_v15, 16  ;;  %v6141_v44 = vor.u32 %v6140_v26, %v6137_v56  ;;  %v11352_v28 = vcombine.low %v13748_v39, %v16292_v50  ;;  %v13750_v26 = vld [vmem:[#allocation2 + $0xc] sm:$0xf] }
 0x3ba   : > { %12536 = vmatmul.mubr.bf16.gmra.mrb[24].mxu1 %v11341_v31  ;;  %v6123_v47 = vsel %vm14056_vm2, %v6118_v23, %v6122_v55  ;;  %v6133_v60 = vsel %vm14056_vm2, %v6128_v12, %v6132_v5  ;;  %v11359_v62 = vcombine.low %v16140_v11, %v16152_v58  ;;  %v11360_v55 = vcombine.low %v16161_v22, %v16163_v36  ;;  %v13639_v39 = vld [vmem:[#allocation3 + $0x90] sm:$0xff]   ;;  %v6763_v31 = vld [vmem:[#allocation2 + $0x78] sm:$0xe]  ;;  %v6753_v22 = vld [vmem:[#allocation2] sm:$0xe] }
 0x3bb   : > { %v11342_v1 = vcombine.low %v6123_v47, %v6133_v60  ;;  %v6151_v63 = vor.u32 %v6150_v9, %v6146_v18  ;;  %v6142_v17 = vrot.slane %v6141_v44, 4  ;;  %v6156_v3 = vrot.slane %v6154_v33, 5  ;;  %v13636_v33 = vld [vmem:[#allocation3 + $0x88] sm:$0xff]   ;;  %v13752_v47 = vld [vmem:[#allocation2 + $0x18] sm:$0xf] }
 0x3bc   : > { %v11361_v21 = vcombine.low %v16178_v32, %v16183_v54  ;;  %v11362_v14 = vcombine.low %v16191_v25, %v16199_v27  ;;  %v11363_v48 = vcombine.low %v16209_v20, %v16211_v52  ;;  %v16320_v60 = vld [vmem:[#allocation2 + $0x1c] sm:$0xf]  ;;  %v6862_v12 = vrot.slane %v16171_v4, 5 }
 0x3bd   : > { %12539 = vmatprep.mubr.bf16.mxu1 %v11342_v1  ;;  %v6152_v45 = vrot.slane %v6151_v63, 4  ;;  %v6147_v57 = vsel %vm14056_vm2, %v6142_v17, %v6146_v18  ;;  %v16317_v18 = vld [vmem:[#allocation2 + $0x10] sm:$0xf]  ;;  %v11354_v44 = vcombine.low %v13752_v47, %v16320_v60  ;;  %v6760_v1 = vld [vmem:[#allocation2 + $0x54] sm:$0xe]  ;;  %v6852_v17 = vrot.slane %v16152_v58, 5 }
 0x3be   : > { %v11353_v9 = vcombine.low %v13750_v26, %v16317_v18  ;;  %v6761_v63 = vld [vmem:[#allocation2 + $0x60] sm:$0xe]  ;;  %v17818_v11 = vcombine.low %v16220_v2, %v16228_v61  ;;  %v6803_v58 = vrot.slane %v16292_v50, 5  ;;  %v17820_v25 = vcombine.low %v16247_v41, %v16259_v34  ;;  %v13757_v41 = vld [vmem:[#allocation2 + $0x14] sm:$0x1] }
 0x3bf   : > { %v6157_v5 = vsel %vm14056_vm2, %v6152_v45, %v6156_v3  ;;  %v6859_v45 = vrot.slane %v16163_v36, 5  ;;  %v6762_v3 = vld [vmem:[#allocation2 + $0x6c] sm:$0xe]  ;;  %v6854_v26 = vrot.slane %v6852_v17, 4  ;;  %v11384_v47 = vrot.slane %v6761_v63, 9 }
 0x3c0   : > { %v11343_v23 = vcombine.low %v6147_v57, %v6157_v5  ;;  %v13754_v57 = vld [vmem:[#allocation2 + $0x24] sm:$0xf]  ;;  %v16326_v5 = vld [vmem:[#allocation2 + $0x28] sm:$0xf]  ;;  %v11385_v63 = vrot.slane %v6762_v3, 9  ;;  %v6805_v32 = vrot.slane %v6803_v58, 4 }
 0x3c1   : > { %v13756_v36 = vld [vmem:[#allocation2 + $0x8] sm:$0x1]  ;;  %v6817_v2 = vrot.slane %v16320_v60, 5  ;;  %v6824_v60 = vrot.slane %v16326_v5, 5 }
 0x3c2   : > { %12540 = vmatmul.mubr.bf16.gmra.mrb[28].mxu1 %v11343_v23  ;;  %v11355_v23 = vcombine.low %v13754_v57, %v16326_v5  ;;  %v6873_v57 = vrot.slane %v16199_v27, 5  ;;  %v13760_v5 = vld [vmem:[#allocation2 + $0x2c] sm:$0x1] }
 0x3c3   : > { %12559 = vmatprep.mubr.bf16.mxu1 %v11352_v28  ;;  %v11383_v28 = vrot.slane %v6760_v1, 9  ;;  %v6861_v1 = vrot.slane %v6859_v45, 4 }
 0x3c4   : > { %v6875_v56 = vrot.slane %v6873_v57, 4 }
 0x3c5   : > { %v16350_v4 = vsel %vm14386_vm5, %v6861_v1, %v6862_v12  ;;  %v6880_v1 = vrot.slane %v16211_v52, 5  ;;  %v6810_v52 = vrot.slane %v16317_v18, 5 }
 0x3c7   : > { %v6812_v50 = vrot.slane %v6810_v52, 4 }
 0x3ca   : > { %12560 = vmatmul.mubr.bf16.vlgmr.msra.gmra.mrb[0].mxu1 %v11353_v9  ;;  %v6855_v9 = vrot.slane %v16159_v13, 5  ;;  %v16343_v13 = vsel %vm14386_vm5, %v11384_v47, %v6859_v45  ;;  %v6765_v47 = vld [vmem:[#allocation2 + $0x90] sm:$0xe]  ;;  %v6767_v45 = vld [vmem:[#allocation2 + $0xa8] sm:$0xe] }
 0x3cb   : > { %12563 = vmatprep.mubr.bf16.mxu1 %v11354_v44  ;;  %12592 = vmatpush3.bf16.msra.mxu1 %v16107_v49  ;;  %v11356_v49 = vcombine.low %v16064_v30, %v16070_v35  ;;  %v16334_v44 = vsel %vm14386_vm5, %v11383_v28, %v6852_v17  ;;  %v6866_v30 = vrot.slane %v16183_v54, 5  ;;  %v6764_v35 = vld [vmem:[#allocation2 + $0x84] sm:$0xe]  ;;  %v13642_v17 = vld [vmem:[#allocation3 + $0x98] sm:$0xff]   ;;  %v17819_v54 = vcombine.low %v16240_v59, %v16244_v51 }
 0x3cc   : > { %12593 = vmatprep.subr.bf16.mxu1 %v13636_v33  ;;  %v16339_v7 = vsel %vm14386_vm5, %v6854_v26, %v6855_v9  ;;  %v11386_v26 = vrot.slane %v6763_v31, 9  ;;  %v6876_v9 = vrot.slane %v16202_v6, 5  ;;  %v11387_v12 = vrot.slane %v6764_v35, 9 }
 0x3cd   : > { %v6868_v3 = vrot.slane %v6866_v30, 4  ;;  %v16359_v28 = vsel %vm14386_vm5, %v11385_v63, %v6866_v30  ;;  %v6883_v6 = vrot.slane %v16224_v53, 5  ;;  %v13645_v63 = vld [vmem:[#allocation3 + $0xa0] sm:$0xff]   ;;  %v11388_v35 = vrot.slane %v6765_v47, 9 }
 0x3ce   : > { %v16368_v31 = vsel %vm14386_vm5, %v11386_v26, %v6873_v57  ;;  %v11357_v57 = vcombine.low %v16090_v16, %v16104_v19  ;;  %v6890_v26 = vrot.slane %v16236_v43, 5  ;;  %v16385_v30 = vsel %vm14386_vm5, %v11387_v12, %v6880_v1 }
 0x3cf   : > { %12594 = vmatpush3.bf16.msra.mxu1 %v13636_v33  ;;  %v6869_v33 = vrot.slane %v16189_v42, 5  ;;  %v6894_v16 = vrot.slane %v16244_v51, 5  ;;  %v6901_v12 = vrot.slane %v16259_v34, 5  ;;  %v11358_v19 = vcombine.low %v16114_v24, %v16116_v38  ;;  %v6754_v51 = vld [vmem:[#allocation2 + $0xc] sm:$0xe] }
 0x3d0   : > { %12595 = vmatprep.subr.bf16.mxu1 %v13639_v39  ;;  %v17821_v59 = vcombine.low %v16265_v10, %v16269_v8  ;;  %v6813_v34 = vrot.slane %v13757_v41, 5  ;;  %v13759_v10 = vld [vmem:[#allocation2 + $0x34] sm:$0xf]  ;;  %v6758_v41 = vld [vmem:[#allocation2 + $0x3c] sm:$0xe] }
 0x3d1   : > { %v16364_v42 = vsel %vm14386_vm5, %v6868_v3, %v6869_v33  ;;  %v6766_v33 = vld [vmem:[#allocation2 + $0x9c] sm:$0xe]  ;;  %v6903_v53 = vrot.slane %v6901_v12, 4 }
 0x3d2   : > { %12564 = vmatmul.mubr.bf16.gmra.mrb[4].mxu1 %v11355_v23  ;;  %v6887_v23 = vrot.slane %v16228_v61, 5  ;;  %v11389_v47 = vrot.slane %v6766_v33, 9  ;;  %v6908_v33 = vrot.slane %v16269_v8, 5  ;;  %v6814_v18 = vsel %vm14386_vm5, %v6812_v50, %v6813_v34 }
 0x3d3   : > { %12567 = vmatprep.mubr.bf16.mxu1 %v11356_v49  ;;  %12596 = vmatpush3.bf16.msra.mxu1 %v13639_v39  ;;  %v16376_v39 = vsel %vm14386_vm5, %v6875_v56, %v6876_v9  ;;  %v6882_v49 = vrot.slane %v6880_v1, 4  ;;  %v6768_v1 = vld [vmem:[#allocation2 + $0xb4] sm:$0xe]  ;;  %v6831_v8 = vrot.slane %v13759_v10, 5 }
 0x3d4   : > { %12597 = vmatprep.subr.bf16.mxu1 %v13642_v17  ;;  %v6889_v3 = vrot.slane %v6887_v23, 4  ;;  %v16393_v9 = vsel %vm14386_vm5, %v11388_v35, %v6887_v23  ;;  %v6897_v35 = vrot.slane %v16253_v40, 5 }
 0x3d5   : > { %v16389_v56 = vsel %vm14386_vm5, %v6882_v49, %v6883_v6  ;;  %v13648_v6 = vld [vmem:[#allocation3 + $0xa8] sm:$0xff]   ;;  %v6896_v49 = vrot.slane %v6894_v16, 4 }
 0x3d6   : > { %v16400_v43 = vsel %vm14386_vm5, %v6889_v3, %v6890_v26  ;;  %v6904_v3 = vrot.slane %v16263_v29, 5  ;;  %v16412_v26 = vsel %vm14386_vm5, %v11389_v47, %v6894_v16  ;;  %v6911_v16 = vrot.slane %v16280_v15, 5  ;;  %v13651_v47 = vld [vmem:[#allocation3 + $0xb0] sm:$0xff]   ;;  %v13655_v15 = vld [vmem:[#allocation3 + $0xc0] sm:$0xff]  }
 0x3d7   : > { %12598 = vmatpush3.bf16.msra.mxu1 %v13642_v17  ;;  %v11390_v17 = vrot.slane %v6767_v45, 9  ;;  %v16416_v23 = vsel %vm14386_vm5, %v6896_v49, %v6897_v35  ;;  %v11391_v45 = vrot.slane %v6768_v1, 9  ;;  %v17835_v49 = vcombine.low %v16385_v30, %v16389_v56  ;;  %v8389_v30 = vld [vmem:[#allocation2 + $0xb4] sm:$0xe] }
 0x3d8   : > { %12599 = vmatprep.subr.bf16.mxu1 %v13645_v63  ;;  %v16426_v29 = vsel %vm14386_vm5, %v6903_v53, %v6904_v3 }
 0x3d9   : > { %v16420_v40 = vsel %vm14386_vm5, %v11390_v17, %v6901_v12  ;;  %v16433_v12 = vsel %vm14386_vm5, %v11391_v45, %v6908_v33 }
 0x3da   : > { %12568 = vmatmul.mubr.bf16.gmra.mrb[8].mxu1 %v11357_v57  ;;  %v6910_v57 = vrot.slane %v6908_v33, 4 }
 0x3db   : > { %12571 = vmatprep.mubr.bf16.mxu1 %v11358_v19  ;;  %12600 = vmatpush3.bf16.msra.mxu1 %v13645_v63  ;;  %v13654_v19 = vld [vmem:[#allocation3 + $0xb8] sm:$0xff]  }
 0x3dc   : > { %12601 = vmatprep.subr.bf16.mxu1 %v13648_v6  ;;  %v16437_v63 = vsel %vm14386_vm5, %v6910_v57, %v6911_v16  ;;  %v13656_v57 = vld [vmem:[#allocation3 + $0xc8] sm:$0xff]  }
 0x3df   : > { %12602 = vmatpush3.bf16.msra.mxu1 %v13648_v6  ;;  %v11377_v6 = vrot.slane %v6754_v51, 9 }
 0x3e0   : > { %12603 = vmatprep.subr.bf16.mxu1 %v13651_v47 }
 0x3e1   : > { %v6811_v3 = vsel %vm14386_vm5, %v11377_v6, %v6810_v52  ;;  %v13659_v6 = vld [vmem:[#allocation3 + $0xe0] sm:$0xff]  }
 0x3e2   : > { %12572 = vmatmul.mubr.bf16.gmra.mrb[12].mxu1 %v11359_v62  ;;  %v6806_v62 = vrot.slane %v13756_v36, 5  ;;  %v11393_v33 = vcombine.low %v6811_v3, %v6814_v18  ;;  %v13761_v36 = vld [vmem:[#allocation2 + $0x38] sm:$0x1]  ;;  %v11381_v18 = vrot.slane %v6758_v41, 9 }
 0x3e3   : > { %12575 = vmatprep.mubr.bf16.mxu1 %v11360_v55  ;;  %12604 = vmatpush3.bf16.msra.mxu1 %v13651_v47  ;;  %v11376_v55 = vrot.slane %v6753_v22, 9  ;;  %v6826_v47 = vrot.slane %v6824_v60, 4  ;;  %v6757_v22 = vld [vmem:[#allocation2 + $0x30] sm:$0xe] }
 0x3e4   : > { %12605 = vmatprep.subr.bf16.mxu1 %v13654_v19  ;;  %v6807_v20 = vsel %vm14386_vm5, %v6805_v32, %v6806_v62  ;;  %v6834_v62 = vrot.slane %v13761_v36, 5  ;;  %v17822_v36 = vcombine.low %v16334_v44, %v16339_v7  ;;  %v16526_v7 = vld [vmem:[#allocation2 + $0x50] sm:$0x1] }
 0x3e5   : > { %v6804_v27 = vsel %vm14386_vm5, %v11376_v55, %v6803_v58  ;;  %v6827_v58 = vrot.slane %v13760_v5, 5  ;;  %v13657_v55 = vld [vmem:[#allocation3 + $0xd0] sm:$0xff]   ;;  %v16508_v5 = vld [vmem:[#allocation2 + $0x38] sm:$0x1] }
 0x3e6   : > { %v11392_v61 = vcombine.low %v6804_v27, %v6807_v20  ;;  %v11380_v20 = vrot.slane %v6757_v22, 9 }
 0x3e7   : > { %12606 = vmatpush3.bf16.msra.mxu1 %v13654_v19  ;;  %v6756_v19 = vld [vmem:[#allocation2 + $0x24] sm:$0xe] }
 0x3e8   : > { %12639 = vmatprep.subr.bf16.mxu1 %v13655_v15  ;;  %v11379_v32 = vrot.slane %v6756_v19, 9  ;;  %v6832_v50 = vsel %vm14386_vm5, %v11380_v20, %v6831_v8  ;;  %v16506_v19 = vld [vmem:[#allocation2 + $0x34] sm:$0xf] }
 0x3e9   : > { %v8462_v44 = vrot.slane %v16506_v19, 5 }
 0x3ea   : > { %12576 = vmatmul.mubr.bf16.gmra.mrb[16].mxu1 %v11361_v21  ;;  %v6819_v21 = vrot.slane %v6817_v2, 4 }
 0x3eb   : > { %12579 = vmatprep.mubr.bf16.mxu1 %v11362_v14  ;;  %v6755_v14 = vld [vmem:[#allocation2 + $0x18] sm:$0xe]  ;;  %v8464_v41 = vrot.slane %v8462_v44, 4 }
 0x3ec   : > { %v11378_v35 = vrot.slane %v6755_v14, 9  ;;  %v13763_v14 = vld [vmem:[#allocation2 + $0x44] sm:$0x1] }
 0x3ee   : > { %v6818_v45 = vsel %vm14386_vm5, %v11378_v35, %v6817_v2  ;;  %v6845_v2 = vrot.slane %v16116_v38, 5  ;;  %v6848_v38 = vrot.slane %v16118_v37, 5  ;;  %v13660_v37 = vld [vmem:[#allocation3 + $0xe8] sm:$0xff]  }
 0x3f0   : > { %v6847_v34 = vrot.slane %v6845_v2, 4 }
 0x3f2   : > { %12580 = vmatmul.mubr.bf16.gmra.mrb[20].mxu1 %v11363_v48  ;;  %v13758_v48 = vld [vmem:[#allocation2 + $0x20] sm:$0x1] }
 0x3f3   : > { %12583 = vmatprep.mubr.bf16.mxu1 %v17818_v11  ;;  %v6820_v1 = vrot.slane %v13758_v48, 5  ;;  %v6833_v11 = vrot.slane %v6831_v8, 4  ;;  %v6841_v48 = vrot.slane %v13763_v14, 5 }
 0x3f5   : > { %v6821_v17 = vsel %vm14386_vm5, %v6819_v21, %v6820_v1  ;;  %v6835_v52 = vsel %vm14386_vm5, %v6833_v11, %v6834_v62  ;;  %v6759_v1 = vld [vmem:[#allocation2 + $0x48] sm:$0xe]  ;;  %v8377_v11 = vld [vmem:[#allocation2 + $0x24] sm:$0xe]  ;;  %v16516_v62 = vld [vmem:[#allocation2 + $0x44] sm:$0x1] }
 0x3f6   : > { %v11394_v16 = vcombine.low %v6818_v45, %v6821_v17  ;;  %v11396_v51 = vcombine.low %v6832_v50, %v6835_v52  ;;  %v11382_v35 = vrot.slane %v6759_v1, 9  ;;  %v6849_v17 = vsel %vm14386_vm5, %v6847_v34, %v6848_v38  ;;  %v13661_v45 = vld [vmem:[#allocation3 + $0xf0] sm:$0xff]   ;;  %v8379_v52 = vld [vmem:[#allocation2 + $0x3c] sm:$0xe]  ;;  %v16531_v50 = vld [vmem:[#allocation2 + $0x5c] sm:$0x1] }
 0x3f7   : > { %v11468_v34 = vrot.slane %v8379_v52, 9  ;;  %v16545_v1 = vld [vmem:[#allocation2 + $0x64] sm:$0xf]  ;;  %v17826_v52 = vcombine.low %v16368_v31, %v16376_v39 }
 0x3f8   : > { %v6846_v3 = vsel %vm14386_vm5, %v11382_v35, %v6845_v2  ;;  %v16524_v2 = vld [vmem:[#allocation3 + $0x100] sm:$0xff]  }
 0x3fa   : > { %12584 = vmatmul.mubr.bf16.gmra.mrb[24].mxu1 %v17819_v54  ;;  %v6828_v54 = vsel %vm14386_vm5, %v6826_v47, %v6827_v58  ;;  %v13662_v47 = vld [vmem:[#allocation3 + $0xf8] sm:$0xff]   ;;  %v16510_v58 = vld [vmem:[#allocation2 + $0x40] sm:$0xf] }
 0x3fb   : > { %12587 = vmatprep.mubr.bf16.mxu1 %v17820_v25  ;;  %v13762_v25 = vld [vmem:[#allocation2 + $0x40] sm:$0xf]  ;;  %v8469_v14 = vrot.slane %v16510_v58, 5 }
 0x3fc   : > { %v6838_v27 = vrot.slane %v13762_v25, 5  ;;  %v11466_v25 = vrot.slane %v8377_v11, 9 }
 0x3fe   : > { %v6840_v21 = vrot.slane %v6838_v27, 4  ;;  %v6839_v10 = vsel %vm14386_vm5, %v11381_v18, %v6838_v27 }
 0x402   : > { %12588 = vmatmul.mubr.bf16.gmra.mrb[28].mxu1 %v17821_v59  ;;  %v13658_v59 = vld [vmem:[#allocation3 + $0xd8] sm:$0xff]  }
 0x403   : > { %12607 = vmatprep.mubr.bf16.mxu1 %v11392_v61 }
 0x40a   : > { %12608 = vmatmul.mubr.bf16.vlgmr.msra.gmra.mrb[0].mxu1 %v11393_v33  ;;  %v11398_v33 = vcombine.low %v6846_v3, %v6849_v17  ;;  %v16560_v17 = vsel %vm14386_vm5, %v11468_v34, %v8469_v14  ;;  %v8382_v3 = vld [vmem:[#allocation2 + $0x60] sm:$0xe]  ;;  %v16596_v34 = vld [vmem:[#allocation2 + $0x80] sm:$0x1] }
 0x40b   : > { %12611 = vmatprep.mubr.bf16.mxu1 %v11394_v16  ;;  %12640 = vmatpush3.bf16.msra.mxu1 %v13655_v15  ;;  %v6825_v15 = vsel %vm14386_vm5, %v11379_v32, %v6824_v60  ;;  %v6842_v60 = vsel %vm14386_vm5, %v6840_v21, %v6841_v48  ;;  %v16504_v16 = vld [vmem:[#allocation2 + $0x2c] sm:$0x1]  ;;  %v8378_v32 = vld [vmem:[#allocation2 + $0x30] sm:$0xe]  ;;  %v8381_v48 = vld [vmem:[#allocation2 + $0x54] sm:$0xe] }
 0x40c   : > { %12641 = vmatprep.subr.bf16.mxu1 %v13656_v57  ;;  %v11395_v61 = vcombine.low %v6825_v15, %v6828_v54  ;;  %v11397_v8 = vcombine.low %v6839_v10, %v6842_v60  ;;  %v17823_v54 = vcombine.low %v16343_v13, %v16350_v4  ;;  %v8458_v20 = vrot.slane %v16504_v16, 5  ;;  %v8380_v15 = vld [vmem:[#allocation2 + $0x48] sm:$0xe] }
 0x40d   : > { %v11469_v18 = vrot.slane %v8380_v15, 9  ;;  %v8471_v10 = vrot.slane %v8469_v14, 4 }
 0x40f   : > { %12642 = vmatpush3.bf16.msra.mxu1 %v13656_v57  ;;  %v16502_v57 = vld [vmem:[#allocation2 + $0x28] sm:$0xf] }
 0x410   : > { %12643 = vmatprep.subr.bf16.mxu1 %v13657_v55  ;;  %v8455_v22 = vrot.slane %v16502_v57, 5 }
 0x412   : > { %12612 = vmatmul.mubr.bf16.gmra.mrb[4].mxu1 %v11395_v61  ;;  %v8457_v27 = vrot.slane %v8455_v22, 4  ;;  %v16529_v61 = vld [vmem:[#allocation2 + $0x58] sm:$0xf]  ;;  %v16535_v13 = vsel %vm14386_vm5, %v11466_v25, %v8455_v22  ;;  %v17824_v22 = vcombine.low %v16359_v28, %v16364_v42  ;;  %v8486_v25 = vrot.slane %v16531_v50, 5  ;;  %v16586_v28 = vld [vmem:[#allocation2 + $0x7c] sm:$0xf] }
 0x413   : > { %12615 = vmatprep.mubr.bf16.mxu1 %v11396_v51  ;;  %12644 = vmatpush3.bf16.msra.mxu1 %v13657_v55  ;;  %v16518_v55 = vld [vmem:[#allocation2 + $0x4c] sm:$0xf]  ;;  %v8465_v51 = vrot.slane %v16508_v5, 5  ;;  %v8483_v11 = vrot.slane %v16529_v61, 5  ;;  %v16632_v42 = vld [vmem:[#allocation2 + $0xa0] sm:$0xf] }
 0x414   : > { %12645 = vmatprep.subr.bf16.mxu1 %v13658_v59  ;;  %v16539_v4 = vsel %vm14386_vm5, %v8457_v27, %v8458_v20  ;;  %v8476_v60 = vrot.slane %v16518_v55, 5  ;;  %v8490_v27 = vrot.slane %v16545_v1, 5  ;;  %v8383_v20 = vld [vmem:[#allocation2 + $0x6c] sm:$0xe] }
 0x415   : > { %v16556_v35 = vsel %vm14386_vm5, %v8464_v41, %v8465_v51  ;;  %v8485_v15 = vrot.slane %v8483_v11, 4  ;;  %v8384_v51 = vld [vmem:[#allocation2 + $0x78] sm:$0xe]  ;;  %v16594_v41 = vld [vmem:[#allocation2 + $0x74] sm:$0x1] }
 0x416   : > { %v8492_v14 = vrot.slane %v8490_v27, 4  ;;  %v8500_v31 = vrot.slane %v16594_v41, 5 }
 0x417   : > { %12646 = vmatpush3.bf16.msra.mxu1 %v13658_v59  ;;  %v11467_v59 = vrot.slane %v8378_v32, 9 }
 0x418   : > { %12647 = vmatprep.subr.bf16.mxu1 %v13659_v6 }
 0x419   : > { %v16549_v38 = vsel %vm14386_vm5, %v11467_v59, %v8462_v44  ;;  %v11471_v59 = vrot.slane %v8382_v3, 9 }
 0x41a   : > { %12616 = vmatmul.mubr.bf16.gmra.mrb[8].mxu1 %v11397_v8  ;;  %v8479_v8 = vrot.slane %v16526_v7, 5 }
 0x41b   : > { %12619 = vmatprep.mubr.bf16.mxu1 %v11398_v33  ;;  %12648 = vmatpush3.bf16.msra.mxu1 %v13659_v6  ;;  %v8472_v6 = vrot.slane %v16516_v62, 5 }
 0x41c   : > { %12649 = vmatprep.subr.bf16.mxu1 %v13660_v37 }
 0x41d   : > { %v16575_v32 = vsel %vm14386_vm5, %v8471_v10, %v8472_v6  ;;  %v16605_v6 = vld [vmem:[#allocation2 + $0x88] sm:$0xf]  ;;  %v16613_v10 = vsel %vm14386_vm5, %v11471_v59, %v8490_v27  ;;  %v7659_v27 = vld [vmem:[#allocation2 + $0xa4] sm:$0x1] }
 0x41e   : > { %17830 = vst [vmem:[#allocation15_spill] sm:$0xff] %v16613_v10  ;;  %v8511_v33 = vrot.slane %v16605_v6, 5 }
 0x41f   : > { %12650 = vmatpush3.bf16.msra.mxu1 %v13660_v37  ;;  %v16563_v37 = vld [vmem:[#allocation2 + $0x68] sm:$0x1] }
 0x420   : > { %12651 = vmatprep.subr.bf16.mxu1 %v13661_v45 }
 0x422   : > { %12620 = vmatmul.mubr.bf16.gmra.mrb[12].mxu1 %v17822_v36  ;;  %v16571_v36 = vld [vmem:[#allocation2 + $0x70] sm:$0xf] }
 0x423   : > { %12623 = vmatprep.mubr.bf16.mxu1 %v17823_v54  ;;  %12652 = vmatpush3.bf16.msra.mxu1 %v13661_v45  ;;  %v8478_v45 = vrot.slane %v8476_v60, 4  ;;  %v16579_v54 = vsel %vm14386_vm5, %v11469_v18, %v8476_v60  ;;  %v7653_v18 = vld [vmem:[#allocation2 + $0x8c] sm:$0x1]  ;;  %v16609_v60 = vsel %vm14386_vm5, %v8485_v15, %v8486_v25  ;;  %v8497_v3 = vrot.slane %v16571_v36, 5  ;;  %v7656_v15 = vld [vmem:[#allocation2 + $0x98] sm:$0x1] }
 0x424   : > { %12653 = vmatprep.subr.bf16.mxu1 %v13662_v47  ;;  %17825 = vst [vmem:[#allocation10_spill] sm:$0xff] %v16579_v54  ;;  %17829 = vst [vmem:[#allocation12_spill] sm:$0xff] %v16609_v60  ;;  %v8504_v25 = vrot.slane %v16586_v28, 5  ;;  %v8514_v21 = vrot.slane %v7653_v18, 5  ;;  %v17837_v18 = vcombine.low %v16393_v9, %v16400_v43  ;;  %v16659_v60 = vld [vmem:[#allocation2 + $0xb8] sm:$0xf] }
 0x425   : > { %v16592_v44 = vsel %vm14386_vm5, %v8478_v45, %v8479_v8  ;;  %v11472_v8 = vrot.slane %v8383_v20, 9  ;;  %v16616_v45 = vld [vmem:[#allocation2 + $0x94] sm:$0xf]  ;;  %v8499_v59 = vrot.slane %v8497_v3, 4  ;;  %v8525_v43 = vrot.slane %v16632_v42, 5 }
 0x426   : > { %17827 = vst [vmem:[#allocation24_spill] sm:$0xff] %v16592_v44  ;;  %v8518_v53 = vrot.slane %v16616_v45, 5 }
 0x427   : > { %12654 = vmatpush3.bf16.msra.mxu1 %v13662_v47  ;;  %v11470_v47 = vrot.slane %v8381_v48, 9  ;;  %v8493_v48 = vrot.slane %v16563_v37, 5  ;;  %v16629_v20 = vsel %vm14386_vm5, %v11472_v8, %v8497_v3  ;;  %v16642_v8 = vsel %vm14386_vm5, %v8499_v59, %v8500_v31  ;;  %v8387_v31 = vld [vmem:[#allocation2 + $0x9c] sm:$0xe]  ;;  %v8388_v59 = vld [vmem:[#allocation2 + $0xa8] sm:$0xe] }
 0x428   : > { %12687 = vmatprep.subr.bf16.mxu1 %v16524_v2  ;;  %17832 = vst [vmem:[#allocation14_spill] sm:$0xff] %v16629_v20  ;;  %17834 = vst [vmem:[#allocation17_spill] sm:$0xff] %v16642_v8  ;;  %v8520_v56 = vrot.slane %v8518_v53, 4 }
 0x429   : > { %v16602_v39 = vsel %vm14386_vm5, %v11470_v47, %v8483_v11  ;;  %v16622_v11 = vsel %vm14386_vm5, %v8492_v14, %v8493_v48  ;;  %v8386_v47 = vld [vmem:[#allocation2 + $0x90] sm:$0xe]  ;;  %v8506_v14 = vrot.slane %v8504_v25, 4  ;;  %v8507_v48 = vrot.slane %v16596_v34, 5 }
 0x42a   : > { %12624 = vmatmul.mubr.bf16.gmra.mrb[16].mxu1 %v17824_v22  ;;  %17828 = vst [vmem:[#allocation25_spill] sm:$0xff] %v16602_v39  ;;  %17831 = vst [vmem:[#allocation13_spill] sm:$0xff] %v16622_v11  ;;  %v11473_v22 = vrot.slane %v8384_v51, 9  ;;  %v8513_v11 = vrot.slane %v8511_v33, 4  ;;  %v11475_v10 = vrot.slane %v8386_v47, 9 }
 0x42b   : > { %12627 = vmatprep.mubr.bf16.mxu1 %v17826_v52  ;;  %v8385_v52 = vld [vmem:[#allocation2 + $0x84] sm:$0xe]  ;;  %v16652_v24 = vsel %vm14386_vm5, %v8506_v14, %v8507_v48  ;;  %v7645_v39 = vld [vmem:[#allocation2 + $0x6c] sm:$0xf] }
 0x42c   : > { %v16636_v51 = vsel %vm14386_vm5, %v11473_v22, %v8504_v25  ;;  %v11474_v3 = vrot.slane %v8385_v52, 9  ;;  %v7661_v22 = vld [vmem:[#allocation2 + $0xac] sm:$0xf]  ;;  %17836 = vst [vmem:[#allocation11_spill] sm:$0xff] %v16652_v24  ;;  %v7662_v52 = vld [vmem:[#allocation2 + $0xb0] sm:$0x1]  ;;  %v16667_v47 = vsel %vm14386_vm5, %v8513_v11, %v8514_v21  ;;  %v16671_v9 = vsel %vm14386_vm5, %v11475_v10, %v8518_v53 }
 0x42d   : > { %17833 = vst [vmem:[#allocation16_spill] sm:$0xff] %v16636_v51  ;;  %v7665_v25 = vld [vmem:[#allocation2 + $0xbc] sm:$0x1]  ;;  %17839 = vst [vmem:[#allocation18_spill] sm:$0xff] %v16667_v47  ;;  %v7667_v48 = vld [vmem:[#allocation2 + $0xc4] sm:$0xf]  ;;  %v17846_v21 = vcombine.low %v16412_v26, %v16416_v23 }
 0x42e   : > { %v16663_v14 = vsel %vm14386_vm5, %v11474_v3, %v8511_v33  ;;  %17840 = vst [vmem:[#allocation19_spill] sm:$0xff] %v16671_v9  ;;  %v11476_v33 = vrot.slane %v8387_v31, 9  ;;  %v8532_v3 = vrot.slane %v7661_v22, 5  ;;  %v7668_v24 = vld [vmem:[#allocation2 + $0xc8] sm:$0x1]  ;;  %v8527_v11 = vrot.slane %v8525_v43, 4 }
 0x42f   : > { %17838 = vst [vmem:[#allocation9_spill] sm:$0xff] %v16663_v14  ;;  %v8528_v53 = vrot.slane %v7659_v27, 5  ;;  %v11477_v10 = vrot.slane %v8388_v59, 9  ;;  %v8539_v47 = vrot.slane %v16659_v60, 5  ;;  %v8546_v27 = vrot.slane %v7667_v48, 5  ;;  %v13676_v14 = vld [vmem:[#allocation2 + $0x78] sm:$0xff]  }
 0x430   : > { %v16684_v51 = vsel %vm14386_vm5, %v11476_v33, %v8525_v43  ;;  %v8534_v8 = vrot.slane %v8532_v3, 4  ;;  %v8542_v33 = vrot.slane %v7665_v25, 5  ;;  %v17847_v48 = vcombine.low %v16420_v40, %v16426_v29  ;;  %v13663_v29 = vld [vmem:[#allocation2 + $0xc] sm:$0xff]  }
 0x431   : > { %17842 = vst [vmem:[#allocation21_spill] sm:$0xff] %v16684_v51  ;;  %v16689_v22 = vsel %vm14386_vm5, %v8527_v11, %v8528_v53  ;;  %v16693_v31 = vsel %vm14386_vm5, %v11477_v10, %v8532_v3  ;;  %v8548_v53 = vrot.slane %v8546_v27, 4  ;;  %v13666_v10 = vld [vmem:[#allocation2 + $0x24] sm:$0xff]  }
 0x432   : > { %12628 = vmatmul.mubr.bf16.gmra.mrb[20].mxu1 %v17835_v49  ;;  %v8521_v49 = vrot.slane %v7656_v15, 5  ;;  %v8535_v15 = vrot.slane %v7662_v52, 5  ;;  %17843 = vst [vmem:[#allocation22_spill] sm:$0xff] %v16689_v22  ;;  %17844 = vst [vmem:[#allocation23_spill] sm:$0xff] %v16693_v31  ;;  %v8541_v52 = vrot.slane %v8539_v47, 4  ;;  %v7731_v22 = vshrl.u32 %v16502_v57, 16 }
 0x433   : > { %12631 = vmatprep.mubr.bf16.mxu1 %v17837_v18 }
 0x434   : > { %v16678_v18 = vsel %vm14386_vm5, %v8520_v56, %v8521_v49  ;;  %v8390_v56 = vld [vmem:[#allocation2 + $0xc0] sm:$0xe]  ;;  %v11478_v49 = vrot.slane %v8389_v30, 9  ;;  %v16699_v43 = vsel %vm14386_vm5, %v8534_v8, %v8535_v15  ;;  %v8549_v30 = vrot.slane %v7668_v24, 5  ;;  %v13664_v15 = vld [vmem:[#allocation2 + $0x18] sm:$0xff]  }
 0x435   : > { %17841 = vst [vmem:[#allocation20_spill] sm:$0xff] %v16678_v18  ;;  %17845 = vst [vmem:[#allocation26_spill] sm:$0xff] %v16699_v43  ;;  %v11479_v3 = vrot.slane %v8390_v56, 9  ;;  %v16715_v25 = vsel %vm14386_vm5, %v8541_v52, %v8542_v33  ;;  %v13671_v56 = vld [vmem:[#allocation3 + $0x110] sm:$0xff]  }
 0x436   : > { %v16711_v8 = vsel %vm14386_vm5, %v11478_v49, %v8539_v47  ;;  %17849 = vst [vmem:[#allocation28_spill] sm:$0xff] %v16715_v25  ;;  %v16725_v24 = vsel %vm14386_vm5, %v8548_v53, %v8549_v30  ;;  %v17852_v47 = vcombine.low %v16433_v12, %v16437_v63  ;;  %v7621_v49 = vld [vmem:[#allocation2 + $0xc] sm:$0xf]  ;;  %v7624_v30 = vld [vmem:[#allocation2 + $0x18] sm:$0xf]  ;;  %v13667_v12 = vld [vmem:[#allocation2 + $0x30] sm:$0xff]  }
 0x437   : > { %17848 = vst [vmem:[#allocation27_spill] sm:$0xff] %v16711_v8  ;;  %v16721_v26 = vsel %vm14386_vm5, %v11479_v3, %v8546_v27  ;;  %17851 = vst [vmem:[#allocation30_spill] sm:$0xff] %v16725_v24  ;;  %v7622_v27 = vld [vmem:[#allocation2 + $0x10] sm:$0xf]  ;;  %v7670_v52 = vshrl.u32 %v7621_v49, 16  ;;  %v7673_v33 = vshll.u32 %v7621_v49, 16 }
 0x438   : > { %17850 = vst [vmem:[#allocation29_spill] sm:$0xff] %v16721_v26  ;;  %v7679_v3 = vshll.u32 %v7622_v27, 16  ;;  %v7683_v53 = vshrl.u32 %v7622_v27, 16  ;;  %v13674_v63 = vld [vmem:[#allocation3 + $0x118] sm:$0xff]   ;;  %v7627_v26 = vld [vmem:[#allocation2 + $0x24] sm:$0xf] }
 0x439   : > { %v16733_v27 = vld [vmem:[#allocation2 + $0x14] sm:$0x1]  ;;  %v13670_v8 = vld [vmem:[#allocation2 + $0x48] sm:$0xff]  }
 0x43a   : > { %12632 = vmatmul.mubr.bf16.gmra.mrb[24].mxu1 %v17846_v21  ;;  %v13668_v21 = vld [vmem:[#allocation3 + $0x108] sm:$0xff]   ;;  %v7681_v40 = vrot.slane %v7679_v3, 5  ;;  %v7685_v23 = vrot.slane %v7683_v53, 4  ;;  %v7689_v3 = vshll.u32 %v16733_v27, 16 }
 0x43b   : > { %12635 = vmatprep.mubr.bf16.mxu1 %v17847_v48  ;;  %v13669_v48 = vld [vmem:[#allocation2 + $0x3c] sm:$0xff]  }
 0x43c   : > { %v16738_v53 = vld [vmem:[#allocation2 + $0x20] sm:$0x1] }
 0x442   : > { %12636 = vmatmul.mubr.bf16.gmra.mrb[28].mxu1 %v17852_v47  ;;  %v7694_v47 = vshrl.u32 %v7624_v30, 16 }
 0x443   : > { %12655 = vmatprep.mubr.bf16.mxu1 %v13663_v29  ;;  %v7625_v29 = vld [vmem:[#allocation2 + $0x1c] sm:$0xf] }
 0x444   : > { %v7703_v49 = vshll.u32 %v7625_v29, 16  ;;  %v7707_v11 = vshrl.u32 %v7625_v29, 16  ;;  %v7696_v59 = vrot.slane %v7694_v47, 4  ;;  %v7721_v29 = vshll.u32 %v7627_v26, 16 }
 0x446   : > { %v7723_v31 = vrot.slane %v7721_v29, 5 }
 0x44a   : > { %12656 = vmatmul.mubr.bf16.vlgmr.msra.gmra.mrb[0].mxu1 %v13664_v15  ;;  %v7697_v15 = vshll.u32 %v7624_v30, 16  ;;  %v13680_v30 = vld [vmem:[#allocation3 + $0x128] sm:$0xff]  }
 0x44b   : > { %12659 = vmatprep.mubr.bf16.mxu1 %v13666_v10  ;;  %12688 = vmatpush3.bf16.msra.mxu1 %v16524_v2  ;;  %v7672_v2 = vrot.slane %v7670_v52, 4  ;;  %v7675_v10 = vrot.slane %v7673_v33, 5  ;;  %v7709_v52 = vrot.slane %v7707_v11, 4  ;;  %v13672_v33 = vld [vmem:[#allocation2 + $0x54] sm:$0xff]   ;;  %v7727_v11 = vshll.u32 %v16502_v57, 16  ;;  %v13675_v57 = vld [vmem:[#allocation2 + $0x6c] sm:$0xff]  }
 0x44c   : > { %12689 = vmatprep.subr.bf16.mxu1 %v13668_v21  ;;  %v7699_v24 = vrot.slane %v7697_v15, 5 }
 0x44d   : > { %v7676_v25 = vor.u32 %v7675_v10, %v7672_v2  ;;  %v7713_v10 = vshll.u32 %v16738_v53, 16 }
 0x44e   : > { %v7700_v47 = vor.u32 %v7699_v24, %v7696_v59  ;;  %v7633_v24 = vld [vmem:[#allocation2 + $0x3c] sm:$0xf] }
 0x44f   : > { %12690 = vmatpush3.bf16.msra.mxu1 %v13668_v21  ;;  %v13677_v21 = vld [vmem:[#allocation3 + $0x120] sm:$0xff]  }
 0x450   : > { %12691 = vmatprep.subr.bf16.mxu1 %v13671_v56 }
 0x452   : > { %12660 = vmatmul.mubr.bf16.gmra.mrb[4].mxu1 %v13667_v12  ;;  %v7686_v12 = vor.u32 %v7685_v23, %v7681_v40  ;;  %v13683_v23 = vld [vmem:[#allocation3 + $0x130] sm:$0xff]  }
 0x453   : > { %12663 = vmatprep.mubr.bf16.mxu1 %v13669_v48  ;;  %12692 = vmatpush3.bf16.msra.mxu1 %v13671_v56  ;;  %v16735_v56 = vrot.slane %v7703_v49, 5  ;;  %v7718_v48 = vshrl.u32 %v7627_v26, 16  ;;  %v7691_v49 = vrot.slane %v7689_v3, 5  ;;  %v7701_v26 = vrot.slane %v7700_v47, 4 }
 0x454   : > { %12693 = vmatprep.subr.bf16.mxu1 %v13674_v63  ;;  %v7687_v15 = vrot.slane %v7686_v12, 4  ;;  %v13686_v12 = vld [vmem:[#allocation3 + $0x138] sm:$0xff]   ;;  %v16748_v3 = vrot.slane %v7727_v11, 5  ;;  %v7733_v47 = vrot.slane %v7731_v22, 4  ;;  %v7779_v22 = vshrl.u32 %v16510_v58, 16 }
 0x455   : > { %v7710_v2 = vor.u32 %v7709_v52, %v16735_v56  ;;  %v7720_v43 = vrot.slane %v7718_v48, 4  ;;  %v7737_v48 = vshll.u32 %v16504_v16, 16  ;;  %v7769_v16 = vshll.u32 %v7633_v24, 16 }
 0x456   : > { %v7781_v9 = vrot.slane %v7779_v22, 4 }
 0x457   : > { %12694 = vmatpush3.bf16.msra.mxu1 %v13674_v63  ;;  %v7677_v63 = vrot.slane %v7676_v25, 4  ;;  %v7692_v25 = vsel %vm14056_vm2, %v7687_v15, %v7691_v49  ;;  %v7711_v52 = vrot.slane %v7710_v2, 4  ;;  %v7724_v29 = vor.u32 %v7723_v31, %v7720_v43  ;;  %v7636_v43 = vld [vmem:[#allocation2 + $0x48] sm:$0xf]  ;;  %v16762_v49 = vld [vmem:[#allocation3 + $0x140] sm:$0xff]  }
 0x458   : > { %12695 = vmatprep.subr.bf16.mxu1 %v13677_v21  ;;  %v7751_v15 = vshll.u32 %v16506_v19, 16  ;;  %v7755_v2 = vshrl.u32 %v16506_v19, 16  ;;  %v7775_v31 = vshll.u32 %v16510_v58, 16  ;;  %v7803_v19 = vshrl.u32 %v16518_v55, 16  ;;  %v7639_v58 = vld [vmem:[#allocation2 + $0x54] sm:$0xf] }
 0x459   : > { %v7682_v59 = vsel %vm14056_vm2, %v7677_v63, %v7681_v40  ;;  %v7706_v63 = vsel %vm14056_vm2, %v7701_v26, %v16735_v56  ;;  %v16764_v56 = vrot.slane %v7737_v48, 5  ;;  %v7799_v26 = vshll.u32 %v16518_v55, 16 }
 0x45a   : > { %12664 = vmatmul.mubr.bf16.gmra.mrb[8].mxu1 %v13670_v8  ;;  %v7630_v8 = vld [vmem:[#allocation2 + $0x30] sm:$0xf]  ;;  %v16751_v40 = vcombine.low %v7682_v59, %v7692_v25  ;;  %v7771_v48 = vrot.slane %v7769_v16, 5  ;;  %v16773_v18 = vrot.slane %v7775_v31, 5  ;;  %v7761_v31 = vshll.u32 %v16508_v5, 16 }
 0x45b   : > { %12667 = vmatprep.mubr.bf16.mxu1 %v13672_v33  ;;  %12696 = vmatpush3.bf16.msra.mxu1 %v13677_v21  ;;  %v13673_v21 = vld [vmem:[#allocation2 + $0x60] sm:$0xff]   ;;  %v7715_v33 = vrot.slane %v7713_v10, 5  ;;  %v7745_v51 = vshll.u32 %v7630_v8, 16  ;;  %v7766_v10 = vshrl.u32 %v7633_v24, 16  ;;  %v16771_v24 = vrot.slane %v7751_v15, 5 }
 0x45c   : > { %12697 = vmatprep.subr.bf16.mxu1 %v13680_v30  ;;  %v16776_v55 = vrot.slane %v7799_v26, 5  ;;  %v7642_v26 = vld [vmem:[#allocation2 + $0x60] sm:$0xf] }
 0x45d   : > { %v7716_v11 = vsel %vm14056_vm2, %v7711_v52, %v7715_v33  ;;  %v7747_v25 = vrot.slane %v7745_v51, 5  ;;  %v7793_v52 = vshll.u32 %v7636_v43, 16  ;;  %v7768_v33 = vrot.slane %v7766_v10, 4 }
 0x45e   : > { %v7817_v51 = vshll.u32 %v7639_v58, 16  ;;  %v16778_v15 = vcombine.low %v7706_v63, %v7716_v11  ;;  %v7827_v10 = vshrl.u32 %v16529_v61, 16  ;;  %v7782_v11 = vor.u32 %v7781_v9, %v16773_v18 }
 0x45f   : > { %12698 = vmatpush3.bf16.msra.mxu1 %v13680_v30  ;;  %v7742_v30 = vshrl.u32 %v7630_v8, 16  ;;  %v7734_v8 = vor.u32 %v7733_v47, %v16748_v3  ;;  %v7814_v47 = vshrl.u32 %v7639_v58, 16  ;;  %v7785_v58 = vshll.u32 %v16516_v62, 16 }
 0x460   : > { %12699 = vmatprep.subr.bf16.mxu1 %v13683_v23  ;;  %v7838_v5 = vshrl.u32 %v7642_v26, 16 }
 0x461   : > { %v7744_v59 = vrot.slane %v7742_v30, 4  ;;  %v13678_v30 = vld [vmem:[#allocation2 + $0x84] sm:$0xff]   ;;  %v7735_v16 = vrot.slane %v7734_v8, 4  ;;  %v7816_v20 = vrot.slane %v7814_v47, 4  ;;  %v7829_v8 = vrot.slane %v7827_v10, 4  ;;  %v13681_v10 = vld [vmem:[#allocation2 + $0x9c] sm:$0xff]  }
 0x462   : > { %12668 = vmatmul.mubr.bf16.gmra.mrb[12].mxu1 %v13673_v21  ;;  %v7757_v21 = vrot.slane %v7755_v2, 4  ;;  %v7823_v2 = vshll.u32 %v16529_v61, 16  ;;  %v7819_v61 = vrot.slane %v7817_v51, 5  ;;  %v7787_v47 = vrot.slane %v7785_v58, 5 }
 0x463   : > { %12671 = vmatprep.mubr.bf16.mxu1 %v13675_v57  ;;  %12700 = vmatpush3.bf16.msra.mxu1 %v13683_v23  ;;  %v16768_v23 = vrot.slane %v7724_v29, 4  ;;  %v7790_v57 = vshrl.u32 %v7636_v43, 16  ;;  %v7805_v29 = vrot.slane %v7803_v19, 4  ;;  %v7795_v43 = vrot.slane %v7793_v52, 5 }
 0x464   : > { %12701 = vmatprep.subr.bf16.mxu1 %v13686_v12  ;;  %v7748_v19 = vor.u32 %v7747_v25, %v7744_v59  ;;  %v7758_v63 = vor.u32 %v7757_v21, %v16771_v24  ;;  %v7847_v59 = vshll.u32 %v16545_v1, 16  ;;  %v7851_v25 = vshrl.u32 %v16545_v1, 16 }
 0x465   : > { %v7792_v22 = vrot.slane %v7790_v57, 4  ;;  %v7841_v57 = vshll.u32 %v7642_v26, 16  ;;  %v7740_v62 = vsel %vm14056_vm2, %v7735_v16, %v16764_v56  ;;  %v7763_v21 = vrot.slane %v7761_v31, 5 }
 0x466   : > { %v7759_v9 = vrot.slane %v7758_v63, 4  ;;  %v16800_v54 = vrot.slane %v7847_v59, 5  ;;  %v7853_v56 = vrot.slane %v7851_v25, 4  ;;  %v7862_v58 = vshrl.u32 %v7645_v39, 16 }
 0x467   : > { %12702 = vmatpush3.bf16.msra.mxu1 %v13686_v12  ;;  %v7730_v12 = vsel %vm14056_vm2, %v16768_v23, %v16748_v3  ;;  %v7772_v3 = vor.u32 %v7771_v48, %v7768_v33  ;;  %v7806_v23 = vor.u32 %v7805_v29, %v16776_v55  ;;  %v7796_v52 = vor.u32 %v7795_v43, %v7792_v22  ;;  %v13679_v48 = vld [vmem:[#allocation2 + $0x90] sm:$0xff]  }
 0x468   : > { %12735 = vmatprep.subr.bf16.mxu1 %v16762_v49  ;;  %v7783_v33 = vrot.slane %v7782_v11, 4  ;;  %v7749_v29 = vrot.slane %v7748_v19, 4  ;;  %v7840_v43 = vrot.slane %v7838_v5, 4  ;;  %v7843_v26 = vrot.slane %v7841_v57, 5  ;;  %v16828_v57 = vld [vmem:[#allocation2 + $0x78] sm:$0xf] }
 0x469   : > { %v7807_v51 = vrot.slane %v7806_v23, 4  ;;  %v7773_v22 = vrot.slane %v7772_v3, 4  ;;  %v7797_v1 = vrot.slane %v7796_v52, 4  ;;  %v16802_v16 = vcombine.low %v7730_v12, %v7740_v62  ;;  %v16839_v62 = vld [vmem:[#allocation2 + $0x20] sm:$0x1] }
 0x46a   : > { %12672 = vmatmul.mubr.bf16.gmra.mrb[16].mxu1 %v13676_v14  ;;  %v16791_v14 = vrot.slane %v7823_v2, 5  ;;  %v7820_v2 = vor.u32 %v7819_v61, %v7816_v20  ;;  %v7764_v31 = vsel %vm14056_vm2, %v7759_v9, %v7763_v21  ;;  %v7788_v20 = vsel %vm14056_vm2, %v7783_v33, %v7787_v47  ;;  %17854 = vst [vmem:[#allocation32_spill] sm:$0xff] %v16839_v62  ;;  %v13682_v9 = vld [vmem:[#allocation2 + $0xa8] sm:$0xff]   ;;  %v13684_v47 = vld [vmem:[#allocation2 + $0xb4] sm:$0xff]  }
 0x46b   : > { %12675 = vmatprep.mubr.bf16.mxu1 %v13678_v30  ;;  %v7809_v30 = vshll.u32 %v16526_v7, 16  ;;  %v7833_v19 = vshll.u32 %v16531_v50, 16  ;;  %v7865_v3 = vshll.u32 %v7645_v39, 16  ;;  %v7754_v12 = vsel %vm14056_vm2, %v7749_v29, %v16771_v24  ;;  %v16830_v24 = vld [vmem:[#allocation2 + $0x1c] sm:$0xf] }
 0x46c   : > { %v7830_v7 = vor.u32 %v7829_v8, %v16791_v14  ;;  %v16811_v11 = vrot.slane %v7820_v2, 4  ;;  %v7844_v61 = vor.u32 %v7843_v26, %v7840_v43  ;;  %v7871_v8 = vshll.u32 %v16571_v36, 16  ;;  %17853 = vst [vmem:[#allocation31_spill] sm:$0xff] %v16830_v24  ;;  %v10014_v29 = vld [vmem:[#allocation2 + $0x18] sm:$0xe] }
 0x46d   : > { %v7811_v44 = vrot.slane %v7809_v30, 5  ;;  %v16819_v5 = vcombine.low %v7754_v12, %v7764_v31  ;;  %v7778_v50 = vsel %vm14056_vm2, %v7773_v22, %v16773_v18  ;;  %v7854_v39 = vor.u32 %v7853_v56, %v16800_v54  ;;  %v16841_v18 = vld [vmem:[#allocation2 + $0x28] sm:$0xf]  ;;  %v16860_v22 = vld [vmem:[#allocation2 + $0x34] sm:$0xf] }
 0x46e   : > { %v16816_v23 = vrot.slane %v7830_v7, 4  ;;  %v16832_v52 = vcombine.low %v7778_v50, %v7788_v20  ;;  %v16836_v59 = vrot.slane %v7833_v19, 5  ;;  %17855 = vst [vmem:[#allocation33_spill] sm:$0xff] %v16841_v18  ;;  %v16847_v21 = vrot.slane %v7862_v58, 4  ;;  %17856 = vst [vmem:[#allocation34_spill] sm:$0xff] %v16860_v22  ;;  %v13685_v50 = vld [vmem:[#allocation2 + $0xc0] sm:$0xff]  }
 0x46f   : > { %v7812_v63 = vsel %vm14056_vm2, %v7807_v51, %v7811_v44  ;;  %v7802_v44 = vsel %vm14056_vm2, %v7797_v1, %v16776_v55  ;;  %v16849_v33 = vrot.slane %v7865_v3, 5  ;;  %v16856_v2 = vrot.slane %v7844_v61, 4  ;;  %v10015_v43 = vld [vmem:[#allocation2 + $0x24] sm:$0xe]  ;;  %v16868_v31 = vld [vmem:[#allocation2 + $0x2c] sm:$0x1] }
 0x470   : > { %v16834_v30 = vcombine.low %v7802_v44, %v7812_v63  ;;  %v10080_v7 = vrot.slane %v16830_v24, 5  ;;  %v16863_v26 = vrot.slane %v7854_v39, 4  ;;  %v7886_v1 = vshrl.u32 %v16828_v57, 16  ;;  %17857 = vst [vmem:[#allocation35_spill] sm:$0xff] %v16868_v31  ;;  %v16870_v20 = vld [vmem:[#allocation2 + $0x38] sm:$0x1] }
 0x471   : > { %17858 = vst [vmem:[#allocation36_spill] sm:$0xff] %v16870_v20  ;;  %v16872_v19 = vld [vmem:[#allocation2 + $0x40] sm:$0xf]  ;;  %v11552_v63 = vrot.slane %v10014_v29, 9  ;;  %v10083_v3 = vrot.slane %v16839_v62, 5  ;;  %v10087_v12 = vrot.slane %v16841_v18, 5 }
 0x472   : > { %12676 = vmatmul.mubr.bf16.gmra.mrb[20].mxu1 %v13679_v48  ;;  %v7875_v48 = vshrl.u32 %v16571_v36, 16  ;;  %17859 = vst [vmem:[#allocation37_spill] sm:$0xff] %v16872_v19  ;;  %v10082_v58 = vrot.slane %v10080_v7, 4  ;;  %v11553_v44 = vrot.slane %v10015_v43, 9  ;;  %v10016_v39 = vld [vmem:[#allocation2 + $0x30] sm:$0xe] }
 0x473   : > { %12679 = vmatprep.mubr.bf16.mxu1 %v13681_v10  ;;  %v16858_v10 = vrot.slane %v7871_v8, 5  ;;  %v10089_v36 = vrot.slane %v10087_v12, 4  ;;  %v10090_v25 = vrot.slane %v16868_v31, 5  ;;  %v10017_v55 = vld [vmem:[#allocation2 + $0x3c] sm:$0xe]  ;;  %v10101_v56 = vrot.slane %v16872_v19, 5 }
 0x474   : > { %v16878_v8 = vrot.slane %v7875_v48, 4  ;;  %v16889_v29 = vsel %vm14386_vm5, %v10082_v58, %v10083_v3  ;;  %v16892_v48 = vrot.slane %v7886_v1, 4  ;;  %v16895_v43 = vld [vmem:[#allocation2 + $0x44] sm:$0x1]  ;;  %v16902_v58 = vsel %vm14386_vm5, %v11553_v44, %v10087_v12  ;;  %v10018_v51 = vld [vmem:[#allocation2 + $0x48] sm:$0xe] }
 0x475   : > { %17862 = vst [vmem:[#allocation40_spill] sm:$0xff] %v16889_v29  ;;  %17863 = vst [vmem:[#allocation41_spill] sm:$0xff] %v16895_v43  ;;  %v16906_v3 = vsel %vm14386_vm5, %v10089_v36, %v10090_v25  ;;  %v11554_v1 = vrot.slane %v10016_v39, 9  ;;  %v16909_v31 = vld [vmem:[#allocation2 + $0x58] sm:$0xf]  ;;  %v10103_v36 = vrot.slane %v10101_v56, 4 }
 0x476   : > { %17864 = vst [vmem:[#allocation42_spill] sm:$0xff] %v16902_v58  ;;  %17865 = vst [vmem:[#allocation43_spill] sm:$0xff] %v16906_v3  ;;  %v16916_v44 = vld [vmem:[#allocation2 + $0x5c] sm:$0x1]  ;;  %v10104_v39 = vrot.slane %v16895_v43, 5  ;;  %v11556_v12 = vrot.slane %v10018_v51, 9 }
 0x477   : > { %17866 = vst [vmem:[#allocation44_spill] sm:$0xff] %v16909_v31  ;;  %17867 = vst [vmem:[#allocation45_spill] sm:$0xff] %v16916_v44  ;;  %v10019_v19 = vld [vmem:[#allocation2 + $0x54] sm:$0xe]  ;;  %v16923_v62 = vld [vmem:[#allocation2 + $0x64] sm:$0xf] }
 0x478   : > { %17869 = vst [vmem:[#allocation47_spill] sm:$0xff] %v16923_v62  ;;  %v16935_v58 = vld [vmem:[#allocation2 + $0x70] sm:$0xf]  ;;  %v9283_v18 = vld [vmem:[#allocation2 + $0x74] sm:$0x1] }
 0x479   : > { %17872 = vst [vmem:[#allocation50_spill] sm:$0xff] %v16935_v58  ;;  %v9291_v24 = vld [vmem:[#allocation2 + $0x94] sm:$0xf] }
 0x47a   : > { %12680 = vmatmul.mubr.bf16.gmra.mrb[24].mxu1 %v13682_v9  ;;  %v16881_v9 = vld [vmem:[#allocation2 + $0x4c] sm:$0xf] }
 0x47b   : > { %12683 = vmatprep.mubr.bf16.mxu1 %v13684_v47  ;;  %17860 = vst [vmem:[#allocation38_spill] sm:$0xff] %v16881_v9  ;;  %v16885_v47 = vsel %vm14386_vm5, %v11552_v63, %v10080_v7  ;;  %v10094_v7 = vrot.slane %v16860_v22, 5  ;;  %v9274_v63 = vld [vmem:[#allocation2 + $0x50] sm:$0x1]  ;;  %v11555_v22 = vrot.slane %v10017_v55, 9  ;;  %v10108_v3 = vrot.slane %v16881_v9, 5 }
 0x47c   : > { %17861 = vst [vmem:[#allocation39_spill] sm:$0xff] %v16885_v47  ;;  %v10097_v47 = vrot.slane %v16870_v20, 5  ;;  %v11557_v9 = vrot.slane %v10019_v19, 9  ;;  %v10021_v20 = vld [vmem:[#allocation2 + $0x6c] sm:$0xe] }
 0x47d   : > { %v10096_v29 = vrot.slane %v10094_v7, 4  ;;  %v16920_v25 = vsel %vm14386_vm5, %v11554_v1, %v10094_v7  ;;  %v16931_v55 = vsel %vm14386_vm5, %v11555_v22, %v10101_v56  ;;  %v10020_v7 = vld [vmem:[#allocation2 + $0x60] sm:$0xe]  ;;  %v9280_v1 = vld [vmem:[#allocation2 + $0x68] sm:$0x1]  ;;  %v10115_v22 = vrot.slane %v16909_v31, 5 }
 0x47e   : > { %17868 = vst [vmem:[#allocation46_spill] sm:$0xff] %v16920_v25  ;;  %17871 = vst [vmem:[#allocation49_spill] sm:$0xff] %v16931_v55  ;;  %v9285_v56 = vld [vmem:[#allocation2 + $0x7c] sm:$0xf]  ;;  %v10110_v43 = vrot.slane %v10108_v3, 4  ;;  %v10125_v51 = vrot.slane %v9280_v1, 5 }
 0x47f   : > { %v16927_v61 = vsel %vm14386_vm5, %v10096_v29, %v10097_v47  ;;  %v16941_v47 = vsel %vm14386_vm5, %v10103_v36, %v10104_v39  ;;  %v10111_v29 = vrot.slane %v9274_v63, 5  ;;  %v11558_v36 = vrot.slane %v10020_v7, 9  ;;  %v9286_v39 = vld [vmem:[#allocation2 + $0x80] sm:$0x1]  ;;  %v10022_v55 = vld [vmem:[#allocation2 + $0x78] sm:$0xe] }
 0x480   : > { %17870 = vst [vmem:[#allocation48_spill] sm:$0xff] %v16927_v61  ;;  %17873 = vst [vmem:[#allocation51_spill] sm:$0xff] %v16941_v47  ;;  %v10117_v61 = vrot.slane %v10115_v22, 4  ;;  %v10122_v63 = vrot.slane %v16923_v62, 5  ;;  %v16958_v19 = vsel %vm14386_vm5, %v11557_v9, %v10115_v22  ;;  %v10129_v47 = vrot.slane %v16935_v58, 5 }
 0x481   : > { %v16954_v25 = vsel %vm14386_vm5, %v10110_v43, %v10111_v29  ;;  %v11559_v43 = vrot.slane %v10021_v20, 9  ;;  %v13688_v29 = vld [vmem:[#allocation3 + $0x148] sm:$0xff]   ;;  %v10132_v58 = vrot.slane %v9283_v18, 5  ;;  %v11560_v20 = vrot.slane %v10022_v55, 9  ;;  %v9292_v9 = vld [vmem:[#allocation2 + $0x98] sm:$0x1] }
 0x482   : > { %12684 = vmatmul.mubr.bf16.gmra.mrb[28].mxu1 %v13685_v50  ;;  %v16949_v50 = vsel %vm14386_vm5, %v11556_v12, %v10108_v3  ;;  %17874 = vst [vmem:[#allocation52_spill] sm:$0xff] %v16954_v25  ;;  %v9289_v3 = vld [vmem:[#allocation2 + $0x8c] sm:$0x1]  ;;  %v10124_v62 = vrot.slane %v10122_v63, 4  ;;  %v16971_v1 = vsel %vm14386_vm5, %v11558_v36, %v10122_v63  ;;  %v10131_v22 = vrot.slane %v10129_v47, 4 }
 0x483   : > { %12703 = vmatprep.mubr.bf16.mxu1 %v16751_v40  ;;  %v10118_v40 = vrot.slane %v16916_v44, 5  ;;  %v9288_v44 = vld [vmem:[#allocation2 + $0x88] sm:$0xf]  ;;  %v10023_v31 = vld [vmem:[#allocation2 + $0x84] sm:$0xe] }
 0x484   : > { %v16975_v12 = vsel %vm14386_vm5, %v10124_v62, %v10125_v51  ;;  %v10024_v25 = vld [vmem:[#allocation2 + $0x90] sm:$0xe]  ;;  %v9294_v36 = vld [vmem:[#allocation2 + $0xa0] sm:$0xf]  ;;  %v16986_v63 = vsel %vm14386_vm5, %v10131_v22, %v10132_v58  ;;  %v10139_v62 = vrot.slane %v9286_v39, 5  ;;  %v10143_v51 = vrot.slane %v9288_v44, 5 }
 0x485   : > { %v16965_v7 = vsel %vm14386_vm5, %v10117_v61, %v10118_v40  ;;  %17876 = vst [vmem:[#allocation54_spill] sm:$0xff] %v16975_v12  ;;  %v16979_v61 = vsel %vm14386_vm5, %v11559_v43, %v10129_v47  ;;  %v10136_v40 = vrot.slane %v9285_v56, 5  ;;  %17878 = vst [vmem:[#allocation56_spill] sm:$0xff] %v16986_v63  ;;  %v10146_v56 = vrot.slane %v9289_v3, 5  ;;  %v10025_v43 = vld [vmem:[#allocation2 + $0x9c] sm:$0xe] }
 0x486   : > { %17875 = vst [vmem:[#allocation53_spill] sm:$0xff] %v16965_v7  ;;  %17877 = vst [vmem:[#allocation55_spill] sm:$0xff] %v16979_v61  ;;  %v13689_v7 = vld [vmem:[#allocation3 + $0x150] sm:$0xff]   ;;  %v9295_v18 = vld [vmem:[#allocation2 + $0xa4] sm:$0x1]  ;;  %v10145_v39 = vrot.slane %v10143_v51, 4 }
 0x487   : > { %v10138_v47 = vrot.slane %v10136_v40, 4  ;;  %v16994_v58 = vsel %vm14386_vm5, %v11560_v20, %v10136_v40  ;;  %v11562_v44 = vrot.slane %v10024_v25, 9  ;;  %v10150_v22 = vrot.slane %v9291_v24, 5  ;;  %v9298_v12 = vld [vmem:[#allocation2 + $0xb0] sm:$0x1] }
 0x488   : > { %17879 = vst [vmem:[#allocation57_spill] sm:$0xff] %v16994_v58  ;;  %v10153_v3 = vrot.slane %v9292_v9, 5  ;;  %v10157_v55 = vrot.slane %v9294_v36, 5  ;;  %v9300_v63 = vld [vmem:[#allocation2 + $0xb8] sm:$0xf]  ;;  %v17008_v25 = vsel %vm14386_vm5, %v10145_v39, %v10146_v56  ;;  %v11563_v40 = vrot.slane %v10025_v43, 9 }
 0x489   : > { %17881 = vst [vmem:[#allocation59_spill] sm:$0xff] %v17008_v25  ;;  %v10152_v24 = vrot.slane %v10150_v22, 4  ;;  %v10026_v61 = vld [vmem:[#allocation2 + $0xa8] sm:$0xe]  ;;  %v13690_v20 = vld [vmem:[#allocation3 + $0x158] sm:$0xff]   ;;  %v17018_v56 = vsel %vm14386_vm5, %v11562_v44, %v10150_v22  ;;  %v10171_v25 = vrot.slane %v9300_v63, 5 }
 0x48a   : > { %12704 = vmatmul.mubr.bf16.vlgmr.msra.gmra.mrb[0].mxu1 %v16778_v15  ;;  %v11561_v15 = vrot.slane %v10023_v31, 9  ;;  %v10159_v36 = vrot.slane %v10157_v55, 4  ;;  %v9303_v58 = vld [vmem:[#allocation2 + $0xc4] sm:$0xf]  ;;  %v17026_v43 = vsel %vm14386_vm5, %v11563_v40, %v10157_v55  ;;  %v11564_v9 = vrot.slane %v10026_v61, 9  ;;  %v13691_v63 = vld [vmem:[#allocation3 + $0x160] sm:$0xff]  }
 0x48b   : > { %12707 = vmatprep.mubr.bf16.mxu1 %v16802_v16  ;;  %12736 = vmatpush3.bf16.msra.mxu1 %v16762_v49  ;;  %v9297_v16 = vld [vmem:[#allocation2 + $0xac] sm:$0xf]  ;;  %v16998_v49 = vsel %vm14386_vm5, %v10138_v47, %v10139_v62  ;;  %v17882_v62 = vshll.u32 %v16586_v28, 16  ;;  %v10028_v44 = vld [vmem:[#allocation2 + $0xc0] sm:$0xe]  ;;  %v10167_v55 = vrot.slane %v9298_v12, 5 }
 0x48c   : > { %12737 = vmatprep.subr.bf16.mxu1 %v13688_v29  ;;  %17880 = vst [vmem:[#allocation58_spill] sm:$0xff] %v16998_v49  ;;  %v17002_v31 = vsel %vm14386_vm5, %v11561_v15, %v10143_v51  ;;  %v10160_v51 = vrot.slane %v9295_v18, 5  ;;  %v10027_v15 = vld [vmem:[#allocation2 + $0xb4] sm:$0xe]  ;;  %v9301_v49 = vld [vmem:[#allocation2 + $0xbc] sm:$0x1] }
 0x48d   : > { %v17012_v47 = vrot.slane %v17882_v62, 5  ;;  %v10164_v39 = vrot.slane %v9297_v16, 5  ;;  %v9304_v22 = vld [vmem:[#allocation2 + $0xc8] sm:$0x1]  ;;  %v11565_v40 = vrot.slane %v10027_v15, 9  ;;  %v17884_v16 = vshrl.u32 %v16586_v28, 16 }
 0x48e   : > { %v17032_v62 = vsel %vm14386_vm5, %v10159_v36, %v10160_v51  ;;  %v10173_v36 = vrot.slane %v10171_v25, 4  ;;  %v10174_v51 = vrot.slane %v9301_v49, 5  ;;  %v10178_v61 = vrot.slane %v9303_v58, 5  ;;  %v17953_v46 = vld [vmem:[#allocation52_spill] sm:$0xff] }
 0x48f   : > { %12738 = vmatpush3.bf16.msra.mxu1 %v13688_v29  ;;  %v17022_v29 = vsel %vm14386_vm5, %v10152_v24, %v10153_v3  ;;  %v11579_v3 = vcombine.low %v17026_v43, %v17032_v62  ;;  %v10166_v24 = vrot.slane %v10164_v39, 4  ;;  %v7901_v18 = vrot.slane %v17884_v16, 4 }
 0x490   : > { %12739 = vmatprep.subr.bf16.mxu1 %v13689_v7  ;;  %17883 = vst [vmem:[#allocation60_spill] sm:$0xff] %v17022_v29  ;;  %v7651_v29 = vld [vmem:[#allocation2 + $0x84] sm:$0xf]  ;;  %v11566_v28 = vrot.slane %v10028_v44, 9  ;;  %v17056_v58 = vsel %vm14386_vm5, %v10173_v36, %v10174_v51  ;;  %v10180_v49 = vrot.slane %v10178_v61, 4  ;;  %v10181_v15 = vrot.slane %v9304_v22, 5 }
 0x491   : > { %v17046_v12 = vsel %vm14386_vm5, %v10166_v24, %v10167_v55  ;;  %v7919_v24 = vshll.u32 %v16605_v6, 16  ;;  %v7923_v55 = vshrl.u32 %v16605_v6, 16  ;;  %v7910_v44 = vshrl.u32 %v7651_v29, 16 }
 0x492   : > { %12708 = vmatmul.mubr.bf16.gmra.mrb[4].mxu1 %v16819_v5  ;;  %v17042_v5 = vsel %vm14386_vm5, %v11564_v9, %v10164_v39  ;;  %v17885_v9 = vshll.u32 %v16828_v57, 16  ;;  %v17066_v16 = vsel %vm14386_vm5, %v11566_v28, %v10178_v61  ;;  %v17070_v22 = vsel %vm14386_vm5, %v10180_v49, %v10181_v15 }
 0x493   : > { %12711 = vmatprep.mubr.bf16.mxu1 %v16832_v52  ;;  %12740 = vmatpush3.bf16.msra.mxu1 %v13689_v7  ;;  %v17050_v52 = vsel %vm14386_vm5, %v11565_v40, %v10171_v25  ;;  %v11580_v7 = vcombine.low %v17042_v5, %v17046_v12  ;;  %v7913_v40 = vshll.u32 %v7651_v29, 16  ;;  %v17886_v57 = vor.u32 %v16849_v33, %v16847_v21  ;;  %v13692_v29 = vld [vmem:[#allocation3 + $0x168] sm:$0xff]  }
 0x494   : > { %12741 = vmatprep.subr.bf16.mxu1 %v13690_v20  ;;  %v7891_v39 = vrot.slane %v17885_v9, 5  ;;  %v11581_v25 = vcombine.low %v17050_v52, %v17056_v58  ;;  %v17887_v6 = vor.u32 %v16878_v8, %v16858_v10  ;;  %v11582_v61 = vcombine.low %v17066_v16, %v17070_v22 }
 0x495   : > { %v7869_v36 = vrot.slane %v17886_v57, 4  ;;  %v17888_v28 = vsel %vm14056_vm2, %v16816_v23, %v16836_v59  ;;  %v17889_v21 = vsel %vm14056_vm2, %v16811_v11, %v16791_v14  ;;  %v17890_v8 = vshll.u32 %v16563_v37, 16  ;;  %v7654_v23 = vld [vmem:[#allocation2 + $0x90] sm:$0xf] }
 0x496   : > { %v7879_v51 = vrot.slane %v17887_v6, 4  ;;  %v11446_v33 = vcombine.low %v17889_v21, %v17888_v28  ;;  %v7905_v9 = vshll.u32 %v16596_v34, 16  ;;  %v17097_v57 = vrot.slane %v7919_v24, 5 }
 0x497   : > { %12742 = vmatpush3.bf16.msra.mxu1 %v13690_v20  ;;  %v7902_v20 = vor.u32 %v7901_v18, %v17012_v47  ;;  %v7859_v49 = vrot.slane %v17890_v8, 5  ;;  %v17891_v18 = vshll.u32 %v16594_v41, 16  ;;  %v7925_v6 = vrot.slane %v7923_v55, 4  ;;  %v13693_v55 = vld [vmem:[#allocation3 + $0x170] sm:$0xff]  }
 0x498   : > { %12743 = vmatprep.subr.bf16.mxu1 %v13691_v63  ;;  %v7850_v14 = vsel %vm14056_vm2, %v16856_v2, %v16800_v54  ;;  %v7892_v37 = vor.u32 %v7891_v39, %v16892_v48  ;;  %v7912_v11 = vrot.slane %v7910_v44, 4  ;;  %v7915_v59 = vrot.slane %v7913_v40, 5  ;;  %v7657_v39 = vld [vmem:[#allocation2 + $0x9c] sm:$0xf] }
 0x499   : > { %v7883_v15 = vrot.slane %v17891_v18, 5  ;;  %v7860_v41 = vsel %vm14056_vm2, %v16863_v26, %v7859_v49  ;;  %v7874_v34 = vsel %vm14056_vm2, %v7869_v36, %v16858_v10  ;;  %v7903_v24 = vrot.slane %v7902_v20, 4  ;;  %v13694_v18 = vld [vmem:[#allocation3 + $0x178] sm:$0xff]  }
 0x49a   : > { %12712 = vmatmul.mubr.bf16.gmra.mrb[8].mxu1 %v16834_v30  ;;  %v7934_v54 = vshrl.u32 %v7654_v23, 16  ;;  %v7937_v2 = vshll.u32 %v7654_v23, 16  ;;  %v7943_v48 = vshll.u32 %v16616_v45, 16  ;;  %v7907_v44 = vrot.slane %v7905_v9, 5 }
 0x49b   : > { %12715 = vmatprep.mubr.bf16.mxu1 %v11446_v33  ;;  %12744 = vmatpush3.bf16.msra.mxu1 %v13691_v63  ;;  %v7884_v30 = vsel %vm14056_vm2, %v7879_v51, %v7883_v15  ;;  %v7947_v63 = vshrl.u32 %v16616_v45, 16  ;;  %v7926_v26 = vor.u32 %v7925_v6, %v17097_v57  ;;  %v7967_v40 = vshll.u32 %v16632_v42, 16  ;;  %v13764_v33 = vld [vmem:[#allocation2 + $0x8c] sm:$0x1] }
 0x49c   : > { %12745 = vmatprep.subr.bf16.mxu1 %v13692_v29  ;;  %v7971_v10 = vshrl.u32 %v16632_v42, 16  ;;  %v11447_v36 = vcombine.low %v7850_v14, %v7860_v41  ;;  %v11448_v28 = vcombine.low %v7874_v34, %v7884_v30  ;;  %v7893_v51 = vrot.slane %v7892_v37, 4 }
 0x49d   : > { %v7916_v20 = vor.u32 %v7915_v59, %v7912_v11  ;;  %v7908_v21 = vsel %vm14056_vm2, %v7903_v24, %v7907_v44  ;;  %v7929_v8 = vshll.u32 %v13764_v33, 16  ;;  %v7958_v49 = vshrl.u32 %v7657_v39, 16  ;;  %v7660_v24 = vld [vmem:[#allocation2 + $0xa8] sm:$0xf] }
 0x49e   : > { %v7961_v45 = vshll.u32 %v7657_v39, 16  ;;  %v7936_v15 = vrot.slane %v7934_v54, 4  ;;  %v7939_v9 = vrot.slane %v7937_v2, 5  ;;  %v17119_v6 = vrot.slane %v7943_v48, 5  ;;  %v17126_v54 = vld [vmem:[#allocation3 + $0x180] sm:$0xff]  }
 0x49f   : > { %12746 = vmatpush3.bf16.msra.mxu1 %v13692_v29  ;;  %v7949_v23 = vrot.slane %v7947_v63, 4  ;;  %v7927_v42 = vrot.slane %v7926_v26, 4  ;;  %v17121_v14 = vrot.slane %v7967_v40, 5  ;;  %v7973_v37 = vrot.slane %v7971_v10, 4  ;;  %v13765_v63 = vld [vmem:[#allocation2 + $0xac] sm:$0xf] }
 0x4a0   : > { %12747 = vmatprep.subr.bf16.mxu1 %v13693_v55  ;;  %v7898_v29 = vsel %vm14056_vm2, %v7893_v51, %v17012_v47  ;;  %v7917_v11 = vrot.slane %v7916_v20, 4  ;;  %v7931_v41 = vrot.slane %v7929_v8, 5  ;;  %v7960_v34 = vrot.slane %v7958_v49, 4  ;;  %v7663_v26 = vld [vmem:[#allocation2 + $0xb4] sm:$0xf] }
 0x4a1   : > { %v11449_v59 = vcombine.low %v7898_v29, %v7908_v21  ;;  %v7963_v30 = vrot.slane %v7961_v45, 5  ;;  %v7940_v2 = vor.u32 %v7939_v9, %v7936_v15  ;;  %v7950_v48 = vor.u32 %v7949_v23, %v17119_v6  ;;  %v13767_v8 = vld [vmem:[#allocation2 + $0xa4] sm:$0x1] }
 0x4a2   : > { %12716 = vmatmul.mubr.bf16.gmra.mrb[12].mxu1 %v11447_v36  ;;  %v7991_v39 = vshll.u32 %v13765_v63, 16  ;;  %v7995_v44 = vshrl.u32 %v13765_v63, 16  ;;  %v7932_v47 = vsel %vm14056_vm2, %v7927_v42, %v7931_v41  ;;  %v8015_v40 = vshll.u32 %v16659_v60, 16 }
 0x4a3   : > { %12719 = vmatprep.mubr.bf16.mxu1 %v11448_v28  ;;  %12748 = vmatpush3.bf16.msra.mxu1 %v13693_v55  ;;  %v7974_v55 = vor.u32 %v7973_v37, %v17121_v14  ;;  %v8019_v10 = vshrl.u32 %v16659_v60, 16  ;;  %v7922_v36 = vsel %vm14056_vm2, %v7917_v11, %v17097_v57  ;;  %v13766_v28 = vld [vmem:[#allocation2 + $0x98] sm:$0x1]  ;;  %v7982_v20 = vshrl.u32 %v7660_v24, 16 }
 0x4a4   : > { %12749 = vmatprep.subr.bf16.mxu1 %v13694_v18  ;;  %v7953_v51 = vshll.u32 %v13766_v28, 16  ;;  %v7985_v21 = vshll.u32 %v7660_v24, 16  ;;  %v7964_v33 = vor.u32 %v7963_v30, %v7960_v34  ;;  %v7977_v49 = vshll.u32 %v13767_v8, 16 }
 0x4a5   : > { %v8006_v45 = vshrl.u32 %v7663_v26, 16  ;;  %v8009_v15 = vshll.u32 %v7663_v26, 16  ;;  %v11450_v9 = vcombine.low %v7922_v36, %v7932_v47  ;;  %v7951_v23 = vrot.slane %v7950_v48, 4  ;;  %v7666_v26 = vld [vmem:[#allocation2 + $0xc0] sm:$0xf] }
 0x4a6   : > { %v7993_v42 = vrot.slane %v7991_v39, 5  ;;  %v7997_v60 = vrot.slane %v7995_v44, 4  ;;  %v7941_v37 = vrot.slane %v7940_v2, 4  ;;  %v7975_v29 = vrot.slane %v7974_v55, 4  ;;  %v13768_v39 = vld [vmem:[#allocation2 + $0xc4] sm:$0xf] }
 0x4a7   : > { %12750 = vmatpush3.bf16.msra.mxu1 %v13694_v18  ;;  %v8017_v57 = vrot.slane %v8015_v40, 5  ;;  %v8021_v11 = vrot.slane %v8019_v10, 4  ;;  %v7955_v41 = vrot.slane %v7953_v51, 5  ;;  %v7984_v24 = vrot.slane %v7982_v20, 4  ;;  %v13769_v36 = vld [vmem:[#allocation2 + $0xb0] sm:$0x1] }
 0x4a8   : > { %12783 = vmatprep.subr.bf16.mxu1 %v17126_v54  ;;  %v7987_v18 = vrot.slane %v7985_v21, 5  ;;  %v7965_v34 = vrot.slane %v7964_v33, 4  ;;  %v7979_v30 = vrot.slane %v7977_v49, 5  ;;  %v8008_v63 = vrot.slane %v8006_v45, 4  ;;  %v13770_v45 = vld [vmem:[#allocation2 + $0xbc] sm:$0x1] }
 0x4a9   : > { %v8011_v28 = vrot.slane %v8009_v15, 5  ;;  %v7956_v47 = vsel %vm14056_vm2, %v7951_v23, %v7955_v41  ;;  %v7998_v48 = vor.u32 %v7997_v60, %v7993_v42  ;;  %v8039_v44 = vshll.u32 %v13768_v39, 16 }
 0x4aa   : > { %12720 = vmatmul.mubr.bf16.gmra.mrb[16].mxu1 %v11449_v59  ;;  %v8043_v59 = vshrl.u32 %v13768_v39, 16  ;;  %v7946_v2 = vsel %vm14056_vm2, %v7941_v37, %v17119_v6  ;;  %v7980_v55 = vsel %vm14056_vm2, %v7975_v29, %v7979_v30  ;;  %v8022_v40 = vor.u32 %v8021_v11, %v8017_v57  ;;  %v13772_v39 = vld [vmem:[#allocation2 + $0xc8] sm:$0x1] }
 0x4ab   : > { %12723 = vmatprep.mubr.bf16.mxu1 %v11450_v9  ;;  %v7988_v10 = vor.u32 %v7987_v18, %v7984_v24  ;;  %v8001_v51 = vshll.u32 %v13769_v36, 16  ;;  %v8030_v20 = vshrl.u32 %v7666_v26, 16  ;;  %v8033_v21 = vshll.u32 %v7666_v26, 16 }
 0x4ac   : > { %v11451_v33 = vcombine.low %v7946_v2, %v7956_v47  ;;  %v7970_v8 = vsel %vm14056_vm2, %v7965_v34, %v17121_v14  ;;  %v8012_v49 = vor.u32 %v8011_v28, %v8008_v63  ;;  %v8025_v15 = vshll.u32 %v13770_v45, 16  ;;  %v13771_v63 = vld [vmem:[#allocation2 + $0x10] sm:$0xf] }
 0x4ad   : > { %v11452_v9 = vcombine.low %v7970_v8, %v7980_v55  ;;  %v7999_v23 = vrot.slane %v7998_v48, 4  ;;  %v8041_v6 = vrot.slane %v8039_v44, 5  ;;  %v8045_v60 = vrot.slane %v8043_v59, 4 }
 0x4ae   : > { %v8023_v37 = vrot.slane %v8022_v40, 4  ;;  %v7989_v29 = vrot.slane %v7988_v10, 4  ;;  %v8003_v11 = vrot.slane %v8001_v51, 5  ;;  %v8032_v41 = vrot.slane %v8030_v20, 4  ;;  %v8375_v20 = vld [vmem:[#allocation2 + $0xc] sm:$0xe] }
 0x4af   : > { %v8035_v24 = vrot.slane %v8033_v21, 5  ;;  %v8013_v18 = vrot.slane %v8012_v49, 4  ;;  %v8027_v30 = vrot.slane %v8025_v15, 5  ;;  %v8046_v14 = vor.u32 %v8045_v60, %v8041_v6 }
 0x4b0   : > { %v8004_v26 = vsel %vm14056_vm2, %v7999_v23, %v8003_v11  ;;  %v8441_v28 = vrot.slane %v13771_v63, 5  ;;  %v7994_v47 = vsel %vm14056_vm2, %v7989_v29, %v7993_v42  ;;  %v8049_v44 = vshll.u32 %v13772_v39, 16 }
 0x4b1   : > { %v8028_v34 = vsel %vm14056_vm2, %v8023_v37, %v8027_v30  ;;  %v8036_v48 = vor.u32 %v8035_v24, %v8032_v41  ;;  %v11453_v59 = vcombine.low %v7994_v47, %v8004_v26  ;;  %v8018_v2 = vsel %vm14056_vm2, %v8013_v18, %v8017_v57  ;;  %v13697_v30 = vld [vmem:[#allocation3 + $0x190] sm:$0xff]   ;;  %v17899_v47 = vld [vmem:[#allocation12_spill] sm:$0xff] }
 0x4b2   : > { %12724 = vmatmul.mubr.bf16.gmra.mrb[20].mxu1 %v11451_v33  ;;  %v11454_v55 = vcombine.low %v8018_v2, %v8028_v34  ;;  %v8047_v40 = vrot.slane %v8046_v14, 4  ;;  %v8443_v10 = vrot.slane %v8441_v28, 4  ;;  %v8051_v51 = vrot.slane %v8049_v44, 5  ;;  %v13773_v33 = vld [vmem:[#allocation2 + $0x1c] sm:$0xf]  ;;  %v17904_v44 = vld [vmem:[#allocation14_spill] sm:$0xff] }
 0x4b3   : > { %12727 = vmatprep.mubr.bf16.mxu1 %v11452_v9  ;;  %v8037_v36 = vrot.slane %v8036_v48, 4  ;;  %v8444_v21 = vrot.slane %v16733_v27, 5  ;;  %v8448_v8 = vrot.slane %v13773_v33, 5  ;;  %v11464_v49 = vrot.slane %v8375_v20, 9  ;;  %v8376_v27 = vld [vmem:[#allocation2 + $0x18] sm:$0xe] }
 0x4b4   : > { %v8052_v42 = vsel %vm14056_vm2, %v8047_v40, %v8051_v51  ;;  %v8451_v37 = vrot.slane %v16738_v53, 5  ;;  %v11465_v29 = vrot.slane %v8376_v27, 9  ;;  %v17892_v18 = vcombine.low %v16535_v13, %v16539_v4  ;;  %v13698_v53 = vld [vmem:[#allocation3 + $0x198] sm:$0xff]   ;;  %v13699_v34 = vld [vmem:[#allocation3 + $0x1a0] sm:$0xff]   ;;  %v13700_v13 = vld [vmem:[#allocation3 + $0x1a8] sm:$0xff]  }
 0x4b5   : > { %v8445_v45 = vsel %vm14386_vm5, %v8443_v10, %v8444_v21  ;;  %v8042_v57 = vsel %vm14056_vm2, %v8037_v36, %v8041_v6  ;;  %v8442_v9 = vsel %vm14386_vm5, %v11464_v49, %v8441_v28  ;;  %v8450_v60 = vrot.slane %v8448_v8, 4  ;;  %v13696_v6 = vld [vmem:[#allocation3 + $0x188] sm:$0xff]   ;;  %v17898_v28 = vld [vmem:[#allocation25_spill] sm:$0xff]  ;;  %v17907_v40 = vld [vmem:[#allocation16_spill] sm:$0xff] }
 0x4b6   : > { %v11455_v15 = vcombine.low %v8042_v57, %v8052_v42  ;;  %v11480_v23 = vcombine.low %v8442_v9, %v8445_v45  ;;  %v8449_v41 = vsel %vm14386_vm5, %v11465_v29, %v8448_v8  ;;  %v17893_v26 = vcombine.low %v16549_v38, %v16556_v35  ;;  %v17895_v4 = vld [vmem:[#allocation10_spill] sm:$0xff]  ;;  %v13701_v38 = vld [vmem:[#allocation3 + $0x1b0] sm:$0xff]   ;;  %v13702_v35 = vld [vmem:[#allocation3 + $0x1b8] sm:$0xff]  }
 0x4b7   : > { %v8452_v11 = vsel %vm14386_vm5, %v8450_v60, %v8451_v37  ;;  %v17894_v14 = vcombine.low %v16560_v17, %v16575_v32  ;;  %v17900_v48 = vcombine.low %v17898_v28, %v17899_v47  ;;  %v17901_v17 = vld [vmem:[#allocation15_spill] sm:$0xff]  ;;  %v17902_v32 = vld [vmem:[#allocation13_spill] sm:$0xff]  ;;  %v17911_v20 = vld [vmem:[#allocation18_spill] sm:$0xff] }
 0x4b8   : > { %v11481_v24 = vcombine.low %v8449_v41, %v8452_v11  ;;  %v17903_v39 = vcombine.low %v17901_v17, %v17902_v32  ;;  %v17908_v10 = vld [vmem:[#allocation11_spill] sm:$0xff]  ;;  %v17910_v51 = vld [vmem:[#allocation9_spill] sm:$0xff]  ;;  %v17914_v33 = vld [vmem:[#allocation20_spill] sm:$0xff] }
 0x4b9   : > { %v17909_v36 = vcombine.low %v17907_v40, %v17908_v10  ;;  %v17912_v21 = vcombine.low %v17910_v51, %v17911_v20  ;;  %v17913_v42 = vld [vmem:[#allocation19_spill] sm:$0xff]  ;;  %v17916_v49 = vld [vmem:[#allocation21_spill] sm:$0xff]  ;;  %v17917_v45 = vld [vmem:[#allocation22_spill] sm:$0xff] }
 0x4ba   : > { %12728 = vmatmul.mubr.bf16.gmra.mrb[24].mxu1 %v11453_v59  ;;  %v17905_v59 = vld [vmem:[#allocation17_spill] sm:$0xff]  ;;  %v17915_v8 = vcombine.low %v17913_v42, %v17914_v33  ;;  %v17918_v57 = vcombine.low %v17916_v49, %v17917_v45  ;;  %v17920_v9 = vld [vmem:[#allocation26_spill] sm:$0xff]  ;;  %v17922_v60 = vld [vmem:[#allocation27_spill] sm:$0xff] }
 0x4bb   : > { %12731 = vmatprep.mubr.bf16.mxu1 %v11454_v55  ;;  %v17906_v2 = vcombine.low %v17904_v44, %v17905_v59  ;;  %v13705_v55 = vld [vmem:[#allocation3 + $0x1c0] sm:$0xff]   ;;  %v17923_v27 = vld [vmem:[#allocation28_spill] sm:$0xff]  ;;  %v17926_v41 = vld [vmem:[#allocation30_spill] sm:$0xff] }
 0x4bc   : > { %v17924_v37 = vcombine.low %v17922_v60, %v17923_v27  ;;  %v13703_v29 = vld [vmem:[#allocation2 + $0x18] sm:$0xff]   ;;  %v13723_v28 = vld [vmem:[#allocation3 + $0x1f0] sm:$0xff]   ;;  %v9263_v59 = vld [vmem:[#allocation2 + $0x24] sm:$0xf] }
 0x4bd   : > { %v17925_v11 = vld [vmem:[#allocation29_spill] sm:$0xff]  ;;  %v13713_v47 = vld [vmem:[#allocation2 + $0x6c] sm:$0xff]   ;;  %v9333_v20 = vshrl.u32 %v9263_v59, 16 }
 0x4be   : > { %v9260_v17 = vld [vmem:[#allocation2 + $0x18] sm:$0xf]  ;;  %v17928_v32 = vld [vmem:[#allocation31_spill] sm:$0xff]  ;;  %v13718_v10 = vld [vmem:[#allocation2 + $0x90] sm:$0xff]  }
 0x4bf   : > { %v9322_v44 = vshrl.u32 %v17928_v32, 16  ;;  %v9312_v40 = vshll.u32 %v9260_v17, 16  ;;  %v13719_v60 = vld [vmem:[#allocation2 + $0x9c] sm:$0xff]  }
 0x4c1   : > { %v9324_v51 = vrot.slane %v9322_v44, 4  ;;  %v9314_v33 = vrot.slane %v9312_v40, 5  ;;  %v17933_v40 = vld [vmem:[#allocation36_spill] sm:$0xff] }
 0x4c2   : > { %12732 = vmatmul.mubr.bf16.gmra.mrb[28].mxu1 %v11455_v15  ;;  %v17919_v15 = vld [vmem:[#allocation23_spill] sm:$0xff] }
 0x4c3   : > { %12751 = vmatprep.mubr.bf16.mxu1 %v11480_v23  ;;  %v17921_v23 = vcombine.low %v17919_v15, %v17920_v9 }
 0x4ca   : > { %12752 = vmatmul.mubr.bf16.vlgmr.msra.gmra.mrb[0].mxu1 %v11481_v24  ;;  %v17927_v24 = vcombine.low %v17925_v11, %v17926_v41  ;;  %v13721_v11 = vld [vmem:[#allocation2 + $0xa8] sm:$0xff]  }
 0x4cb   : > { %12755 = vmatprep.mubr.bf16.mxu1 %v17892_v18  ;;  %12784 = vmatpush3.bf16.msra.mxu1 %v17126_v54  ;;  %v17896_v54 = vld [vmem:[#allocation24_spill] sm:$0xff]  ;;  %v13708_v18 = vld [vmem:[#allocation3 + $0x1c8] sm:$0xff]  }
 0x4cc   : > { %12785 = vmatprep.subr.bf16.mxu1 %v13696_v6  ;;  %v17897_v63 = vcombine.low %v17895_v4, %v17896_v54  ;;  %v13710_v4 = vld [vmem:[#allocation2 + $0x54] sm:$0xff]   ;;  %v13720_v54 = vld [vmem:[#allocation3 + $0x1e8] sm:$0xff]  }
 0x4cf   : > { %12786 = vmatpush3.bf16.msra.mxu1 %v13696_v6  ;;  %v13704_v6 = vld [vmem:[#allocation2 + $0x24] sm:$0xff]  }
 0x4d0   : > { %12787 = vmatprep.subr.bf16.mxu1 %v13697_v30 }
 0x4d2   : > { %12756 = vmatmul.mubr.bf16.gmra.mrb[4].mxu1 %v17893_v26  ;;  %v13707_v26 = vld [vmem:[#allocation2 + $0x3c] sm:$0xff]  }
 0x4d3   : > { %12759 = vmatprep.mubr.bf16.mxu1 %v17894_v14  ;;  %12788 = vmatpush3.bf16.msra.mxu1 %v13697_v30  ;;  %v13706_v30 = vld [vmem:[#allocation2 + $0x30] sm:$0xff]  }
 0x4d4   : > { %12789 = vmatprep.subr.bf16.mxu1 %v13698_v53  ;;  %v13714_v14 = vld [vmem:[#allocation3 + $0x1d8] sm:$0xff]  }
 0x4d7   : > { %12790 = vmatpush3.bf16.msra.mxu1 %v13698_v53  ;;  %v13711_v53 = vld [vmem:[#allocation3 + $0x1d0] sm:$0xff]  }
 0x4d8   : > { %12791 = vmatprep.subr.bf16.mxu1 %v13699_v34 }
 0x4da   : > { %12760 = vmatmul.mubr.bf16.gmra.mrb[8].mxu1 %v17897_v63  ;;  %v13712_v63 = vld [vmem:[#allocation2 + $0x60] sm:$0xff]  }
 0x4db   : > { %12763 = vmatprep.mubr.bf16.mxu1 %v17900_v48  ;;  %12792 = vmatpush3.bf16.msra.mxu1 %v13699_v34  ;;  %v13709_v34 = vld [vmem:[#allocation2 + $0x48] sm:$0xff]   ;;  %v13726_v48 = vld [vmem:[#allocation3 + $0x1f8] sm:$0xff]  }
 0x4dc   : > { %12793 = vmatprep.subr.bf16.mxu1 %v13700_v13 }
 0x4df   : > { %12794 = vmatpush3.bf16.msra.mxu1 %v13700_v13  ;;  %v13717_v13 = vld [vmem:[#allocation3 + $0x1e0] sm:$0xff]  }
 0x4e0   : > { %12795 = vmatprep.subr.bf16.mxu1 %v13701_v38 }
 0x4e2   : > { %12764 = vmatmul.mubr.bf16.gmra.mrb[12].mxu1 %v17903_v39  ;;  %v9318_v39 = vshll.u32 %v17928_v32, 16 }
 0x4e3   : > { %12767 = vmatprep.mubr.bf16.mxu1 %v17906_v2  ;;  %12796 = vmatpush3.bf16.msra.mxu1 %v13701_v38  ;;  %v13715_v38 = vld [vmem:[#allocation2 + $0x78] sm:$0xff]   ;;  %v13716_v2 = vld [vmem:[#allocation2 + $0x84] sm:$0xff]  }
 0x4e4   : > { %12797 = vmatprep.subr.bf16.mxu1 %v13702_v35 }
 0x4e7   : > { %12798 = vmatpush3.bf16.msra.mxu1 %v13702_v35  ;;  %v17213_v35 = vld [vmem:[#allocation3 + $0x200] sm:$0xff]  }
 0x4e8   : > { %12831 = vmatprep.subr.bf16.mxu1 %v13705_v55 }
 0x4ea   : > { %12768 = vmatmul.mubr.bf16.gmra.mrb[16].mxu1 %v17909_v36  ;;  %v9320_v36 = vrot.slane %v9318_v39, 5 }
 0x4eb   : > { %12771 = vmatprep.mubr.bf16.mxu1 %v17912_v21  ;;  %v9336_v21 = vshll.u32 %v9263_v59, 16  ;;  %v13722_v59 = vld [vmem:[#allocation2 + $0xb4] sm:$0xff]  }
 0x4ec   : > { %v9325_v45 = vor.u32 %v9324_v51, %v9320_v36 }
 0x4ed   : > { %v9338_v15 = vrot.slane %v9336_v21, 5 }
 0x4f2   : > { %12772 = vmatmul.mubr.bf16.gmra.mrb[20].mxu1 %v17915_v8  ;;  %v17929_v8 = vld [vmem:[#allocation33_spill] sm:$0xff] }
 0x4f3   : > { %12775 = vmatprep.mubr.bf16.mxu1 %v17918_v57  ;;  %v9342_v49 = vshll.u32 %v17929_v8, 16  ;;  %v9335_v57 = vrot.slane %v9333_v20, 4  ;;  %v9346_v9 = vshrl.u32 %v17929_v8, 16  ;;  %v13724_v20 = vld [vmem:[#allocation2 + $0xc0] sm:$0xff]  }
 0x4f5   : > { %v17221_v41 = vrot.slane %v9342_v49, 5 }
 0x4fa   : > { %12776 = vmatmul.mubr.bf16.gmra.mrb[24].mxu1 %v17921_v23  ;;  %v9266_v23 = vld [vmem:[#allocation2 + $0x30] sm:$0xf] }
 0x4fb   : > { %12779 = vmatprep.mubr.bf16.mxu1 %v17924_v37  ;;  %v17930_v37 = vld [vmem:[#allocation32_spill] sm:$0xff] }
 0x502   : > { %12780 = vmatmul.mubr.bf16.gmra.mrb[28].mxu1 %v17927_v24  ;;  %v9357_v24 = vshrl.u32 %v9266_v23, 16 }
 0x503   : > { %12799 = vmatprep.mubr.bf16.mxu1 %v13703_v29  ;;  %v9328_v29 = vshll.u32 %v17930_v37, 16 }
 0x50a   : > { %12800 = vmatmul.mubr.bf16.vlgmr.msra.gmra.mrb[0].mxu1 %v13704_v6  ;;  %v9326_v6 = vrot.slane %v9325_v45, 4  ;;  %v9272_v45 = vld [vmem:[#allocation2 + $0x48] sm:$0xf] }
 0x50b   : > { %12803 = vmatprep.mubr.bf16.mxu1 %v13706_v30  ;;  %12832 = vmatpush3.bf16.msra.mxu1 %v13705_v55  ;;  %v9309_v55 = vshrl.u32 %v9260_v17, 16  ;;  %v9348_v30 = vrot.slane %v9346_v9, 4  ;;  %v17935_v9 = vld [vmem:[#allocation38_spill] sm:$0xff] }
 0x50c   : > { %12833 = vmatprep.subr.bf16.mxu1 %v13708_v18 }
 0x50d   : > { %v9311_v42 = vrot.slane %v9309_v55, 4  ;;  %v9349_v17 = vor.u32 %v9348_v30, %v17221_v41  ;;  %v17936_v30 = vld [vmem:[#allocation44_spill] sm:$0xff] }
 0x50f   : > { %12834 = vmatpush3.bf16.msra.mxu1 %v13708_v18  ;;  %v9315_v27 = vor.u32 %v9314_v33, %v9311_v42  ;;  %v9339_v18 = vor.u32 %v9338_v15, %v9335_v57  ;;  %v17934_v33 = vld [vmem:[#allocation37_spill] sm:$0xff] }
 0x510   : > { %12835 = vmatprep.subr.bf16.mxu1 %v13711_v53  ;;  %v9390_v8 = vshll.u32 %v17934_v33, 16  ;;  %v9394_v49 = vshrl.u32 %v17934_v33, 16 }
 0x512   : > { %12804 = vmatmul.mubr.bf16.gmra.mrb[4].mxu1 %v13707_v26  ;;  %v17931_v26 = vld [vmem:[#allocation34_spill] sm:$0xff] }
 0x513   : > { %12807 = vmatprep.mubr.bf16.mxu1 %v13709_v34  ;;  %12836 = vmatpush3.bf16.msra.mxu1 %v13711_v53  ;;  %v9360_v53 = vshll.u32 %v9266_v23, 16  ;;  %v9370_v34 = vshrl.u32 %v17931_v26, 16  ;;  %v9414_v23 = vshll.u32 %v17935_v9, 16 }
 0x514   : > { %12837 = vmatprep.subr.bf16.mxu1 %v13714_v14 }
 0x515   : > { %v9362_v32 = vrot.slane %v9360_v53, 5  ;;  %v9372_v44 = vrot.slane %v9370_v34, 4  ;;  %v9438_v53 = vshll.u32 %v17936_v30, 16 }
 0x517   : > { %12838 = vmatpush3.bf16.msra.mxu1 %v13714_v14  ;;  %v9366_v14 = vshll.u32 %v17931_v26, 16  ;;  %v9442_v26 = vshrl.u32 %v17936_v30, 16 }
 0x518   : > { %12839 = vmatprep.subr.bf16.mxu1 %v13717_v13 }
 0x519   : > { %v17231_v39 = vrot.slane %v9366_v14, 5 }
 0x51a   : > { %12808 = vmatmul.mubr.bf16.gmra.mrb[8].mxu1 %v13710_v4  ;;  %v9330_v4 = vrot.slane %v9328_v29, 5  ;;  %v9418_v29 = vshrl.u32 %v17935_v9, 16 }
 0x51b   : > { %12811 = vmatprep.mubr.bf16.mxu1 %v13712_v63  ;;  %12840 = vmatpush3.bf16.msra.mxu1 %v13717_v13  ;;  %v9316_v13 = vrot.slane %v9315_v27, 4  ;;  %v17247_v27 = vld [vmem:[#allocation2 + $0xd4] sm:$0x1]  ;;  %v9373_v37 = vor.u32 %v9372_v44, %v17231_v39 }
 0x51c   : > { %12841 = vmatprep.subr.bf16.mxu1 %v13720_v54 }
 0x51f   : > { %12842 = vmatpush3.bf16.msra.mxu1 %v13720_v54  ;;  %v17932_v54 = vld [vmem:[#allocation35_spill] sm:$0xff] }
 0x520   : > { %12843 = vmatprep.subr.bf16.mxu1 %v13723_v28  ;;  %v9352_v63 = vshll.u32 %v17932_v54, 16 }
 0x522   : > { %12812 = vmatmul.mubr.bf16.gmra.mrb[12].mxu1 %v13713_v47  ;;  %v9269_v47 = vld [vmem:[#allocation2 + $0x3c] sm:$0xf]  ;;  %v17235_v55 = vrot.slane %v9352_v63, 5  ;;  %v13725_v63 = vld [vmem:[#allocation2 + $0xcc] sm:$0xff]  }
 0x523   : > { %12815 = vmatprep.mubr.bf16.mxu1 %v13715_v38  ;;  %12844 = vmatpush3.bf16.msra.mxu1 %v13723_v28  ;;  %v9359_v28 = vrot.slane %v9357_v24, 4  ;;  %v17228_v38 = vrot.slane %v9339_v18, 4  ;;  %v9381_v51 = vshrl.u32 %v9269_v47, 16  ;;  %v9384_v42 = vshll.u32 %v9269_v47, 16 }
 0x524   : > { %12845 = vmatprep.subr.bf16.mxu1 %v13726_v48  ;;  %v9408_v47 = vshll.u32 %v9272_v45, 16 }
 0x525   : > { %v9345_v57 = vsel %vm14056_vm2, %v17228_v38, %v17221_v41  ;;  %v9363_v15 = vor.u32 %v9362_v32, %v9359_v28  ;;  %v9383_v18 = vrot.slane %v9381_v51, 4  ;;  %v9275_v41 = vld [vmem:[#allocation2 + $0x54] sm:$0xf]  ;;  %v9386_v34 = vrot.slane %v9384_v42, 5 }
 0x526   : > { %v9405_v28 = vshrl.u32 %v9272_v45, 16  ;;  %v9429_v32 = vshrl.u32 %v9275_v41, 16  ;;  %v9432_v44 = vshll.u32 %v9275_v41, 16  ;;  %v9444_v51 = vrot.slane %v9442_v26, 4  ;;  %v17937_v45 = vld [vmem:[#allocation41_spill] sm:$0xff] }
 0x527   : > { %12846 = vmatpush3.bf16.msra.mxu1 %v13726_v48  ;;  %v9331_v48 = vsel %vm14056_vm2, %v9326_v6, %v9330_v4  ;;  %v10188_v6 = vrot.slane %v17247_v27, 5  ;;  %v9396_v4 = vrot.slane %v9394_v49, 4  ;;  %v9374_v49 = vrot.slane %v9373_v37, 4  ;;  %v13774_v26 = vld [vmem:[#allocation2 + $0x50] sm:$0x1] }
 0x528   : > { %12879 = vmatprep.subr.bf16.mxu1 %v17213_v35  ;;  %v9400_v9 = vshll.u32 %v17937_v45, 16  ;;  %v9387_v0 = vor.u32 %v9386_v34, %v9383_v18 }
 0x52a   : > { %12816 = vmatmul.mubr.bf16.gmra.mrb[16].mxu1 %v13716_v2  ;;  %v9321_v2 = vsel %vm14056_vm2, %v9316_v13, %v9320_v36  ;;  %v9350_v36 = vrot.slane %v9349_v17, 4  ;;  %v17255_v13 = vrot.slane %v9390_v8, 5  ;;  %v9420_v17 = vrot.slane %v9418_v29, 4 }
 0x52b   : > { %12819 = vmatprep.mubr.bf16.mxu1 %v13718_v10  ;;  %v9376_v10 = vshll.u32 %v17933_v40, 16  ;;  %v11528_v21 = vcombine.low %v9321_v2, %v9331_v48  ;;  %v17257_v48 = vrot.slane %v9414_v23, 5  ;;  %v17267_v40 = vrot.slane %v9438_v53, 5 }
 0x52c   : > { %v9355_v33 = vsel %vm14056_vm2, %v9350_v36, %v17235_v55  ;;  %v9364_v8 = vrot.slane %v9363_v15, 4  ;;  %v9397_v23 = vor.u32 %v9396_v4, %v17255_v13  ;;  %v9410_v29 = vrot.slane %v9408_v47, 5  ;;  %v17938_v55 = vld [vmem:[#allocation47_spill] sm:$0xff] }
 0x52d   : > { %v9378_v2 = vrot.slane %v9376_v10, 5  ;;  %v9407_v10 = vrot.slane %v9405_v28, 4  ;;  %v9445_v30 = vor.u32 %v9444_v51, %v17267_v40  ;;  %v9462_v36 = vshll.u32 %v17938_v55, 16  ;;  %v9281_v51 = vld [vmem:[#allocation2 + $0x6c] sm:$0xf] }
 0x52e   : > { %v9466_v15 = vshrl.u32 %v17938_v55, 16  ;;  %v11529_v37 = vcombine.low %v9345_v57, %v9355_v33  ;;  %v9369_v18 = vsel %vm14056_vm2, %v9364_v8, %v17231_v39  ;;  %v9388_v34 = vrot.slane %v9387_v0, 4  ;;  %v13728_v57 = vld [vmem:[#allocation3 + $0x208] sm:$0xff]  }
 0x52f   : > { %v9398_v4 = vrot.slane %v9397_v23, 4  ;;  %v9411_v47 = vor.u32 %v9410_v29, %v9407_v10  ;;  %v17286_v45 = vrot.slane %v9462_v36, 5  ;;  %v9477_v10 = vshrl.u32 %v9281_v51, 16 }
 0x530   : > { %v9468_v39 = vrot.slane %v9466_v15, 4  ;;  %v9480_v29 = vshll.u32 %v9281_v51, 16 }
 0x532   : > { %12820 = vmatmul.mubr.bf16.gmra.mrb[20].mxu1 %v13719_v60  ;;  %v17245_v60 = vld [vmem:[#allocation2 + $0xd0] sm:$0xf]  ;;  %v9469_v15 = vor.u32 %v9468_v39, %v17286_v45 }
 0x533   : > { %12823 = vmatprep.mubr.bf16.mxu1 %v13721_v11  ;;  %v10029_v11 = vld [vmem:[#allocation2 + $0xcc] sm:$0xe]  ;;  %v10185_v24 = vrot.slane %v17245_v60, 5  ;;  %v13730_v39 = vld [vmem:[#allocation3 + $0x218] sm:$0xff]  }
 0x534   : > { %v11567_v14 = vrot.slane %v10029_v11, 9  ;;  %v9421_v11 = vor.u32 %v9420_v17, %v17257_v48 }
 0x535   : > { %v10187_v54 = vrot.slane %v10185_v24, 4 }
 0x536   : > { %v17261_v38 = vsel %vm14386_vm5, %v11567_v14, %v10185_v24  ;;  %v9431_v24 = vrot.slane %v9429_v32, 4  ;;  %v9424_v14 = vshll.u32 %v13774_v26, 16  ;;  %v9422_v17 = vrot.slane %v9421_v11, 4  ;;  %v9284_v11 = vld [vmem:[#allocation2 + $0x78] sm:$0xf] }
 0x537   : > { %v9501_v26 = vshrl.u32 %v9284_v11, 16 }
 0x53a   : > { %12824 = vmatmul.mubr.bf16.gmra.mrb[24].mxu1 %v13722_v59  ;;  %v17265_v59 = vsel %vm14386_vm5, %v10187_v54, %v10188_v6  ;;  %v9434_v6 = vrot.slane %v9432_v44, 5  ;;  %v9402_v54 = vrot.slane %v9400_v9, 5  ;;  %v9393_v9 = vsel %vm14056_vm2, %v9388_v34, %v17255_v13  ;;  %v13729_v13 = vld [vmem:[#allocation3 + $0x210] sm:$0xff]  }
 0x53b   : > { %12827 = vmatprep.mubr.bf16.mxu1 %v13724_v20  ;;  %v9278_v20 = vld [vmem:[#allocation2 + $0x60] sm:$0xf]  ;;  %v11583_v42 = vcombine.low %v17261_v38, %v17265_v59  ;;  %v9479_v34 = vrot.slane %v9477_v10, 4 }
 0x53c   : > { %v9453_v41 = vshrl.u32 %v9278_v20, 16  ;;  %v9456_v53 = vshll.u32 %v9278_v20, 16  ;;  %v9435_v32 = vor.u32 %v9434_v6, %v9431_v24  ;;  %v9446_v20 = vrot.slane %v9445_v30, 4 }
 0x53d   : > { %v9403_v24 = vsel %vm14056_vm2, %v9398_v4, %v9402_v54  ;;  %v9412_v6 = vrot.slane %v9411_v47, 4  ;;  %v9482_v4 = vrot.slane %v9480_v29, 5  ;;  %v13776_v54 = vld [vmem:[#allocation2 + $0x7c] sm:$0xf] }
 0x53e   : > { %v9455_v44 = vrot.slane %v9453_v41, 4  ;;  %v9458_v33 = vrot.slane %v9456_v53, 5  ;;  %v9436_v30 = vrot.slane %v9435_v32, 4  ;;  %v11531_v47 = vcombine.low %v9393_v9, %v9403_v24  ;;  %v9290_v9 = vld [vmem:[#allocation2 + $0x90] sm:$0xf] }
 0x53f   : > { %v13778_v24 = vld [vmem:[#allocation2 + $0x88] sm:$0xf] }
 0x540   : > { %v9459_v36 = vor.u32 %v9458_v33, %v9455_v44  ;;  %v9441_v32 = vsel %vm14056_vm2, %v9436_v30, %v17267_v40  ;;  %v13731_v30 = vld [vmem:[#allocation3 + $0x220] sm:$0xff]  }
 0x542   : > { %12828 = vmatmul.mubr.bf16.gmra.mrb[28].mxu1 %v13725_v63  ;;  %v17939_v63 = vld [vmem:[#allocation45_spill] sm:$0xff] }
 0x543   : > { %12847 = vmatprep.mubr.bf16.mxu1 %v11528_v21  ;;  %v9379_v21 = vsel %vm14056_vm2, %v9374_v49, %v9378_v2  ;;  %v9448_v28 = vshll.u32 %v17939_v63, 16  ;;  %v9426_v2 = vrot.slane %v9424_v14, 5  ;;  %v17940_v49 = vld [vmem:[#allocation50_spill] sm:$0xff]  ;;  %v9504_v14 = vshll.u32 %v9284_v11, 16 }
 0x544   : > { %v11530_v8 = vcombine.low %v9369_v18, %v9379_v21  ;;  %v9486_v55 = vshll.u32 %v17940_v49, 16  ;;  %v9490_v0 = vshrl.u32 %v17940_v49, 16  ;;  %v9510_v63 = vshll.u32 %v13776_v54, 16 }
 0x545   : > { %v9450_v23 = vrot.slane %v9448_v28, 5  ;;  %v9427_v41 = vsel %vm14056_vm2, %v9422_v17, %v9426_v2  ;;  %v9514_v28 = vshrl.u32 %v13776_v54, 16  ;;  %v9417_v17 = vsel %vm14056_vm2, %v9412_v6, %v17257_v48 }
 0x546   : > { %v17301_v21 = vrot.slane %v9486_v55, 5  ;;  %v11532_v44 = vcombine.low %v9417_v17, %v9427_v41  ;;  %v9470_v2 = vrot.slane %v9469_v15, 4  ;;  %v9503_v55 = vrot.slane %v9501_v26, 4  ;;  %v13779_v15 = vld [vmem:[#allocation2 + $0x94] sm:$0xf] }
 0x547   : > { %v9451_v53 = vsel %vm14056_vm2, %v9446_v20, %v9450_v23  ;;  %v9460_v20 = vrot.slane %v9459_v36, 4  ;;  %v9483_v48 = vor.u32 %v9482_v4, %v9479_v34  ;;  %v17310_v10 = vrot.slane %v9510_v63, 5  ;;  %v13780_v63 = vld [vmem:[#allocation2 + $0x80] sm:$0x1] }
 0x548   : > { %v11533_v51 = vcombine.low %v9441_v32, %v9451_v53  ;;  %v9516_v40 = vrot.slane %v9514_v28, 4  ;;  %v9534_v6 = vshll.u32 %v13778_v24, 16  ;;  %v9538_v41 = vshrl.u32 %v13778_v24, 16 }
 0x549   : > { %v9549_v53 = vshrl.u32 %v9290_v9, 16  ;;  %v9552_v36 = vshll.u32 %v9290_v9, 16  ;;  %v9484_v34 = vrot.slane %v9483_v48, 4  ;;  %v9520_v28 = vshll.u32 %v13780_v63, 16 }
 0x54a   : > { %12848 = vmatmul.mubr.bf16.vlgmr.msra.gmra.mrb[0].mxu1 %v11529_v37  ;;  %v13775_v37 = vld [vmem:[#allocation2 + $0x68] sm:$0x1]  ;;  %v9517_v54 = vor.u32 %v9516_v40, %v17310_v10  ;;  %v17318_v32 = vrot.slane %v9534_v6, 5 }
 0x54b   : > { %12851 = vmatprep.mubr.bf16.mxu1 %v11530_v8  ;;  %12880 = vmatpush3.bf16.msra.mxu1 %v17213_v35  ;;  %v9472_v18 = vshll.u32 %v13775_v37, 16  ;;  %v9492_v35 = vrot.slane %v9490_v0, 4  ;;  %v9287_v8 = vld [vmem:[#allocation2 + $0x84] sm:$0xf]  ;;  %v9506_v0 = vrot.slane %v9504_v14, 5  ;;  %v9558_v37 = vshll.u32 %v13779_v15, 16 }
 0x54c   : > { %12881 = vmatprep.subr.bf16.mxu1 %v13728_v57  ;;  %v9525_v29 = vshrl.u32 %v9287_v8, 16  ;;  %v9528_v11 = vshll.u32 %v9287_v8, 16  ;;  %v9293_v8 = vld [vmem:[#allocation2 + $0x9c] sm:$0xf]  ;;  %v9518_v48 = vrot.slane %v9517_v54, 4  ;;  %v9522_v24 = vrot.slane %v9520_v28, 5 }
 0x54d   : > { %v9474_v33 = vrot.slane %v9472_v18, 5  ;;  %v9493_v49 = vor.u32 %v9492_v35, %v17301_v21  ;;  %v9562_v18 = vshrl.u32 %v13779_v15, 16  ;;  %v9465_v35 = vsel %vm14056_vm2, %v9460_v20, %v17286_v45  ;;  %v13782_v15 = vld [vmem:[#allocation2 + $0xa0] sm:$0xf] }
 0x54e   : > { %v9507_v14 = vor.u32 %v9506_v0, %v9503_v55  ;;  %v9530_v17 = vrot.slane %v9528_v11, 5  ;;  %v9551_v45 = vrot.slane %v9549_v53, 4  ;;  %v9554_v20 = vrot.slane %v9552_v36, 5  ;;  %v13733_v53 = vld [vmem:[#allocation3 + $0x230] sm:$0xff]  }
 0x54f   : > { %12882 = vmatpush3.bf16.msra.mxu1 %v13728_v57  ;;  %v13777_v57 = vld [vmem:[#allocation2 + $0x74] sm:$0x1]  ;;  %v9475_v26 = vsel %vm14056_vm2, %v9470_v2, %v9474_v33  ;;  %v17320_v9 = vrot.slane %v9558_v37, 5  ;;  %v9564_v33 = vrot.slane %v9562_v18, 4  ;;  %v13732_v2 = vld [vmem:[#allocation3 + $0x228] sm:$0xff]   ;;  %v9573_v40 = vshrl.u32 %v9293_v8, 16 }
 0x550   : > { %12883 = vmatprep.subr.bf16.mxu1 %v13729_v13  ;;  %v9496_v23 = vshll.u32 %v13777_v57, 16  ;;  %v9508_v0 = vrot.slane %v9507_v14, 4  ;;  %v9555_v6 = vor.u32 %v9554_v20, %v9551_v45  ;;  %v9582_v37 = vshll.u32 %v13782_v15, 16  ;;  %v13784_v14 = vld [vmem:[#allocation2 + $0xac] sm:$0xf]  ;;  %v13734_v45 = vld [vmem:[#allocation3 + $0x238] sm:$0xff]  }
 0x551   : > { %v9586_v18 = vshrl.u32 %v13782_v15, 16  ;;  %v9575_v28 = vrot.slane %v9573_v40, 4 }
 0x552   : > { %12852 = vmatmul.mubr.bf16.gmra.mrb[4].mxu1 %v11531_v47  ;;  %v9498_v4 = vrot.slane %v9496_v23, 5  ;;  %v9527_v47 = vrot.slane %v9525_v29, 4  ;;  %v9576_v29 = vshll.u32 %v9293_v8, 16 }
 0x553   : > { %12855 = vmatprep.mubr.bf16.mxu1 %v11532_v44  ;;  %12884 = vmatpush3.bf16.msra.mxu1 %v13729_v13  ;;  %v9494_v13 = vrot.slane %v9493_v49, 4  ;;  %v9540_v44 = vrot.slane %v9538_v41, 4  ;;  %v11534_v49 = vcombine.low %v9465_v35, %v9475_v26  ;;  %v9565_v41 = vor.u32 %v9564_v33, %v17320_v9  ;;  %v9296_v35 = vld [vmem:[#allocation2 + $0xa8] sm:$0xf]  ;;  %v13783_v26 = vld [vmem:[#allocation2 + $0x98] sm:$0x1] }
 0x554   : > { %12885 = vmatprep.subr.bf16.mxu1 %v13730_v39  ;;  %v9531_v57 = vor.u32 %v9530_v17, %v9527_v47  ;;  %v9578_v47 = vrot.slane %v9576_v29, 5  ;;  %v9600_v8 = vshll.u32 %v9296_v35, 16  ;;  %v13785_v29 = vld [vmem:[#allocation2 + $0xa4] sm:$0x1] }
 0x555   : > { %v9499_v55 = vsel %vm14056_vm2, %v9494_v13, %v9498_v4  ;;  %v9541_v23 = vor.u32 %v9540_v44, %v17318_v32  ;;  %v9568_v13 = vshll.u32 %v13783_v26, 16  ;;  %v9610_v4 = vshrl.u32 %v13784_v14, 16 }
 0x556   : > { %v9532_v54 = vrot.slane %v9531_v57, 4  ;;  %v9566_v17 = vrot.slane %v9565_v41, 4  ;;  %v9597_v44 = vshrl.u32 %v9296_v35, 16  ;;  %v9299_v57 = vld [vmem:[#allocation2 + $0xb4] sm:$0xf]  ;;  %v9579_v40 = vor.u32 %v9578_v47, %v9575_v28 }
 0x557   : > { %12886 = vmatpush3.bf16.msra.mxu1 %v13730_v39  ;;  %v9489_v39 = vsel %vm14056_vm2, %v9484_v34, %v17301_v21  ;;  %v13781_v21 = vld [vmem:[#allocation2 + $0x8c] sm:$0x1]  ;;  %v9606_v34 = vshll.u32 %v13784_v14, 16  ;;  %v9542_v63 = vrot.slane %v9541_v23, 4 }
 0x558   : > { %12887 = vmatprep.subr.bf16.mxu1 %v13731_v30  ;;  %v11535_v11 = vcombine.low %v9489_v39, %v9499_v55  ;;  %v9544_v36 = vshll.u32 %v13781_v21, 16  ;;  %v9588_v55 = vrot.slane %v9586_v18, 4  ;;  %v9599_v41 = vrot.slane %v9597_v44, 4  ;;  %v9302_v18 = vld [vmem:[#allocation2 + $0xc0] sm:$0xf] }
 0x559   : > { %v17336_v39 = vrot.slane %v9606_v34, 5  ;;  %v9580_v34 = vrot.slane %v9579_v40, 4  ;;  %v9645_v47 = vshrl.u32 %v9302_v18, 16  ;;  %v9682_v40 = vshrl.u32 %v17245_v60, 16 }
 0x55a   : > { %12856 = vmatmul.mubr.bf16.gmra.mrb[8].mxu1 %v11533_v51  ;;  %v9513_v51 = vsel %vm14056_vm2, %v9508_v0, %v17310_v10  ;;  %v9556_v10 = vrot.slane %v9555_v6, 4  ;;  %v9546_v33 = vrot.slane %v9544_v36, 5  ;;  %v9570_v0 = vrot.slane %v9568_v13, 5  ;;  %v13786_v36 = vld [vmem:[#allocation2 + $0xb8] sm:$0xf] }
 0x55b   : > { %12859 = vmatprep.mubr.bf16.mxu1 %v11534_v49  ;;  %12888 = vmatpush3.bf16.msra.mxu1 %v13731_v30  ;;  %v9523_v30 = vsel %vm14056_vm2, %v9518_v48, %v9522_v24  ;;  %v17334_v49 = vrot.slane %v9582_v37, 5  ;;  %v9612_v48 = vrot.slane %v9610_v4, 4  ;;  %v9592_v24 = vshll.u32 %v13785_v29, 16 }
 0x55c   : > { %12889 = vmatprep.subr.bf16.mxu1 %v13732_v2  ;;  %v11536_v20 = vcombine.low %v9513_v51, %v9523_v30  ;;  %v9547_v23 = vsel %vm14056_vm2, %v9542_v63, %v9546_v33  ;;  %v9571_v6 = vsel %vm14056_vm2, %v9566_v17, %v9570_v0  ;;  %v9602_v51 = vrot.slane %v9600_v8, 5  ;;  %v13787_v30 = vld [vmem:[#allocation2 + $0xc4] sm:$0xf]  ;;  %v13788_v63 = vld [vmem:[#allocation2 + $0xb0] sm:$0x1] }
 0x55d   : > { %v9589_v21 = vor.u32 %v9588_v55, %v17334_v49  ;;  %v9630_v15 = vshll.u32 %v13786_v36, 16  ;;  %v9634_v37 = vshrl.u32 %v13786_v36, 16  ;;  %v9613_v35 = vor.u32 %v9612_v48, %v17336_v39  ;;  %v9305_v17 = vld [vmem:[#allocation2 + $0xcc] sm:$0xf] }
 0x55e   : > { %v9654_v26 = vshll.u32 %v13787_v30, 16  ;;  %v9658_v13 = vshrl.u32 %v13787_v30, 16  ;;  %v9594_v4 = vrot.slane %v9592_v24, 5  ;;  %v9616_v28 = vshll.u32 %v13788_v63, 16 }
 0x55f   : > { %12890 = vmatpush3.bf16.msra.mxu1 %v13732_v2  ;;  %v9537_v2 = vsel %vm14056_vm2, %v9532_v54, %v17318_v32  ;;  %v9621_v32 = vshrl.u32 %v9299_v57, 16  ;;  %v9603_v54 = vor.u32 %v9602_v51, %v9599_v41  ;;  %v9590_v44 = vrot.slane %v9589_v21, 4 }
 0x560   : > { %12891 = vmatprep.subr.bf16.mxu1 %v13733_v53  ;;  %v9636_v33 = vrot.slane %v9634_v37, 4  ;;  %v9614_v55 = vrot.slane %v9613_v35, 4  ;;  %v9656_v48 = vrot.slane %v9654_v26, 5  ;;  %v9618_v24 = vrot.slane %v9616_v28, 5 }
 0x561   : > { %v9623_v8 = vrot.slane %v9621_v32, 4  ;;  %v9604_v29 = vrot.slane %v9603_v54, 4  ;;  %v9585_v41 = vsel %vm14056_vm2, %v9580_v34, %v17334_v49  ;;  %v9595_v51 = vsel %vm14056_vm2, %v9590_v44, %v9594_v4 }
 0x562   : > { %12860 = vmatmul.mubr.bf16.gmra.mrb[12].mxu1 %v11535_v11  ;;  %v9561_v11 = vsel %vm14056_vm2, %v9556_v10, %v17320_v9  ;;  %v11537_v9 = vcombine.low %v9537_v2, %v9547_v23  ;;  %v9648_v10 = vshll.u32 %v9302_v18, 16  ;;  %v9669_v2 = vshrl.u32 %v9305_v17, 16 }
 0x563   : > { %12863 = vmatprep.mubr.bf16.mxu1 %v11536_v20  ;;  %12892 = vmatpush3.bf16.msra.mxu1 %v13733_v53  ;;  %v9624_v53 = vshll.u32 %v9299_v57, 16  ;;  %v11538_v14 = vcombine.low %v9561_v11, %v9571_v6  ;;  %v9632_v20 = vrot.slane %v9630_v15, 5  ;;  %v9660_v57 = vrot.slane %v9658_v13, 4  ;;  %v13789_v15 = vld [vmem:[#allocation2 + $0xbc] sm:$0x1] }
 0x564   : > { %12893 = vmatprep.subr.bf16.mxu1 %v13734_v45  ;;  %v9672_v23 = vshll.u32 %v9305_v17, 16  ;;  %v9647_v11 = vrot.slane %v9645_v47, 4  ;;  %v9650_v6 = vrot.slane %v9648_v10, 5  ;;  %v9619_v32 = vsel %vm14056_vm2, %v9614_v55, %v9618_v24 }
 0x565   : > { %v9626_v0 = vrot.slane %v9624_v53, 5  ;;  %v9637_v21 = vor.u32 %v9636_v33, %v9632_v20  ;;  %v9640_v37 = vshll.u32 %v13789_v15, 16  ;;  %v9661_v18 = vor.u32 %v9660_v57, %v9656_v48  ;;  %v17950_v15 = vld [vmem:[#allocation49_spill] sm:$0xff] }
 0x566   : > { %v9674_v35 = vrot.slane %v9672_v23, 5  ;;  %v9684_v30 = vrot.slane %v9682_v40, 4  ;;  %v11539_v26 = vcombine.low %v9585_v41, %v9595_v51  ;;  %v9609_v49 = vsel %vm14056_vm2, %v9604_v29, %v17336_v39  ;;  %v17944_v41 = vld [vmem:[#allocation42_spill] sm:$0xff]  ;;  %v17945_v51 = vld [vmem:[#allocation43_spill] sm:$0xff] }
 0x567   : > { %12894 = vmatpush3.bf16.msra.mxu1 %v13734_v45  ;;  %v9678_v45 = vshll.u32 %v17245_v60, 16  ;;  %v9627_v36 = vor.u32 %v9626_v0, %v9623_v8  ;;  %v9671_v60 = vrot.slane %v9669_v2, 4  ;;  %v9651_v13 = vor.u32 %v9650_v6, %v9647_v11  ;;  %v17941_v11 = vld [vmem:[#allocation39_spill] sm:$0xff] }
 0x568   : > { %v11540_v34 = vcombine.low %v9609_v49, %v9619_v32  ;;  %v9638_v4 = vrot.slane %v9637_v21, 4  ;;  %v9642_v54 = vrot.slane %v9640_v37, 5  ;;  %v9662_v63 = vrot.slane %v9661_v18, 4  ;;  %v17948_v32 = vld [vmem:[#allocation48_spill] sm:$0xff]  ;;  %v17951_v37 = vld [vmem:[#allocation51_spill] sm:$0xff] }
 0x569   : > { %v9680_v53 = vrot.slane %v9678_v45, 5  ;;  %v9628_v28 = vrot.slane %v9627_v36, 4  ;;  %v9675_v47 = vor.u32 %v9674_v35, %v9671_v60  ;;  %v9688_v17 = vshll.u32 %v17247_v27, 16  ;;  %v17955_v35 = vld [vmem:[#allocation53_spill] sm:$0xff]  ;;  %v17959_v49 = vld [vmem:[#allocation55_spill] sm:$0xff] }
 0x56a   : > { %12864 = vmatmul.mubr.bf16.gmra.mrb[16].mxu1 %v11537_v9  ;;  %v13790_v9 = vld [vmem:[#allocation2 + $0xc8] sm:$0x1]  ;;  %v9652_v44 = vrot.slane %v9651_v13, 4  ;;  %v9643_v33 = vsel %vm14056_vm2, %v9638_v4, %v9642_v54  ;;  %v17946_v21 = vcombine.low %v17944_v41, %v17945_v51  ;;  %v17952_v18 = vcombine.low %v17950_v15, %v17951_v37  ;;  %v17960_v13 = vld [vmem:[#allocation56_spill] sm:$0xff] }
 0x56b   : > { %12867 = vmatprep.mubr.bf16.mxu1 %v11538_v14  ;;  %v9664_v14 = vshll.u32 %v13790_v9, 16  ;;  %v9685_v10 = vor.u32 %v9684_v30, %v9680_v53  ;;  %v9633_v55 = vsel %vm14056_vm2, %v9628_v28, %v9632_v20  ;;  %v9676_v0 = vrot.slane %v9675_v47, 4  ;;  %v17942_v20 = vld [vmem:[#allocation40_spill] sm:$0xff]  ;;  %v17957_v30 = vld [vmem:[#allocation54_spill] sm:$0xff]  ;;  %v17965_v54 = vld [vmem:[#allocation59_spill] sm:$0xff] }
 0x56c   : > { %v9690_v2 = vrot.slane %v9688_v17, 5  ;;  %v11541_v23 = vcombine.low %v9633_v55, %v9643_v33  ;;  %v9657_v45 = vsel %vm14056_vm2, %v9652_v44, %v9656_v48  ;;  %v17943_v6 = vcombine.low %v17941_v11, %v17942_v20  ;;  %v17947_v48 = vld [vmem:[#allocation46_spill] sm:$0xff] }
 0x56d   : > { %v9666_v8 = vrot.slane %v9664_v14, 5  ;;  %v9686_v57 = vrot.slane %v9685_v10, 4  ;;  %v9681_v27 = vsel %vm14056_vm2, %v9676_v0, %v9680_v53  ;;  %v17949_v36 = vcombine.low %v17947_v48, %v17948_v32  ;;  %v17962_v14 = vld [vmem:[#allocation57_spill] sm:$0xff] }
 0x56e   : > { %v17954_v60 = vcombine.low %v16949_v50, %v17953_v46  ;;  %v17956_v53 = vcombine.low %v16958_v19, %v17955_v35  ;;  %v17961_v9 = vcombine.low %v17959_v49, %v17960_v13  ;;  %v17966_v50 = vcombine.low %v17002_v31, %v17965_v54 }
 0x56f   : > { %v9667_v39 = vsel %vm14056_vm2, %v9662_v63, %v9666_v8  ;;  %v9691_v29 = vsel %vm14056_vm2, %v9686_v57, %v9690_v2  ;;  %v17967_v63 = vld [vmem:[#allocation60_spill] sm:$0xff] }
 0x570   : > { %v11542_v40 = vcombine.low %v9657_v45, %v9667_v39  ;;  %v11543_v24 = vcombine.low %v9681_v27, %v9691_v29  ;;  %v17968_v19 = vcombine.low %v17018_v56, %v17967_v63 }
 0x572   : > { %12868 = vmatmul.mubr.bf16.gmra.mrb[20].mxu1 %v11539_v26  ;;  %v17958_v26 = vcombine.low %v16971_v1, %v17957_v30  ;;  %v17427_v1 = vld [vmem:[%s17553_s4] ss:$0 sm:$0xff] }
 0x573   : > { %12871 = vmatprep.mubr.bf16.mxu1 %v11540_v34  ;;  %v17963_v34 = vld [vmem:[#allocation58_spill] sm:$0xff] }
 0x574   : > { %v17964_v4 = vcombine.low %v17962_v14, %v17963_v34 }
 0x57a   : > { %12872 = vmatmul.mubr.bf16.gmra.mrb[24].mxu1 %v11541_v23 }
 0x57b   : > { %12875 = vmatprep.mubr.bf16.mxu1 %v11542_v40 }
 0x582   : > { %12876 = vmatmul.mubr.bf16.gmra.mrb[28].mxu1 %v11543_v24 }
 0x583   : > { %12895 = vmatprep.mubr.bf16.mxu1 %v17943_v6 }
 0x58a   : > { %12896 = vmatmul.mubr.bf16.vlgmr.msra.gmra.mrb[0].mxu1 %v17946_v21 }
 0x58b   : > { %12899 = vmatprep.mubr.bf16.mxu1 %v17949_v36 }
 0x592   : > { %12900 = vmatmul.mubr.bf16.gmra.mrb[4].mxu1 %v17952_v18 }
 0x593   : > { %12903 = vmatprep.mubr.bf16.mxu1 %v17954_v60 }
 0x59a   : > { %12904 = vmatmul.mubr.bf16.gmra.mrb[8].mxu1 %v17956_v53 }
 0x59b   : > { %12907 = vmatprep.mubr.bf16.mxu1 %v17958_v26 }
 0x5a2   : > { %12908 = vmatmul.mubr.bf16.gmra.mrb[12].mxu1 %v17961_v9 }
 0x5a3   : > { %12911 = vmatprep.mubr.bf16.mxu1 %v17964_v4 }
 0x5aa   : > { %12912 = vmatmul.mubr.bf16.gmra.mrb[16].mxu1 %v17966_v50 }
 0x5ab   : > { %12915 = vmatprep.mubr.bf16.mxu1 %v17968_v19 }
 0x5b2   : > { %12916 = vmatmul.mubr.bf16.gmra.mrb[20].mxu1 %v11579_v3 }
 0x5b3   : > { %12919 = vmatprep.mubr.bf16.mxu1 %v11580_v7 }
 0x5ba   : > { %12920 = vmatmul.mubr.bf16.gmra.mrb[24].mxu1 %v11581_v25 }
 0x5bb   : > { %12923 = vmatprep.mubr.bf16.mxu1 %v11582_v61 }
 0x5c2   : > { %12924 = vmatmul.mubr.bf16.gmra.mrb[28].mxu1 %v11583_v42 }
 0x65d   : > { %v12897_v31 = vpop.f32.mrb[0].mxu1 }
 0x65e   : > { %v10521_v56 = vadd.f32 %v12897_v31, %v17427_v1  ;;  %v10353_v43 = vpop.f32.mrb[1].mxu1 }
 0x65f   : > { %v10519_v62 = vadd.f32 %v17427_v1, %v10353_v43  ;;  %v12898_v3 = vpop.f32.mrb[2].mxu1 }
 0x660   : > { %v10553_v5 = vmax.f32 %v10521_v56, 0.0  ;;  %v10522_v12 = vadd.f32 %v12898_v3, %v17427_v1  ;;  %v10356_v52 = vpop.f32.mrb[3].mxu1 }
 0x661   : > { %v10551_v7 = vmax.f32 %v10519_v62, 0.0  ;;  %v10520_v58 = vadd.f32 %v17427_v1, %v10356_v52 }
 0x662   : > { %10585 = vst [vmem:[%s17435_s30 + $0x10] sm:$0xff] %v10553_v5  ;;  %v10554_v25 = vmax.f32 %v10522_v12, 0.0 }
 0x663   : > { %10583 = vst [vmem:[%s17435_s30] sm:$0xff] %v10551_v7  ;;  %v10552_v16 = vmax.f32 %v10520_v58, 0.0 }
 0x664   : > { %10586 = vst [vmem:[%s17435_s30 + $0x18] sm:$0xff] %v10554_v25 }
 0x665   : > { %10584 = vst [vmem:[%s17435_s30 + $0x8] sm:$0xff] %v10552_v16  ;;  %v12901_v22 = vpop.f32.mrb[4].mxu1 }
 0x666   : > { %v10525_v61 = vadd.f32 %v12901_v22, %v17427_v1  ;;  %v10369_v38 = vpop.f32.mrb[5].mxu1 }
 0x667   : > { %v10523_v59 = vadd.f32 %v17427_v1, %v10369_v38  ;;  %v12902_v42 = vpop.f32.mrb[6].mxu1 }
 0x668   : > { %v10557_v28 = vmax.f32 %v10525_v61, 0.0  ;;  %v10526_v47 = vadd.f32 %v12902_v42, %v17427_v1  ;;  %v10372_v10 = vpop.f32.mrb[7].mxu1 }
 0x669   : > { %v10555_v17 = vmax.f32 %v10523_v59, 0.0  ;;  %v10524_v44 = vadd.f32 %v17427_v1, %v10372_v10 }
 0x66a   : > { %10589 = vst [vmem:[%s17435_s30 + $0x30] sm:$0xff] %v10557_v28  ;;  %v10558_v8 = vmax.f32 %v10526_v47, 0.0 }
 0x66b   : > { %10587 = vst [vmem:[%s17435_s30 + $0x20] sm:$0xff] %v10555_v17  ;;  %v10556_v33 = vmax.f32 %v10524_v44, 0.0 }
 0x66c   : > { %10590 = vst [vmem:[%s17435_s30 + $0x38] sm:$0xff] %v10558_v8 }
 0x66d   : > { %10588 = vst [vmem:[%s17435_s30 + $0x28] sm:$0xff] %v10556_v33  ;;  %v12905_v39 = vpop.f32.mrb[8].mxu1 }
 0x66e   : > { %v10529_v55 = vadd.f32 %v12905_v39, %v17427_v1  ;;  %v10385_v0 = vpop.f32.mrb[9].mxu1 }
 0x66f   : > { %v10527_v57 = vadd.f32 %v17427_v1, %v10385_v0  ;;  %v12906_v2 = vpop.f32.mrb[10].mxu1 }
 0x670   : > { %v10561_v23 = vmax.f32 %v10529_v55, 0.0  ;;  %v10530_v45 = vadd.f32 %v12906_v2, %v17427_v1  ;;  %v10388_v40 = vpop.f32.mrb[11].mxu1 }
 0x671   : > { %v10559_v27 = vmax.f32 %v10527_v57, 0.0  ;;  %v10528_v29 = vadd.f32 %v17427_v1, %v10388_v40 }
 0x672   : > { %10593 = vst [vmem:[%s17435_s30 + $0x50] sm:$0xff] %v10561_v23  ;;  %v10562_v24 = vmax.f32 %v10530_v45, 0.0 }
 0x673   : > { %10591 = vst [vmem:[%s17435_s30 + $0x40] sm:$0xff] %v10559_v27  ;;  %v10560_v11 = vmax.f32 %v10528_v29, 0.0 }
 0x674   : > { %10594 = vst [vmem:[%s17435_s30 + $0x58] sm:$0xff] %v10562_v24 }
 0x675   : > { %10592 = vst [vmem:[%s17435_s30 + $0x48] sm:$0xff] %v10560_v11  ;;  %v12909_v20 = vpop.f32.mrb[12].mxu1 }
 0x676   : > { %v10533_v6 = vadd.f32 %v12909_v20, %v17427_v1  ;;  %v10401_v41 = vpop.f32.mrb[13].mxu1 }
 0x677   : > { %v10531_v51 = vadd.f32 %v17427_v1, %v10401_v41  ;;  %v12910_v21 = vpop.f32.mrb[14].mxu1 }
 0x678   : > { %v10565_v48 = vmax.f32 %v10533_v6, 0.0  ;;  %v10534_v32 = vadd.f32 %v12910_v21, %v17427_v1  ;;  %v10404_v36 = vpop.f32.mrb[15].mxu1 }
 0x679   : > { %v10563_v15 = vmax.f32 %v10531_v51, 0.0  ;;  %v10532_v37 = vadd.f32 %v17427_v1, %v10404_v36 }
 0x67a   : > { %10597 = vst [vmem:[%s17435_s30 + $0x70] sm:$0xff] %v10565_v48  ;;  %v10566_v18 = vmax.f32 %v10534_v32, 0.0 }
 0x67b   : > { %10595 = vst [vmem:[%s17435_s30 + $0x60] sm:$0xff] %v10563_v15  ;;  %v10564_v46 = vmax.f32 %v10532_v37, 0.0 }
 0x67c   : > { %10598 = vst [vmem:[%s17435_s30 + $0x78] sm:$0xff] %v10566_v18 }
 0x67d   : > { %10596 = vst [vmem:[%s17435_s30 + $0x68] sm:$0xff] %v10564_v46  ;;  %v12913_v60 = vpop.f32.mrb[16].mxu1 }
 0x67e   : > { %v10537_v35 = vadd.f32 %v12913_v60, %v17427_v1  ;;  %v10417_v53 = vpop.f32.mrb[17].mxu1 }
 0x67f   : > { %v10535_v30 = vadd.f32 %v17427_v1, %v10417_v53  ;;  %v12914_v26 = vpop.f32.mrb[18].mxu1 }
 0x680   : > { %v10569_v49 = vmax.f32 %v10537_v35, 0.0  ;;  %v10538_v13 = vadd.f32 %v12914_v26, %v17427_v1  ;;  %v10420_v9 = vpop.f32.mrb[19].mxu1 }
 0x681   : > { %v10567_v14 = vmax.f32 %v10535_v30, 0.0  ;;  %v10536_v34 = vadd.f32 %v17427_v1, %v10420_v9 }
 0x682   : > { %10601 = vst [vmem:[%s17435_s30 + $0x90] sm:$0xff] %v10569_v49  ;;  %v10570_v4 = vmax.f32 %v10538_v13, 0.0 }
 0x683   : > { %10599 = vst [vmem:[%s17435_s30 + $0x80] sm:$0xff] %v10567_v14  ;;  %v10568_v54 = vmax.f32 %v10536_v34, 0.0 }
 0x684   : > { %10602 = vst [vmem:[%s17435_s30 + $0x98] sm:$0xff] %v10570_v4 }
 0x685   : > { %10600 = vst [vmem:[%s17435_s30 + $0x88] sm:$0xff] %v10568_v54  ;;  %v12917_v50 = vpop.f32.mrb[20].mxu1 }
 0x686   : > { %v10541_v63 = vadd.f32 %v12917_v50, %v17427_v1  ;;  %v10433_v19 = vpop.f32.mrb[21].mxu1 }
 0x687   : > { %v10539_v31 = vadd.f32 %v17427_v1, %v10433_v19  ;;  %v12918_v56 = vpop.f32.mrb[22].mxu1 }
 0x688   : > { %v10573_v43 = vmax.f32 %v10541_v63, 0.0  ;;  %v10542_v62 = vadd.f32 %v12918_v56, %v17427_v1  ;;  %v10436_v3 = vpop.f32.mrb[23].mxu1 }
 0x689   : > { %v10571_v5 = vmax.f32 %v10539_v31, 0.0  ;;  %v10540_v12 = vadd.f32 %v17427_v1, %v10436_v3 }
 0x68a   : > { %10605 = vst [vmem:[%s17435_s30 + $0xb0] sm:$0xff] %v10573_v43  ;;  %v10574_v52 = vmax.f32 %v10542_v62, 0.0 }
 0x68b   : > { %10603 = vst [vmem:[%s17435_s30 + $0xa0] sm:$0xff] %v10571_v5  ;;  %v10572_v7 = vmax.f32 %v10540_v12, 0.0 }
 0x68c   : > { %10606 = vst [vmem:[%s17435_s30 + $0xb8] sm:$0xff] %v10574_v52 }
 0x68d   : > { %10604 = vst [vmem:[%s17435_s30 + $0xa8] sm:$0xff] %v10572_v7  ;;  %v12921_v58 = vpop.f32.mrb[24].mxu1 }
 0x68e   : > { %v10545_v25 = vadd.f32 %v12921_v58, %v17427_v1  ;;  %v10449_v16 = vpop.f32.mrb[25].mxu1 }
 0x68f   : > { %v10543_v22 = vadd.f32 %v17427_v1, %v10449_v16  ;;  %v12922_v61 = vpop.f32.mrb[26].mxu1 }
 0x690   : > { %v10577_v38 = vmax.f32 %v10545_v25, 0.0  ;;  %v10546_v59 = vadd.f32 %v12922_v61, %v17427_v1  ;;  %v10452_v42 = vpop.f32.mrb[27].mxu1 }
 0x691   : > { %v10575_v28 = vmax.f32 %v10543_v22, 0.0  ;;  %v10544_v47 = vadd.f32 %v17427_v1, %v10452_v42 }
 0x692   : > { %10609 = vst [vmem:[%s17435_s30 + $0xd0] sm:$0xff] %v10577_v38  ;;  %v10578_v10 = vmax.f32 %v10546_v59, 0.0 }
 0x693   : > { %10607 = vst [vmem:[%s17435_s30 + $0xc0] sm:$0xff] %v10575_v28  ;;  %v10576_v17 = vmax.f32 %v10544_v47, 0.0 }
 0x694   : > { %10610 = vst [vmem:[%s17435_s30 + $0xd8] sm:$0xff] %v10578_v10 }
 0x695   : > { %10608 = vst [vmem:[%s17435_s30 + $0xc8] sm:$0xff] %v10576_v17  ;;  %v12925_v44 = vpop.f32.mrb[28].mxu1 }
 0x696   : > { %v10549_v8 = vadd.f32 %v12925_v44, %v17427_v1  ;;  %v10465_v33 = vpop.f32.mrb[29].mxu1 }
 0x697   : > { %v10547_v39 = vadd.f32 %v17427_v1, %v10465_v33  ;;  %v12926_v55 = vpop.f32.mrb[30].mxu1 }
 0x698   : > { %v10581_v0 = vmax.f32 %v10549_v8, 0.0  ;;  %v10550_v57 = vadd.f32 %v12926_v55, %v17427_v1  ;;  %v10468_v2 = vpop.f32.mrb[31].mxu1 }
 0x699   : > { %v10579_v23 = vmax.f32 %v10547_v39, 0.0  ;;  %v10548_v45 = vadd.f32 %v17427_v1, %v10468_v2 }
 0x69a   : > { %10613 = vst [vmem:[%s17435_s30 + $0xf0] sm:$0xff] %v10581_v0  ;;  %v10582_v40 = vmax.f32 %v10550_v57, 0.0 }
 0x69b   : > { %10611 = vst [vmem:[%s17435_s30 + $0xe0] sm:$0xff] %v10579_v23  ;;  %v10580_v27 = vmax.f32 %v10548_v45, 0.0 }
 0x69c   : > { %10614 = vst [vmem:[%s17435_s30 + $0xf8] sm:$0xff] %v10582_v40 }
 0x69d   : > { %10612 = vst [vmem:[%s17435_s30 + $0xe8] sm:$0xff] %v10580_v27 }
 0x69e   : > { %13832 = shalt.err (!%p13829_p7)
}
 0x69f   : > { %s13833_s26 = scalar_lea.hbm %s17499_s16, 4096  ;;  %s13837_s10 = scalar_lea.hbm %s17554_s5, 8192 }
 0x6a0   : > { %p13834_p8 = scmp.ne.s32.totalorder %s17499_s16, %s13833_s26  ;;  %p13838_p1 = scmp.lt.u32.totalorder %s17499_s16, %s17554_s5 }
 0x6a1   : > { %p13839_p0 = scmp.lt.u32.totalorder %s13837_s10, %s13833_s26  ;;  %p13841_p6 = scmp.lt.u32.totalorder %s13833_s26, %s17499_s16 }
 0x6a2   : > { %p13835_p11 = pnand %p13834_p8, %p17969_p9 }
 0x6a3   : > { %p13840_p5 = por %p13839_p0, %p13838_p1 }
 0x6a4   : > { %p13836_p13 = pneg %p13835_p11 }
 0x6a5   : > { %p13842_p10 = por %p13841_p6, %p13840_p5 }
 0x6a7   : > { %p13843_p12 = pnand %p13842_p10, %p13836_p13 }
 0x6a9   : > { %13846 = shalt.err (!%p13843_p12)
}
 0x6aa   : > { %s13892_s30 = smov 128   ;;  %s13893_s7 = smov 8  }
 0x6ab   : > { %13444 = dma.vmem_to_hbm [thread:$0]  (%p17969_p9), %s17501_s12, 4096, %s17499_s16, %s17508_s22, %s13892_s30, %s13892_s30, %s13893_s7  }
 0x6ac PF: > { %p13456_p2 = scmp.ge.s32.totalorder %s13885_s21, 2  ;;  %s10644_s13 = sand.u32 1, %s13873_s18  }
 0x6ad   : > { %p17970_p3 = scmp.ne.s32.totalorder %s17667_s29, 0  ;;  %s10645_s14 = scalar_lea.sflag [#allocation5], %s10644_s13 }
 0x6af   : > { %p13451_p4 = pnand %p13456_p2, %p17970_p3 }
 0x6b1   : > { %13868 = dma.done.wait (!%p13451_p4), %s10645_s14, 4096  }
 0x6b2   : > { %13870 = vsyncadd (!%p13451_p4), %s10645_s14, 4294963200  ;;  %p16_p7 = scmp.ge.s32.totalorder %s13949_s24, 4   ;;  %s17971_s18 = smov %s13877_s19 }
 0x6b3   : > { %s17972_s19 = smov %s13881_s20  ;;  %s17973_s20 = smov %s13960_s27 }
 0x6b4   : > { %s17974_s21 = smov %s13949_s24  ;;  %18 = sbr.rel (!%p16_p7) target bundleno = 4 (0x4), region = 100 }
 0x6bb   :  { %10650 = vsyncpa [#allocation4], 1 }
 0x6bc   :  { %10652 = vsyncpa [#allocation4 + $0x1], 1 }
 0x6bd   :  { %10653 = vsyncpa [#allocation5], 1 }
 0x6be   :  { %10655 = vsyncpa [#allocation5 + $0x1], 1 }

</bundles_post_ra>
